<compile_context>
chip_gen: v6e
topology: v6e:2x2x1
jax: 0.10.0
libtpu: 0.0.40
codegen_flags: <defaults>
</compile_context>

<pallas_src>
import functools

import jax
import jax.numpy as jnp
from jax.experimental import pallas as pl
from jax.experimental.pallas import tpu as pltpu

F32 = jnp.float32
BF16 = jnp.bfloat16


def _round_up(x, m):
    return (x + m - 1) // m * m


# ---------------------------------------------------------------------------
# Fused per-image kernel: direct 3x3 conv (9 tap matmuls) + folded BN + ReLU,
# twice, with the intermediate activation kept in a VMEM scratch.
# ---------------------------------------------------------------------------
def _vgg_block_kernel(x_ref, w1_ref, b1_ref, w2_ref, b2_ref, o_ref, h_scr):
    hp2, wp2, cin = x_ref.shape          # (H+2, W+2, Cin_p), spatial halo = 1
    H, W = hp2 - 2, wp2 - 2
    cmid = h_scr.shape[-1]               # padded middle channels (mult of 128)
    cout = o_ref.shape[-1]               # padded out channels (mult of 128)

    # ---- conv1 + bn1 + relu: 9 shifted-slice bf16 matmuls, f32 accumulate ---
    x = x_ref[...]                       # (H+2, W+2, Cin_p) bf16, VMEM
    acc1 = jnp.zeros((H * W, cmid), jnp.float32)
    for t in range(9):
        kh, kw = t // 3, t % 3
        patch = x[kh:kh + H, kw:kw + W, :].reshape(H * W, cin)
        acc1 = acc1 + jnp.dot(patch, w1_ref[t],
                              preferred_element_type=jnp.float32)
    h1 = jnp.maximum(acc1 + b1_ref[...], 0.0).astype(h_scr.dtype)

    # Intermediate activation stays in VMEM with a zero halo for conv2.
    h_scr[...] = jnp.zeros_like(h_scr)
    h_scr[1:H + 1, 1:W + 1, :] = h1.reshape(H, W, cmid)

    # ---- conv2 + bn2 + relu ------------------------------------------------
    acc2 = jnp.zeros((H * W, cout), jnp.float32)
    for t in range(9):
        kh, kw = t // 3, t % 3
        patch = h_scr[kh:kh + H, kw:kw + W, :].reshape(H * W, cmid)
        acc2 = acc2 + jnp.dot(patch, w2_ref[t],
                              preferred_element_type=jnp.float32)
    o_ref[...] = jnp.maximum(acc2 + b2_ref[...], 0.0).astype(o_ref.dtype)


def _vmem_limit_bytes(h, w, cin_p, cmid_p, cout_p):
    """VMEM budget derived from the actual per-image tile footprint."""
    bf, f = 2, 4
    x_blk = (h + 2) * (w + 2) * cin_p * bf
    weights = (9 * cin_p * cmid_p + 9 * cmid_p * cout_p) * bf \
        + (cmid_p + cout_p) * f
    out_blk = h * w * cout_p * f
    scratch = (h + 2) * (w + 2) * cmid_p * bf
    temps = h * w * (cmid_p + cout_p) * f + 2 * h * w * max(cin_p, cmid_p) * bf
    need = 2 * (x_blk + weights) + 2 * out_blk + scratch + 2 * temps
    return int(min(max(need + (8 << 20), 16 << 20), 56 << 20))


# ---------------------------------------------------------------------------
# One-time parameter preparation (hoisted out of the per-call path):
# fold BN into conv weights/bias, pad channels, cast to bf16.
# ---------------------------------------------------------------------------
def fold_and_pack_params(params, eps=1e-5):
    w1, b1 = params["w1"], params["b1"]          # (3,3,Cin,Cmid), (Cmid,)
    w2, b2 = params["w2"], params["b2"]          # (3,3,Cmid,Cout), (Cout,)
    cin, cmid = w1.shape[2], w1.shape[3]
    cout = w2.shape[3]
    cin_p = _round_up(cin, 8)
    cmid_p = _round_up(cmid, 128)
    cout_p = _round_up(cout, 128)

    s1 = params["bn1_gamma"] * jax.lax.rsqrt(params["bn1_var"] + eps)
    s2 = params["bn2_gamma"] * jax.lax.rsqrt(params["bn2_var"] + eps)
    w1f = w1 * s1                                # BN scale -> weights
    b1f = (b1 - params["bn1_mean"]) * s1 + params["bn1_beta"]
    w2f = w2 * s2
    b2f = (b2 - params["bn2_mean"]) * s2 + params["bn2_beta"]

    w1p = jnp.pad(w1f, ((0, 0), (0, 0), (0, cin_p - cin), (0, cmid_p - cmid)))
    w2p = jnp.pad(w2f, ((0, 0), (0, 0), (0, cmid_p - cmid), (0, cout_p - cout)))
    return {
        "w1": w1p.reshape(9, cin_p, cmid_p).astype(BF16),
        "b1": jnp.pad(b1f, (0, cmid_p - cmid)).reshape(1, cmid_p).astype(F32),
        "w2": w2p.reshape(9, cmid_p, cout_p).astype(BF16),
        "b2": jnp.pad(b2f, (0, cout_p - cout)).reshape(1, cout_p).astype(F32),
    }


# ---------------------------------------------------------------------------
# VGGBlock forward (NCHW in / NCHW out, PyTorch convention)
# ---------------------------------------------------------------------------
def vgg_block_forward(packed, x_nchw, *, out_channels):
    n, cin, h, w = x_nchw.shape
    cin_p = packed["w1"].shape[1]
    cmid_p = packed["w1"].shape[2]
    cout_p = packed["w2"].shape[2]

    # NCHW -> NHWC; single pad adds the 1-pixel spatial halo AND the Cin pad.
    x = jnp.transpose(x_nchw, (0, 2, 3, 1))
    x = jnp.pad(x, ((0, 0), (1, 1), (1, 1), (0, cin_p - cin))).astype(BF16)

    out = pl.pallas_call(
        _vgg_block_kernel,
        out_shape=jax.ShapeDtypeStruct((n, h * w, cout_p), F32),
        grid=(n,),
        in_specs=[
            pl.BlockSpec((None, h + 2, w + 2, cin_p), lambda i: (i, 0, 0, 0)),
            pl.BlockSpec((9, cin_p, cmid_p), lambda i: (0, 0, 0)),
            pl.BlockSpec((1, cmid_p), lambda i: (0, 0)),
            pl.BlockSpec((9, cmid_p, cout_p), lambda i: (0, 0, 0)),
            pl.BlockSpec((1, cout_p), lambda i: (0, 0)),
        ],
        out_specs=pl.BlockSpec((None, h * w, cout_p), lambda i: (i, 0, 0)),
        scratch_shapes=[pltpu.VMEM((h + 2, w + 2, cmid_p), BF16)],
        compiler_params=pltpu.CompilerParams(
            dimension_semantics=("parallel",),
            vmem_limit_bytes=_vmem_limit_bytes(h, w, cin_p, cmid_p, cout_p)),
    )(x, packed["w1"], packed["b1"], packed["w2"], packed["b2"])

    out = out[:, :, :out_channels].reshape(n, h, w, out_channels)
    return jnp.transpose(out, (0, 3, 1, 2))      # NHWC -> NCHW


# ---------------------------------------------------------------------------
# Pure-JAX reference (numerical sanity check) and synthetic params
# ---------------------------------------------------------------------------
def _reference_forward(params, x_nchw, eps=1e-5):
    x = jnp.transpose(x_nchw, (0, 2, 3, 1)).astype(F32)

    def block(x, w, b, g, bt, m, v):
        y = jax.lax.conv_general_dilated(
            x, w, window_strides=(1, 1), padding=((1, 1), (1, 1)),
            dimension_numbers=("NHWC", "HWIO", "NHWC"))
        s = g * jax.lax.rsqrt(v + eps)
        return jnp.maximum(y * s + ((b - m) * s + bt), 0.0)

    h = block(x, params["w1"], params["b1"], params["bn1_gamma"],
              params["bn1_beta"], params["bn1_mean"], params["bn1_var"])
    y = block(h, params["w2"], params["b2"], params["bn2_gamma"],
              params["bn2_beta"], params["bn2_mean"], params["bn2_var"])
    return jnp.transpose(y, (0, 3, 1, 2))


def init_params(key, in_ch, mid_ch, out_ch):
    ks = jax.random.split(key, 4)

    def conv_w(k, cin, cout):
        std = (2.0 / (9 * cin)) ** 0.5
        return std * jax.random.normal(k, (3, 3, cin, cout), F32)

    def bn(k, c, prefix):
        k1, k2, k3, k4 = jax.random.split(k, 4)
        return {
            f"{prefix}_gamma": 1.0 + 0.1 * jax.random.normal(k1, (c,), F32),
            f"{prefix}_beta": 0.1 * jax.random.normal(k2, (c,), F32),
            f"{prefix}_mean": 0.1 * jax.random.normal(k3, (c,), F32),
            f"{prefix}_var": 1.0 + 0.1 * jax.random.uniform(k4, (c,), F32),
        }

    params = {
        "w1": conv_w(ks[0], in_ch, mid_ch),
        "b1": 0.1 * jax.random.normal(jax.random.fold_in(ks[0], 1), (mid_ch,), F32),
        "w2": conv_w(ks[1], mid_ch, out_ch),
        "b2": 0.1 * jax.random.normal(jax.random.fold_in(ks[1], 1), (out_ch,), F32),
    }
    params.update(bn(ks[2], mid_ch, "bn1"))
    params.update(bn(ks[3], out_ch, "bn2"))
    return params


if __name__ == "__main__":
    key = jax.random.PRNGKey(0)
    pkey, xkey = jax.random.split(key)

    batch, in_ch, mid_ch, out_ch, hw = 2, 4, 32, 32, 16
    params = init_params(pkey, in_ch, mid_ch, out_ch)
    x = jax.random.normal(xkey, (batch, in_ch, hw, hw), F32)   # NCHW input

    packed = fold_and_pack_params(params)      # one-time BN fold / pad / cast
    fwd = jax.jit(functools.partial(vgg_block_forward, out_channels=out_ch))
    out = jax.block_until_ready(fwd(packed, x))

    assert out.shape == (batch, out_ch, hw, hw), out.shape
    assert out.dtype == F32
    assert bool(jnp.all(jnp.isfinite(out)))

    # Numerical sanity check vs. a pure-JAX f32 reference (the kernel uses
    # bf16 operands with f32 accumulation, so the tolerance is bf16-scale).
    ref = jax.block_until_ready(jax.jit(_reference_forward)(params, x))
    err = float(jnp.max(jnp.abs(out - ref)))
    tol = 0.1 + 0.05 * float(jnp.max(jnp.abs(ref)))
    assert err <= tol, f"max abs err {err} > tol {tol}"

    print("KERNEL_OK")
</pallas_src>

<mosaic_0001>
module attributes {stable_mosaic.version = 11 : i64} {
  func.func @_vgg_block_kernel(%arg0: i32, %arg1: memref<1x18x18x8xbf16, #tpu.memory_space<vmem>>, %arg2: memref<9x8x128xbf16, #tpu.memory_space<vmem>>, %arg3: memref<1x128xf32, #tpu.memory_space<vmem>>, %arg4: memref<9x128x128xbf16, #tpu.memory_space<vmem>>, %arg5: memref<1x128xf32, #tpu.memory_space<vmem>>, %arg6: memref<1x256x128xf32, #tpu.memory_space<vmem>>, %arg7: memref<18x18x128xbf16, #tpu.memory_space<vmem>>) attributes {dimension_semantics = [#tpu.dimension_semantics<parallel>], iteration_bounds = array<i64: 2>, scalar_prefetch = 0 : i64, scratch_operands = 1 : i64, tpu.core_type = #tpu.core_type<tc>, window_params = [{transform_indices = @transform_0, window_bounds = array<i64: 1, 18, 18, 8>}, {pipeline_mode = #tpu.pipeline_mode<synchronous>, transform_indices = @transform_1, window_bounds = array<i64: 9, 8, 128>}, {pipeline_mode = #tpu.pipeline_mode<synchronous>, transform_indices = @transform_2, window_bounds = array<i64: 1, 128>}, {pipeline_mode = #tpu.pipeline_mode<synchronous>, transform_indices = @transform_3, window_bounds = array<i64: 9, 128, 128>}, {pipeline_mode = #tpu.pipeline_mode<synchronous>, transform_indices = @transform_4, window_bounds = array<i64: 1, 128>}, {transform_indices = @transform_5, window_bounds = array<i64: 1, 256, 128>}]} {
    %c0 = arith.constant 0 : index
    %c0_0 = arith.constant 0 : index
    %c0_1 = arith.constant 0 : index
    %c0_2 = arith.constant 0 : index
    %0 = vector.load %arg1[%c0, %c0_0, %c0_1, %c0_2] : memref<1x18x18x8xbf16, #tpu.memory_space<vmem>>, vector<1x18x18x8xbf16>
    %1 = vector.shape_cast %0 : vector<1x18x18x8xbf16> to vector<18x18x8xbf16>
    %cst = arith.constant 0.000000e+00 : f32
    %2 = vector.broadcast %cst : f32 to vector<256x128xf32>
    %3 = vector.extract_strided_slice %1 {offsets = [0, 0, 0], sizes = [16, 16, 8], strides = [1, 1, 1]} : vector<18x18x8xbf16> to vector<16x16x8xbf16>
    %4 = vector.shape_cast %3 : vector<16x16x8xbf16> to vector<256x8xbf16>
    %c0_3 = arith.constant 0 : index
    %c0_4 = arith.constant 0 : index
    %c0_5 = arith.constant 0 : index
    %5 = vector.load %arg2[%c0_3, %c0_4, %c0_5] : memref<9x8x128xbf16, #tpu.memory_space<vmem>>, vector<1x8x128xbf16>
    %6 = vector.shape_cast %5 : vector<1x8x128xbf16> to vector<8x128xbf16>
    %cst_6 = arith.constant dense<0.000000e+00> : vector<256x128xf32>
    %7 = tpu.matmul %4, %6, %cst_6 {dimension_numbers = #tpu.dot_dimension_numbers<[1], [0], [0], [1], [0, 0, 1, 1], [], []>} : vector<256x8xbf16>, vector<8x128xbf16>, vector<256x128xf32> -> vector<256x128xf32>
    %8 = arith.addf %2, %7 : vector<256x128xf32>
    %9 = vector.extract_strided_slice %1 {offsets = [0, 1, 0], sizes = [16, 16, 8], strides = [1, 1, 1]} : vector<18x18x8xbf16> to vector<16x16x8xbf16>
    %10 = vector.shape_cast %9 : vector<16x16x8xbf16> to vector<256x8xbf16>
    %c1 = arith.constant 1 : index
    %c0_7 = arith.constant 0 : index
    %c0_8 = arith.constant 0 : index
    %11 = vector.load %arg2[%c1, %c0_7, %c0_8] : memref<9x8x128xbf16, #tpu.memory_space<vmem>>, vector<1x8x128xbf16>
    %12 = vector.shape_cast %11 : vector<1x8x128xbf16> to vector<8x128xbf16>
    %cst_9 = arith.constant dense<0.000000e+00> : vector<256x128xf32>
    %13 = tpu.matmul %10, %12, %cst_9 {dimension_numbers = #tpu.dot_dimension_numbers<[1], [0], [0], [1], [0, 0, 1, 1], [], []>} : vector<256x8xbf16>, vector<8x128xbf16>, vector<256x128xf32> -> vector<256x128xf32>
    %14 = arith.addf %8, %13 : vector<256x128xf32>
    %15 = vector.extract_strided_slice %1 {offsets = [0, 2, 0], sizes = [16, 16, 8], strides = [1, 1, 1]} : vector<18x18x8xbf16> to vector<16x16x8xbf16>
    %16 = vector.shape_cast %15 : vector<16x16x8xbf16> to vector<256x8xbf16>
    %c2 = arith.constant 2 : index
    %c0_10 = arith.constant 0 : index
    %c0_11 = arith.constant 0 : index
    %17 = vector.load %arg2[%c2, %c0_10, %c0_11] : memref<9x8x128xbf16, #tpu.memory_space<vmem>>, vector<1x8x128xbf16>
    %18 = vector.shape_cast %17 : vector<1x8x128xbf16> to vector<8x128xbf16>
    %cst_12 = arith.constant dense<0.000000e+00> : vector<256x128xf32>
    %19 = tpu.matmul %16, %18, %cst_12 {dimension_numbers = #tpu.dot_dimension_numbers<[1], [0], [0], [1], [0, 0, 1, 1], [], []>} : vector<256x8xbf16>, vector<8x128xbf16>, vector<256x128xf32> -> vector<256x128xf32>
    %20 = arith.addf %14, %19 : vector<256x128xf32>
    %21 = vector.extract_strided_slice %1 {offsets = [1, 0, 0], sizes = [16, 16, 8], strides = [1, 1, 1]} : vector<18x18x8xbf16> to vector<16x16x8xbf16>
    %22 = vector.shape_cast %21 : vector<16x16x8xbf16> to vector<256x8xbf16>
    %c3 = arith.constant 3 : index
    %c0_13 = arith.constant 0 : index
    %c0_14 = arith.constant 0 : index
    %23 = vector.load %arg2[%c3, %c0_13, %c0_14] : memref<9x8x128xbf16, #tpu.memory_space<vmem>>, vector<1x8x128xbf16>
    %24 = vector.shape_cast %23 : vector<1x8x128xbf16> to vector<8x128xbf16>
    %cst_15 = arith.constant dense<0.000000e+00> : vector<256x128xf32>
    %25 = tpu.matmul %22, %24, %cst_15 {dimension_numbers = #tpu.dot_dimension_numbers<[1], [0], [0], [1], [0, 0, 1, 1], [], []>} : vector<256x8xbf16>, vector<8x128xbf16>, vector<256x128xf32> -> vector<256x128xf32>
    %26 = arith.addf %20, %25 : vector<256x128xf32>
    %27 = vector.extract_strided_slice %1 {offsets = [1, 1, 0], sizes = [16, 16, 8], strides = [1, 1, 1]} : vector<18x18x8xbf16> to vector<16x16x8xbf16>
    %28 = vector.shape_cast %27 : vector<16x16x8xbf16> to vector<256x8xbf16>
    %c4 = arith.constant 4 : index
    %c0_16 = arith.constant 0 : index
    %c0_17 = arith.constant 0 : index
    %29 = vector.load %arg2[%c4, %c0_16, %c0_17] : memref<9x8x128xbf16, #tpu.memory_space<vmem>>, vector<1x8x128xbf16>
    %30 = vector.shape_cast %29 : vector<1x8x128xbf16> to vector<8x128xbf16>
    %cst_18 = arith.constant dense<0.000000e+00> : vector<256x128xf32>
    %31 = tpu.matmul %28, %30, %cst_18 {dimension_numbers = #tpu.dot_dimension_numbers<[1], [0], [0], [1], [0, 0, 1, 1], [], []>} : vector<256x8xbf16>, vector<8x128xbf16>, vector<256x128xf32> -> vector<256x128xf32>
    %32 = arith.addf %26, %31 : vector<256x128xf32>
    %33 = vector.extract_strided_slice %1 {offsets = [1, 2, 0], sizes = [16, 16, 8], strides = [1, 1, 1]} : vector<18x18x8xbf16> to vector<16x16x8xbf16>
    %34 = vector.shape_cast %33 : vector<16x16x8xbf16> to vector<256x8xbf16>
    %c5 = arith.constant 5 : index
    %c0_19 = arith.constant 0 : index
    %c0_20 = arith.constant 0 : index
    %35 = vector.load %arg2[%c5, %c0_19, %c0_20] : memref<9x8x128xbf16, #tpu.memory_space<vmem>>, vector<1x8x128xbf16>
    %36 = vector.shape_cast %35 : vector<1x8x128xbf16> to vector<8x128xbf16>
    %cst_21 = arith.constant dense<0.000000e+00> : vector<256x128xf32>
    %37 = tpu.matmul %34, %36, %cst_21 {dimension_numbers = #tpu.dot_dimension_numbers<[1], [0], [0], [1], [0, 0, 1, 1], [], []>} : vector<256x8xbf16>, vector<8x128xbf16>, vector<256x128xf32> -> vector<256x128xf32>
    %38 = arith.addf %32, %37 : vector<256x128xf32>
    %39 = vector.extract_strided_slice %1 {offsets = [2, 0, 0], sizes = [16, 16, 8], strides = [1, 1, 1]} : vector<18x18x8xbf16> to vector<16x16x8xbf16>
    %40 = vector.shape_cast %39 : vector<16x16x8xbf16> to vector<256x8xbf16>
    %c6 = arith.constant 6 : index
    %c0_22 = arith.constant 0 : index
    %c0_23 = arith.constant 0 : index
    %41 = vector.load %arg2[%c6, %c0_22, %c0_23] : memref<9x8x128xbf16, #tpu.memory_space<vmem>>, vector<1x8x128xbf16>
    %42 = vector.shape_cast %41 : vector<1x8x128xbf16> to vector<8x128xbf16>
    %cst_24 = arith.constant dense<0.000000e+00> : vector<256x128xf32>
    %43 = tpu.matmul %40, %42, %cst_24 {dimension_numbers = #tpu.dot_dimension_numbers<[1], [0], [0], [1], [0, 0, 1, 1], [], []>} : vector<256x8xbf16>, vector<8x128xbf16>, vector<256x128xf32> -> vector<256x128xf32>
    %44 = arith.addf %38, %43 : vector<256x128xf32>
    %45 = vector.extract_strided_slice %1 {offsets = [2, 1, 0], sizes = [16, 16, 8], strides = [1, 1, 1]} : vector<18x18x8xbf16> to vector<16x16x8xbf16>
    %46 = vector.shape_cast %45 : vector<16x16x8xbf16> to vector<256x8xbf16>
    %c7 = arith.constant 7 : index
    %c0_25 = arith.constant 0 : index
    %c0_26 = arith.constant 0 : index
    %47 = vector.load %arg2[%c7, %c0_25, %c0_26] : memref<9x8x128xbf16, #tpu.memory_space<vmem>>, vector<1x8x128xbf16>
    %48 = vector.shape_cast %47 : vector<1x8x128xbf16> to vector<8x128xbf16>
    %cst_27 = arith.constant dense<0.000000e+00> : vector<256x128xf32>
    %49 = tpu.matmul %46, %48, %cst_27 {dimension_numbers = #tpu.dot_dimension_numbers<[1], [0], [0], [1], [0, 0, 1, 1], [], []>} : vector<256x8xbf16>, vector<8x128xbf16>, vector<256x128xf32> -> vector<256x128xf32>
    %50 = arith.addf %44, %49 : vector<256x128xf32>
    %51 = vector.extract_strided_slice %1 {offsets = [2, 2, 0], sizes = [16, 16, 8], strides = [1, 1, 1]} : vector<18x18x8xbf16> to vector<16x16x8xbf16>
    %52 = vector.shape_cast %51 : vector<16x16x8xbf16> to vector<256x8xbf16>
    %c8 = arith.constant 8 : index
    %c0_28 = arith.constant 0 : index
    %c0_29 = arith.constant 0 : index
    %53 = vector.load %arg2[%c8, %c0_28, %c0_29] : memref<9x8x128xbf16, #tpu.memory_space<vmem>>, vector<1x8x128xbf16>
    %54 = vector.shape_cast %53 : vector<1x8x128xbf16> to vector<8x128xbf16>
    %cst_30 = arith.constant dense<0.000000e+00> : vector<256x128xf32>
    %55 = tpu.matmul %52, %54, %cst_30 {dimension_numbers = #tpu.dot_dimension_numbers<[1], [0], [0], [1], [0, 0, 1, 1], [], []>} : vector<256x8xbf16>, vector<8x128xbf16>, vector<256x128xf32> -> vector<256x128xf32>
    %56 = arith.addf %50, %55 : vector<256x128xf32>
    %c0_31 = arith.constant 0 : index
    %c0_32 = arith.constant 0 : index
    %57 = vector.load %arg3[%c0_31, %c0_32] : memref<1x128xf32, #tpu.memory_space<vmem>>, vector<1x128xf32>
    %58 = vector.broadcast %57 : vector<1x128xf32> to vector<256x128xf32>
    %59 = arith.addf %56, %58 : vector<256x128xf32>
    %cst_33 = arith.constant 0.000000e+00 : f32
    %60 = vector.broadcast %cst_33 : f32 to vector<256x128xf32>
    %61 = arith.maximumf %59, %60 : vector<256x128xf32>
    %62 = arith.truncf %61 : vector<256x128xf32> to vector<256x128xbf16>
    %cst_34 = arith.constant 0.000000e+00 : bf16
    %63 = vector.broadcast %cst_34 : bf16 to vector<18x18x128xbf16>
    %c0_35 = arith.constant 0 : index
    %c0_36 = arith.constant 0 : index
    %c0_37 = arith.constant 0 : index
    %64 = vector.load %arg7[%c0_35, %c0_36, %c0_37] : memref<18x18x128xbf16, #tpu.memory_space<vmem>>, vector<18x18x128xbf16>
    tpu.vector_store %arg7[%c0_35, %c0_36, %c0_37], %63 {strides = array<i32>} : memref<18x18x128xbf16, #tpu.memory_space<vmem>>, vector<18x18x128xbf16>,
    %65 = vector.shape_cast %62 : vector<256x128xbf16> to vector<16x16x128xbf16>
    %c1_38 = arith.constant 1 : index
    %c1_39 = arith.constant 1 : index
    %c0_40 = arith.constant 0 : index
    %66 = vector.load %arg7[%c1_38, %c1_39, %c0_40] : memref<18x18x128xbf16, #tpu.memory_space<vmem>>, vector<16x16x128xbf16>
    tpu.vector_store %arg7[%c1_38, %c1_39, %c0_40], %65 {strides = array<i32>} : memref<18x18x128xbf16, #tpu.memory_space<vmem>>, vector<16x16x128xbf16>,
    %cst_41 = arith.constant 0.000000e+00 : f32
    %67 = vector.broadcast %cst_41 : f32 to vector<256x128xf32>
    %c0_42 = arith.constant 0 : index
    %c0_43 = arith.constant 0 : index
    %c0_44 = arith.constant 0 : index
    %68 = vector.load %arg7[%c0_42, %c0_43, %c0_44] : memref<18x18x128xbf16, #tpu.memory_space<vmem>>, vector<16x16x128xbf16>
    %69 = vector.shape_cast %68 : vector<16x16x128xbf16> to vector<256x128xbf16>
    %c0_45 = arith.constant 0 : index
    %c0_46 = arith.constant 0 : index
    %c0_47 = arith.constant 0 : index
    %70 = vector.load %arg4[%c0_45, %c0_46, %c0_47] : memref<9x128x128xbf16, #tpu.memory_space<vmem>>, vector<1x128x128xbf16>
    %71 = vector.shape_cast %70 : vector<1x128x128xbf16> to vector<128x128xbf16>
    %cst_48 = arith.constant dense<0.000000e+00> : vector<256x128xf32>
    %72 = tpu.matmul %69, %71, %cst_48 {dimension_numbers = #tpu.dot_dimension_numbers<[1], [0], [0], [1], [0, 0, 1, 1], [], []>} : vector<256x128xbf16>, vector<128x128xbf16>, vector<256x128xf32> -> vector<256x128xf32>
    %73 = arith.addf %67, %72 : vector<256x128xf32>
    %c0_49 = arith.constant 0 : index
    %c1_50 = arith.constant 1 : index
    %c0_51 = arith.constant 0 : index
    %74 = vector.load %arg7[%c0_49, %c1_50, %c0_51] : memref<18x18x128xbf16, #tpu.memory_space<vmem>>, vector<16x16x128xbf16>
    %75 = vector.shape_cast %74 : vector<16x16x128xbf16> to vector<256x128xbf16>
    %c1_52 = arith.constant 1 : index
    %c0_53 = arith.constant 0 : index
    %c0_54 = arith.constant 0 : index
    %76 = vector.load %arg4[%c1_52, %c0_53, %c0_54] : memref<9x128x128xbf16, #tpu.memory_space<vmem>>, vector<1x128x128xbf16>
    %77 = vector.shape_cast %76 : vector<1x128x128xbf16> to vector<128x128xbf16>
    %cst_55 = arith.constant dense<0.000000e+00> : vector<256x128xf32>
    %78 = tpu.matmul %75, %77, %cst_55 {dimension_numbers = #tpu.dot_dimension_numbers<[1], [0], [0], [1], [0, 0, 1, 1], [], []>} : vector<256x128xbf16>, vector<128x128xbf16>, vector<256x128xf32> -> vector<256x128xf32>
    %79 = arith.addf %73, %78 : vector<256x128xf32>
    %c0_56 = arith.constant 0 : index
    %c2_57 = arith.constant 2 : index
    %c0_58 = arith.constant 0 : index
    %80 = vector.load %arg7[%c0_56, %c2_57, %c0_58] : memref<18x18x128xbf16, #tpu.memory_space<vmem>>, vector<16x16x128xbf16>
    %81 = vector.shape_cast %80 : vector<16x16x128xbf16> to vector<256x128xbf16>
    %c2_59 = arith.constant 2 : index
    %c0_60 = arith.constant 0 : index
    %c0_61 = arith.constant 0 : index
    %82 = vector.load %arg4[%c2_59, %c0_60, %c0_61] : memref<9x128x128xbf16, #tpu.memory_space<vmem>>, vector<1x128x128xbf16>
    %83 = vector.shape_cast %82 : vector<1x128x128xbf16> to vector<128x128xbf16>
    %cst_62 = arith.constant dense<0.000000e+00> : vector<256x128xf32>
    %84 = tpu.matmul %81, %83, %cst_62 {dimension_numbers = #tpu.dot_dimension_numbers<[1], [0], [0], [1], [0, 0, 1, 1], [], []>} : vector<256x128xbf16>, vector<128x128xbf16>, vector<256x128xf32> -> vector<256x128xf32>
    %85 = arith.addf %79, %84 : vector<256x128xf32>
    %c1_63 = arith.constant 1 : index
    %c0_64 = arith.constant 0 : index
    %c0_65 = arith.constant 0 : index
    %86 = vector.load %arg7[%c1_63, %c0_64, %c0_65] : memref<18x18x128xbf16, #tpu.memory_space<vmem>>, vector<16x16x128xbf16>
    %87 = vector.shape_cast %86 : vector<16x16x128xbf16> to vector<256x128xbf16>
    %c3_66 = arith.constant 3 : index
    %c0_67 = arith.constant 0 : index
    %c0_68 = arith.constant 0 : index
    %88 = vector.load %arg4[%c3_66, %c0_67, %c0_68] : memref<9x128x128xbf16, #tpu.memory_space<vmem>>, vector<1x128x128xbf16>
    %89 = vector.shape_cast %88 : vector<1x128x128xbf16> to vector<128x128xbf16>
    %cst_69 = arith.constant dense<0.000000e+00> : vector<256x128xf32>
    %90 = tpu.matmul %87, %89, %cst_69 {dimension_numbers = #tpu.dot_dimension_numbers<[1], [0], [0], [1], [0, 0, 1, 1], [], []>} : vector<256x128xbf16>, vector<128x128xbf16>, vector<256x128xf32> -> vector<256x128xf32>
    %91 = arith.addf %85, %90 : vector<256x128xf32>
    %c1_70 = arith.constant 1 : index
    %c1_71 = arith.constant 1 : index
    %c0_72 = arith.constant 0 : index
    %92 = vector.load %arg7[%c1_70, %c1_71, %c0_72] : memref<18x18x128xbf16, #tpu.memory_space<vmem>>, vector<16x16x128xbf16>
    %93 = vector.shape_cast %92 : vector<16x16x128xbf16> to vector<256x128xbf16>
    %c4_73 = arith.constant 4 : index
    %c0_74 = arith.constant 0 : index
    %c0_75 = arith.constant 0 : index
    %94 = vector.load %arg4[%c4_73, %c0_74, %c0_75] : memref<9x128x128xbf16, #tpu.memory_space<vmem>>, vector<1x128x128xbf16>
    %95 = vector.shape_cast %94 : vector<1x128x128xbf16> to vector<128x128xbf16>
    %cst_76 = arith.constant dense<0.000000e+00> : vector<256x128xf32>
    %96 = tpu.matmul %93, %95, %cst_76 {dimension_numbers = #tpu.dot_dimension_numbers<[1], [0], [0], [1], [0, 0, 1, 1], [], []>} : vector<256x128xbf16>, vector<128x128xbf16>, vector<256x128xf32> -> vector<256x128xf32>
    %97 = arith.addf %91, %96 : vector<256x128xf32>
    %c1_77 = arith.constant 1 : index
    %c2_78 = arith.constant 2 : index
    %c0_79 = arith.constant 0 : index
    %98 = vector.load %arg7[%c1_77, %c2_78, %c0_79] : memref<18x18x128xbf16, #tpu.memory_space<vmem>>, vector<16x16x128xbf16>
    %99 = vector.shape_cast %98 : vector<16x16x128xbf16> to vector<256x128xbf16>
    %c5_80 = arith.constant 5 : index
    %c0_81 = arith.constant 0 : index
    %c0_82 = arith.constant 0 : index
    %100 = vector.load %arg4[%c5_80, %c0_81, %c0_82] : memref<9x128x128xbf16, #tpu.memory_space<vmem>>, vector<1x128x128xbf16>
    %101 = vector.shape_cast %100 : vector<1x128x128xbf16> to vector<128x128xbf16>
    %cst_83 = arith.constant dense<0.000000e+00> : vector<256x128xf32>
    %102 = tpu.matmul %99, %101, %cst_83 {dimension_numbers = #tpu.dot_dimension_numbers<[1], [0], [0], [1], [0, 0, 1, 1], [], []>} : vector<256x128xbf16>, vector<128x128xbf16>, vector<256x128xf32> -> vector<256x128xf32>
    %103 = arith.addf %97, %102 : vector<256x128xf32>
    %c2_84 = arith.constant 2 : index
    %c0_85 = arith.constant 0 : index
    %c0_86 = arith.constant 0 : index
    %104 = vector.load %arg7[%c2_84, %c0_85, %c0_86] : memref<18x18x128xbf16, #tpu.memory_space<vmem>>, vector<16x16x128xbf16>
    %105 = vector.shape_cast %104 : vector<16x16x128xbf16> to vector<256x128xbf16>
    %c6_87 = arith.constant 6 : index
    %c0_88 = arith.constant 0 : index
    %c0_89 = arith.constant 0 : index
    %106 = vector.load %arg4[%c6_87, %c0_88, %c0_89] : memref<9x128x128xbf16, #tpu.memory_space<vmem>>, vector<1x128x128xbf16>
    %107 = vector.shape_cast %106 : vector<1x128x128xbf16> to vector<128x128xbf16>
    %cst_90 = arith.constant dense<0.000000e+00> : vector<256x128xf32>
    %108 = tpu.matmul %105, %107, %cst_90 {dimension_numbers = #tpu.dot_dimension_numbers<[1], [0], [0], [1], [0, 0, 1, 1], [], []>} : vector<256x128xbf16>, vector<128x128xbf16>, vector<256x128xf32> -> vector<256x128xf32>
    %109 = arith.addf %103, %108 : vector<256x128xf32>
    %c2_91 = arith.constant 2 : index
    %c1_92 = arith.constant 1 : index
    %c0_93 = arith.constant 0 : index
    %110 = vector.load %arg7[%c2_91, %c1_92, %c0_93] : memref<18x18x128xbf16, #tpu.memory_space<vmem>>, vector<16x16x128xbf16>
    %111 = vector.shape_cast %110 : vector<16x16x128xbf16> to vector<256x128xbf16>
    %c7_94 = arith.constant 7 : index
    %c0_95 = arith.constant 0 : index
    %c0_96 = arith.constant 0 : index
    %112 = vector.load %arg4[%c7_94, %c0_95, %c0_96] : memref<9x128x128xbf16, #tpu.memory_space<vmem>>, vector<1x128x128xbf16>
    %113 = vector.shape_cast %112 : vector<1x128x128xbf16> to vector<128x128xbf16>
    %cst_97 = arith.constant dense<0.000000e+00> : vector<256x128xf32>
    %114 = tpu.matmul %111, %113, %cst_97 {dimension_numbers = #tpu.dot_dimension_numbers<[1], [0], [0], [1], [0, 0, 1, 1], [], []>} : vector<256x128xbf16>, vector<128x128xbf16>, vector<256x128xf32> -> vector<256x128xf32>
    %115 = arith.addf %109, %114 : vector<256x128xf32>
    %c2_98 = arith.constant 2 : index
    %c2_99 = arith.constant 2 : index
    %c0_100 = arith.constant 0 : index
    %116 = vector.load %arg7[%c2_98, %c2_99, %c0_100] : memref<18x18x128xbf16, #tpu.memory_space<vmem>>, vector<16x16x128xbf16>
    %117 = vector.shape_cast %116 : vector<16x16x128xbf16> to vector<256x128xbf16>
    %c8_101 = arith.constant 8 : index
    %c0_102 = arith.constant 0 : index
    %c0_103 = arith.constant 0 : index
    %118 = vector.load %arg4[%c8_101, %c0_102, %c0_103] : memref<9x128x128xbf16, #tpu.memory_space<vmem>>, vector<1x128x128xbf16>
    %119 = vector.shape_cast %118 : vector<1x128x128xbf16> to vector<128x128xbf16>
    %cst_104 = arith.constant dense<0.000000e+00> : vector<256x128xf32>
    %120 = tpu.matmul %117, %119, %cst_104 {dimension_numbers = #tpu.dot_dimension_numbers<[1], [0], [0], [1], [0, 0, 1, 1], [], []>} : vector<256x128xbf16>, vector<128x128xbf16>, vector<256x128xf32> -> vector<256x128xf32>
    %121 = arith.addf %115, %120 : vector<256x128xf32>
    %c0_105 = arith.constant 0 : index
    %c0_106 = arith.constant 0 : index
    %122 = vector.load %arg5[%c0_105, %c0_106] : memref<1x128xf32, #tpu.memory_space<vmem>>, vector<1x128xf32>
    %123 = vector.broadcast %122 : vector<1x128xf32> to vector<256x128xf32>
    %124 = arith.addf %121, %123 : vector<256x128xf32>
    %cst_107 = arith.constant 0.000000e+00 : f32
    %125 = vector.broadcast %cst_107 : f32 to vector<256x128xf32>
    %126 = arith.maximumf %124, %125 : vector<256x128xf32>
    %c0_108 = arith.constant 0 : index
    %c0_109 = arith.constant 0 : index
    %c0_110 = arith.constant 0 : index
    %127 = vector.load %arg6[%c0_108, %c0_109, %c0_110] : memref<1x256x128xf32, #tpu.memory_space<vmem>>, vector<1x256x128xf32>
    %128 = vector.shape_cast %127 : vector<1x256x128xf32> to vector<256x128xf32>
    %129 = vector.shape_cast %126 : vector<256x128xf32> to vector<1x256x128xf32>
    tpu.vector_store %arg6[%c0_108, %c0_109, %c0_110], %129 {strides = array<i32>} : memref<1x256x128xf32, #tpu.memory_space<vmem>>, vector<1x256x128xf32>,
    return
  }
  func.func @transform_0(%arg0: i32) -> (i32, i32, i32, i32) {
    %c0_i32 = arith.constant 0 : i32
    %c0_i32_0 = arith.constant 0 : i32
    %c0_i32_1 = arith.constant 0 : i32
    %c0_i32_2 = arith.constant 0 : i32
    return %arg0, %c0_i32, %c0_i32_0, %c0_i32_1 : i32, i32, i32, i32
  }
  func.func @transform_1(%arg0: i32) -> (i32, i32, i32) {
    %c0_i32 = arith.constant 0 : i32
    %c0_i32_0 = arith.constant 0 : i32
    %c0_i32_1 = arith.constant 0 : i32
    %c0_i32_2 = arith.constant 0 : i32
    return %c0_i32, %c0_i32_0, %c0_i32_1 : i32, i32, i32
  }
  func.func @transform_2(%arg0: i32) -> (i32, i32) {
    %c0_i32 = arith.constant 0 : i32
    %c0_i32_0 = arith.constant 0 : i32
    %c0_i32_1 = arith.constant 0 : i32
    return %c0_i32, %c0_i32_0 : i32, i32
  }
  func.func @transform_3(%arg0: i32) -> (i32, i32, i32) {
    %c0_i32 = arith.constant 0 : i32
    %c0_i32_0 = arith.constant 0 : i32
    %c0_i32_1 = arith.constant 0 : i32
    %c0_i32_2 = arith.constant 0 : i32
    return %c0_i32, %c0_i32_0, %c0_i32_1 : i32, i32, i32
  }
  func.func @transform_4(%arg0: i32) -> (i32, i32) {
    %c0_i32 = arith.constant 0 : i32
    %c0_i32_0 = arith.constant 0 : i32
    %c0_i32_1 = arith.constant 0 : i32
    return %c0_i32, %c0_i32_0 : i32, i32
  }
  func.func @transform_5(%arg0: i32) -> (i32, i32, i32) {
    %c0_i32 = arith.constant 0 : i32
    %c0_i32_0 = arith.constant 0 : i32
    %c0_i32_1 = arith.constant 0 : i32
    return %arg0, %c0_i32, %c0_i32_0 : i32, i32, i32
  }
}

</mosaic_0001>

<bundles_post_ra>
// kernel: vgg_block_forward.1
= control target key start
LH: loop header
LB: loop body
LE: loop exit
PB: predicated region body
PF: predicated region fallthrough
CT: control target
= control target key end

     0   :  { %10 = vsyncpa [#allocation4], 0  ;;  %s14877_s0 = inlined_call_operand.vmem [shape: bf16[2,18,18,8], index: 0, kind: input, shape index: {}]   ;;  %s14878_s1 = inlined_call_operand.vmem [shape: bf16[9,8,128], index: 1, kind: input, shape index: {}]   ;;  %s14879_s2 = inlined_call_operand.vmem [shape: f32[1,128], index: 2, kind: input, shape index: {}]   ;;  %s14880_s3 = inlined_call_operand.vmem [shape: bf16[9,128,128], index: 3, kind: input, shape index: {}]   ;;  %s14881_s4 = inlined_call_operand.vmem [shape: f32[1,128], index: 4, kind: input, shape index: {}]   ;;  %s14882_s5 = inlined_call_operand.hbm [shape: f32[2,256,128], index: 5, kind: output, shape index: {}]  }
   0x1   :  { %12 = vsyncpa [#allocation4 + $0x1], 0  ;;  %s10680_s18 = smov 0   ;;  %s10682_s19 = smov 0  }
   0x2   :  { %s10684_s20 = smov 0   ;;  %s10686_s21 = smov 0  }
   0x3 LB: > { %s10701_s22 = sadd.s32 4294967295, %s10644_s21   ;;  %s8582_s23 = sadd.s32 4294967294, %s10644_s21   ;;  %s10644_s21 = sphi %s10686_s21, %s15347_s21   ;;  %s10640_s20 = sphi %s10684_s20, %s15346_s20   ;;  %s10636_s19 = sphi %s10682_s19, %s15345_s19   ;;  %s10632_s18 = sphi %s10680_s18, %s15344_s18  }
   0x4   : > { %s10705_s24 = sadd.s32 1, %s10644_s21   ;;  %s135_s25 = sadd.s32 1, %s10640_s20 }
   0x5   : > { %s132_s26 = ssub.s32 %s10644_s21, %s10705_s24  ;;  %p145_p0 = scmp.ne.s32.totalorder %s10640_s20, %s10636_s19 }
   0x6   : > { %p133_p1 = scmp.eq.s32.totalorder %s132_s26, 0  ;;  %p146_p2 = scmp.eq.s32.totalorder %s10701_s22, 1 }
   0x7   : > { %p151_p3 = scmp.ne.s32.totalorder %s10636_s19, %s10632_s18  ;;  %p152_p4 = scmp.eq.s32.totalorder %s8582_s23, 1 }
   0x8   : > { %s10716_s27 = scalar_select %p133_p1, %s10640_s20, %s135_s25  }
   0x9   : > { %p10718_p5 = por %p146_p2, %p145_p0  ;;  %p10722_p6 = por %p152_p4, %p151_p3 }
   0xa   : > { %p8585_p7 = scmp.ge.s32.totalorder %s10644_s21, 1  ;;  %p190_p8 = scmp.lt.s32.totalorder %s10644_s21, 3 }
   0xc   : > { %p191_p9 = pnand %p8585_p7, %p190_p8 }
   0xe   : > { %194 = sbr.rel (%p191_p9) target bundleno = 1154 (0x482), region = 40 }
  0x13   : > { %v8588_v0 = vld [vmem:[%s14878_s1 + $0x4] sm:$0xf]  ;;  %vm765_vm0 = vcmask 1043456   ;;  %v278_v1 = vld [vmem:[%s14878_s1] sm:$0xf]  ;;  %p218_p10 = scmp.lt.s32.totalorder %s10701_s22, 1 }
  0x14   : > { %10383 = vmatprep.subr.msk.bf16.mxu0 %vm765_vm0, %v8588_v0  ;;  %v767_v2 = vsel %vm765_vm0, %v8588_v0, 0  ;;  %10384 = vmatprep.subr.msk.bf16.mxu1 %vm765_vm0, %v278_v1  ;;  %v1059_v3 = vsel %vm765_vm0, %v278_v1, 0  ;;  %vm279_vm1 = vsmask.f32 3328  ;;  %vm280_vm2 = vsmask.f32 7440 }
  0x15   : > { %9646 = vmatpush3.bf16.msra.mxu0 %v767_v2  ;;  %9680 = vmatpush3.bf16.msra.mxu1 %v1059_v3  ;;  %s219_s9 = scalar_select %p218_p10, %s10701_s22, 1  ;;  %v8669_v4 = vld [vmem:[%s14878_s1 + $0x8] sm:$0xf]  ;;  %v8702_v5 = vld [vmem:[%s14878_s1 + $0xc] sm:$0xf]  ;;  %vm716_vm3 = vcmask 64512   ;;  %vm10803_vm4 = vmor %vm279_vm1, %vm280_vm2 }
  0x16   : > { %10385 = vmatprep.subr.msk.bf16.mxu0 %vm765_vm0, %v8669_v4  ;;  %v10748_v6 = vsel %vm765_vm0, %v8669_v4, 0  ;;  %10386 = vmatprep.subr.msk.bf16.mxu1 %vm765_vm0, %v8702_v5  ;;  %v1658_v7 = vsel %vm765_vm0, %v8702_v5, 0  ;;  %v10755_v8 = vld [vmem:[%s14878_s1 + $0x10] sm:$0xf]  ;;  %v14954_v36 = vmov 0  ;;  %vm1238_vm5 = vcmask 1042432  }
  0x17   : > { %s10392_s16 = smul.u32 216, %s219_s9  ;;  %v10759_v9 = vsel %vm765_vm0, %v10755_v8, 0  ;;  %v14955_v36 = vsel %vm10803_vm4, 4294967295, %v14954_v36  ;;  %vm1239_vm6 = vcmask 1046532   ;;  %vm3485_vm8 = vsmask.f32 7938 }
  0x18   : > { %14953 = vst [vmem:[#allocation6_spill] sm:$0xff] %v10759_v9  ;;  %14956 = vst [vmem:[#allocation7_spill] sm:$0xff] %v14955_v36  ;;  %vm3160_vm9 = vsmask.f32 256  ;;  %vm3161_vm10 = vsmask.f32 4368 }
  0x19   : > { %s10764_s25 = scalar_lea.vmem %s14877_s0, %s10392_s16  ;;  %vm11214_vm7 = vmor %vm1238_vm5, %vm1239_vm6  ;;  %vm3491_vm11 = vcmask 1040384   ;;  %s215_s23 = sand.u32 1, %s10636_s19  }
  0x1a   : > { %v10767_v10 = vld [vmem:[%s10764_s25] sm:$0xf]  ;;  %v10770_v11 = vld [vmem:[%s10764_s25 + $0x4] sm:$0xf]  ;;  %v10773_v12 = vld [vmem:[%s10764_s25 + $0x8] sm:$0x1] }
  0x1b   : > { %v283_v13 = vshrl.u32 %v10767_v10, 16  ;;  %v286_v14 = vshll.u32 %v10767_v10, 16  ;;  %v292_v15 = vshll.u32 %v10770_v11, 16  ;;  %v296_v16 = vshrl.u32 %v10770_v11, 16  ;;  %v10780_v17 = vld [vmem:[%s10764_s25 + $0xc] sm:$0xf]  ;;  %vm12342_vm12 = vmand %vm765_vm0, %vm3485_vm8 }
  0x1c   : > { %v302_v18 = vshll.u32 %v10773_v12, 16  ;;  %v8621_v20 = vcombine.low %v10767_v10, %v10770_v11  ;;  %v10787_v21 = vld [vmem:[%s10764_s25 + $0x10] sm:$0xf]  ;;  %v10790_v22 = vld [vmem:[%s10764_s25 + $0x14] sm:$0x1]  ;;  %v307_v28 = vshrl.u32 %v10780_v17, 16  ;;  %vm12353_vm13 = vmor %vm3160_vm9, %vm3161_vm10 }
  0x1d   : > { %v285_v23 = vrot.slane %v283_v13, 4  ;;  %v288_v24 = vrot.slane %v286_v14, 5  ;;  %v294_v25 = vrot.slane %v292_v15, 5  ;;  %v298_v26 = vrot.slane %v296_v16, 4  ;;  %v10799_v35 = vld [vmem:[%s10764_s25 + $0x18] sm:$0xf]  ;;  %vm12359_vm14 = vmand %vm3491_vm11, %vm3160_vm9 }
  0x1e   : > { %v304_v27 = vrot.slane %v302_v18, 5  ;;  %9681 = vmatprep.mubr.msk.bf16.mxu1 %vm716_vm3, %v8621_v20  ;;  %v310_v29 = vshll.u32 %v10780_v17, 16  ;;  %v316_v30 = vshll.u32 %v10787_v21, 16  ;;  %v320_v33 = vshrl.u32 %v10787_v21, 16  ;;  %v10809_v45 = vld [vmem:[%s10764_s25 + $0x1c] sm:$0xf] }
  0x1f   : > { %v289_v31 = vor.u32 %v288_v24, %v285_v23  ;;  %v299_v32 = vor.u32 %v298_v26, %v294_v25  ;;  %v326_v34 = vshll.u32 %v10790_v22, 16  ;;  %v309_v37 = vrot.slane %v307_v28, 4  ;;  %v10817_v49 = vld [vmem:[%s10764_s25 + $0x20] sm:$0x1]  ;;  %v10826_v55 = vld [vmem:[%s10764_s25 + $0x24] sm:$0xf] }
  0x20   : > { %v312_v38 = vrot.slane %v310_v29, 5  ;;  %v318_v39 = vrot.slane %v316_v30, 5  ;;  %v322_v43 = vrot.slane %v320_v33, 4  ;;  %v10814_v48 = vcombine.low %v10780_v17, %v10787_v21  ;;  %v10834_v0 = vld [vmem:[%s10764_s25 + $0x28] sm:$0xf]  ;;  %s8586_s30 = sshll.u32 %s215_s23, 8 }
  0x21   : > { %v290_v41 = vrot.slane %v289_v31, 4  ;;  %v300_v42 = vrot.slane %v299_v32, 4  ;;  %v328_v44 = vrot.slane %v326_v34, 5  ;;  %v331_v50 = vshrl.u32 %v10799_v35, 16  ;;  %v10844_v4 = vld [vmem:[%s10764_s25 + $0x2c] sm:$0x1] }
  0x22   : > { %v313_v46 = vor.u32 %v312_v38, %v309_v37  ;;  %v323_v53 = vor.u32 %v322_v43, %v318_v39  ;;  %v334_v54 = vshll.u32 %v10799_v35, 16  ;;  %9682 = vmatmul.mubr.msk.bf16.vlgmr.msra.gmra.mxu1 %vm716_vm3, %v10814_v48  ;;  %v340_v59 = vshll.u32 %v10809_v45, 16  ;;  %v10850_v16 = vld [vmem:[%s10764_s25 + $0x30] sm:$0xf]  ;;  %v10861_v29 = vld [vmem:[%s10764_s25 + $0x34] sm:$0xf] }
  0x23   : > { %v295_v51 = vsel %vm10803_vm4, %v290_v41, %v294_v25  ;;  %v305_v52 = vsel %vm10803_vm4, %v300_v42, %v304_v27  ;;  %v333_v58 = vrot.slane %v331_v50, 4  ;;  %v344_v62 = vshrl.u32 %v10809_v45, 16  ;;  %9748 = vmatpush3.bf16.msra.mxu1 %v1658_v7  ;;  %v10870_v33 = vld [vmem:[%s10764_s25 + $0x38] sm:$0x1]  ;;  %v11014_v47 = vld [vmem:[%s10764_s25 + $0x74] sm:$0x1] }
  0x24   : > { %v8589_v56 = vcombine.low %v295_v51, %v305_v52  ;;  %v314_v57 = vrot.slane %v313_v46, 4  ;;  %v324_v60 = vrot.slane %v323_v53, 4  ;;  %v336_v61 = vrot.slane %v334_v54, 5  ;;  %v10887_v53 = vld [vmem:[%s10764_s25 + $0x3c] sm:$0xf]  ;;  %s14654_s6 = scalar_lea.vmem [#allocation3], %s8586_s30 }
  0x25   : > { %v350_v63 = vshll.u32 %v10817_v49, 16  ;;  %v342_v2 = vrot.slane %v340_v59, 5  ;;  %v10841_v3 = vcombine.low %v10799_v35, %v10809_v45  ;;  %v355_v5 = vshrl.u32 %v10826_v55, 16  ;;  %v10892_v59 = vld [vmem:[%s10764_s25 + $0x40] sm:$0xf]  ;;  %s9275_s7 = sshll.u32 %s10701_s22, 12 }
  0x26   : > { %9647 = vmatprep.mubr.msk.bf16.mxu0 %vm716_vm3, %v8589_v56  ;;  %v319_v1 = vsel %vm10803_vm4, %v314_v57, %v318_v39  ;;  %v329_v13 = vsel %vm10803_vm4, %v324_v60, %v328_v44  ;;  %v337_v14 = vor.u32 %v336_v61, %v333_v58  ;;  %v346_v7 = vrot.slane %v344_v62, 4  ;;  %s8520_s8 = sshll.u32 %s14654_s6, 4  ;;  %s14829_s11 = scalar_lea.hbm %s14882_s5, %s9275_s7  ;;  %s14831_s8 = int_to_ptr.vmem [resolvable:$true] %s8520_s8 }
  0x27   : > { %v352_v15 = vrot.slane %v350_v63, 5  ;;  %v10852_v18 = vcombine.low %v319_v1, %v329_v13  ;;  %9685 = vmatprep.mubr.msk.bf16.mxu1 %vm716_vm3, %v10841_v3  ;;  %v357_v20 = vrot.slane %v355_v5, 4  ;;  %v358_v23 = vshll.u32 %v10826_v55, 16  ;;  %s14837_s22 = scalar_lea.sflag [#allocation4], %s215_s23  ;;  %s10584_s12 = scalar_lea.vmem %s14831_s8, 4096 }
  0x28   : > { %v364_v24 = vshll.u32 %v10834_v0, 16  ;;  %v338_v25 = vrot.slane %v337_v14, 4  ;;  %v347_v26 = vor.u32 %v346_v7, %v342_v2  ;;  %v368_v27 = vshrl.u32 %v10834_v0, 16  ;;  %p10585_p11 = scmp.ne.s32.totalorder %s14831_s8, %s10584_s12  ;;  %s10647_s13 = smov [#allocation3]  }
  0x29   : > { %14957 = vst [vmem:[#allocation8_spill] sm:$0xff] %v10852_v18  ;;  %v374_v28 = vshll.u32 %v10844_v4, 16  ;;  %9648 = vmatmul.mubr.msk.bf16.vlgmr.msra.gmra.mxu0 %vm716_vm3, %v10852_v18  ;;  %v360_v30 = vrot.slane %v358_v23, 5  ;;  %v10867_v32 = vcombine.low %v10826_v55, %v10834_v0  ;;  %v379_v34 = vshrl.u32 %v10850_v16, 16  ;;  %v10914_v23 = vld [vmem:[%s10764_s25 + $0x48] sm:$0xf] }
  0x2a   : > { %v366_v31 = vrot.slane %v364_v24, 5  ;;  %9714 = vmatpush3.bf16.msra.mxu0 %v10748_v6  ;;  %v343_v37 = vsel %vm10803_vm4, %v338_v25, %v342_v2  ;;  %v348_v38 = vrot.slane %v347_v26, 4  ;;  %v370_v39 = vrot.slane %v368_v27, 4  ;;  %v10903_v2 = vld [vmem:[%s10764_s25 + $0x44] sm:$0x1]  ;;  %p10586_p12 = pnand %p10585_p11, %p10718_p5  ;;  %s10588_s14 = sshll.u32 %s10647_s13, 4  ;;  %s10589_s14 = int_to_ptr.vmem [resolvable:$false] %s10588_s14 }
  0x2b   : > { %v376_v41 = vrot.slane %v374_v28, 5  ;;  %v361_v42 = vor.u32 %v360_v30, %v357_v20  ;;  %9686 = vmatmul.mubr.msk.bf16.gmra.mxu1 %vm716_vm3, %v10867_v32  ;;  %v381_v43 = vrot.slane %v379_v34, 4  ;;  %v382_v44 = vshll.u32 %v10850_v16, 16  ;;  %10387 = vmatprep.subr.msk.bf16.mxu0 %vm765_vm0, %v10755_v8  ;;  %v11060_v18 = vld [vmem:[%s10764_s25 + $0x88] sm:$0xf]  ;;  %s10590_s15 = scalar_lea.vmem %s10589_s14, 8192  ;;  %p10591_p0 = scmp.lt.s32.totalorder %s14831_s8, %s10589_s14 }
  0x2c   : > { %v388_v46 = vshll.u32 %v10861_v29, 16  ;;  %v353_v6 = vsel %vm10803_vm4, %v348_v38, %v352_v15  ;;  %v371_v50 = vor.u32 %v370_v39, %v366_v31  ;;  %v392_v51 = vshrl.u32 %v10861_v29, 16  ;;  %14973 = vst [vmem:[#allocation24_spill] sm:$0xff] %v11060_v18  ;;  %p10587_p13 = pneg %p10586_p12  ;;  %p10592_p1 = scmp.lt.s32.totalorder %s10590_s15, %s10584_s12 }
  0x2d   : > { %v398_v52 = vshll.u32 %v10870_v33, 16  ;;  %v10889_v54 = vcombine.low %v343_v37, %v353_v6  ;;  %v362_v56 = vrot.slane %v361_v42, 4  ;;  %v384_v57 = vrot.slane %v382_v44, 5  ;;  %v10920_v37 = vld [vmem:[%s10764_s25 + $0x4c] sm:$0xf] }
  0x2e   : > { %v390_v58 = vrot.slane %v388_v46, 5  ;;  %v372_v8 = vrot.slane %v371_v50, 4  ;;  %v394_v60 = vrot.slane %v392_v51, 4  ;;  %v10896_v62 = vcombine.low %v10850_v16, %v10861_v29  ;;  %v10931_v42 = vld [vmem:[%s10764_s25 + $0x50] sm:$0x1]  ;;  %p10593_p2 = por %p10592_p1, %p10591_p0 }
  0x2f   : > { %14958 = vst [vmem:[#allocation9_spill] sm:$0xff] %v10889_v54  ;;  %v400_v61 = vrot.slane %v398_v52, 5  ;;  %9651 = vmatprep.mubr.msk.bf16.mxu0 %vm716_vm3, %v10889_v54  ;;  %v367_v63 = vsel %vm10803_vm4, %v362_v56, %v366_v31  ;;  %v385_v1 = vor.u32 %v384_v57, %v381_v43  ;;  %v403_v5 = vshrl.u32 %v10887_v53, 16  ;;  %v10938_v51 = vld [vmem:[%s10764_s25 + $0x54] sm:$0xf] }
  0x30   : > { %v406_v13 = vshll.u32 %v10887_v53, 16  ;;  %v377_v14 = vsel %vm10803_vm4, %v372_v8, %v376_v41  ;;  %v395_v7 = vor.u32 %v394_v60, %v390_v58  ;;  %9689 = vmatprep.mubr.msk.bf16.mxu1 %vm716_vm3, %v10896_v62  ;;  %v412_v15 = vshll.u32 %v10892_v59, 16  ;;  %v11045_v54 = vld [vmem:[%s10764_s25 + $0x84] sm:$0xf]  ;;  %p10594_p3 = pnand %p10593_p2, %p10587_p13 }
  0x31   : > { %v416_v20 = vshrl.u32 %v10892_v59, 16  ;;  %v10916_v24 = vcombine.low %v367_v63, %v377_v14  ;;  %v386_v25 = vrot.slane %v385_v1, 4  ;;  %v405_v26 = vrot.slane %v403_v5, 4  ;;  %v10948_v1 = vld [vmem:[%s10764_s25 + $0x58] sm:$0xf]  ;;  %14971 = vst [vmem:[#allocation22_spill] sm:$0xff] %v11045_v54 }
  0x32   : > { %v408_v27 = vrot.slane %v406_v13, 5  ;;  %v396_v28 = vrot.slane %v395_v7, 4  ;;  %v414_v30 = vrot.slane %v412_v15, 5  ;;  %v422_v34 = vshll.u32 %v10903_v2, 16  ;;  %v10959_v7 = vld [vmem:[%s10764_s25 + $0x5c] sm:$0x1] }
  0x33   : > { %14959 = vst [vmem:[#allocation10_spill] sm:$0xff] %v10916_v24  ;;  %v418_v31 = vrot.slane %v416_v20, 4  ;;  %9652 = vmatmul.mubr.msk.bf16.gmra.mxu0 %vm716_vm3, %v10916_v24  ;;  %v391_v38 = vsel %vm10803_vm4, %v386_v25, %v390_v58  ;;  %v10928_v41 = vcombine.low %v10887_v53, %v10892_v59  ;;  %v427_v43 = vshrl.u32 %v10914_v23, 16 }
  0x34   : > { %v409_v39 = vor.u32 %v408_v27, %v405_v26  ;;  %v401_v44 = vsel %vm10803_vm4, %v396_v28, %v400_v61  ;;  %v424_v6 = vrot.slane %v422_v34, 5  ;;  %v430_v50 = vshll.u32 %v10914_v23, 16  ;;  %v10965_v28 = vld [vmem:[%s10764_s25 + $0x60] sm:$0xf] }
  0x35   : > { %14960 = vst [vmem:[#allocation11_spill] sm:$0xff] %v10928_v41  ;;  %v419_v46 = vor.u32 %v418_v31, %v414_v30  ;;  %v10940_v52 = vcombine.low %v391_v38, %v401_v44  ;;  %9690 = vmatmul.mubr.msk.bf16.gmra.mxu1 %vm716_vm3, %v10928_v41  ;;  %v429_v57 = vrot.slane %v427_v43, 4  ;;  %v436_v58 = vshll.u32 %v10920_v37, 16 }
  0x36   : > { %v410_v56 = vrot.slane %v409_v39, 4  ;;  %v432_v60 = vrot.slane %v430_v50, 5  ;;  %v440_v61 = vshrl.u32 %v10920_v37, 16  ;;  %v446_v63 = vshll.u32 %v10931_v42, 16 }
  0x37   : > { %14961 = vst [vmem:[#allocation12_spill] sm:$0xff] %v10940_v52  ;;  %v420_v8 = vrot.slane %v419_v46, 4  ;;  %9655 = vmatprep.mubr.msk.bf16.mxu0 %vm716_vm3, %v10940_v52  ;;  %v438_v13 = vrot.slane %v436_v58, 5  ;;  %v10956_v14 = vcombine.low %v10914_v23, %v10920_v37  ;;  %v451_v15 = vshrl.u32 %v10938_v51, 16  ;;  %v10985_v58 = vld [vmem:[%s10764_s25 + $0x68] sm:$0x1] }
  0x38   : > { %v415_v5 = vsel %vm10803_vm4, %v410_v56, %v414_v30  ;;  %v433_v25 = vor.u32 %v432_v60, %v429_v57  ;;  %v442_v26 = vrot.slane %v440_v61, 4  ;;  %v448_v27 = vrot.slane %v446_v63, 5 }
  0x39   : > { %14962 = vst [vmem:[#allocation13_spill] sm:$0xff] %v10956_v14  ;;  %v425_v20 = vsel %vm10803_vm4, %v420_v8, %v424_v6  ;;  %9693 = vmatprep.mubr.msk.bf16.mxu1 %vm716_vm3, %v10956_v14  ;;  %v453_v31 = vrot.slane %v451_v15, 4  ;;  %v454_v34 = vshll.u32 %v10938_v51, 16  ;;  %v460_v38 = vshll.u32 %v10948_v1, 16  ;;  %v10976_v6 = vld [vmem:[%s10764_s25 + $0x64] sm:$0xf] }
  0x3a   : > { %v10967_v30 = vcombine.low %v415_v5, %v425_v20  ;;  %v434_v39 = vrot.slane %v433_v25, 4  ;;  %v443_v43 = vor.u32 %v442_v26, %v438_v13  ;;  %v464_v44 = vshrl.u32 %v10948_v1, 16  ;;  %v10991_v15 = vld [vmem:[%s10764_s25 + $0x6c] sm:$0xf]  ;;  %v10996_v20 = vld [vmem:[%s14878_s1 + $0x14] sm:$0xf] }
  0x3b   : > { %v470_v46 = vshll.u32 %v10959_v7, 16  ;;  %v456_v50 = vrot.slane %v454_v34, 5  ;;  %v462_v56 = vrot.slane %v460_v38, 5  ;;  %v10982_v57 = vcombine.low %v10938_v51, %v10948_v1  ;;  %14965 = vst [vmem:[#allocation16_spill] sm:$0xff] %v10996_v20  ;;  %v11003_v38 = vld [vmem:[%s10764_s25 + $0x70] sm:$0xf]  ;;  %10388 = vmatprep.subr.msk.bf16.mxu1 %vm765_vm0, %v10996_v20 }
  0x3c   : > { %14963 = vst [vmem:[#allocation14_spill] sm:$0xff] %v10967_v30  ;;  %9656 = vmatmul.mubr.msk.bf16.gmra.mxu0 %vm716_vm3, %v10967_v30  ;;  %v475_v8 = vshrl.u32 %v10965_v28, 16  ;;  %v439_v60 = vsel %vm10803_vm4, %v434_v39, %v438_v13  ;;  %v444_v61 = vrot.slane %v443_v43, 4  ;;  %v466_v63 = vrot.slane %v464_v44, 4 }
  0x3d   : > { %14964 = vst [vmem:[#allocation15_spill] sm:$0xff] %v10982_v57  ;;  %v472_v5 = vrot.slane %v470_v46, 5  ;;  %v457_v25 = vor.u32 %v456_v50, %v453_v31  ;;  %9694 = vmatmul.mubr.msk.bf16.gmra.mxu1 %vm716_vm3, %v10982_v57  ;;  %v478_v34 = vshll.u32 %v10965_v28, 16  ;;  %v484_v13 = vshll.u32 %v10976_v6, 16  ;;  %v11087_v57 = vld [vmem:[%s10764_s25 + $0x94] sm:$0xf] }
  0x3e   : > { %v477_v26 = vrot.slane %v475_v8, 4  ;;  %v449_v39 = vsel %vm10803_vm4, %v444_v61, %v448_v27  ;;  %v467_v43 = vor.u32 %v466_v63, %v462_v56  ;;  %v488_v31 = vshrl.u32 %v10976_v6, 16  ;;  %v11021_v27 = vld [vmem:[%s10764_s25 + $0x78] sm:$0xf] }
  0x3f   : > { %v494_v44 = vshll.u32 %v10985_v58, 16  ;;  %v11011_v46 = vcombine.low %v439_v60, %v449_v39  ;;  %v458_v50 = vrot.slane %v457_v25, 4  ;;  %v480_v8 = vrot.slane %v478_v34, 5 }
  0x40   : > { %v486_v19 = vrot.slane %v484_v13, 5  ;;  %v468_v40 = vrot.slane %v467_v43, 4  ;;  %v490_v30 = vrot.slane %v488_v31, 4  ;;  %v11018_v24 = vcombine.low %v10965_v28, %v10976_v6  ;;  %v11036_v31 = vld [vmem:[%s10764_s25 + $0x7c] sm:$0xf] }
  0x41   : > { %14966 = vst [vmem:[#allocation17_spill] sm:$0xff] %v11011_v46  ;;  %v496_v52 = vrot.slane %v494_v44, 5  ;;  %9659 = vmatprep.mubr.msk.bf16.mxu0 %vm716_vm3, %v11011_v46  ;;  %v463_v60 = vsel %vm10803_vm4, %v458_v50, %v462_v56  ;;  %v481_v61 = vor.u32 %v480_v8, %v477_v26  ;;  %v499_v63 = vshrl.u32 %v10991_v15, 16  ;;  %14968 = vst [vmem:[#allocation19_spill] sm:$0xff] %v11036_v31  ;;  %v11041_v8 = vld [vmem:[%s10764_s25 + $0x80] sm:$0x1] }
  0x42   : > { %14967 = vst [vmem:[#allocation18_spill] sm:$0xff] %v11018_v24  ;;  %v502_v25 = vshll.u32 %v10991_v15, 16  ;;  %v473_v34 = vsel %vm10803_vm4, %v468_v40, %v472_v5  ;;  %v491_v13 = vor.u32 %v490_v30, %v486_v19  ;;  %9697 = vmatprep.mubr.msk.bf16.mxu1 %vm716_vm3, %v11018_v24  ;;  %v508_v39 = vshll.u32 %v11003_v38, 16  ;;  %14970 = vst [vmem:[#allocation21_spill] sm:$0xff] %v11041_v8 }
  0x43   : > { %v512_v43 = vshrl.u32 %v11003_v38, 16  ;;  %v11038_v56 = vcombine.low %v463_v60, %v473_v34  ;;  %v482_v26 = vrot.slane %v481_v61, 4  ;;  %v501_v44 = vrot.slane %v499_v63, 4 }
  0x44   : > { %v504_v50 = vrot.slane %v502_v25, 5  ;;  %v492_v46 = vrot.slane %v491_v13, 4  ;;  %v510_v40 = vrot.slane %v508_v39, 5  ;;  %v518_v5 = vshll.u32 %v11014_v47, 16 }
  0x45   : > { %14969 = vst [vmem:[#allocation20_spill] sm:$0xff] %v11038_v56  ;;  %v514_v30 = vrot.slane %v512_v43, 4  ;;  %9660 = vmatmul.mubr.msk.bf16.gmra.mxu0 %vm716_vm3, %v11038_v56  ;;  %v487_v60 = vsel %vm10803_vm4, %v482_v26, %v486_v19  ;;  %v11053_v63 = vcombine.low %v10991_v15, %v11003_v38  ;;  %v523_v25 = vshrl.u32 %v11021_v27, 16 }
  0x46   : > { %v505_v61 = vor.u32 %v504_v50, %v501_v44  ;;  %v497_v34 = vsel %vm10803_vm4, %v492_v46, %v496_v52  ;;  %v520_v39 = vrot.slane %v518_v5, 5  ;;  %v526_v43 = vshll.u32 %v11021_v27, 16  ;;  %v11068_v50 = vld [vmem:[%s10764_s25 + $0x8c] sm:$0x1]  ;;  %v11073_v5 = vld [vmem:[%s10764_s25 + $0x90] sm:$0xf] }
  0x47   : > { %14972 = vst [vmem:[#allocation23_spill] sm:$0xff] %v11053_v63  ;;  %v515_v13 = vor.u32 %v514_v30, %v510_v40  ;;  %v11062_v56 = vcombine.low %v487_v60, %v497_v34  ;;  %9698 = vmatmul.mubr.msk.bf16.gmra.mxu1 %vm716_vm3, %v11053_v63  ;;  %v525_v26 = vrot.slane %v523_v25, 4  ;;  %v532_v44 = vshll.u32 %v11036_v31, 16  ;;  %14975 = vst [vmem:[#allocation26_spill] sm:$0xff] %v11068_v50 }
  0x48   : > { %v506_v19 = vrot.slane %v505_v61, 4  ;;  %v528_v52 = vrot.slane %v526_v43, 5  ;;  %v536_v46 = vshrl.u32 %v11036_v31, 16  ;;  %v542_v30 = vshll.u32 %v11041_v8, 16 }
  0x49   : > { %14974 = vst [vmem:[#allocation25_spill] sm:$0xff] %v11062_v56  ;;  %v516_v24 = vrot.slane %v515_v13, 4  ;;  %9663 = vmatprep.mubr.msk.bf16.mxu0 %vm716_vm3, %v11062_v56  ;;  %v534_v61 = vrot.slane %v532_v44, 5  ;;  %v11081_v25 = vcombine.low %v11021_v27, %v11036_v31  ;;  %v547_v34 = vshrl.u32 %v11045_v54, 16  ;;  %v11096_v56 = vld [vmem:[%s10764_s25 + $0x98] sm:$0x1] }
  0x4a   : > { %v511_v60 = vsel %vm10803_vm4, %v506_v19, %v510_v40  ;;  %v529_v43 = vor.u32 %v528_v52, %v525_v26  ;;  %v538_v63 = vrot.slane %v536_v46, 4  ;;  %v544_v20 = vrot.slane %v542_v30, 5  ;;  %14978 = vst [vmem:[#allocation29_spill] sm:$0xff] %v11096_v56 }
  0x4b   : > { %14976 = vst [vmem:[#allocation27_spill] sm:$0xff] %v11081_v25  ;;  %v521_v13 = vsel %vm10803_vm4, %v516_v24, %v520_v39  ;;  %9701 = vmatprep.mubr.msk.bf16.mxu1 %vm716_vm3, %v11081_v25  ;;  %v549_v40 = vrot.slane %v547_v34, 4  ;;  %v550_v19 = vshll.u32 %v11045_v54, 16  ;;  %v556_v44 = vshll.u32 %v11060_v18, 16  ;;  %v11110_v25 = vld [vmem:[%s10764_s25 + $0x9c] sm:$0xf] }
  0x4c   : > { %v11089_v14 = vcombine.low %v511_v60, %v521_v13  ;;  %v530_v8 = vrot.slane %v529_v43, 4  ;;  %v539_v24 = vor.u32 %v538_v63, %v534_v61  ;;  %v560_v39 = vshrl.u32 %v11060_v18, 16 }
  0x4d   : > { %v566_v26 = vshll.u32 %v11068_v50, 16  ;;  %v552_v52 = vrot.slane %v550_v19, 5  ;;  %v558_v46 = vrot.slane %v556_v44, 5  ;;  %v11104_v30 = vcombine.low %v11045_v54, %v11060_v18  ;;  %v11117_v18 = vld [vmem:[%s10764_s25 + $0xa0] sm:$0xf] }
  0x4e   : > { %14977 = vst [vmem:[#allocation28_spill] sm:$0xff] %v11089_v14  ;;  %9664 = vmatmul.mubr.msk.bf16.gmra.mxu0 %vm716_vm3, %v11089_v14  ;;  %v571_v60 = vshrl.u32 %v11073_v5, 16  ;;  %v535_v34 = vsel %vm10803_vm4, %v530_v8, %v534_v61  ;;  %v540_v63 = vrot.slane %v539_v24, 4  ;;  %v562_v13 = vrot.slane %v560_v39, 4  ;;  %14980 = vst [vmem:[#allocation31_spill] sm:$0xff] %v11117_v18 }
  0x4f   : > { %14979 = vst [vmem:[#allocation30_spill] sm:$0xff] %v11104_v30  ;;  %v568_v43 = vrot.slane %v566_v26, 5  ;;  %v553_v50 = vor.u32 %v552_v52, %v549_v40  ;;  %9702 = vmatmul.mubr.msk.bf16.gmra.mxu1 %vm716_vm3, %v11104_v30  ;;  %v574_v44 = vshll.u32 %v11073_v5, 16  ;;  %v580_v14 = vshll.u32 %v11087_v57, 16  ;;  %v11126_v30 = vld [vmem:[%s10764_s25 + $0xa4] sm:$0x1] }
  0x50   : > { %v573_v19 = vrot.slane %v571_v60, 4  ;;  %v545_v8 = vsel %vm10803_vm4, %v540_v63, %v544_v20  ;;  %v563_v61 = vor.u32 %v562_v13, %v558_v46  ;;  %v584_v24 = vshrl.u32 %v11087_v57, 16  ;;  %14982 = vst [vmem:[#allocation33_spill] sm:$0xff] %v11126_v30  ;;  %v11133_v20 = vld [vmem:[%s10764_s25 + $0xa8] sm:$0xf] }
  0x51   : > { %v590_v39 = vshll.u32 %v11096_v56, 16  ;;  %v11123_v40 = vcombine.low %v535_v34, %v545_v8  ;;  %v554_v26 = vrot.slane %v553_v50, 4  ;;  %v576_v52 = vrot.slane %v574_v44, 5  ;;  %14984 = vst [vmem:[#allocation35_spill] sm:$0xff] %v11133_v20 }
  0x52   : > { %v582_v60 = vrot.slane %v580_v14, 5  ;;  %v564_v54 = vrot.slane %v563_v61, 4  ;;  %v586_v41 = vrot.slane %v584_v24, 4  ;;  %v11130_v9 = vcombine.low %v11073_v5, %v11087_v57  ;;  %v11148_v24 = vld [vmem:[%s10764_s25 + $0xac] sm:$0xf] }
  0x53   : > { %14981 = vst [vmem:[#allocation32_spill] sm:$0xff] %v11123_v40  ;;  %v592_v31 = vrot.slane %v590_v39, 5  ;;  %9667 = vmatprep.mubr.msk.bf16.mxu0 %vm716_vm3, %v11123_v40  ;;  %v559_v50 = vsel %vm10803_vm4, %v554_v26, %v558_v46  ;;  %v577_v14 = vor.u32 %v576_v52, %v573_v19  ;;  %v595_v34 = vshrl.u32 %v11110_v25, 16  ;;  %14985 = vst [vmem:[#allocation36_spill] sm:$0xff] %v11148_v24  ;;  %v11153_v52 = vld [vmem:[%s10764_s25 + $0xb0] sm:$0x1] }
  0x54   : > { %14983 = vst [vmem:[#allocation34_spill] sm:$0xff] %v11130_v9  ;;  %v598_v63 = vshll.u32 %v11110_v25, 16  ;;  %v569_v13 = vsel %vm10803_vm4, %v564_v54, %v568_v43  ;;  %v587_v44 = vor.u32 %v586_v41, %v582_v60  ;;  %9705 = vmatprep.mubr.msk.bf16.mxu1 %vm716_vm3, %v11130_v9  ;;  %v604_v8 = vshll.u32 %v11117_v18, 16  ;;  %14987 = vst [vmem:[#allocation38_spill] sm:$0xff] %v11153_v52  ;;  %v11157_v9 = vld [vmem:[%s10764_s25 + $0xb4] sm:$0xf] }
  0x55   : > { %v608_v61 = vshrl.u32 %v11117_v18, 16  ;;  %v11150_v46 = vcombine.low %v559_v50, %v569_v13  ;;  %v578_v19 = vrot.slane %v577_v14, 4  ;;  %v597_v39 = vrot.slane %v595_v34, 4 }
  0x56   : > { %v600_v26 = vrot.slane %v598_v63, 5  ;;  %v588_v54 = vrot.slane %v587_v44, 4  ;;  %v606_v41 = vrot.slane %v604_v8, 5  ;;  %v614_v40 = vshll.u32 %v11126_v30, 16  ;;  %v11172_v30 = vld [vmem:[%s10764_s25 + $0xb8] sm:$0xf] }
  0x57   : > { %14986 = vst [vmem:[#allocation37_spill] sm:$0xff] %v11150_v46  ;;  %v610_v43 = vrot.slane %v608_v61, 4  ;;  %9668 = vmatmul.mubr.msk.bf16.gmra.mxu0 %vm716_vm3, %v11150_v46  ;;  %v583_v50 = vsel %vm10803_vm4, %v578_v19, %v582_v60  ;;  %v11165_v34 = vcombine.low %v11110_v25, %v11117_v18  ;;  %v619_v63 = vshrl.u32 %v11133_v20, 16 }
  0x58   : > { %v601_v14 = vor.u32 %v600_v26, %v597_v39  ;;  %v593_v13 = vsel %vm10803_vm4, %v588_v54, %v592_v31  ;;  %v616_v8 = vrot.slane %v614_v40, 5  ;;  %v622_v61 = vshll.u32 %v11133_v20, 16  ;;  %v11180_v39 = vld [vmem:[%s10764_s25 + $0xbc] sm:$0x1] }
  0x59   : > { %14988 = vst [vmem:[#allocation39_spill] sm:$0xff] %v11165_v34  ;;  %v611_v44 = vor.u32 %v610_v43, %v606_v41  ;;  %v11174_v46 = vcombine.low %v583_v50, %v593_v13  ;;  %9706 = vmatmul.mubr.msk.bf16.gmra.mxu1 %vm716_vm3, %v11165_v34  ;;  %v621_v60 = vrot.slane %v619_v63, 4  ;;  %v628_v19 = vshll.u32 %v11148_v24, 16 }
  0x5a   : > { %v602_v56 = vrot.slane %v601_v14, 4  ;;  %v624_v18 = vrot.slane %v622_v61, 5  ;;  %v632_v31 = vshrl.u32 %v11148_v24, 16  ;;  %v638_v40 = vshll.u32 %v11153_v52, 16 }
  0x5b   : > { %14989 = vst [vmem:[#allocation40_spill] sm:$0xff] %v11174_v46  ;;  %v612_v26 = vrot.slane %v611_v44, 4  ;;  %9671 = vmatprep.mubr.msk.bf16.mxu0 %vm716_vm3, %v11174_v46  ;;  %v630_v43 = vrot.slane %v628_v19, 5  ;;  %v11190_v50 = vcombine.low %v11133_v20, %v11148_v24  ;;  %v643_v14 = vshrl.u32 %v11157_v9, 16 }
  0x5c   : > { %v607_v54 = vsel %vm10803_vm4, %v602_v56, %v606_v41  ;;  %v625_v13 = vor.u32 %v624_v18, %v621_v60  ;;  %v634_v44 = vrot.slane %v632_v31, 4  ;;  %v640_v61 = vrot.slane %v638_v40, 5 }
  0x5d   : > { %v617_v63 = vsel %vm10803_vm4, %v612_v26, %v616_v8  ;;  %9709 = vmatprep.mubr.msk.bf16.mxu1 %vm716_vm3, %v11190_v50  ;;  %v645_v46 = vrot.slane %v643_v14, 4  ;;  %v646_v56 = vshll.u32 %v11157_v9, 16  ;;  %v652_v41 = vshll.u32 %v11172_v30, 16 }
  0x5e   : > { %v11195_v34 = vcombine.low %v607_v54, %v617_v63  ;;  %v626_v19 = vrot.slane %v625_v13, 4  ;;  %v635_v52 = vor.u32 %v634_v44, %v630_v43  ;;  %v656_v24 = vshrl.u32 %v11172_v30, 16 }
  0x5f   : > { %v662_v20 = vshll.u32 %v11180_v39, 16  ;;  %v648_v18 = vrot.slane %v646_v56, 5  ;;  %v654_v8 = vrot.slane %v652_v41, 5  ;;  %v11207_v60 = vcombine.low %v11157_v9, %v11172_v30 }
  0x60   : > { %9672 = vmatmul.mubr.msk.bf16.gmra.mxu0 %vm716_vm3, %v11195_v34  ;;  %v8653_v26 = vrot.slane %v10767_v10, 9  ;;  %v631_v31 = vsel %vm10803_vm4, %v626_v19, %v630_v43  ;;  %v636_v40 = vrot.slane %v635_v52, 4  ;;  %v658_v54 = vrot.slane %v656_v24, 4 }
  0x61   : > { %v664_v14 = vrot.slane %v662_v20, 5  ;;  %v14990_v63 = vmov 0  ;;  %v649_v13 = vor.u32 %v648_v18, %v645_v46  ;;  %9710 = vmatmul.mubr.msk.bf16.gmra.mxu1 %vm716_vm3, %v11207_v60  ;;  %v1243_v44 = vrot.slane %v10770_v11, 5 }
  0x62   : > { %v14991_v63 = vsel %vm11214_vm7, 4294967295, %v14990_v63  ;;  %v8654_v10 = vrot.slane %v10780_v17, 9  ;;  %v14993_v56 = vrot.slane %v10787_v21, 5  ;;  %v641_v20 = vsel %vm10803_vm4, %v636_v40, %v640_v61  ;;  %9749 = vmatprep.mubr.msk.bf16.mxu1 %vm716_vm3, %v10814_v48 }
  0x63   : > { %14992 = vst [vmem:[#allocation41_spill] sm:$0xff] %v14991_v63  ;;  %v659_v24 = vor.u32 %v658_v54, %v654_v8  ;;  %v8655_v52 = vrot.slane %v10799_v35, 9  ;;  %v1257_v46 = vrot.slane %v10809_v45, 5  ;;  %v11230_v41 = vcombine.low %v631_v31, %v641_v20 }
  0x64   : > { %v1252_v43 = vrot.slane %v14993_v56, 4  ;;  %v650_v19 = vrot.slane %v649_v13, 4  ;;  %v1244_v11 = vsel %vm11214_vm7, %v8653_v26, %v1243_v44  ;;  %v1245_v17 = vrot.slane %v1243_v44, 4 }
  0x65   : > { %v660_v18 = vrot.slane %v659_v24, 4  ;;  %v1251_v61 = vsel %vm11214_vm7, %v8654_v10, %v14993_v56  ;;  %v14994_v40 = vrot.slane %v10790_v22, 5  ;;  %v1258_v45 = vsel %vm11214_vm7, %v8655_v52, %v1257_v46  ;;  %9675 = vmatprep.mubr.msk.bf16.mxu0 %vm716_vm3, %v11230_v41 }
  0x66   : > { %v655_v48 = vsel %vm10803_vm4, %v650_v19, %v654_v8  ;;  %v14995_v26 = vrot.slane %v10773_v12, 5  ;;  %v1259_v22 = vrot.slane %v1257_v46, 4  ;;  %v1260_v44 = vrot.slane %v10817_v49, 5 }
  0x67   : > { %v1254_v35 = vsel %vm11214_vm7, %v1252_v43, %v14994_v40  ;;  %v665_v54 = vsel %vm10803_vm4, %v660_v18, %v664_v14  ;;  %v8656_v10 = vrot.slane %v10826_v55, 9  ;;  %v1264_v8 = vrot.slane %v10834_v0, 5 }
  0x68   : > { %v1247_v21 = vsel %vm11214_vm7, %v1245_v17, %v14995_v26  ;;  %v11252_v31 = vcombine.low %v1251_v61, %v1254_v35  ;;  %v11258_v43 = vcombine.low %v655_v48, %v665_v54  ;;  %v1267_v12 = vrot.slane %v10844_v4, 5 }
  0x69   : > { %v8670_v13 = vcombine.low %v1244_v11, %v1247_v21  ;;  %v8657_v20 = vrot.slane %v10850_v16, 9  ;;  %v1261_v24 = vsel %vm11214_vm7, %v1259_v22, %v1260_v44  ;;  %v1271_v52 = vrot.slane %v10861_v29, 5  ;;  %9750 = vmatmul.mubr.msk.bf16.vlgmr.msra.gmra.mxu1 %vm716_vm3, %v10841_v3 }
  0x6a   : > { %v1274_v14 = vrot.slane %v10870_v33, 5  ;;  %v8658_v46 = vrot.slane %v10887_v53, 9  ;;  %9676 = vmatmul.mubr.msk.bf16.gmra.mxu0 %vm716_vm3, %v11258_v43  ;;  %v11272_v49 = vcombine.low %v1258_v45, %v1261_v24  ;;  %v1265_v55 = vsel %vm11214_vm7, %v8656_v10, %v1264_v8  ;;  %9753 = vmatprep.mubr.msk.bf16.mxu1 %vm716_vm3, %v10867_v32  ;;  %v14997_v24 = vld [vmem:[#allocation19_spill] sm:$0xff] }
  0x6b   : > { %v1266_v0 = vrot.slane %v1264_v8, 4  ;;  %v1278_v4 = vrot.slane %v10892_v59, 5  ;;  %9715 = vmatprep.mubr.msk.bf16.mxu0 %vm716_vm3, %v8670_v13  ;;  %v1272_v16 = vsel %vm11214_vm7, %v8657_v20, %v1271_v52  ;;  %v1273_v29 = vrot.slane %v1271_v52, 4  ;;  %v14996_v8 = vld [vmem:[#allocation6_spill] sm:$0xff] }
  0x6c   : > { %v1281_v33 = vrot.slane %v10903_v2, 5  ;;  %v8659_v53 = vrot.slane %v10914_v23, 9  ;;  %v1285_v17 = vrot.slane %v10920_v37, 5  ;;  %v1288_v61 = vrot.slane %v10931_v42, 5  ;;  %v11309_v42 = vld [vmem:[%s14878_s1 + $0x18] sm:$0xf] }
  0x6d   : > { %v1268_v19 = vsel %vm11214_vm7, %v1266_v0, %v1267_v12  ;;  %v1279_v11 = vsel %vm11214_vm7, %v8658_v46, %v1278_v4  ;;  %v1280_v59 = vrot.slane %v1278_v4, 4  ;;  %v1275_v56 = vsel %vm11214_vm7, %v1273_v29, %v1274_v14  ;;  %v14998_v14 = vld [vmem:[#allocation11_spill] sm:$0xff]  ;;  %v14999_v46 = vld [vmem:[#allocation21_spill] sm:$0xff]  ;;  %v15000_v0 = vld [vmem:[#allocation22_spill] sm:$0xff] }
  0x6e   : > { %v11289_v18 = vcombine.low %v1265_v55, %v1268_v19  ;;  %v8660_v2 = vrot.slane %v10938_v51, 9  ;;  %v11295_v40 = vcombine.low %v1272_v16, %v1275_v56  ;;  %v1286_v35 = vsel %vm11214_vm7, %v8659_v53, %v1285_v17 }
  0x6f   : > { %v1282_v23 = vsel %vm11214_vm7, %v1280_v59, %v1281_v33  ;;  %v1287_v45 = vrot.slane %v1285_v17, 4  ;;  %v1292_v37 = vrot.slane %v10948_v1, 5  ;;  %v1295_v26 = vrot.slane %v10959_v7, 5  ;;  %v15002_v17 = vld [vmem:[#allocation26_spill] sm:$0xff] }
  0x70   : > { %v11301_v48 = vcombine.low %v1279_v11, %v1282_v23  ;;  %v8661_v21 = vrot.slane %v10965_v28, 9  ;;  %v1299_v22 = vrot.slane %v10976_v6, 5  ;;  %v1302_v54 = vrot.slane %v10985_v58, 5  ;;  %v15001_v11 = vld [vmem:[#allocation24_spill] sm:$0xff] }
  0x71   : > { %v1289_v51 = vsel %vm11214_vm7, %v1287_v45, %v1288_v61  ;;  %v8662_v13 = vrot.slane %v10991_v15, 9  ;;  %v1293_v1 = vsel %vm11214_vm7, %v8660_v2, %v1292_v37  ;;  %v1294_v7 = vrot.slane %v1292_v37, 4  ;;  %9754 = vmatmul.mubr.msk.bf16.gmra.mxu1 %vm716_vm3, %v10896_v62 }
  0x72   : > { %v11316_v44 = vcombine.low %v1286_v35, %v1289_v51  ;;  %v1306_v28 = vrot.slane %v11003_v38, 5  ;;  %9716 = vmatmul.mubr.msk.bf16.vlgmr.msra.gmra.mxu0 %vm716_vm3, %v11252_v31  ;;  %v1300_v6 = vsel %vm11214_vm7, %v8661_v21, %v1299_v22  ;;  %v1301_v58 = vrot.slane %v1299_v22, 4  ;;  %9757 = vmatprep.mubr.msk.bf16.mxu1 %vm716_vm3, %v14998_v14  ;;  %v15003_v35 = vld [vmem:[#allocation29_spill] sm:$0xff]  ;;  %v15004_v22 = vld [vmem:[#allocation31_spill] sm:$0xff] }
  0x73   : > { %v1309_v15 = vrot.slane %v11014_v47, 5  ;;  %v8663_v10 = vrot.slane %v11021_v27, 9  ;;  %9782 = vmatpush3.bf16.msra.mxu0 %v14996_v8  ;;  %9719 = vmatprep.mubr.msk.bf16.mxu0 %vm716_vm3, %v11272_v49  ;;  %v1296_v38 = vsel %vm11214_vm7, %v1294_v7, %v1295_v26  ;;  %v1313_v52 = vrot.slane %v14997_v24, 5  ;;  %v15010_v24 = vld [vmem:[#allocation38_spill] sm:$0xff] }
  0x74   : > { %v1307_v12 = vsel %vm11214_vm7, %v8662_v13, %v1306_v28  ;;  %v1308_v20 = vrot.slane %v1306_v28, 4  ;;  %v11339_v47 = vcombine.low %v1293_v1, %v1296_v38  ;;  %v1303_v27 = vsel %vm11214_vm7, %v1301_v58, %v1302_v54  ;;  %10389 = vmatprep.subr.msk.bf16.mxu0 %vm765_vm0, %v11309_v42  ;;  %v15005_v1 = vld [vmem:[#allocation33_spill] sm:$0xff]  ;;  %v15006_v28 = vld [vmem:[#allocation35_spill] sm:$0xff] }
  0x75   : > { %v1316_v55 = vrot.slane %v14999_v46, 5  ;;  %v8664_v4 = vrot.slane %v15000_v0, 9  ;;  %v11347_v16 = vcombine.low %v1300_v6, %v1303_v27  ;;  %v1314_v33 = vsel %vm11214_vm7, %v8663_v10, %v1313_v52  ;;  %v15008_v10 = vld [vmem:[#allocation36_spill] sm:$0xff]  ;;  %v15009_v38 = vld [vmem:[#allocation15_spill] sm:$0xff] }
  0x76   : > { %v1310_v29 = vsel %vm11214_vm7, %v1308_v20, %v1309_v15  ;;  %v1315_v53 = vrot.slane %v1313_v52, 4  ;;  %v1320_v59 = vrot.slane %v15001_v11, 5  ;;  %v1323_v56 = vrot.slane %v15002_v17, 5 }
  0x77   : > { %v11353_v19 = vcombine.low %v1307_v12, %v1310_v29  ;;  %v8665_v61 = vrot.slane %v11073_v5, 9  ;;  %v1327_v23 = vrot.slane %v11087_v57, 5  ;;  %v1330_v45 = vrot.slane %v15003_v35, 5  ;;  %v15013_v35 = vld [vmem:[#allocation23_spill] sm:$0xff] }
  0x78   : > { %v1317_v2 = vsel %vm11214_vm7, %v1315_v53, %v1316_v55  ;;  %v8666_v37 = vrot.slane %v11110_v25, 9  ;;  %v1321_v21 = vsel %vm11214_vm7, %v8664_v4, %v1320_v59  ;;  %v1322_v51 = vrot.slane %v1320_v59, 4  ;;  %v15007_v25 = vld [vmem:[#allocation13_spill] sm:$0xff] }
  0x79   : > { %v11363_v26 = vcombine.low %v1314_v33, %v1317_v2  ;;  %v1334_v54 = vrot.slane %v15004_v22, 5  ;;  %v1328_v5 = vsel %vm11214_vm7, %v8665_v61, %v1327_v23  ;;  %v1329_v13 = vrot.slane %v1327_v23, 4  ;;  %9758 = vmatmul.mubr.msk.bf16.gmra.mxu1 %vm716_vm3, %v15007_v25  ;;  %v15011_v61 = vld [vmem:[#allocation16_spill] sm:$0xff]  ;;  %v272_v22 = vld [vmem:[%s10764_s25 + $0xc0] sm:$0xf] }
  0x7a   : > { %v1337_v7 = vrot.slane %v15005_v1, 5  ;;  %v8667_v57 = vrot.slane %v15006_v28, 9  ;;  %9720 = vmatmul.mubr.msk.bf16.gmra.mxu0 %vm716_vm3, %v11289_v18  ;;  %v1324_v6 = vsel %vm11214_vm7, %v1322_v51, %v1323_v56  ;;  %v1341_v8 = vrot.slane %v15008_v10, 5  ;;  %9761 = vmatprep.mubr.msk.bf16.mxu1 %vm716_vm3, %v15009_v38  ;;  %v15017_v51 = vld [vmem:[#allocation39_spill] sm:$0xff]  ;;  %v15018_v1 = vld [vmem:[#allocation8_spill] sm:$0xff]  ;;  %v15019_v28 = vld [vmem:[#allocation9_spill] sm:$0xff] }
  0x7b   : > { %v1335_v58 = vsel %vm11214_vm7, %v8666_v37, %v1334_v54  ;;  %v1336_v15 = vrot.slane %v1334_v54, 4  ;;  %9723 = vmatprep.mubr.msk.bf16.mxu0 %vm716_vm3, %v11295_v40  ;;  %v11385_v12 = vcombine.low %v1321_v21, %v1324_v6  ;;  %v1331_v20 = vsel %vm11214_vm7, %v1329_v13, %v1330_v45  ;;  %v15014_v45 = vld [vmem:[#allocation27_spill] sm:$0xff]  ;;  %v15015_v37 = vld [vmem:[#allocation30_spill] sm:$0xff]  ;;  %v15025_v10 = vld [vmem:[#allocation25_spill] sm:$0xff] }
  0x7c   : > { %v1344_v52 = vrot.slane %v15010_v24, 5  ;;  %v8668_v27 = vrot.slane %v11157_v9, 9  ;;  %v11391_v46 = vcombine.low %v1328_v5, %v1331_v20  ;;  %v1342_v0 = vsel %vm11214_vm7, %v8667_v57, %v1341_v8  ;;  %v8775_v9 = vld [vmem:[%s14878_s1 + $0x1c] sm:$0xf]  ;;  %v273_v54 = vld [vmem:[%s10764_s25 + $0xc4] sm:$0xf] }
  0x7d   : > { %v1338_v55 = vsel %vm11214_vm7, %v1336_v15, %v1337_v7  ;;  %v1343_v4 = vrot.slane %v1341_v8, 4  ;;  %v1348_v33 = vrot.slane %v11172_v30, 5  ;;  %v1351_v53 = vrot.slane %v11180_v39, 5  ;;  %v15012_v39 = vld [vmem:[#allocation18_spill] sm:$0xff]  ;;  %v15024_v15 = vld [vmem:[#allocation20_spill] sm:$0xff] }
  0x7e   : > { %v11397_v29 = vcombine.low %v1335_v58, %v1338_v55  ;;  %v2098_v2 = vsel %vm765_vm0, %v15011_v61, 0  ;;  %v15016_v21 = vld [vmem:[#allocation34_spill] sm:$0xff]  ;;  %v11451_v5 = vcombine.low %v272_v22, %v273_v54  ;;  %v2532_v13 = vsel %vm765_vm0, %v8775_v9, 0  ;;  %v15023_v58 = vld [vmem:[#allocation17_spill] sm:$0xff]  ;;  %v15026_v8 = vld [vmem:[#allocation28_spill] sm:$0xff] }
  0x7f   : > { %v1345_v11 = vsel %vm11214_vm7, %v1343_v4, %v1344_v52  ;;  %v1349_v17 = vsel %vm11214_vm7, %v8668_v27, %v1348_v33  ;;  %v1350_v56 = vrot.slane %v1348_v33, 4  ;;  %9816 = vmatpush3.bf16.msra.mxu1 %v2098_v2  ;;  %v2304_v7 = vsel %vm765_vm0, %v11309_v42, 0  ;;  %v15020_v57 = vld [vmem:[#allocation10_spill] sm:$0xff]  ;;  %v15021_v42 = vld [vmem:[#allocation12_spill] sm:$0xff]  ;;  %v15028_v55 = vld [vmem:[#allocation37_spill] sm:$0xff] }
  0x80   : > { %v11406_v59 = vcombine.low %v1342_v0, %v1345_v11  ;;  %10390 = vmatprep.subr.msk.bf16.mxu1 %vm765_vm0, %v8775_v9  ;;  %v15022_v6 = vld [vmem:[#allocation14_spill] sm:$0xff]  ;;  %v1854_v20 = vshrl.u32 %v272_v22, 16  ;;  %v1857_v24 = vshll.u32 %v272_v22, 16  ;;  %v1867_v52 = vshrl.u32 %v273_v54, 16  ;;  %v15027_v27 = vld [vmem:[#allocation32_spill] sm:$0xff] }
  0x81   : > { %v1352_v30 = vsel %vm11214_vm7, %v1350_v56, %v1351_v53  ;;  %9762 = vmatmul.mubr.msk.bf16.gmra.mxu1 %vm716_vm3, %v15012_v39  ;;  %v1863_v0 = vshll.u32 %v273_v54, 16  ;;  %v2084_v4 = vrot.slane %v273_v54, 5  ;;  %v274_v33 = vld [vmem:[%s10764_s25 + $0xc8] sm:$0x1]  ;;  %v8738_v56 = vrot.slane %v272_v22, 9 }
  0x82   : > { %9724 = vmatmul.mubr.msk.bf16.gmra.mxu0 %vm716_vm3, %v11301_v48  ;;  %v11419_v23 = vcombine.low %v1349_v17, %v1352_v30  ;;  %9765 = vmatprep.mubr.msk.bf16.mxu1 %vm716_vm3, %v15013_v35  ;;  %v1856_v53 = vrot.slane %v1854_v20, 4  ;;  %v1859_v11 = vrot.slane %v1857_v24, 5  ;;  %v1869_v9 = vrot.slane %v1867_v52, 4  ;;  %v15029_v30 = vld [vmem:[#allocation40_spill] sm:$0xff] }
  0x83   : > { %9727 = vmatprep.mubr.msk.bf16.mxu0 %vm716_vm3, %v11316_v44  ;;  %v1865_v17 = vrot.slane %v1863_v0, 5  ;;  %v2086_v61 = vrot.slane %v2084_v4, 4  ;;  %v2087_v2 = vrot.slane %v274_v33, 5  ;;  %v1873_v54 = vshll.u32 %v274_v33, 16 }
  0x84   : > { %v2085_v22 = vsel %vm11214_vm7, %v8738_v56, %v2084_v4 }
  0x85   : > { %v1875_v0 = vrot.slane %v1873_v54, 5 }
  0x89   : > { %9766 = vmatmul.mubr.msk.bf16.gmra.mxu1 %vm716_vm3, %v15014_v45 }
  0x8a   : > { %9728 = vmatmul.mubr.msk.bf16.gmra.mxu0 %vm716_vm3, %v11339_v47  ;;  %9769 = vmatprep.mubr.msk.bf16.mxu1 %vm716_vm3, %v15015_v37 }
  0x8b   : > { %9731 = vmatprep.mubr.msk.bf16.mxu0 %vm716_vm3, %v11347_v16 }
  0x91   : > { %9770 = vmatmul.mubr.msk.bf16.gmra.mxu1 %vm716_vm3, %v15016_v21 }
  0x92   : > { %9732 = vmatmul.mubr.msk.bf16.gmra.mxu0 %vm716_vm3, %v11353_v19  ;;  %9773 = vmatprep.mubr.msk.bf16.mxu1 %vm716_vm3, %v15017_v51 }
  0x93   : > { %9735 = vmatprep.mubr.msk.bf16.mxu0 %vm716_vm3, %v11363_v26 }
  0x99   : > { %9774 = vmatmul.mubr.msk.bf16.gmra.mxu1 %vm716_vm3, %v11190_v50 }
  0x9a   : > { %9736 = vmatmul.mubr.msk.bf16.gmra.mxu0 %vm716_vm3, %v11385_v12  ;;  %9777 = vmatprep.mubr.msk.bf16.mxu1 %vm716_vm3, %v11207_v60 }
  0x9b   : > { %9739 = vmatprep.mubr.msk.bf16.mxu0 %vm716_vm3, %v11391_v46 }
  0xa1   : > { %9778 = vmatmul.mubr.msk.bf16.gmra.mxu1 %vm716_vm3, %v11451_v5 }
  0xa2   : > { %9740 = vmatmul.mubr.msk.bf16.gmra.mxu0 %vm716_vm3, %v11397_v29  ;;  %9817 = vmatprep.mubr.msk.bf16.mxu1 %vm716_vm3, %v11252_v31  ;;  %v11475_v31 = vld [vmem:[%s14878_s1 + $0x20] sm:$0xf] }
  0xa3   : > { %9743 = vmatprep.mubr.msk.bf16.mxu0 %vm716_vm3, %v11406_v59 }
  0xa9   : > { %9818 = vmatmul.mubr.msk.bf16.vlgmr.msra.gmra.mxu1 %vm716_vm3, %v11272_v49 }
  0xaa   : > { %9744 = vmatmul.mubr.msk.bf16.gmra.mxu0 %vm716_vm3, %v11419_v23  ;;  %9821 = vmatprep.mubr.msk.bf16.mxu1 %vm716_vm3, %v11289_v18 }
  0xab   : > { %9783 = vmatprep.mubr.msk.bf16.mxu0 %vm716_vm3, %v15018_v1  ;;  %9884 = vmatpush3.bf16.msra.mxu1 %v2532_v13  ;;  %v1860_v13 = vor.u32 %v1859_v11, %v1856_v53  ;;  %v1870_v1 = vor.u32 %v1869_v9, %v1865_v17 }
  0xad   : > { %v1861_v24 = vrot.slane %v1860_v13, 4  ;;  %v1871_v52 = vrot.slane %v1870_v1, 4 }
  0xaf   : > { %v1866_v4 = vsel %vm10803_vm4, %v1861_v24, %v1865_v17  ;;  %v1876_v33 = vsel %vm10803_vm4, %v1871_v52, %v1875_v0 }
  0xb0   : > { %v11546_v11 = vcombine.low %v1866_v4, %v1876_v33 }
  0xb1   : > { %9822 = vmatmul.mubr.msk.bf16.gmra.mxu1 %vm716_vm3, %v11295_v40 }
  0xb2   : > { %9784 = vmatmul.mubr.msk.bf16.vlgmr.msra.gmra.mxu0 %vm716_vm3, %v15019_v28  ;;  %9825 = vmatprep.mubr.msk.bf16.mxu1 %vm716_vm3, %v11301_v48 }
  0xb3   : > { %9850 = vmatpush3.bf16.msra.mxu0 %v2304_v7  ;;  %9787 = vmatprep.mubr.msk.bf16.mxu0 %vm716_vm3, %v15020_v57  ;;  %v2088_v7 = vsel %vm11214_vm7, %v2086_v61, %v2087_v2 }
  0xb4   : > { %10391 = vmatprep.subr.msk.bf16.mxu0 %vm765_vm0, %v11475_v31  ;;  %v11532_v20 = vcombine.low %v2085_v22, %v2088_v7 }
  0xb9   : > { %9826 = vmatmul.mubr.msk.bf16.gmra.mxu1 %vm716_vm3, %v11316_v44 }
  0xba   : > { %9788 = vmatmul.mubr.msk.bf16.gmra.mxu0 %vm716_vm3, %v15021_v42  ;;  %9829 = vmatprep.mubr.msk.bf16.mxu1 %vm716_vm3, %v11339_v47 }
  0xbb   : > { %9791 = vmatprep.mubr.msk.bf16.mxu0 %vm716_vm3, %v15022_v6 }
  0xc1   : > { %9830 = vmatmul.mubr.msk.bf16.gmra.mxu1 %vm716_vm3, %v11347_v16 }
  0xc2   : > { %9792 = vmatmul.mubr.msk.bf16.gmra.mxu0 %vm716_vm3, %v15023_v58  ;;  %9833 = vmatprep.mubr.msk.bf16.mxu1 %vm716_vm3, %v11353_v19 }
  0xc3   : > { %9795 = vmatprep.mubr.msk.bf16.mxu0 %vm716_vm3, %v15024_v15 }
  0xc9   : > { %9834 = vmatmul.mubr.msk.bf16.gmra.mxu1 %vm716_vm3, %v11363_v26 }
  0xca   : > { %9796 = vmatmul.mubr.msk.bf16.gmra.mxu0 %vm716_vm3, %v15025_v10  ;;  %9837 = vmatprep.mubr.msk.bf16.mxu1 %vm716_vm3, %v11385_v12 }
  0xcb   : > { %9799 = vmatprep.mubr.msk.bf16.mxu0 %vm716_vm3, %v15026_v8 }
  0xd1   : > { %9838 = vmatmul.mubr.msk.bf16.gmra.mxu1 %vm716_vm3, %v11391_v46 }
  0xd2   : > { %9800 = vmatmul.mubr.msk.bf16.gmra.mxu0 %vm716_vm3, %v15027_v27  ;;  %9841 = vmatprep.mubr.msk.bf16.mxu1 %vm716_vm3, %v11397_v29 }
  0xd3   : > { %9803 = vmatprep.mubr.msk.bf16.mxu0 %vm716_vm3, %v15028_v55 }
  0xd9   : > { %9842 = vmatmul.mubr.msk.bf16.gmra.mxu1 %vm716_vm3, %v11406_v59 }
  0xda   : > { %9804 = vmatmul.mubr.msk.bf16.gmra.mxu0 %vm716_vm3, %v15029_v30  ;;  %9845 = vmatprep.mubr.msk.bf16.mxu1 %vm716_vm3, %v11419_v23 }
  0xdb   : > { %9807 = vmatprep.mubr.msk.bf16.mxu0 %vm716_vm3, %v11195_v34 }
  0xe1   : > { %9846 = vmatmul.mubr.msk.bf16.gmra.mxu1 %vm716_vm3, %v11532_v20 }
  0xe2   : > { %9808 = vmatmul.mubr.msk.bf16.gmra.mxu0 %vm716_vm3, %v11230_v41  ;;  %9885 = vmatprep.mubr.msk.bf16.mxu1 %vm716_vm3, %v15019_v28  ;;  %v9683_v53 = vpop.f32.mrf.mxu1 }
  0xe3   : > { %9811 = vmatprep.mubr.msk.bf16.mxu0 %vm716_vm3, %v11258_v43 }
  0xe4   : > { %v1095_v9 = vpop.f32.mrf.mxu1 }
  0xe6   : > { %v9684_v56 = vpop.f32.mrf.mxu1 }
  0xe8   : > { %v1098_v2 = vpop.f32.mrf.mxu1 }
  0xe9   : > { %v9649_v61 = vpop.f32.mrf.mxu0  ;;  %9886 = vmatmul.mubr.msk.bf16.vlgmr.msra.gmra.mxu1 %vm716_vm3, %v15020_v57  ;;  %v2744_v57 = vsel %vm765_vm0, %v11475_v31, 0 }
  0xea   : > { %9812 = vmatmul.mubr.msk.bf16.gmra.mxu0 %vm716_vm3, %v11546_v11  ;;  %v11554_v17 = vadd.f32 %v9683_v53, %v9649_v61  ;;  %9889 = vmatprep.mubr.msk.bf16.mxu1 %vm716_vm3, %v15021_v42 }
  0xeb   : > { %9851 = vmatprep.mubr.msk.bf16.mxu0 %vm716_vm3, %v10841_v3  ;;  %v803_v28 = vpop.f32.mrf.mxu0  ;;  %v9687_v13 = vpop.f32.mrf.mxu1 }
  0xec   : > { %v11558_v1 = vadd.f32 %v1095_v9, %v803_v28 }
  0xed   : > { %v9650_v54 = vpop.f32.mrf.mxu0  ;;  %v1111_v22 = vpop.f32.mrf.mxu1 }
  0xee   : > { %v11560_v7 = vadd.f32 %v9684_v56, %v9650_v54 }
  0xef   : > { %v806_v24 = vpop.f32.mrf.mxu0  ;;  %v9688_v52 = vpop.f32.mrf.mxu1 }
  0xf0   : > { %v11564_v0 = vadd.f32 %v1098_v2, %v806_v24 }
  0xf1   : > { %9890 = vmatmul.mubr.msk.bf16.gmra.mxu1 %vm716_vm3, %v15022_v6  ;;  %v1114_v3 = vpop.f32.mrf.mxu1 }
  0xf2   : > { %9852 = vmatmul.mubr.msk.bf16.vlgmr.msra.gmra.mxu0 %vm716_vm3, %v10867_v32  ;;  %9893 = vmatprep.mubr.msk.bf16.mxu1 %vm716_vm3, %v15023_v58 }
  0xf3   : > { %9918 = vmatpush3.bf16.msra.mxu0 %v2744_v57  ;;  %9855 = vmatprep.mubr.msk.bf16.mxu0 %vm716_vm3, %v10896_v62  ;;  %v9653_v42 = vpop.f32.mrf.mxu0 }
  0xf4   : > { %v11574_v31 = vadd.f32 %v9687_v13, %v9653_v42 }
  0xf5   : > { %v819_v4 = vpop.f32.mrf.mxu0  ;;  %v9691_v33 = vpop.f32.mrf.mxu1 }
  0xf6   : > { %v11576_v53 = vadd.f32 %v1111_v22, %v819_v4  ;;  %v11609_v4 = vld [vmem:[%s10764_s25 + $0xcc] sm:$0xf] }
  0xf7   : > { %v9654_v9 = vpop.f32.mrf.mxu0  ;;  %v1127_v32 = vpop.f32.mrf.mxu1 }
  0xf8   : > { %v11578_v56 = vadd.f32 %v9688_v52, %v9654_v9  ;;  %v11612_v9 = vld [vmem:[%s10764_s25 + $0xd0] sm:$0xf] }
  0xf9   : > { %v822_v6 = vpop.f32.mrf.mxu0  ;;  %9894 = vmatmul.mubr.msk.bf16.gmra.mxu1 %vm716_vm3, %v15024_v15  ;;  %v9692_v62 = vpop.f32.mrf.mxu1 }
  0xfa   : > { %9856 = vmatmul.mubr.msk.bf16.gmra.mxu0 %vm716_vm3, %v14998_v14  ;;  %v11584_v61 = vadd.f32 %v1114_v3, %v822_v6  ;;  %9897 = vmatprep.mubr.msk.bf16.mxu1 %vm716_vm3, %v15025_v10 }
  0xfb   : > { %9859 = vmatprep.mubr.msk.bf16.mxu0 %vm716_vm3, %v15007_v25  ;;  %v1130_v2 = vpop.f32.mrf.mxu1 }
  0xfc   : > { %v9657_v58 = vpop.f32.mrf.mxu0 }
  0xfd   : > { %v11590_v28 = vadd.f32 %v9691_v33, %v9657_v58  ;;  %v9695_v14 = vpop.f32.mrf.mxu1  ;;  %v2509_v58 = vshll.u32 %v11612_v9, 16 }
  0xfe   : > { %v835_v13 = vpop.f32.mrf.mxu0 }
  0xff   : > { %v11592_v54 = vadd.f32 %v1127_v32, %v835_v13  ;;  %v1143_v15 = vpop.f32.mrf.mxu1 }
 0x100   : > { %v9658_v22 = vpop.f32.mrf.mxu0 }
 0x101   : > { %v11594_v57 = vadd.f32 %v9692_v62, %v9658_v22  ;;  %9898 = vmatmul.mubr.msk.bf16.gmra.mxu1 %vm716_vm3, %v15026_v8  ;;  %v9696_v10 = vpop.f32.mrf.mxu1  ;;  %v2503_v62 = vshll.u32 %v11609_v4, 16 }
 0x102   : > { %9860 = vmatmul.mubr.msk.bf16.gmra.mxu0 %vm716_vm3, %v15009_v38  ;;  %v838_v25 = vpop.f32.mrf.mxu0  ;;  %9901 = vmatprep.mubr.msk.bf16.mxu1 %vm716_vm3, %v15027_v27  ;;  %v2500_v27 = vshrl.u32 %v11609_v4, 16 }
 0x103   : > { %v11600_v24 = vadd.f32 %v1130_v2, %v838_v25  ;;  %9863 = vmatprep.mubr.msk.bf16.mxu0 %vm716_vm3, %v15012_v39  ;;  %v1146_v52 = vpop.f32.mrf.mxu1 }
 0x105   : > { %v9661_v3 = vpop.f32.mrf.mxu0 }
 0x106   : > { %v11606_v42 = vadd.f32 %v9695_v14, %v9661_v3 }
 0x107   : > { %v851_v38 = vpop.f32.mrf.mxu0  ;;  %v9699_v33 = vpop.f32.mrf.mxu1 }
 0x108   : > { %v11614_v8 = vadd.f32 %v1143_v15, %v851_v38  ;;  %v2502_v15 = vrot.slane %v2500_v27, 4 }
 0x109   : > { %v9662_v32 = vpop.f32.mrf.mxu0  ;;  %v1159_v39 = vpop.f32.mrf.mxu1  ;;  %9902 = vmatmul.mubr.msk.bf16.gmra.mxu1 %vm716_vm3, %v15028_v55 }
 0x10a   : > { %9864 = vmatmul.mubr.msk.bf16.gmra.mxu0 %vm716_vm3, %v15013_v35  ;;  %v11621_v6 = vadd.f32 %v9696_v10, %v9662_v32  ;;  %9905 = vmatprep.mubr.msk.bf16.mxu1 %vm716_vm3, %v15029_v30  ;;  %v2513_v35 = vshrl.u32 %v11612_v9, 16  ;;  %v2511_v10 = vrot.slane %v2509_v58, 5  ;;  %v11637_v32 = vld [vmem:[%s10764_s25 + $0xd4] sm:$0x1] }
 0x10b   : > { %9867 = vmatprep.mubr.msk.bf16.mxu0 %vm716_vm3, %v15014_v45  ;;  %v854_v2 = vpop.f32.mrf.mxu0  ;;  %v9700_v13 = vpop.f32.mrf.mxu1  ;;  %v2505_v45 = vrot.slane %v2503_v62, 5 }
 0x10c   : > { %v11630_v55 = vadd.f32 %v1146_v52, %v854_v2  ;;  %v2515_v30 = vrot.slane %v2513_v35, 4 }
 0x10d   : > { %v11632_v22 = vpop.f32.mrf.mxu1 }
 0x10e   : > { %v9665_v14 = vpop.f32.mrf.mxu0  ;;  %v2516_v62 = vor.u32 %v2515_v30, %v2511_v10 }
 0x10f   : > { %v11634_v25 = vadd.f32 %v9699_v33, %v9665_v14  ;;  %v9703_v38 = vpop.f32.mrf.mxu1  ;;  %v2506_v33 = vor.u32 %v2505_v45, %v2502_v15 }
 0x110   : > { %v867_v3 = vpop.f32.mrf.mxu0 }
 0x111   : > { %v11639_v63 = vadd.f32 %v1159_v39, %v867_v3  ;;  %v1175_v2 = vpop.f32.mrf.mxu1  ;;  %9906 = vmatmul.mubr.msk.bf16.gmra.mxu1 %vm716_vm3, %v11195_v34  ;;  %v2519_v39 = vshll.u32 %v11637_v32, 16  ;;  %v2507_v14 = vrot.slane %v2506_v33, 4  ;;  %v2517_v3 = vrot.slane %v2516_v62, 4 }
 0x112   : > { %9868 = vmatmul.mubr.msk.bf16.gmra.mxu0 %vm716_vm3, %v15015_v37  ;;  %v9666_v52 = vpop.f32.mrf.mxu0  ;;  %9909 = vmatprep.mubr.msk.bf16.mxu1 %vm716_vm3, %v11230_v41 }
 0x113   : > { %v11645_v27 = vadd.f32 %v9700_v13, %v9666_v52  ;;  %9871 = vmatprep.mubr.msk.bf16.mxu0 %vm716_vm3, %v15016_v21  ;;  %v9704_v37 = vpop.f32.mrf.mxu1  ;;  %v2521_v34 = vrot.slane %v2519_v39, 5  ;;  %v2512_v45 = vsel %vm10803_vm4, %v2507_v14, %v2511_v10 }
 0x114   : > { %v11652_v35 = vpop.f32.mrf.mxu0 }
 0x115   : > { %v11654_v58 = vpop.f32.mrf.mxu1  ;;  %v2522_v30 = vsel %vm10803_vm4, %v2517_v3, %v2521_v34 }
 0x116   : > { %15030 = vst [vmem:[#allocation6_spill] sm:$0xff] %v11654_v58 }
 0x117   : > { %v9669_v13 = vpop.f32.mrf.mxu0 }
 0x118   : > { %v11656_v52 = vadd.f32 %v9703_v38, %v9669_v13 }
 0x119   : > { %v883_v21 = vpop.f32.mrf.mxu0  ;;  %v9707_v41 = vpop.f32.mrf.mxu1  ;;  %9910 = vmatmul.mubr.msk.bf16.gmra.mxu1 %vm716_vm3, %v11258_v43 }
 0x11a   : > { %9872 = vmatmul.mubr.msk.bf16.gmra.mxu0 %vm716_vm3, %v15017_v51  ;;  %v11662_v15 = vadd.f32 %v1175_v2, %v883_v21  ;;  %9913 = vmatprep.mubr.msk.bf16.mxu1 %vm716_vm3, %v11546_v11  ;;  %v8776_v2 = vcombine.low %v2512_v45, %v2522_v30 }
 0x11b   : > { %9875 = vmatprep.mubr.msk.bf16.mxu0 %vm716_vm3, %v11190_v50  ;;  %v9670_v51 = vpop.f32.mrf.mxu0  ;;  %v1191_v38 = vpop.f32.mrf.mxu1 }
 0x11c   : > { %v11672_v33 = vadd.f32 %v9704_v37, %v9670_v51 }
 0x11d   : > { %v11674_v62 = vpop.f32.mrf.mxu0  ;;  %v9708_v43 = vpop.f32.mrf.mxu1 }
 0x11f   : > { %v11676_v13 = vpop.f32.mrf.mxu1 }
 0x120   : > { %v9673_v39 = vpop.f32.mrf.mxu0  ;;  %15031 = vst [vmem:[#allocation19_spill] sm:$0xff] %v11676_v13 }
 0x121   : > { %v11678_v50 = vadd.f32 %v9707_v41, %v9673_v39  ;;  %v9711_v10 = vpop.f32.mrf.mxu1  ;;  %9914 = vmatmul.mubr.msk.bf16.gmra.mxu1 %vm716_vm3, %v8776_v2  ;;  %v8758_v41 = vcombine.low %v11609_v4, %v11612_v9 }
 0x122   : > { %9876 = vmatmul.mubr.msk.bf16.gmra.mxu0 %vm716_vm3, %v11207_v60  ;;  %v899_v11 = vpop.f32.mrf.mxu0 }
 0x123   : > { %v11683_v14 = vadd.f32 %v1191_v38, %v899_v11  ;;  %9879 = vmatprep.mubr.msk.bf16.mxu0 %vm716_vm3, %v11451_v5  ;;  %v1207_v3 = vpop.f32.mrf.mxu1 }
 0x124   : > { %v9674_v37 = vpop.f32.mrf.mxu0 }
 0x125   : > { %v11687_v34 = vadd.f32 %v9708_v43, %v9674_v37  ;;  %v9712_v45 = vpop.f32.mrf.mxu1 }
 0x126   : > { %v11689_v21 = vpop.f32.mrf.mxu0 }
 0x127   : > { %15032 = vst [vmem:[#allocation11_spill] sm:$0xff] %v11689_v21  ;;  %v11693_v60 = vpop.f32.mrf.mxu1 }
 0x128   : > { %15033 = vst [vmem:[#allocation21_spill] sm:$0xff] %v11693_v60 }
 0x129   : > { %v9751_v51 = vpop.f32.mrf.mxu1 }
 0x12a   : > { %v9677_v30 = vpop.f32.mrf.mxu0  ;;  %9880 = vmatmul.mubr.msk.bf16.gmra.mxu0 %vm716_vm3, %v8758_v41 }
 0x12b   : > { %v11696_v38 = vadd.f32 %v9711_v10, %v9677_v30  ;;  %9919 = vmatprep.mubr.msk.bf16.mxu0 %vm716_vm3, %v11272_v49  ;;  %v1694_v43 = vpop.f32.mrf.mxu1 }
 0x12c   : > { %v915_v5 = vpop.f32.mrf.mxu0 }
 0x12d   : > { %v11700_v2 = vadd.f32 %v1207_v3, %v915_v5  ;;  %v9752_v11 = vpop.f32.mrf.mxu1 }
 0x12e   : > { %v9678_v39 = vpop.f32.mrf.mxu0 }
 0x12f   : > { %v11702_v37 = vadd.f32 %v9712_v45, %v9678_v39  ;;  %v11706_v60 = vpop.f32.mrf.mxu1 }
 0x130   : > { %v11704_v13 = vpop.f32.mrf.mxu0  ;;  %15035 = vst [vmem:[#allocation24_spill] sm:$0xff] %v11706_v60 }
 0x131   : > { %15034 = vst [vmem:[#allocation22_spill] sm:$0xff] %v11704_v13  ;;  %v9755_v10 = vpop.f32.mrf.mxu1 }
 0x132   : > { %v9717_v21 = vpop.f32.mrf.mxu0  ;;  %9920 = vmatmul.mubr.msk.bf16.vlgmr.msra.gmra.mxu0 %vm716_vm3, %v11289_v18 }
 0x133   : > { %v1617_v41 = vadd.f32 %v9717_v21, %v11554_v17  ;;  %9923 = vmatprep.mubr.msk.bf16.mxu0 %vm716_vm3, %v11295_v40  ;;  %v1710_v3 = vpop.f32.mrf.mxu1 }
 0x134   : > { %v1488_v49 = vpop.f32.mrf.mxu0 }
 0x135   : > { %v1615_v30 = vadd.f32 %v1488_v49, %v11558_v1  ;;  %v11714_v45 = vadd.f32 %v9751_v51, %v1617_v41  ;;  %v9756_v39 = vpop.f32.mrf.mxu1 }
 0x136   : > { %v9718_v5 = vpop.f32.mrf.mxu0 }
 0x137   : > { %v1618_v60 = vadd.f32 %v9718_v5, %v11560_v7  ;;  %v11717_v13 = vadd.f32 %v1694_v43, %v1615_v30  ;;  %v11719_v18 = vpop.f32.mrf.mxu1 }
 0x138   : > { %v1491_v58 = vpop.f32.mrf.mxu0 }
 0x139   : > { %v11722_v17 = vadd.f32 %v1491_v58, %v11564_v0  ;;  %v11724_v21 = vadd.f32 %v9752_v11, %v1618_v60  ;;  %v9759_v1 = vpop.f32.mrf.mxu1 }
 0x13a   : > { %v9721_v40 = vpop.f32.mrf.mxu0  ;;  %9924 = vmatmul.mubr.msk.bf16.gmra.mxu0 %vm716_vm3, %v11301_v48 }
 0x13b   : > { %v1621_v51 = vadd.f32 %v9721_v40, %v11574_v31  ;;  %9927 = vmatprep.mubr.msk.bf16.mxu0 %vm716_vm3, %v11316_v44  ;;  %v1726_v43 = vpop.f32.mrf.mxu1 }
 0x13c   : > { %v1504_v7 = vpop.f32.mrf.mxu0 }
 0x13d   : > { %v1619_v41 = vadd.f32 %v1504_v7, %v11576_v53  ;;  %v11732_v49 = vadd.f32 %v9755_v10, %v1621_v51  ;;  %v9760_v58 = vpop.f32.mrf.mxu1 }
 0x13e   : > { %v9722_v0 = vpop.f32.mrf.mxu0 }
 0x13f   : > { %v1622_v60 = vadd.f32 %v9722_v0, %v11578_v56  ;;  %v11735_v11 = vadd.f32 %v1710_v3, %v1619_v41  ;;  %v11737_v48 = vpop.f32.mrf.mxu1 }
 0x140   : > { %v1507_v30 = vpop.f32.mrf.mxu0 }
 0x141   : > { %v11740_v31 = vadd.f32 %v1507_v30, %v11584_v61  ;;  %v11742_v5 = vadd.f32 %v9756_v39, %v1622_v60  ;;  %v9763_v53 = vpop.f32.mrf.mxu1 }
 0x142   : > { %v9725_v44 = vpop.f32.mrf.mxu0  ;;  %9928 = vmatmul.mubr.msk.bf16.gmra.mxu0 %vm716_vm3, %v11339_v47 }
 0x143   : > { %v1625_v10 = vadd.f32 %v9725_v44, %v11590_v28  ;;  %9931 = vmatprep.mubr.msk.bf16.mxu0 %vm716_vm3, %v11347_v16  ;;  %v1742_v3 = vpop.f32.mrf.mxu1 }
 0x144   : > { %v1520_v56 = vpop.f32.mrf.mxu0 }
 0x145   : > { %v1623_v40 = vadd.f32 %v1520_v56, %v11592_v54  ;;  %v11750_v51 = vadd.f32 %v9759_v1, %v1625_v10  ;;  %v9764_v7 = vpop.f32.mrf.mxu1 }
 0x146   : > { %v9726_v61 = vpop.f32.mrf.mxu0 }
 0x147   : > { %v1626_v39 = vadd.f32 %v9726_v61, %v11594_v57  ;;  %v11753_v41 = vadd.f32 %v1726_v43, %v1623_v40  ;;  %v11755_v47 = vpop.f32.mrf.mxu1 }
 0x148   : > { %v1523_v0 = vpop.f32.mrf.mxu0 }
 0x149   : > { %v11758_v28 = vadd.f32 %v1523_v0, %v11600_v24  ;;  %v11760_v60 = vadd.f32 %v9760_v58, %v1626_v39  ;;  %v9767_v54 = vpop.f32.mrf.mxu1 }
 0x14a   : > { %v9729_v16 = vpop.f32.mrf.mxu0  ;;  %9932 = vmatmul.mubr.msk.bf16.gmra.mxu0 %vm716_vm3, %v11353_v19 }
 0x14b   : > { %v1629_v1 = vadd.f32 %v9729_v16, %v11606_v42  ;;  %9935 = vmatprep.mubr.msk.bf16.mxu0 %vm716_vm3, %v11363_v26  ;;  %v1758_v43 = vpop.f32.mrf.mxu1 }
 0x14c   : > { %v1536_v57 = vpop.f32.mrf.mxu0 }
 0x14d   : > { %v1627_v30 = vadd.f32 %v1536_v57, %v11614_v8  ;;  %v11768_v44 = vadd.f32 %v9763_v53, %v1629_v1  ;;  %v9768_v10 = vpop.f32.mrf.mxu1 }
 0x14e   : > { %v9730_v24 = vpop.f32.mrf.mxu0 }
 0x14f   : > { %v1630_v58 = vadd.f32 %v9730_v24, %v11621_v6  ;;  %v11771_v56 = vadd.f32 %v1742_v3, %v1627_v30  ;;  %v11773_v19 = vpop.f32.mrf.mxu1 }
 0x150   : > { %v1539_v40 = vpop.f32.mrf.mxu0 }
 0x151   : > { %v11776_v42 = vadd.f32 %v1539_v40, %v11630_v55  ;;  %v11778_v61 = vadd.f32 %v9764_v7, %v1630_v58  ;;  %v9771_v8 = vpop.f32.mrf.mxu1 }
 0x152   : > { %v9733_v26 = vpop.f32.mrf.mxu0  ;;  %9936 = vmatmul.mubr.msk.bf16.gmra.mxu0 %vm716_vm3, %v11385_v12 }
 0x153   : > { %v1633_v53 = vadd.f32 %v9733_v26, %v11634_v25  ;;  %9939 = vmatprep.mubr.msk.bf16.mxu0 %vm716_vm3, %v11391_v46  ;;  %v1774_v3 = vpop.f32.mrf.mxu1 }
 0x154   : > { %v1552_v6 = vpop.f32.mrf.mxu0 }
 0x155   : > { %v1631_v39 = vadd.f32 %v1552_v6, %v11639_v63  ;;  %v11786_v0 = vadd.f32 %v9767_v54, %v1633_v53  ;;  %v9772_v16 = vpop.f32.mrf.mxu1  ;;  %v10453_v54 = vld [vmem:[%s14880_s3 + $0x78] sm:$0xff]   ;;  %v2733_v53 = vrot.slane %v11637_v32, 5 }
 0x156   : > { %v9734_v55 = vpop.f32.mrf.mxu0  ;;  %9951 = vmatprep.subr.bf16.mxu1 %v10453_v54 }
 0x157   : > { %v1634_v7 = vadd.f32 %v9734_v55, %v11645_v27  ;;  %v11789_v1 = vadd.f32 %v1758_v43, %v1631_v39  ;;  %v11793_v12 = vpop.f32.mrf.mxu1  ;;  %v2730_v27 = vrot.slane %v11612_v9, 5  ;;  %9952 = vmatpush3.bf16.msra.mxu1 %v10453_v54 }
 0x158   : > { %v11791_v57 = vpop.f32.mrf.mxu0 }
 0x159   : > { %v11795_v25 = vadd.f32 %v9768_v10, %v1634_v7  ;;  %v9775_v46 = vpop.f32.mrf.mxu1  ;;  %v2732_v9 = vrot.slane %v2730_v27, 4 }
 0x15a   : > { %v9737_v30 = vpop.f32.mrf.mxu0  ;;  %9940 = vmatmul.mubr.msk.bf16.gmra.mxu0 %vm716_vm3, %v11397_v29 }
 0x15b   : > { %v1637_v63 = vadd.f32 %v9737_v30, %v11656_v52  ;;  %9943 = vmatprep.mubr.msk.bf16.mxu0 %vm716_vm3, %v11406_v59  ;;  %v1790_v24 = vpop.f32.mrf.mxu1  ;;  %v8793_v52 = vrot.slane %v11609_v4, 9  ;;  %v2734_v32 = vsel %vm11214_vm7, %v2732_v9, %v2733_v53  ;;  %v10455_v9 = vld [vmem:[%s14880_s3 + $0x68] sm:$0xff]  }
 0x15c   : > { %v1568_v43 = vpop.f32.mrf.mxu0 }
 0x15d   : > { %v1635_v10 = vadd.f32 %v1568_v43, %v11662_v15  ;;  %v11807_v58 = vadd.f32 %v9771_v8, %v1637_v63  ;;  %v9776_v40 = vpop.f32.mrf.mxu1 }
 0x15e   : > { %v9738_v29 = vpop.f32.mrf.mxu0 }
 0x15f   : > { %v1638_v59 = vadd.f32 %v9738_v29, %v11672_v33  ;;  %v11811_v26 = vadd.f32 %v1774_v3, %v1635_v10  ;;  %v11816_v39 = vpop.f32.mrf.mxu1  ;;  %v2731_v3 = vsel %vm11214_vm7, %v8793_v52, %v2730_v27 }
 0x160   : > { %v11814_v6 = vpop.f32.mrf.mxu0  ;;  %v8795_v54 = vcombine.low %v2731_v3, %v2734_v32 }
 0x161   : > { %v11818_v15 = vadd.f32 %v9772_v16, %v1638_v59  ;;  %v9779_v55 = vpop.f32.mrf.mxu1  ;;  %v10454_v16 = vld [vmem:[%s14880_s3 + $0x70] sm:$0xff]  }
 0x162   : > { %v9741_v8 = vpop.f32.mrf.mxu0  ;;  %9944 = vmatmul.mubr.msk.bf16.gmra.mxu0 %vm716_vm3, %v11419_v23  ;;  %9953 = vmatprep.subr.bf16.mxu1 %v10454_v16 }
 0x163   : > { %v1641_v4 = vadd.f32 %v9741_v8, %v11678_v50  ;;  %9947 = vmatprep.mubr.msk.bf16.mxu0 %vm716_vm3, %v11532_v20  ;;  %v1806_v30 = vpop.f32.mrf.mxu1  ;;  %9954 = vmatpush3.bf16.msra.mxu1 %v10454_v16 }
 0x164   : > { %v1584_v7 = vpop.f32.mrf.mxu0  ;;  %9955 = vmatprep.subr.bf16.mxu1 %v10455_v9 }
 0x165   : > { %v1639_v23 = vadd.f32 %v1584_v7, %v11683_v14  ;;  %v11833_v63 = vadd.f32 %v9775_v46, %v1641_v4  ;;  %v9780_v20 = vpop.f32.mrf.mxu1  ;;  %v10457_v7 = vld [vmem:[%s14880_s3 + $0x38] sm:$0xff]  }
 0x166   : > { %v9742_v50 = vpop.f32.mrf.mxu0  ;;  %9999 = vmatprep.subr.bf16.mxu0 %v10457_v7 }
 0x167   : > { %v1642_v27 = vadd.f32 %v9742_v50, %v11687_v34  ;;  %v11836_v43 = vadd.f32 %v1790_v24, %v1639_v23  ;;  %v11840_v29 = vpop.f32.mrf.mxu1  ;;  %9956 = vmatpush3.bf16.msra.mxu1 %v10455_v9  ;;  %10000 = vmatpush3.bf16.msra.mxu0 %v10457_v7 }
 0x168   : > { %v11838_v10 = vpop.f32.mrf.mxu0 }
 0x169   : > { %v11842_v52 = vadd.f32 %v9776_v40, %v1642_v27  ;;  %v11845_v14 = vpop.f32.mrf.mxu1  ;;  %v10458_v27 = vld [vmem:[%s14880_s3 + $0x30] sm:$0xff]  }
 0x16a   : > { %v9745_v59 = vpop.f32.mrf.mxu0  ;;  %9948 = vmatmul.mubr.msk.bf16.gmra.mxu0 %vm716_vm3, %v8795_v54  ;;  %15037 = vst [vmem:[#allocation26_spill] sm:$0xff] %v11845_v14  ;;  %10001 = vmatprep.subr.bf16.mxu0 %v10458_v27 }
 0x16b   : > { %v1645_v46 = vadd.f32 %v9745_v59, %v11696_v38  ;;  %v11851_v24 = vpop.f32.mrf.mxu1  ;;  %10002 = vmatpush3.bf16.msra.mxu0 %v10458_v27 }
 0x16c   : > { %v1600_v34 = vpop.f32.mrf.mxu0  ;;  %15038 = vst [vmem:[#allocation29_spill] sm:$0xff] %v11851_v24 }
 0x16d   : > { %v1643_v53 = vadd.f32 %v1600_v34, %v11700_v2  ;;  %v11854_v8 = vadd.f32 %v9779_v55, %v1645_v46  ;;  %v11856_v4 = vpop.f32.mrf.mxu1  ;;  %v10646_v34 = vmov 0  }
 0x16e   : > { %v9746_v40 = vpop.f32.mrf.mxu0  ;;  %15039 = vst [vmem:[#allocation31_spill] sm:$0xff] %v11856_v4  ;;  %3032 = vst [vmem:[#allocation2 + $0x18] sm:$0xf] %v10646_v34 }
 0x16f   : > { %v1646_v3 = vadd.f32 %v9746_v40, %v11702_v37  ;;  %v11859_v32 = vadd.f32 %v1806_v30, %v1643_v53  ;;  %v11863_v16 = vpop.f32.mrf.mxu1  ;;  %3026 = vst [vmem:[#allocation2] sm:$0xf] %v10646_v34  ;;  %3027 = vst [vmem:[#allocation2 + $0x4] sm:$0xf] %v10646_v34 }
 0x170   : > { %v11861_v38 = vpop.f32.mrf.mxu0  ;;  %15040 = vst [vmem:[#allocation33_spill] sm:$0xff] %v11863_v16  ;;  %3028 = vst [vmem:[#allocation2 + $0x8] sm:$0x1] %v10646_v34 }
 0x171   : > { %v11868_v2 = vadd.f32 %v9780_v20, %v1646_v3  ;;  %v11870_v23 = vpop.f32.mrf.mxu1  ;;  %3029 = vst [vmem:[#allocation2 + $0xc] sm:$0xf] %v10646_v34  ;;  %3030 = vst [vmem:[#allocation2 + $0x10] sm:$0xf] %v10646_v34 }
 0x172   : > { %v9785_v55 = vpop.f32.mrf.mxu0  ;;  %15041 = vst [vmem:[#allocation35_spill] sm:$0xff] %v11870_v23  ;;  %3031 = vst [vmem:[#allocation2 + $0x14] sm:$0x1] %v10646_v34 }
 0x173   : > { %v11873_v50 = vadd.f32 %v9785_v55, %v11714_v45  ;;  %v11875_v30 = vpop.f32.mrf.mxu1  ;;  %3033 = vst [vmem:[#allocation2 + $0x1c] sm:$0xf] %v10646_v34  ;;  %3034 = vst [vmem:[#allocation2 + $0x20] sm:$0x1] %v10646_v34 }
 0x174   : > { %v1922_v37 = vpop.f32.mrf.mxu0  ;;  %15042 = vst [vmem:[#allocation13_spill] sm:$0xff] %v11875_v30  ;;  %3035 = vst [vmem:[#allocation2 + $0x24] sm:$0xf] %v10646_v34 }
 0x175   : > { %v11878_v54 = vadd.f32 %v1922_v37, %v11717_v13  ;;  %v11883_v59 = vpop.f32.mrf.mxu1  ;;  %3036 = vst [vmem:[#allocation2 + $0x28] sm:$0xf] %v10646_v34  ;;  %3037 = vst [vmem:[#allocation2 + $0x2c] sm:$0x1] %v10646_v34  ;;  %v10460_v13 = vld [vmem:[%s14880_s3 + $0x28] sm:$0xff]  }
 0x176   : > { %v9786_v20 = vpop.f32.mrf.mxu0  ;;  %3038 = vst [vmem:[#allocation2 + $0x30] sm:$0xf] %v10646_v34  ;;  %3039 = vst [vmem:[#allocation2 + $0x34] sm:$0xf] %v10646_v34  ;;  %10003 = vmatprep.subr.bf16.mxu0 %v10460_v13 }
 0x177   : > { %15043 = vst [vmem:[#allocation36_spill] sm:$0xff] %v11878_v54  ;;  %v11886_v46 = vadd.f32 %v9786_v20, %v11724_v21  ;;  %v11890_v9 = vpop.f32.mrf.mxu1  ;;  %3040 = vst [vmem:[#allocation2 + $0x38] sm:$0x1] %v10646_v34  ;;  %10004 = vmatpush3.bf16.msra.mxu0 %v10460_v13 }
 0x178   : > { %v11888_v45 = vpop.f32.mrf.mxu0  ;;  %15045 = vst [vmem:[#allocation38_spill] sm:$0xff] %v11890_v9  ;;  %3041 = vst [vmem:[#allocation2 + $0x3c] sm:$0xf] %v10646_v34 }
 0x179   : > { %15044 = vst [vmem:[#allocation15_spill] sm:$0xff] %v11886_v46  ;;  %3042 = vst [vmem:[#allocation2 + $0x40] sm:$0xf] %v10646_v34  ;;  %v9827_v53 = vpop.f32.mrf.mxu1  ;;  %v10469_v46 = vld [vmem:[%s14880_s3 + $0x40] sm:$0xff]  }
 0x17a   : > { %3043 = vst [vmem:[#allocation2 + $0x44] sm:$0x1] %v10646_v34  ;;  %3044 = vst [vmem:[#allocation2 + $0x48] sm:$0xf] %v10646_v34  ;;  %v9789_v21 = vpop.f32.mrf.mxu0 }
 0x17b   : > { %3045 = vst [vmem:[#allocation2 + $0x4c] sm:$0xf] %v10646_v34  ;;  %3046 = vst [vmem:[#allocation2 + $0x50] sm:$0x1] %v10646_v34  ;;  %v11896_v40 = vadd.f32 %v9789_v21, %v11732_v49  ;;  %v2166_v7 = vpop.f32.mrf.mxu1  ;;  %v10461_v49 = vld [vmem:[%s14880_s3 + $0x20] sm:$0xff]  }
 0x17c   : > { %3047 = vst [vmem:[#allocation2 + $0x54] sm:$0xf] %v10646_v34  ;;  %3048 = vst [vmem:[#allocation2 + $0x58] sm:$0xf] %v10646_v34  ;;  %v1938_v3 = vpop.f32.mrf.mxu0  ;;  %10005 = vmatprep.subr.bf16.mxu0 %v10461_v49 }
 0x17d   : > { %3049 = vst [vmem:[#allocation2 + $0x5c] sm:$0x1] %v10646_v34  ;;  %3050 = vst [vmem:[#allocation2 + $0x60] sm:$0xf] %v10646_v34  ;;  %v11899_v55 = vadd.f32 %v1938_v3, %v11735_v11  ;;  %v9828_v20 = vpop.f32.mrf.mxu1  ;;  %v10456_v11 = vld [vmem:[%s14880_s3 + $0x60] sm:$0xff]   ;;  %10006 = vmatpush3.bf16.msra.mxu0 %v10461_v49 }
 0x17e   : > { %3051 = vst [vmem:[#allocation2 + $0x64] sm:$0xf] %v10646_v34  ;;  %3052 = vst [vmem:[#allocation2 + $0x68] sm:$0x1] %v10646_v34  ;;  %v9790_v37 = vpop.f32.mrf.mxu0  ;;  %9957 = vmatprep.subr.bf16.mxu1 %v10456_v11 }
 0x17f   : > { %3053 = vst [vmem:[#allocation2 + $0x6c] sm:$0xf] %v10646_v34  ;;  %3054 = vst [vmem:[#allocation2 + $0x70] sm:$0xf] %v10646_v34  ;;  %v2056_v27 = vadd.f32 %v9790_v37, %v11742_v5  ;;  %v11904_v33 = vpop.f32.mrf.mxu1  ;;  %9958 = vmatpush3.bf16.msra.mxu1 %v10456_v11  ;;  %v10459_v11 = vld [vmem:[%s14880_s3 + $0x58] sm:$0xff]  }
 0x180   : > { %3055 = vst [vmem:[#allocation2 + $0x74] sm:$0x1] %v10646_v34  ;;  %3056 = vst [vmem:[#allocation2 + $0x78] sm:$0xf] %v10646_v34  ;;  %9959 = vmatprep.subr.bf16.mxu1 %v10459_v11 }
 0x181   : > { %3057 = vst [vmem:[#allocation2 + $0x7c] sm:$0xf] %v10646_v34  ;;  %3058 = vst [vmem:[#allocation2 + $0x80] sm:$0x1] %v10646_v34  ;;  %v11910_v21 = vadd.f32 %v11883_v59, %v2056_v27  ;;  %v9831_v13 = vpop.f32.mrf.mxu1  ;;  %v10463_v59 = vld [vmem:[%s14880_s3 + $0x18] sm:$0xff]  }
 0x182   : > { %3059 = vst [vmem:[#allocation2 + $0x84] sm:$0xf] %v10646_v34  ;;  %3060 = vst [vmem:[#allocation2 + $0x88] sm:$0xf] %v10646_v34  ;;  %10007 = vmatprep.subr.bf16.mxu0 %v10463_v59 }
 0x183   : > { %3061 = vst [vmem:[#allocation2 + $0x8c] sm:$0x1] %v10646_v34  ;;  %3062 = vst [vmem:[#allocation2 + $0x90] sm:$0xf] %v10646_v34  ;;  %v2182_v37 = vpop.f32.mrf.mxu1  ;;  %10008 = vmatpush3.bf16.msra.mxu0 %v10463_v59  ;;  %9960 = vmatpush3.bf16.msra.mxu1 %v10459_v11  ;;  %v10462_v11 = vld [vmem:[%s14880_s3 + $0x50] sm:$0xff]  }
 0x184   : > { %3063 = vst [vmem:[#allocation2 + $0x94] sm:$0xf] %v10646_v34  ;;  %3064 = vst [vmem:[#allocation2 + $0x98] sm:$0x1] %v10646_v34  ;;  %9961 = vmatprep.subr.bf16.mxu1 %v10462_v11 }
 0x185   : > { %3065 = vst [vmem:[#allocation2 + $0x9c] sm:$0xf] %v10646_v34  ;;  %3066 = vst [vmem:[#allocation2 + $0xa0] sm:$0xf] %v10646_v34 }
 0x186   : > { %3067 = vst [vmem:[#allocation2 + $0xa4] sm:$0x1] %v10646_v34  ;;  %3068 = vst [vmem:[#allocation2 + $0xa8] sm:$0xf] %v10646_v34 }
 0x187   : > { %3069 = vst [vmem:[#allocation2 + $0xac] sm:$0xf] %v10646_v34  ;;  %3070 = vst [vmem:[#allocation2 + $0xb0] sm:$0x1] %v10646_v34  ;;  %9962 = vmatpush3.bf16.msra.mxu1 %v10462_v11 }
 0x188   : > { %3071 = vst [vmem:[#allocation2 + $0xb4] sm:$0xf] %v10646_v34  ;;  %3072 = vst [vmem:[#allocation2 + $0xb8] sm:$0xf] %v10646_v34 }
 0x189   : > { %3073 = vst [vmem:[#allocation2 + $0xbc] sm:$0x1] %v10646_v34  ;;  %3074 = vst [vmem:[#allocation2 + $0xc0] sm:$0xf] %v10646_v34 }
 0x18a   : > { %3075 = vst [vmem:[#allocation2 + $0xc4] sm:$0xf] %v10646_v34  ;;  %3076 = vst [vmem:[#allocation2 + $0xc8] sm:$0x1] %v10646_v34 }
 0x18b   : > { %3077 = vst [vmem:[#allocation2 + $0xcc] sm:$0xf] %v10646_v34  ;;  %3078 = vst [vmem:[#allocation2 + $0xd0] sm:$0xf] %v10646_v34 }
 0x18c   : > { %3079 = vst [vmem:[#allocation2 + $0xd4] sm:$0x1] %v10646_v34  ;;  %15046 = vst [vmem:[#allocation16_spill] sm:$0xff] %v11896_v40  ;;  %v11902_v34 = vpop.f32.mrf.mxu0 }
 0x18d   : > { %15047 = vst [vmem:[#allocation18_spill] sm:$0xff] %v11899_v55  ;;  %15048 = vst [vmem:[#allocation23_spill] sm:$0xff] %v11904_v33  ;;  %v9832_v55 = vpop.f32.mrf.mxu1 }
 0x18e   : > { %v9793_v9 = vpop.f32.mrf.mxu0 }
 0x18f   : > { %v2059_v5 = vadd.f32 %v9793_v9, %v11750_v51  ;;  %v11927_v9 = vpop.f32.mrf.mxu1 }
 0x190   : > { %v1954_v3 = vpop.f32.mrf.mxu0  ;;  %15050 = vst [vmem:[#allocation30_spill] sm:$0xff] %v11927_v9 }
 0x191   : > { %v2057_v33 = vadd.f32 %v1954_v3, %v11753_v41  ;;  %v11917_v30 = vadd.f32 %v9827_v53, %v2059_v5  ;;  %v9835_v49 = vpop.f32.mrf.mxu1 }
 0x192   : > { %v9794_v27 = vpop.f32.mrf.mxu0 }
 0x193   : > { %v2060_v23 = vadd.f32 %v9794_v27, %v11760_v60  ;;  %v11923_v40 = vadd.f32 %v2166_v7, %v2057_v33  ;;  %v10464_v60 = vld [vmem:[%s14880_s3 + $0x10] sm:$0xff]   ;;  %v2198_v5 = vpop.f32.mrf.mxu1 }
 0x194   : > { %v11925_v51 = vpop.f32.mrf.mxu0  ;;  %10009 = vmatprep.subr.bf16.mxu0 %v10464_v60 }
 0x195   : > { %15049 = vst [vmem:[#allocation27_spill] sm:$0xff] %v11925_v51  ;;  %v11929_v41 = vadd.f32 %v9828_v20, %v2060_v23  ;;  %10010 = vmatpush3.bf16.msra.mxu0 %v10464_v60  ;;  %v9836_v59 = vpop.f32.mrf.mxu1 }
 0x196   : > { %v9797_v53 = vpop.f32.mrf.mxu0 }
 0x197   : > { %v2063_v33 = vadd.f32 %v9797_v53, %v11768_v44  ;;  %v11946_v4 = vpop.f32.mrf.mxu1 }
 0x198   : > { %v1970_v7 = vpop.f32.mrf.mxu0  ;;  %15052 = vst [vmem:[#allocation39_spill] sm:$0xff] %v11946_v4 }
 0x199   : > { %v2061_v3 = vadd.f32 %v1970_v7, %v11771_v56  ;;  %v11939_v23 = vadd.f32 %v9831_v13, %v2063_v33  ;;  %v10466_v56 = vld [vmem:[%s14880_s3 + $0x8] sm:$0xff]   ;;  %v9839_v53 = vpop.f32.mrf.mxu1  ;;  %v10467_v7 = vld [vmem:[%s14880_s3] sm:$0xff]  }
 0x19a   : > { %v9798_v20 = vpop.f32.mrf.mxu0  ;;  %10011 = vmatprep.subr.bf16.mxu0 %v10466_v56 }
 0x19b   : > { %v2064_v27 = vadd.f32 %v9798_v20, %v11778_v61  ;;  %v11942_v9 = vadd.f32 %v2182_v37, %v2061_v3  ;;  %v2214_v60 = vpop.f32.mrf.mxu1  ;;  %10012 = vmatpush3.bf16.msra.mxu0 %v10466_v56 }
 0x19c   : > { %v11944_v16 = vpop.f32.mrf.mxu0  ;;  %10013 = vmatprep.subr.bf16.mxu0 %v10467_v7 }
 0x19d   : > { %15051 = vst [vmem:[#allocation34_spill] sm:$0xff] %v11944_v16  ;;  %v11948_v44 = vadd.f32 %v9832_v55, %v2064_v27  ;;  %v9840_v20 = vpop.f32.mrf.mxu1 }
 0x19e   : > { %v9801_v13 = vpop.f32.mrf.mxu0 }
 0x19f   : > { %v2067_v61 = vadd.f32 %v9801_v13, %v11786_v0  ;;  %v11968_v13 = vpop.f32.mrf.mxu1  ;;  %10014 = vmatpush3.bf16.msra.mxu0 %v10467_v7 }
 0x1a0   : > { %v1986_v37 = vpop.f32.mrf.mxu0  ;;  %15054 = vst [vmem:[#allocation9_spill] sm:$0xff] %v11968_v13 }
 0x1a1   : > { %v2065_v55 = vadd.f32 %v1986_v37, %v11789_v1  ;;  %v11958_v33 = vadd.f32 %v9835_v49, %v2067_v61  ;;  %v3601_v1 = vld [vmem:[#allocation2] sm:$0xf]  ;;  %v3602_v49 = vld [vmem:[#allocation2 + $0x4] sm:$0xf]  ;;  %v9843_v61 = vpop.f32.mrf.mxu1  ;;  %v10465_v37 = vld [vmem:[%s14880_s3 + $0x48] sm:$0xff]  }
 0x1a2   : > { %v9802_v3 = vpop.f32.mrf.mxu0  ;;  %v8885_v16 = vcombine.low %v3601_v1, %v3602_v49  ;;  %9963 = vmatprep.subr.bf16.mxu1 %v10465_v37  ;;  %v3666_v24 = vshrl.u32 %v3601_v1, 16 }
 0x1a3   : > { %v2068_v27 = vadd.f32 %v9802_v3, %v11795_v25  ;;  %v11964_v4 = vadd.f32 %v2198_v5, %v2065_v55  ;;  %v2230_v55 = vpop.f32.mrf.mxu1  ;;  %9964 = vmatpush3.bf16.msra.mxu1 %v10465_v37 }
 0x1a4   : > { %v11966_v0 = vpop.f32.mrf.mxu0  ;;  %10015 = vmatprep.mubr.bf16.mxu0 %v8885_v16  ;;  %9965 = vmatprep.subr.bf16.mxu1 %v10469_v46 }
 0x1a5   : > { %15053 = vst [vmem:[#allocation8_spill] sm:$0xff] %v11966_v0  ;;  %v11970_v56 = vadd.f32 %v9836_v59, %v2068_v27  ;;  %v9844_v27 = vpop.f32.mrf.mxu1 }
 0x1a6   : > { %v9805_v11 = vpop.f32.mrf.mxu0 }
 0x1a7   : > { %v2071_v25 = vadd.f32 %v9805_v11, %v11807_v58  ;;  %v11987_v11 = vpop.f32.mrf.mxu1  ;;  %9966 = vmatpush3.bf16.msra.mxu1 %v10469_v46  ;;  %v3679_v46 = vshrl.u32 %v3602_v49, 16 }
 0x1a8   : > { %v2002_v5 = vpop.f32.mrf.mxu0  ;;  %15056 = vst [vmem:[#allocation12_spill] sm:$0xff] %v11987_v11 }
 0x1a9   : > { %v2069_v3 = vadd.f32 %v2002_v5, %v11811_v26  ;;  %v11977_v7 = vadd.f32 %v9839_v53, %v2071_v25  ;;  %v9847_v53 = vpop.f32.mrf.mxu1 }
 0x1aa   : > { %v9806_v59 = vpop.f32.mrf.mxu0 }
 0x1ab   : > { %v2072_v13 = vadd.f32 %v9806_v59, %v11818_v15  ;;  %v11980_v0 = vadd.f32 %v2214_v60, %v2069_v3  ;;  %v2246_v15 = vpop.f32.mrf.mxu1 }
 0x1ac   : > { %v11985_v58 = vpop.f32.mrf.mxu0 }
 0x1ad   : > { %15055 = vst [vmem:[#allocation10_spill] sm:$0xff] %v11985_v58  ;;  %v11989_v16 = vadd.f32 %v9840_v20, %v2072_v13  ;;  %v9848_v59 = vpop.f32.mrf.mxu1  ;;  %v3669_v58 = vshll.u32 %v3601_v1, 16 }
 0x1ae   : > { %v9809_v26 = vpop.f32.mrf.mxu0 }
 0x1af   : > { %v2075_v37 = vadd.f32 %v9809_v26, %v11833_v63  ;;  %v12000_v54 = vpop.f32.mrf.mxu1 }
 0x1b0   : > { %v2018_v25 = vpop.f32.mrf.mxu0  ;;  %15058 = vst [vmem:[#allocation17_spill] sm:$0xff] %v12000_v54  ;;  %v3649_v54 = vld [vmem:[#allocation2 + $0x8] sm:$0x1] }
 0x1b1   : > { %v2073_v60 = vadd.f32 %v2018_v25, %v11836_v43  ;;  %v11993_v5 = vadd.f32 %v9843_v61, %v2075_v37  ;;  %v12004_v51 = vpop.f32.mrf.mxu1  ;;  %v3668_v43 = vrot.slane %v3666_v24, 4  ;;  %v3671_v61 = vrot.slane %v3669_v58, 5 }
 0x1b2   : > { %v9810_v3 = vpop.f32.mrf.mxu0  ;;  %15059 = vst [vmem:[#allocation20_spill] sm:$0xff] %v12004_v51  ;;  %v3675_v37 = vshll.u32 %v3602_v49, 16  ;;  %v3685_v24 = vshll.u32 %v3649_v54, 16 }
 0x1b3   : > { %v2076_v11 = vadd.f32 %v9810_v3, %v11842_v52  ;;  %v11996_v20 = vadd.f32 %v2230_v55, %v2073_v60  ;;  %v12007_v14 = vpop.f32.mrf.mxu1  ;;  %v3681_v55 = vrot.slane %v3679_v46, 4 }
 0x1b4   : > { %v11998_v13 = vpop.f32.mrf.mxu0  ;;  %v3677_v52 = vrot.slane %v3675_v37, 5 }
 0x1b5   : > { %15057 = vst [vmem:[#allocation14_spill] sm:$0xff] %v11998_v13  ;;  %v12002_v63 = vadd.f32 %v9844_v27, %v2076_v11  ;;  %v12012_v11 = vpop.f32.mrf.mxu1  ;;  %v3672_v13 = vor.u32 %v3671_v61, %v3668_v43 }
 0x1b6   : > { %v9813_v26 = vpop.f32.mrf.mxu0  ;;  %v3682_v51 = vor.u32 %v3681_v55, %v3677_v52 }
 0x1b7   : > { %v2079_v25 = vadd.f32 %v9813_v26, %v11854_v8  ;;  %v12019_v26 = vpop.f32.mrf.mxu1  ;;  %v3673_v46 = vrot.slane %v3672_v13, 4 }
 0x1b8   : > { %v2034_v1 = vpop.f32.mrf.mxu0  ;;  %v3683_v37 = vrot.slane %v3682_v51, 4 }
 0x1b9   : > { %v2077_v60 = vadd.f32 %v2034_v1, %v11859_v32  ;;  %v12010_v3 = vadd.f32 %v9847_v53, %v2079_v25  ;;  %v3687_v32 = vrot.slane %v3685_v24, 5  ;;  %v12025_v1 = vpop.f32.mrf.mxu1  ;;  %v3678_v54 = vsel %vm10803_vm4, %v3673_v46, %v3677_v52  ;;  %v10473_v52 = vld [vmem:[%s14880_s3 + $0xb8] sm:$0xff]  }
 0x1ba   : > { %v9814_v27 = vpop.f32.mrf.mxu0  ;;  %10047 = vmatprep.subr.bf16.mxu1 %v10473_v52 }
 0x1bb   : > { %v2080_v49 = vadd.f32 %v9814_v27, %v11868_v2  ;;  %v12015_v58 = vadd.f32 %v2246_v15, %v2077_v60  ;;  %v3688_v2 = vsel %vm10803_vm4, %v3683_v37, %v3687_v32  ;;  %v12033_v61 = vpop.f32.mrf.mxu1 }
 0x1bc   : > { %v12017_v8 = vpop.f32.mrf.mxu0  ;;  %v8861_v15 = vcombine.low %v3678_v54, %v3688_v2 }
 0x1bd   : > { %v12021_v53 = vadd.f32 %v9848_v59, %v2080_v49  ;;  %v12037_v59 = vpop.f32.mrf.mxu1 }
 0x1be   : > { %v12023_v25 = vpop.f32.mrf.mxu0  ;;  %9967 = vmatprep.mubr.bf16.mxu1 %v8861_v15  ;;  %15060 = vst [vmem:[#allocation25_spill] sm:$0xff] %v12037_v59 }
 0x1bf   : > { %v12041_v55 = vpop.f32.mrf.mxu1 }
 0x1c0   : > { %v12031_v43 = vpop.f32.mrf.mxu0  ;;  %15061 = vst [vmem:[#allocation28_spill] sm:$0xff] %v12041_v55 }
 0x1c1   : > { %v12048_v27 = vpop.f32.mrf.mxu1 }
 0x1c2   : > { %v12035_v51 = vpop.f32.mrf.mxu0  ;;  %15062 = vst [vmem:[#allocation32_spill] sm:$0xff] %v12048_v27 }
 0x1c3   : > { %v12052_v49 = vpop.f32.mrf.mxu1 }
 0x1c4   : > { %v12039_v13 = vpop.f32.mrf.mxu0  ;;  %15063 = vst [vmem:[#allocation37_spill] sm:$0xff] %v12052_v49 }
 0x1c5   : > { %v12054_v37 = vpop.f32.mrf.mxu1 }
 0x1c6   : > { %v12046_v60 = vpop.f32.mrf.mxu0  ;;  %15064 = vst [vmem:[#allocation40_spill] sm:$0xff] %v12054_v37 }
 0x1c7   : > { %v12061_v2 = vpop.f32.mrf.mxu1 }
 0x1c8   : > { %v12050_v24 = vpop.f32.mrf.mxu0  ;;  %15066 = vst [vmem:[#allocation43_spill] sm:$0xff] %v12061_v2 }
 0x1c9   : > { %v12063_v36 = vpop.f32.mrf.mxu1 }
 0x1ca   : > { %v9858_v46 = vpop.f32.mrf.mxu0  ;;  %15067 = vst [vmem:[#allocation44_spill] sm:$0xff] %v12063_v36 }
 0x1cb   : > { %v12057_v32 = vadd.f32 %v9858_v46, %v11910_v21  ;;  %v12068_v55 = vpop.f32.mrf.mxu1 }
 0x1cc   : > { %v12059_v54 = vpop.f32.mrf.mxu0  ;;  %15068 = vst [vmem:[#allocation45_spill] sm:$0xff] %v12068_v55 }
 0x1cd   : > { %15065 = vst [vmem:[#allocation42_spill] sm:$0xff] %v12057_v32  ;;  %v12073_v59 = vpop.f32.mrf.mxu1 }
 0x1ce   : > { %v9861_v15 = vpop.f32.mrf.mxu0  ;;  %15069 = vst [vmem:[#allocation46_spill] sm:$0xff] %v12073_v59 }
 0x1cf   : > { %v12066_v27 = vadd.f32 %v9861_v15, %v11917_v30  ;;  %v12080_v2 = vpop.f32.mrf.mxu1 }
 0x1d0   : > { %v2372_v52 = vpop.f32.mrf.mxu0  ;;  %15071 = vst [vmem:[#allocation48_spill] sm:$0xff] %v12080_v2 }
 0x1d1   : > { %v12071_v49 = vadd.f32 %v2372_v52, %v11923_v40  ;;  %v12082_v32 = vpop.f32.mrf.mxu1 }
 0x1d2   : > { %v9862_v37 = vpop.f32.mrf.mxu0  ;;  %15072 = vst [vmem:[#allocation49_spill] sm:$0xff] %v12082_v32 }
 0x1d3   : > { %v12076_v21 = vadd.f32 %v9862_v37, %v11929_v41  ;;  %v12087_v55 = vpop.f32.mrf.mxu1 }
 0x1d4   : > { %v12078_v46 = vpop.f32.mrf.mxu0  ;;  %15073 = vst [vmem:[#allocation50_spill] sm:$0xff] %v12087_v55 }
 0x1d5   : > { %15070 = vst [vmem:[#allocation47_spill] sm:$0xff] %v12076_v21  ;;  %v12092_v59 = vpop.f32.mrf.mxu1 }
 0x1d6   : > { %v9865_v36 = vpop.f32.mrf.mxu0  ;;  %15074 = vst [vmem:[#allocation51_spill] sm:$0xff] %v12092_v59 }
 0x1d7   : > { %v12085_v30 = vadd.f32 %v9865_v36, %v11939_v23  ;;  %v12099_v2 = vpop.f32.mrf.mxu1 }
 0x1d8   : > { %v2388_v15 = vpop.f32.mrf.mxu0  ;;  %15075 = vst [vmem:[#allocation52_spill] sm:$0xff] %v12099_v2 }
 0x1d9   : > { %v12090_v40 = vadd.f32 %v2388_v15, %v11942_v9  ;;  %v12101_v21 = vpop.f32.mrf.mxu1 }
 0x1da   : > { %v9866_v52 = vpop.f32.mrf.mxu0  ;;  %15076 = vst [vmem:[#allocation53_spill] sm:$0xff] %v12101_v21 }
 0x1db   : > { %v12095_v41 = vadd.f32 %v9866_v52, %v11948_v44  ;;  %v12106_v55 = vpop.f32.mrf.mxu1 }
 0x1dc   : > { %v12097_v37 = vpop.f32.mrf.mxu0  ;;  %15078 = vst [vmem:[#allocation55_spill] sm:$0xff] %v12106_v55 }
 0x1dd   : > { %v12111_v59 = vpop.f32.mrf.mxu1 }
 0x1de   : > { %v9869_v32 = vpop.f32.mrf.mxu0  ;;  %15080 = vst [vmem:[#allocation57_spill] sm:$0xff] %v12111_v59 }
 0x1df   : > { %v12104_v36 = vadd.f32 %v9869_v32, %v11958_v33  ;;  %v12118_v2 = vpop.f32.mrf.mxu1 }
 0x1e0   : > { %v2404_v23 = vpop.f32.mrf.mxu0  ;;  %15082 = vst [vmem:[#allocation59_spill] sm:$0xff] %v12118_v2  ;;  %v15087_v2 = vld [vmem:[#allocation6_spill] sm:$0xff] }
 0x1e1   : > { %15077 = vst [vmem:[#allocation54_spill] sm:$0xff] %v12104_v36  ;;  %v12109_v9 = vadd.f32 %v2404_v23, %v11964_v4  ;;  %v12126_v4 = vpop.f32.mrf.mxu1 }
 0x1e2   : > { %v9870_v15 = vpop.f32.mrf.mxu0  ;;  %15085 = vst [vmem:[#allocation62_spill] sm:$0xff] %v12126_v4 }
 0x1e3   : > { %15079 = vst [vmem:[#allocation56_spill] sm:$0xff] %v12109_v9  ;;  %v12114_v44 = vadd.f32 %v9870_v15, %v11970_v56  ;;  %v1163_v15 = vadd.f32 %v11632_v22, %v11652_v35 }
 0x1e4   : > { %v12116_v52 = vpop.f32.mrf.mxu0 }
 0x1e5   : > { %15081 = vst [vmem:[#allocation58_spill] sm:$0xff] %v12114_v44  ;;  %v1179_v44 = vadd.f32 %v15087_v2, %v11674_v62 }
 0x1e6   : > { %v9873_v21 = vpop.f32.mrf.mxu0 }
 0x1e7   : > { %v12121_v33 = vadd.f32 %v9873_v21, %v11977_v7  ;;  %v12137_v7 = vpop.f32.mrf.mxu1  ;;  %v15088_v21 = vld [vmem:[#allocation11_spill] sm:$0xff]  ;;  %v1636_v36 = vadd.f32 %v11814_v6, %v1179_v44  ;;  %v1834_v6 = vadd.f32 %v11755_v47, %v11776_v42  ;;  %v15095_v42 = vld [vmem:[#allocation36_spill] sm:$0xff] }
 0x1e8   : > { %v2420_v32 = vpop.f32.mrf.mxu0 }
 0x1e9   : > { %15083 = vst [vmem:[#allocation60_spill] sm:$0xff] %v12121_v33  ;;  %v12124_v55 = vadd.f32 %v2420_v32, %v11980_v0  ;;  %v15089_v33 = vld [vmem:[#allocation19_spill] sm:$0xff]  ;;  %v15090_v32 = vld [vmem:[#allocation22_spill] sm:$0xff] }
 0x1ea   : > { %v9874_v23 = vpop.f32.mrf.mxu0  ;;  %v1195_v0 = vadd.f32 %v15089_v33, %v15088_v21  ;;  %v1826_v33 = vadd.f32 %v11719_v18, %v11740_v31 }
 0x1eb   : > { %15084 = vst [vmem:[#allocation61_spill] sm:$0xff] %v12124_v55  ;;  %v12129_v59 = vadd.f32 %v9874_v23, %v11989_v16  ;;  %v15091_v55 = vld [vmem:[#allocation21_spill] sm:$0xff]  ;;  %v15092_v16 = vld [vmem:[#allocation24_spill] sm:$0xff] }
 0x1ec   : > { %v12131_v56 = vpop.f32.mrf.mxu0  ;;  %v1211_v4 = vadd.f32 %v15091_v55, %v15090_v32  ;;  %v1822_v23 = vadd.f32 %v15092_v16, %v11722_v17  ;;  %v1640_v35 = vadd.f32 %v11838_v10, %v1195_v0  ;;  %v12158_v17 = vpop.f32.mrf.mxu1  ;;  %v2054_v18 = vadd.f32 %v11902_v34, %v1826_v33  ;;  %v15101_v0 = vld [vmem:[#allocation35_spill] sm:$0xff]  ;;  %v15103_v16 = vld [vmem:[#allocation13_spill] sm:$0xff]  ;;  %v15106_v33 = vld [vmem:[#allocation10_spill] sm:$0xff] }
 0x1ed   : > { %15086 = vst [vmem:[#allocation63_spill] sm:$0xff] %v12129_v59  ;;  %v1632_v59 = vadd.f32 %v11791_v57, %v1163_v15  ;;  %v1830_v57 = vadd.f32 %v11737_v48, %v11758_v28  ;;  %v15094_v28 = vld [vmem:[#allocation27_spill] sm:$0xff]  ;;  %v15100_v15 = vld [vmem:[#allocation16_spill] sm:$0xff] }
 0x1ee   : > { %v9877_v9 = vpop.f32.mrf.mxu0  ;;  %v1644_v62 = vadd.f32 %v11861_v38, %v1211_v4  ;;  %v2050_v55 = vadd.f32 %v11888_v45, %v1822_v23  ;;  %v1846_v45 = vadd.f32 %v11816_v39, %v1640_v35  ;;  %v15099_v4 = vld [vmem:[#allocation33_spill] sm:$0xff]  ;;  %v2267_v39 = vadd.f32 %v15101_v0, %v15100_v15  ;;  %v12184_v32 = vpop.f32.mrf.mxu1  ;;  %v15104_v23 = vld [vmem:[#allocation34_spill] sm:$0xff] }
 0x1ef   : > { %v12148_v22 = vadd.f32 %v9877_v9, %v11993_v5  ;;  %v1838_v38 = vadd.f32 %v11773_v19, %v1632_v59  ;;  %v1842_v5 = vadd.f32 %v11793_v12, %v1636_v36  ;;  %v15093_v9 = vld [vmem:[#allocation26_spill] sm:$0xff]  ;;  %v2058_v44 = vadd.f32 %v15094_v28, %v1830_v57  ;;  %v15096_v19 = vld [vmem:[#allocation29_spill] sm:$0xff]  ;;  %v15097_v12 = vld [vmem:[#allocation15_spill] sm:$0xff] }
 0x1f0   : > { %v2436_v2 = vpop.f32.mrf.mxu0  ;;  %v2263_v48 = vadd.f32 %v15093_v9, %v11873_v50  ;;  %v2261_v59 = vadd.f32 %v15096_v19, %v15095_v42  ;;  %v15098_v36 = vld [vmem:[#allocation31_spill] sm:$0xff]  ;;  %v2062_v35 = vadd.f32 %v15104_v23, %v1834_v6  ;;  %v15107_v9 = vld [vmem:[#allocation38_spill] sm:$0xff] }
 0x1f1   : > { %v12156_v21 = vadd.f32 %v2436_v2, %v11996_v20  ;;  %v1850_v20 = vadd.f32 %v11840_v29, %v1644_v62  ;;  %v2264_v34 = vadd.f32 %v15098_v36, %v15097_v12  ;;  %v15102_v29 = vld [vmem:[#allocation18_spill] sm:$0xff]  ;;  %v15105_v62 = vld [vmem:[#allocation8_spill] sm:$0xff]  ;;  %v2070_v57 = vadd.f32 %v15106_v33, %v1842_v5  ;;  %v15109_v36 = vld [vmem:[#allocation23_spill] sm:$0xff] }
 0x1f2   : > { %v9878_v10 = vpop.f32.mrf.mxu0  ;;  %v2265_v50 = vadd.f32 %v15103_v16, %v15102_v29  ;;  %v2066_v2 = vadd.f32 %v15105_v62, %v1838_v38  ;;  %v2266_v28 = vadd.f32 %v15107_v9, %v2054_v18  ;;  %v15108_v42 = vld [vmem:[#allocation14_spill] sm:$0xff]  ;;  %v2469_v15 = vadd.f32 %v12023_v25, %v2263_v48  ;;  %v15111_v29 = vld [vmem:[#allocation39_spill] sm:$0xff]  ;;  %v15112_v48 = vld [vmem:[#allocation9_spill] sm:$0xff] }
 0x1f3   : > { %v12168_v31 = vadd.f32 %v9878_v10, %v12002_v63  ;;  %v2262_v63 = vadd.f32 %v15099_v4, %v2050_v55  ;;  %v2074_v19 = vadd.f32 %v15108_v42, %v1846_v45  ;;  %v2078_v55 = vadd.f32 %v12017_v8, %v1850_v20  ;;  %v15110_v20 = vld [vmem:[#allocation30_spill] sm:$0xff]  ;;  %v15118_v9 = vld [vmem:[#allocation28_spill] sm:$0xff]  ;;  %v12247_v42 = vld [vmem:[%s14879_s2] ss:$0 sm:$0xff] }
 0x1f4   : > { %v12175_v47 = vpop.f32.mrf.mxu0  ;;  %v2270_v4 = vadd.f32 %v15109_v36, %v2058_v44  ;;  %v2467_v6 = vadd.f32 %v12031_v43, %v2261_v59  ;;  %v2470_v38 = vadd.f32 %v12035_v51, %v2264_v34  ;;  %v2473_v18 = vadd.f32 %v12046_v60, %v2267_v39  ;;  %v15113_v34 = vld [vmem:[#allocation12_spill] sm:$0xff] }
 0x1f5   : > { %v2468_v5 = vadd.f32 %v12039_v13, %v2262_v63  ;;  %v2471_v45 = vadd.f32 %v12050_v24, %v2265_v50  ;;  %v2274_v44 = vadd.f32 %v15110_v20, %v2062_v35  ;;  %v2278_v25 = vadd.f32 %v15111_v29, %v2066_v2  ;;  %v15114_v63 = vld [vmem:[#allocation17_spill] sm:$0xff]  ;;  %v15115_v39 = vld [vmem:[#allocation20_spill] sm:$0xff] }
 0x1f6   : > { %v9881_v10 = vpop.f32.mrf.mxu0  ;;  %v2282_v43 = vadd.f32 %v15112_v48, %v2070_v57  ;;  %v2472_v51 = vadd.f32 %v12059_v54, %v2266_v28  ;;  %v2286_v13 = vadd.f32 %v15113_v34, %v2074_v19  ;;  %v2290_v60 = vadd.f32 %v15114_v63, %v2078_v55  ;;  %v15117_v57 = vld [vmem:[#allocation25_spill] sm:$0xff]  ;;  %v12252_v19 = vld [vmem:[%s14880_s3 + $0xf8] sm:$0xff]   ;;  %v15121_v55 = vld [vmem:[#allocation47_spill] sm:$0xff] }
 0x1f7   : > { %v12195_v12 = vadd.f32 %v9881_v10, %v12010_v3  ;;  %v12207_v3 = vpop.f32.mrf.mxu1  ;;  %v2476_v24 = vadd.f32 %v12078_v46, %v2270_v4  ;;  %v2697_v16 = vadd.f32 %v15115_v39, %v2469_v15  ;;  %v2695_v50 = vadd.f32 %v12007_v14, %v2467_v6  ;;  %v15116_v46 = vld [vmem:[#allocation42_spill] sm:$0xff]  ;;  %v15119_v14 = vld [vmem:[#allocation32_spill] sm:$0xff]  ;;  %v15123_v4 = vld [vmem:[#allocation43_spill] sm:$0xff]  ;;  %10095 = vmatprep.subr.bf16.mxu0 %v12252_v19 }
 0x1f8   : > { %v2452_v0 = vpop.f32.mrf.mxu0  ;;  %v2698_v23 = vadd.f32 %v12012_v11, %v2470_v38  ;;  %v2480_v35 = vadd.f32 %v12097_v37, %v2274_v44  ;;  %v2696_v54 = vadd.f32 %v12019_v26, %v2468_v5  ;;  %v2701_v2 = vadd.f32 %v12025_v1, %v2473_v18  ;;  %v15120_v37 = vld [vmem:[#allocation37_spill] sm:$0xff]  ;;  %v15126_v5 = vld [vmem:[#allocation46_spill] sm:$0xff]  ;;  %v15133_v39 = vld [vmem:[#allocation51_spill] sm:$0xff] }
 0x1f9   : > { %v12205_v8 = vadd.f32 %v2452_v0, %v12015_v58  ;;  %v12226_v33 = vadd.f32 %v12033_v61, %v2471_v45  ;;  %v2680_v10 = vpop.f32.mrf.mxu1  ;;  %v12233_v28 = vadd.f32 %v15118_v9, %v2472_v51  ;;  %v12237_v11 = vadd.f32 %v15119_v14, %v12066_v27  ;;  %v15122_v27 = vld [vmem:[#allocation40_spill] sm:$0xff]  ;;  %v15125_v38 = vld [vmem:[#allocation45_spill] sm:$0xff] }
 0x1fa   : > { %v9882_v59 = vpop.f32.mrf.mxu0  ;;  %v12241_v26 = vadd.f32 %v15120_v37, %v12071_v49  ;;  %v2484_v1 = vadd.f32 %v12116_v52, %v2278_v25  ;;  %v12256_v36 = vadd.f32 %v15122_v27, %v15121_v55  ;;  %v12259_v49 = vadd.f32 %v15123_v4, %v2476_v24  ;;  %v15124_v52 = vld [vmem:[#allocation44_spill] sm:$0xff]  ;;  %v15129_v25 = vld [vmem:[#allocation49_spill] sm:$0xff]  ;;  %v15132_v24 = vld [vmem:[#allocation58_spill] sm:$0xff] }
 0x1fb   : > { %v12217_v58 = vadd.f32 %v9882_v59, %v12021_v53  ;;  %v12230_v53 = vadd.f32 %v15117_v57, %v15116_v46  ;;  %v12263_v15 = vadd.f32 %v15124_v52, %v12085_v30  ;;  %v12267_v0 = vadd.f32 %v15125_v38, %v12090_v40  ;;  %v15127_v45 = vld [vmem:[#allocation48_spill] sm:$0xff]  ;;  %v15128_v30 = vld [vmem:[#allocation54_spill] sm:$0xff]  ;;  %v9916_v34 = vpop.f32.mrf.mxu1  ;;  %v15136_v46 = vld [vmem:[#allocation53_spill] sm:$0xff] }
 0x1fc   : > { %v2455_v62 = vpop.f32.mrf.mxu0  ;;  %v12271_v18 = vadd.f32 %v15126_v5, %v12095_v41  ;;  %v12274_v20 = vadd.f32 %v15127_v45, %v2480_v35  ;;  %v2488_v44 = vadd.f32 %v12131_v56, %v2282_v43  ;;  %v12280_v48 = vadd.f32 %v15129_v25, %v15128_v30  ;;  %v15130_v51 = vld [vmem:[#allocation56_spill] sm:$0xff]  ;;  %v15131_v59 = vld [vmem:[#allocation50_spill] sm:$0xff]  ;;  %v15137_v37 = vld [vmem:[#allocation61_spill] sm:$0xff] }
 0x1fd   : > { %v12284_v40 = vadd.f32 %v15131_v59, %v15130_v51  ;;  %v15134_v56 = vld [vmem:[#allocation52_spill] sm:$0xff]  ;;  %v2492_v9 = vadd.f32 %v12175_v47, %v2286_v13  ;;  %v15140_v52 = vld [vmem:[#allocation57_spill] sm:$0xff]  ;;  %v15141_v38 = vld [vmem:[#allocation59_spill] sm:$0xff]  ;;  %v2496_v45 = vadd.f32 %v2455_v62, %v2290_v60  ;;  %v2683_v30 = vpop.f32.mrf.mxu1  ;;  %v12332_v62 = vadd.f32 %v2680_v10, %v12205_v8 }
 0x1fe   : > { %v9921_v61 = vpop.f32.mrf.mxu0  ;;  %v12292_v43 = vadd.f32 %v15134_v56, %v2484_v1  ;;  %v15135_v35 = vld [vmem:[#allocation60_spill] sm:$0xff]  ;;  %v15139_v1 = vld [vmem:[#allocation63_spill] sm:$0xff]  ;;  %v12309_v5 = vadd.f32 %v15141_v38, %v2488_v44  ;;  %v15142_v47 = vld [vmem:[#allocation62_spill] sm:$0xff]  ;;  %v12322_v44 = vadd.f32 %v12158_v17, %v12168_v31 }
 0x1ff   : > { %v2909_v6 = vadd.f32 %v9921_v61, %v2697_v16  ;;  %v12289_v16 = vadd.f32 %v15133_v39, %v15132_v24  ;;  %v12296_v57 = vadd.f32 %v15136_v46, %v15135_v35  ;;  %v15138_v61 = vld [vmem:[#allocation55_spill] sm:$0xff]  ;;  %v12313_v13 = vadd.f32 %v15142_v47, %v12148_v22  ;;  %v3496_v10 = vld [vmem:[#allocation2 + $0x18] sm:$0xf] }
 0x200   : > { %v2780_v29 = vpop.f32.mrf.mxu0  ;;  %v12301_v55 = vadd.f32 %v15138_v61, %v15137_v37  ;;  %v12329_v22 = vadd.f32 %v12207_v3, %v12195_v12 }
 0x201   : > { %v2948_v41 = vadd.f32 %v12247_v42, %v2909_v6  ;;  %v2907_v63 = vadd.f32 %v2780_v29, %v2695_v50  ;;  %v12306_v6 = vadd.f32 %v15140_v52, %v15139_v1 }
 0x202   : > { %v9922_v14 = vpop.f32.mrf.mxu0 }
 0x203   : > { %v2980_v50 = vmax.f32 %v2948_v41, 0.0  ;;  %v2946_v27 = vadd.f32 %v12247_v42, %v2907_v63  ;;  %v2910_v4 = vadd.f32 %v9922_v14, %v2698_v23  ;;  %v12318_v41 = vadd.f32 %v12137_v7, %v12156_v21 }
 0x204   : > { %v2783_v29 = vpop.f32.mrf.mxu0  ;;  %v12325_v63 = vadd.f32 %v12184_v32, %v2492_v9  ;;  %v12335_v7 = vadd.f32 %v9916_v34, %v12217_v58  ;;  %v12337_v21 = vadd.f32 %v2683_v30, %v2496_v45 }
 0x205   : > { %v9245_v25 = vpack.c.bf16 %v2980_v50, %v2980_v50  ;;  %v2978_v51 = vmax.f32 %v2946_v27, 0.0  ;;  %v2949_v59 = vadd.f32 %v12247_v42, %v2910_v4  ;;  %v2908_v23 = vadd.f32 %v2783_v29, %v2696_v54  ;;  %v3487_v27 = vld [vmem:[#allocation2 + $0xc] sm:$0xf] }
 0x206   : > { %v9925_v60 = vpop.f32.mrf.mxu0 }
 0x207   : > { %v3181_v54 = vshrl.u32 %v9245_v25, 16  ;;  %v9243_v24 = vpack.c.bf16 %v2978_v51, %v2978_v51  ;;  %v2981_v39 = vmax.f32 %v2949_v59, 0.0  ;;  %v2947_v17 = vadd.f32 %v12247_v42, %v2908_v23  ;;  %v3500_v59 = vld [vmem:[#allocation2 + $0x20] sm:$0x1] }
 0x208   : > { %v2913_v31 = vadd.f32 %v9925_v60, %v2701_v2  ;;  %v2796_v32 = vpop.f32.mrf.mxu0  ;;  %v3184_v35 = vshll.u32 %v9245_v25, 16 }
 0x209   : > { %v3183_v56 = vrot.slane %v3181_v54, 7  ;;  %v3164_v12 = vshrl.u32 %v9243_v24, 16  ;;  %v9246_v3 = vpack.c.bf16 %v2981_v39, %v2981_v39  ;;  %v3167_v46 = vshll.u32 %v9243_v24, 16 }
 0x20a   : > { %v2979_v58 = vmax.f32 %v2947_v17, 0.0  ;;  %v2952_v34 = vadd.f32 %v12247_v42, %v2913_v31  ;;  %v2911_v9 = vadd.f32 %v2796_v32, %v12226_v33  ;;  %v9926_v14 = vpop.f32.mrf.mxu0 }
 0x20b   : > { %v3186_v2 = vor.u32 %v3184_v35, %v3183_v56  ;;  %v3187_v37 = vrot.slane %v3183_v56, 4  ;;  %v3166_v61 = vrot.slane %v3164_v12, 7  ;;  %v3189_v50 = vshrl.u32 %v9246_v3, 16 }
 0x20c   : > { %v3192_v4 = vshll.u32 %v9246_v3, 16  ;;  %v9244_v1 = vpack.c.bf16 %v2979_v58, %v2979_v58  ;;  %v2984_v52 = vmax.f32 %v2952_v34, 0.0  ;;  %v2950_v38 = vadd.f32 %v12247_v42, %v2911_v9  ;;  %v2799_v47 = vpop.f32.mrf.mxu0  ;;  %v3493_v9 = vld [vmem:[#allocation2 + $0x14] sm:$0x1] }
 0x20d   : > { %v3497_v45 = vsel %vm12342_vm12, %v3186_v2, %v3496_v10  ;;  %v3169_v29 = vor.u32 %v3167_v46, %v3166_v61  ;;  %v3170_v30 = vrot.slane %v3166_v61, 4  ;;  %v3191_v25 = vrot.slane %v3189_v50, 7 }
 0x20e   : > { %3498 = vst [vmem:[#allocation2 + $0x18] sm:$0xf] %v3497_v45  ;;  %v3172_v23 = vshrl.u32 %v9244_v1, 16  ;;  %v3175_v60 = vshll.u32 %v9244_v1, 16  ;;  %v9249_v54 = vpack.c.bf16 %v2984_v52, %v2984_v52  ;;  %v2982_v24 = vmax.f32 %v2950_v38, 0.0  ;;  %v9929_v39 = vpop.f32.mrf.mxu0 }
 0x20f   : > { %v3488_v17 = vsel %vm12342_vm12, %v3169_v29, %v3487_v27  ;;  %v3194_v31 = vor.u32 %v3192_v4, %v3191_v25  ;;  %v3196_v32 = vrot.slane %v3191_v25, 4  ;;  %v2914_v56 = vadd.f32 %v9926_v14, %v12230_v53  ;;  %v3510_v1 = vld [vmem:[#allocation2 + $0x30] sm:$0xf] }
 0x210   : > { %3489 = vst [vmem:[#allocation2 + $0xc] sm:$0xf] %v3488_v17  ;;  %v3174_v35 = vrot.slane %v3172_v23, 7  ;;  %v3215_v12 = vshrl.u32 %v9249_v54, 16  ;;  %v3218_v3 = vshll.u32 %v9249_v54, 16  ;;  %v9247_v10 = vpack.c.bf16 %v2982_v24, %v2982_v24  ;;  %v2812_v46 = vpop.f32.mrf.mxu0 }
 0x211   : > { %v3195_v58 = vsel %vm12353_vm13, %v3187_v37, %v3194_v31  ;;  %v3501_v34 = vsel %vm12359_vm14, %v3196_v32, %v3500_v59  ;;  %v2953_v2 = vadd.f32 %v12247_v42, %v2914_v56  ;;  %v2912_v61 = vadd.f32 %v2799_v47, %v12233_v28 }
 0x212   : > { %3499 = vst [vmem:[#allocation2 + $0x1c] sm:$0xf] %v3195_v58  ;;  %3502 = vst [vmem:[#allocation2 + $0x20] sm:$0x1] %v3501_v34  ;;  %v3177_v53 = vor.u32 %v3175_v60, %v3174_v35  ;;  %v3179_v14 = vrot.slane %v3174_v35, 4  ;;  %v3217_v50 = vrot.slane %v3215_v12, 7  ;;  %v9930_v4 = vpop.f32.mrf.mxu0  ;;  %v2917_v45 = vadd.f32 %v9929_v39, %v12237_v11 }
 0x213   : > { %v3198_v27 = vshrl.u32 %v9247_v10, 16  ;;  %v3201_v52 = vshll.u32 %v9247_v10, 16  ;;  %v2985_v38 = vmax.f32 %v2953_v2, 0.0  ;;  %v2951_v37 = vadd.f32 %v12247_v42, %v2912_v61  ;;  %v3503_v11 = vld [vmem:[#allocation2 + $0x24] sm:$0xf] }
 0x214   : > { %v3178_v29 = vsel %vm12353_vm13, %v3170_v30, %v3177_v53  ;;  %v3494_v28 = vsel %vm12359_vm14, %v3179_v14, %v3493_v9  ;;  %v3220_v47 = vor.u32 %v3218_v3, %v3217_v50  ;;  %v3221_v25 = vrot.slane %v3217_v50, 4  ;;  %v2815_v59 = vpop.f32.mrf.mxu0  ;;  %v3514_v61 = vld [vmem:[#allocation2 + $0x38] sm:$0x1] }
 0x215   : > { %3490 = vst [vmem:[#allocation2 + $0x10] sm:$0xf] %v3178_v29  ;;  %3495 = vst [vmem:[#allocation2 + $0x14] sm:$0x1] %v3494_v28  ;;  %v3200_v23 = vrot.slane %v3198_v27, 7  ;;  %v9250_v60 = vpack.c.bf16 %v2985_v38, %v2985_v38  ;;  %v2983_v54 = vmax.f32 %v2951_v37, 0.0  ;;  %v2956_v24 = vadd.f32 %v12247_v42, %v2917_v45 }
 0x216   : > { %v3511_v17 = vsel %vm12342_vm12, %v3220_v47, %v3510_v1  ;;  %v2915_v39 = vadd.f32 %v2812_v46, %v12241_v26  ;;  %v2918_v30 = vadd.f32 %v9930_v4, %v12256_v36  ;;  %v2916_v31 = vadd.f32 %v2815_v59, %v12259_v49  ;;  %v9933_v32 = vpop.f32.mrf.mxu0 }
 0x217   : > { %3512 = vst [vmem:[#allocation2 + $0x30] sm:$0xf] %v3511_v17  ;;  %v3203_v56 = vor.u32 %v3201_v52, %v3200_v23  ;;  %v3204_v35 = vrot.slane %v3200_v23, 4  ;;  %v3223_v12 = vshrl.u32 %v9250_v60, 16  ;;  %v3226_v3 = vshll.u32 %v9250_v60, 16 }
 0x218   : > { %v9248_v10 = vpack.c.bf16 %v2983_v54, %v2983_v54  ;;  %v2988_v58 = vmax.f32 %v2956_v24, 0.0  ;;  %v2954_v34 = vadd.f32 %v12247_v42, %v2915_v39  ;;  %v2957_v9 = vadd.f32 %v12247_v42, %v2918_v30  ;;  %v2828_v2 = vpop.f32.mrf.mxu0  ;;  %v3507_v23 = vld [vmem:[#allocation2 + $0x2c] sm:$0x1]  ;;  %v3524_v39 = vld [vmem:[#allocation2 + $0x48] sm:$0xf] }
 0x219   : > { %v3504_v26 = vsel %vm12342_vm12, %v3203_v56, %v3503_v11  ;;  %v3225_v46 = vrot.slane %v3223_v12, 7  ;;  %v2955_v36 = vadd.f32 %v12247_v42, %v2916_v31  ;;  %v2921_v49 = vadd.f32 %v9933_v32, %v12263_v15 }
 0x21a   : > { %3505 = vst [vmem:[#allocation2 + $0x24] sm:$0xf] %v3504_v26  ;;  %v3206_v53 = vshrl.u32 %v9248_v10, 16  ;;  %v3209_v14 = vshll.u32 %v9248_v10, 16  ;;  %v9253_v50 = vpack.c.bf16 %v2988_v58, %v2988_v58  ;;  %v2986_v27 = vmax.f32 %v2954_v34, 0.0  ;;  %v9934_v4 = vpop.f32.mrf.mxu0 }
 0x21b   : > { %v3228_v1 = vor.u32 %v3226_v3, %v3225_v46  ;;  %v3230_v52 = vrot.slane %v3225_v46, 4  ;;  %v2989_v38 = vmax.f32 %v2957_v9, 0.0  ;;  %v2987_v37 = vmax.f32 %v2955_v36, 0.0  ;;  %v3517_v26 = vld [vmem:[#allocation2 + $0x3c] sm:$0xf] }
 0x21c   : > { %v3208_v45 = vrot.slane %v3206_v53, 7  ;;  %v3249_v29 = vshrl.u32 %v9253_v50, 16  ;;  %v3252_v28 = vshll.u32 %v9253_v50, 16  ;;  %v9251_v47 = vpack.c.bf16 %v2986_v27, %v2986_v27  ;;  %v2831_v31 = vpop.f32.mrf.mxu0  ;;  %v3521_v50 = vld [vmem:[#allocation2 + $0x44] sm:$0x1] }
 0x21d   : > { %v3229_v59 = vsel %vm12353_vm13, %v3221_v25, %v3228_v1  ;;  %v3515_v15 = vsel %vm12359_vm14, %v3230_v52, %v3514_v61  ;;  %v9254_v60 = vpack.c.bf16 %v2989_v38, %v2989_v38  ;;  %v9252_v54 = vpack.c.bf16 %v2987_v37, %v2987_v37 }
 0x21e   : > { %3513 = vst [vmem:[#allocation2 + $0x34] sm:$0xf] %v3229_v59  ;;  %3516 = vst [vmem:[#allocation2 + $0x38] sm:$0x1] %v3515_v15  ;;  %v3211_v24 = vor.u32 %v3209_v14, %v3208_v45  ;;  %v3213_v17 = vrot.slane %v3208_v45, 4  ;;  %v3251_v11 = vrot.slane %v3249_v29, 7  ;;  %v2960_v27 = vadd.f32 %v12247_v42, %v2921_v49  ;;  %v9937_v52 = vpop.f32.mrf.mxu0 }
 0x21f   : > { %v3232_v30 = vshrl.u32 %v9251_v47, 16  ;;  %v3235_v32 = vshll.u32 %v9251_v47, 16  ;;  %v3257_v56 = vshrl.u32 %v9254_v60, 16  ;;  %v3260_v12 = vshll.u32 %v9254_v60, 16  ;;  %v3528_v14 = vld [vmem:[#allocation2 + $0x50] sm:$0x1] }
 0x220   : > { %v3240_v3 = vshrl.u32 %v9252_v54, 16  ;;  %v3212_v25 = vsel %vm12353_vm13, %v3204_v35, %v3211_v24  ;;  %v3508_v10 = vsel %vm12359_vm14, %v3213_v17, %v3507_v23  ;;  %v3254_v58 = vor.u32 %v3252_v28, %v3251_v11  ;;  %v3603_v23 = vld [vmem:[#allocation2 + $0xc] sm:$0xf]  ;;  %v12415_v17 = vpop.f32.mrf.mxu0 }
 0x221   : > { %v3255_v34 = vrot.slane %v3251_v11, 4  ;;  %3506 = vst [vmem:[#allocation2 + $0x28] sm:$0xf] %v3212_v25  ;;  %3509 = vst [vmem:[#allocation2 + $0x2c] sm:$0x1] %v3508_v10  ;;  %v3234_v9 = vrot.slane %v3232_v30, 7  ;;  %v2919_v35 = vadd.f32 %v2828_v2, %v12267_v0  ;;  %v2922_v1 = vadd.f32 %v9934_v4, %v12271_v18 }
 0x222   : > { %v3259_v46 = vrot.slane %v3257_v56, 7  ;;  %v3242_v36 = vrot.slane %v3240_v3, 7  ;;  %v3243_v61 = vshll.u32 %v9252_v54, 16  ;;  %v3525_v53 = vsel %vm12342_vm12, %v3254_v58, %v3524_v39  ;;  %v3538_v10 = vld [vmem:[#allocation2 + $0x60] sm:$0xf] }
 0x223   : > { %3526 = vst [vmem:[#allocation2 + $0x48] sm:$0xf] %v3525_v53  ;;  %v3237_v38 = vor.u32 %v3235_v32, %v3234_v9  ;;  %v3238_v37 = vrot.slane %v3234_v9, 4  ;;  %v2992_v59 = vmax.f32 %v2960_v27, 0.0  ;;  %v2958_v15 = vadd.f32 %v12247_v42, %v2919_v35  ;;  %v9938_v53 = vpop.f32.mrf.mxu0 }
 0x224   : > { %v3262_v45 = vor.u32 %v3260_v12, %v3259_v46  ;;  %v3264_v29 = vrot.slane %v3259_v46, 4  ;;  %v3245_v28 = vor.u32 %v3243_v61, %v3242_v36  ;;  %v3247_v47 = vrot.slane %v3242_v36, 4 }
 0x225   : > { %v3518_v60 = vsel %vm12342_vm12, %v3237_v38, %v3517_v26  ;;  %v2961_v2 = vadd.f32 %v12247_v42, %v2922_v1  ;;  %v9257_v54 = vpack.c.bf16 %v2992_v59, %v2992_v59  ;;  %v2990_v24 = vmax.f32 %v2958_v15, 0.0  ;;  %v12421_v26 = vld [vmem:[#allocation2 + $0x10] sm:$0xf] }
 0x226   : > { %v3263_v0 = vsel %vm12353_vm13, %v3255_v34, %v3262_v45  ;;  %v3529_v18 = vsel %vm12359_vm14, %v3264_v29, %v3528_v14  ;;  %3519 = vst [vmem:[#allocation2 + $0x3c] sm:$0xf] %v3518_v60  ;;  %v3246_v49 = vsel %vm12353_vm13, %v3238_v37, %v3245_v28  ;;  %v3522_v4 = vsel %vm12359_vm14, %v3247_v47, %v3521_v50  ;;  %v3531_v45 = vld [vmem:[#allocation2 + $0x54] sm:$0xf] }
 0x227   : > { %3527 = vst [vmem:[#allocation2 + $0x4c] sm:$0xf] %v3263_v0  ;;  %3530 = vst [vmem:[#allocation2 + $0x50] sm:$0x1] %v3529_v18  ;;  %v2993_v11 = vmax.f32 %v2961_v2, 0.0  ;;  %v2920_v39 = vadd.f32 %v2831_v31, %v12274_v20  ;;  %v2925_v30 = vadd.f32 %v9937_v52, %v12280_v48  ;;  %v3690_v32 = vshrl.u32 %v3603_v23, 16 }
 0x228   : > { %3520 = vst [vmem:[#allocation2 + $0x40] sm:$0xf] %v3246_v49  ;;  %3523 = vst [vmem:[#allocation2 + $0x44] sm:$0x1] %v3522_v4  ;;  %v3283_v56 = vshrl.u32 %v9257_v54, 16  ;;  %v3286_v12 = vshll.u32 %v9257_v54, 16  ;;  %v9255_v3 = vpack.c.bf16 %v2990_v24, %v2990_v24  ;;  %v8886_v59 = vcombine.low %v3603_v23, %v12421_v26  ;;  %v2847_v4 = vpop.f32.mrf.mxu0 }
 0x229   : > { %v3693_v25 = vshll.u32 %v3603_v23, 16  ;;  %v9258_v58 = vpack.c.bf16 %v2993_v11, %v2993_v11  ;;  %v2959_v34 = vadd.f32 %v12247_v42, %v2920_v39  ;;  %v2964_v9 = vadd.f32 %v12247_v42, %v2925_v30  ;;  %v3605_v48 = vld [vmem:[#allocation2 + $0x18] sm:$0xf]  ;;  %v10485_v15 = vld [vmem:[%s14880_s3 + $0xf0] sm:$0xff]   ;;  %v3542_v2 = vld [vmem:[#allocation2 + $0x68] sm:$0x1] }
 0x22a   : > { %v12423_v46 = vrot.slane %v3690_v32, 4  ;;  %v3285_v36 = vrot.slane %v3283_v56, 7  ;;  %v3266_v61 = vshrl.u32 %v9255_v3, 16  ;;  %v3269_v20 = vshll.u32 %v9255_v3, 16  ;;  %10016 = vmatmul.mubr.bf16.vlgmr.msra.gmra.mxu0 %v8886_v59  ;;  %v12434_v30 = vld [vmem:[#allocation2 + $0x1c] sm:$0xf] }
 0x22b   : > { %v12425_v31 = vrot.slane %v3693_v25, 5  ;;  %v3291_v14 = vshrl.u32 %v9258_v58, 16  ;;  %v3294_v50 = vshll.u32 %v9258_v58, 16  ;;  %v2991_v27 = vmax.f32 %v2959_v34, 0.0  ;;  %10096 = vmatpush3.bf16.msra.mxu0 %v12252_v19  ;;  %v10488_v3 = vld [vmem:[%s14880_s3 + $0xe8] sm:$0xff]  }
 0x22c   : > { %v2996_v35 = vmax.f32 %v2964_v9, 0.0  ;;  %v3288_v1 = vor.u32 %v3286_v12, %v3285_v36  ;;  %v3289_v52 = vrot.slane %v3285_v36, 4  ;;  %v3268_v38 = vrot.slane %v3266_v61, 7  ;;  %10097 = vmatprep.subr.bf16.mxu0 %v10485_v15  ;;  %v3535_v9 = vld [vmem:[#allocation2 + $0x5c] sm:$0x1] }
 0x22d   : > { %v3703_v37 = vshrl.u32 %v12421_v26, 16  ;;  %v3293_v29 = vrot.slane %v3291_v14, 7  ;;  %v9256_v28 = vpack.c.bf16 %v2991_v27, %v2991_v27  ;;  %v3714_v49 = vshrl.u32 %v3605_v48, 16  ;;  %v3552_v19 = vld [vmem:[#allocation2 + $0x78] sm:$0xf] }
 0x22e   : > { %v9261_v47 = vpack.c.bf16 %v2996_v35, %v2996_v35  ;;  %v3539_v60 = vsel %vm12342_vm12, %v3288_v1, %v3538_v10  ;;  %v3271_v0 = vor.u32 %v3269_v20, %v3268_v38  ;;  %v3272_v18 = vrot.slane %v3268_v38, 4  ;;  %v3607_v38 = vld [vmem:[#allocation2 + $0x24] sm:$0xf] }
 0x22f   : > { %3540 = vst [vmem:[#allocation2 + $0x60] sm:$0xf] %v3539_v60  ;;  %v3296_v54 = vor.u32 %v3294_v50, %v3293_v29  ;;  %v3298_v24 = vrot.slane %v3293_v29, 4  ;;  %v3274_v11 = vshrl.u32 %v9256_v28, 16  ;;  %v3277_v39 = vshll.u32 %v9256_v28, 16  ;;  %v9941_v50 = vpop.f32.mrf.mxu0  ;;  %10098 = vmatpush3.bf16.msra.mxu0 %v10485_v15 }
 0x230   : > { %v3532_v23 = vsel %vm12342_vm12, %v3271_v0, %v3531_v45  ;;  %v3317_v32 = vshrl.u32 %v9261_v47, 16  ;;  %v3320_v56 = vshll.u32 %v9261_v47, 16  ;;  %v12438_v12 = vrot.slane %v3714_v49, 4  ;;  %v12461_v47 = vld [vmem:[#allocation2 + $0x28] sm:$0xf]  ;;  %10099 = vmatprep.subr.bf16.mxu0 %v10488_v3 }
 0x231   : > { %3533 = vst [vmem:[#allocation2 + $0x54] sm:$0xf] %v3532_v23  ;;  %v3297_v25 = vsel %vm12353_vm13, %v3289_v52, %v3296_v54  ;;  %v3543_v10 = vsel %vm12359_vm14, %v3298_v24, %v3542_v2  ;;  %v3276_v58 = vrot.slane %v3274_v11, 7  ;;  %v3717_v34 = vshll.u32 %v3605_v48, 16 }
 0x232   : > { %3541 = vst [vmem:[#allocation2 + $0x64] sm:$0xf] %v3297_v25  ;;  %3544 = vst [vmem:[#allocation2 + $0x68] sm:$0x1] %v3543_v10  ;;  %v12448_v36 = vrot.slane %v3317_v32, 7  ;;  %v3727_v61 = vshrl.u32 %v12434_v30, 16  ;;  %v8887_v20 = vcombine.low %v3605_v48, %v12434_v30  ;;  %v2923_v14 = vadd.f32 %v12415_v17, %v12284_v40 }
 0x233   : > { %v3279_v27 = vor.u32 %v3277_v39, %v3276_v58  ;;  %v3281_v35 = vrot.slane %v3276_v58, 4  ;;  %v12454_v1 = vrot.slane %v3717_v34, 5  ;;  %v2926_v52 = vadd.f32 %v9938_v53, %v12289_v16  ;;  %v10490_v40 = vld [vmem:[%s14880_s3 + $0xe0] sm:$0xff]   ;;  %v12480_v39 = vpop.f32.mrf.mxu0  ;;  %10100 = vmatpush3.bf16.msra.mxu0 %v10488_v3  ;;  %v10493_v10 = vld [vmem:[%s14880_s3 + $0xd8] sm:$0xff]  }
 0x234   : > { %v3322_v45 = vor.u32 %v3320_v56, %v12448_v36  ;;  %v3323_v29 = vrot.slane %v12448_v36, 4  ;;  %10019 = vmatprep.mubr.bf16.mxu0 %v8887_v20  ;;  %v2962_v28 = vadd.f32 %v12247_v42, %v2923_v14  ;;  %v2924_v48 = vadd.f32 %v2847_v4, %v12292_v43  ;;  %10101 = vmatprep.subr.bf16.mxu0 %v10490_v40  ;;  %v3545_v20 = vld [vmem:[#allocation2 + $0x6c] sm:$0xf] }
 0x235   : > { %v3280_v16 = vsel %vm12353_vm13, %v3272_v18, %v3279_v27  ;;  %v3536_v17 = vsel %vm12359_vm14, %v3281_v35, %v3535_v9  ;;  %v2965_v53 = vadd.f32 %v12247_v42, %v2926_v52  ;;  %v2929_v59 = vadd.f32 %v9941_v50, %v12296_v57  ;;  %v3556_v52 = vld [vmem:[#allocation2 + $0x80] sm:$0x1] }
 0x236   : > { %3534 = vst [vmem:[#allocation2 + $0x58] sm:$0xf] %v3280_v16  ;;  %3537 = vst [vmem:[#allocation2 + $0x5c] sm:$0x1] %v3536_v17  ;;  %v3553_v43 = vsel %vm12342_vm12, %v3322_v45, %v3552_v19  ;;  %v2994_v15 = vmax.f32 %v2962_v28, 0.0  ;;  %v2963_v60 = vadd.f32 %v12247_v42, %v2924_v48  ;;  %v3738_v0 = vshrl.u32 %v3607_v38, 16  ;;  %v12490_v45 = vpop.f32.mrf.mxu0 }
 0x237   : > { %3554 = vst [vmem:[#allocation2 + $0x78] sm:$0xf] %v3553_v43  ;;  %v2997_v2 = vmax.f32 %v2965_v53, 0.0  ;;  %v2968_v18 = vadd.f32 %v12247_v42, %v2929_v59  ;;  %v3741_v49 = vshll.u32 %v3607_v38, 16  ;;  %v3751_v4 = vshrl.u32 %v12461_v47, 16  ;;  %10102 = vmatpush3.bf16.msra.mxu0 %v10490_v40  ;;  %v10495_v28 = vld [vmem:[%s14880_s3 + $0xd0] sm:$0xff]  }
 0x238   : > { %v9259_v54 = vpack.c.bf16 %v2994_v15, %v2994_v15  ;;  %v2995_v24 = vmax.f32 %v2963_v60, 0.0  ;;  %v12477_v57 = vrot.slane %v3738_v0, 4  ;;  %v8888_v11 = vcombine.low %v3607_v38, %v12461_v47  ;;  %v3650_v53 = vld [vmem:[#allocation2 + $0x14] sm:$0x1]  ;;  %10103 = vmatprep.subr.bf16.mxu0 %v10493_v10 }
 0x239   : > { %v9262_v23 = vpack.c.bf16 %v2997_v2, %v2997_v2  ;;  %v3000_v32 = vmax.f32 %v2968_v18, 0.0  ;;  %v12482_v56 = vrot.slane %v3741_v49, 5  ;;  %v3696_v25 = vor.u32 %v12425_v31, %v12423_v46  ;;  %v3549_v0 = vld [vmem:[#allocation2 + $0x74] sm:$0x1]  ;;  %v3566_v2 = vld [vmem:[#allocation2 + $0x90] sm:$0xf] }
 0x23a   : > { %v3300_v58 = vshrl.u32 %v9259_v54, 16  ;;  %v3303_v34 = vshll.u32 %v9259_v54, 16  ;;  %v9260_v9 = vpack.c.bf16 %v2995_v24, %v2995_v24  ;;  %10020 = vmatmul.mubr.bf16.gmra.mxu0 %v8888_v11  ;;  %v3699_v19 = vshll.u32 %v12421_v26, 16 }
 0x23b   : > { %v3325_v3 = vshrl.u32 %v9262_v23, 16  ;;  %v3328_v14 = vshll.u32 %v9262_v23, 16  ;;  %v9265_v50 = vpack.c.bf16 %v3000_v32, %v3000_v32  ;;  %v3697_v27 = vrot.slane %v3696_v25, 4  ;;  %v3609_v23 = vld [vmem:[#allocation2 + $0x30] sm:$0xf]  ;;  %10104 = vmatpush3.bf16.msra.mxu0 %v10493_v10 }
 0x23c   : > { %v3302_v35 = vrot.slane %v3300_v58, 7  ;;  %v3308_v38 = vshrl.u32 %v9260_v9, 16  ;;  %v3311_v46 = vshll.u32 %v9260_v9, 16  ;;  %v3701_v31 = vrot.slane %v3699_v19, 5  ;;  %v12503_v58 = vld [vmem:[#allocation2 + $0x34] sm:$0xf]  ;;  %10105 = vmatprep.subr.bf16.mxu0 %v10495_v28 }
 0x23d   : > { %v3327_v48 = vrot.slane %v3325_v3, 7  ;;  %v3351_v16 = vshrl.u32 %v9265_v50, 16  ;;  %v3354_v17 = vshll.u32 %v9265_v50, 16  ;;  %v3705_v59 = vrot.slane %v3703_v37, 4 }
 0x23e   : > { %v3305_v43 = vor.u32 %v3303_v34, %v3302_v35  ;;  %v3306_v15 = vrot.slane %v3302_v35, 4  ;;  %v3310_v60 = vrot.slane %v3308_v38, 7  ;;  %v3702_v40 = vsel %vm10803_vm4, %v3697_v27, %v3701_v31  ;;  %v2863_v34 = vpop.f32.mrf.mxu0  ;;  %v3651_v27 = vld [vmem:[#allocation2 + $0x20] sm:$0x1] }
 0x23f   : > { %v3330_v49 = vor.u32 %v3328_v14, %v3327_v48  ;;  %v3332_v54 = vrot.slane %v3327_v48, 4  ;;  %v12499_v24 = vrot.slane %v3351_v16, 7  ;;  %v3706_v11 = vor.u32 %v3705_v59, %v3701_v31  ;;  %v10498_v14 = vld [vmem:[%s14880_s3 + $0xc8] sm:$0xff]   ;;  %v3611_v59 = vld [vmem:[#allocation2 + $0x3c] sm:$0xf]  ;;  %10106 = vmatpush3.bf16.msra.mxu0 %v10495_v28  ;;  %v10500_v28 = vld [vmem:[%s14880_s3 + $0xc0] sm:$0xff]  }
 0x240   : > { %v3546_v32 = vsel %vm12342_vm12, %v3305_v43, %v3545_v20  ;;  %v3313_v26 = vor.u32 %v3311_v46, %v3310_v60  ;;  %v3315_v37 = vrot.slane %v3310_v60, 4  ;;  %v3709_v25 = vshll.u32 %v3650_v53, 16  ;;  %v9945_v53 = vpop.f32.mrf.mxu0  ;;  %10107 = vmatprep.subr.bf16.mxu0 %v10498_v14 }
 0x241   : > { %3547 = vst [vmem:[#allocation2 + $0x6c] sm:$0xf] %v3546_v32  ;;  %v3331_v9 = vsel %vm12353_vm13, %v3323_v29, %v3330_v49  ;;  %v3557_v19 = vsel %vm12359_vm14, %v3332_v54, %v3556_v52  ;;  %v3356_v3 = vor.u32 %v3354_v17, %v12499_v24  ;;  %v3357_v20 = vrot.slane %v12499_v24, 4  ;;  %v12551_v32 = vld [vmem:[#allocation2 + $0x40] sm:$0xf] }
 0x242   : > { %3555 = vst [vmem:[#allocation2 + $0x7c] sm:$0xf] %v3331_v9  ;;  %3558 = vst [vmem:[#allocation2 + $0x80] sm:$0x1] %v3557_v19  ;;  %v3314_v36 = vsel %vm12353_vm13, %v3306_v15, %v3313_v26  ;;  %v3550_v29 = vsel %vm12359_vm14, %v3315_v37, %v3549_v0  ;;  %v3707_v10 = vrot.slane %v3706_v11, 4  ;;  %v3711_v50 = vrot.slane %v3709_v25, 5 }
 0x243   : > { %3548 = vst [vmem:[#allocation2 + $0x70] sm:$0xf] %v3314_v36  ;;  %3551 = vst [vmem:[#allocation2 + $0x74] sm:$0x1] %v3550_v29  ;;  %v3567_v35 = vsel %vm12342_vm12, %v3356_v3, %v3566_v2  ;;  %v3762_v52 = vshrl.u32 %v3609_v23, 16  ;;  %v3765_v38 = vshll.u32 %v3609_v23, 16  ;;  %v8889_v48 = vcombine.low %v3609_v23, %v12503_v58  ;;  %10108 = vmatpush3.bf16.msra.mxu0 %v10498_v14 }
 0x244   : > { %v3775_v46 = vshrl.u32 %v12503_v58, 16  ;;  %3568 = vst [vmem:[#allocation2 + $0x90] sm:$0xf] %v3567_v35  ;;  %v3712_v31 = vsel %vm10803_vm4, %v3707_v10, %v3711_v50  ;;  %v2927_v16 = vadd.f32 %v12480_v39, %v12301_v55  ;;  %v3720_v17 = vor.u32 %v12454_v1, %v12438_v12  ;;  %v10476_v2 = vld [vmem:[%s14880_s3 + $0xb0] sm:$0xff]   ;;  %v10573_v23 = vld [vmem:[%s14880_s3 + $0xb8] sm:$0xff]   ;;  %10109 = vmatprep.subr.bf16.mxu0 %v10500_v28 }
 0x245   : > { %v8862_v43 = vcombine.low %v3702_v40, %v3712_v31  ;;  %v12530_v15 = vrot.slane %v3762_v52, 4  ;;  %v12532_v60 = vrot.slane %v3765_v38, 5  ;;  %v3723_v0 = vshll.u32 %v12434_v30, 16  ;;  %10023 = vmatprep.mubr.bf16.mxu0 %v8889_v48  ;;  %v12568_v14 = vld [vmem:[%s14880_s3 + $0x178] sm:$0xff]   ;;  %v12572_v38 = vpop.f32.mrf.mxu0 }
 0x246   : > { %v2966_v55 = vadd.f32 %v12247_v42, %v2927_v16  ;;  %v3721_v39 = vrot.slane %v3720_v17, 4  ;;  %v3729_v12 = vrot.slane %v3727_v61, 4  ;;  %v3733_v1 = vshll.u32 %v3651_v27, 16 }
 0x247   : > { %9968 = vmatmul.mubr.bf16.vlgmr.msra.gmra.mxu1 %v8862_v43  ;;  %v3725_v40 = vrot.slane %v3723_v0, 5  ;;  %v2930_v49 = vadd.f32 %v12490_v45, %v12306_v6  ;;  %v2928_v54 = vadd.f32 %v2863_v34, %v12309_v5  ;;  %v2933_v11 = vadd.f32 %v9945_v53, %v12313_v13  ;;  %v10479_v45 = vld [vmem:[%s14880_s3 + $0xa8] sm:$0xff]   ;;  %10110 = vmatpush3.bf16.msra.mxu0 %v10500_v28  ;;  %v10482_v53 = vld [vmem:[%s14880_s3 + $0xa0] sm:$0xff]  }
 0x248   : > { %10048 = vmatpush3.bf16.msra.mxu1 %v10573_v23  ;;  %v2998_v30 = vmax.f32 %v2966_v55, 0.0  ;;  %v3735_v61 = vrot.slane %v3733_v1, 5  ;;  %v3786_v26 = vshrl.u32 %v3611_v59, 16  ;;  %v3789_v37 = vshll.u32 %v3611_v59, 16  ;;  %v3559_v0 = vld [vmem:[#allocation2 + $0x84] sm:$0xf]  ;;  %10191 = vmatprep.subr.bf16.mxu0 %v12568_v14  ;;  %v12585_v23 = vpop.f32.mrf.mxu0 }
 0x249   : > { %v3726_v25 = vsel %vm10803_vm4, %v3721_v39, %v3725_v40  ;;  %v3730_v6 = vor.u32 %v3729_v12, %v3725_v40  ;;  %v2969_v5 = vadd.f32 %v12247_v42, %v2930_v49  ;;  %v2967_v13 = vadd.f32 %v12247_v42, %v2928_v54  ;;  %10049 = vmatprep.subr.bf16.mxu1 %v10476_v2  ;;  %v12583_v40 = vld [vmem:[#allocation2 + $0x2c] sm:$0x1]  ;;  %v3570_v49 = vld [vmem:[#allocation2 + $0x98] sm:$0x1] }
 0x24a   : > { %v9263_v34 = vpack.c.bf16 %v2998_v30, %v2998_v30  ;;  %v2972_v9 = vadd.f32 %v12247_v42, %v2933_v11  ;;  %v12561_v19 = vrot.slane %v3786_v26, 4  ;;  %v12563_v3 = vrot.slane %v3789_v37, 5 }
 0x24b   : > { %v3731_v36 = vrot.slane %v3730_v6, 4  ;;  %v3001_v29 = vmax.f32 %v2969_v5, 0.0  ;;  %v2999_v10 = vmax.f32 %v2967_v13, 0.0  ;;  %v3799_v50 = vshrl.u32 %v12551_v32, 16  ;;  %v3563_v5 = vld [vmem:[#allocation2 + $0x8c] sm:$0x1] }
 0x24c   : > { %v3334_v27 = vshrl.u32 %v9263_v34, 16  ;;  %v3337_v35 = vshll.u32 %v9263_v34, 16  ;;  %v3004_v52 = vmax.f32 %v2972_v9, 0.0  ;;  %v8890_v42 = vcombine.low %v3611_v59, %v12551_v32  ;;  %10050 = vmatpush3.bf16.msra.mxu1 %v10476_v2  ;;  %v3625_v33 = vld [vmem:[#allocation2 + $0x90] sm:$0xf] }
 0x24d   : > { %v3736_v31 = vsel %vm10803_vm4, %v3731_v36, %v3735_v61  ;;  %v9266_v48 = vpack.c.bf16 %v3001_v29, %v3001_v29  ;;  %v9264_v16 = vpack.c.bf16 %v2999_v10, %v2999_v10  ;;  %v3744_v17 = vor.u32 %v12482_v56, %v12477_v57  ;;  %10051 = vmatprep.subr.bf16.mxu1 %v10479_v45 }
 0x24e   : > { %v3336_v43 = vrot.slane %v3334_v27, 7  ;;  %v8863_v59 = vcombine.low %v3726_v25, %v3736_v31  ;;  %v9269_v2 = vpack.c.bf16 %v3004_v52, %v3004_v52  ;;  %10024 = vmatmul.mubr.bf16.gmra.mxu0 %v8890_v42  ;;  %v3747_v55 = vshll.u32 %v12461_v47, 16  ;;  %v10487_v25 = vld [vmem:[%s14880_s3 + $0x98] sm:$0xff]   ;;  %v3580_v27 = vld [vmem:[#allocation2 + $0xa8] sm:$0xf]  ;;  %v2879_v47 = vpop.f32.mrf.mxu0 }
 0x24f   : > { %v3359_v39 = vshrl.u32 %v9266_v48, 16  ;;  %v3362_v12 = vshll.u32 %v9266_v48, 16  ;;  %v3342_v1 = vshrl.u32 %v9264_v16, 16  ;;  %v3345_v28 = vshll.u32 %v9264_v16, 16  ;;  %v12601_v16 = vld [vmem:[#allocation2 + $0x4c] sm:$0xf] }
 0x250   : > { %v3339_v57 = vor.u32 %v3337_v35, %v3336_v43  ;;  %v3340_v56 = vrot.slane %v3336_v43, 4  ;;  %9971 = vmatprep.mubr.bf16.mxu1 %v8863_v59  ;;  %v3385_v54 = vshrl.u32 %v9269_v2, 16  ;;  %v3388_v11 = vshll.u32 %v9269_v2, 16  ;;  %10052 = vmatpush3.bf16.msra.mxu1 %v10479_v45  ;;  %v3613_v35 = vld [vmem:[#allocation2 + $0x48] sm:$0xf]  ;;  %v10492_v59 = vld [vmem:[%s14880_s3 + $0x90] sm:$0xff]  }
 0x251   : > { %v3361_v30 = vrot.slane %v3359_v39, 7  ;;  %v3344_v61 = vrot.slane %v3342_v1, 7  ;;  %v3745_v26 = vrot.slane %v3744_v17, 4  ;;  %v3749_v37 = vrot.slane %v3747_v55, 5  ;;  %10053 = vmatprep.subr.bf16.mxu1 %v10482_v53 }
 0x252   : > { %v3560_v6 = vsel %vm12342_vm12, %v3339_v57, %v3559_v0  ;;  %v12592_v13 = vrot.slane %v3385_v54, 7  ;;  %v3753_v34 = vrot.slane %v3751_v4, 4  ;;  %v3757_v45 = vshll.u32 %v12583_v40, 16 }
 0x253   : > { %3561 = vst [vmem:[#allocation2 + $0x84] sm:$0xf] %v3560_v6  ;;  %v3364_v9 = vor.u32 %v3362_v12, %v3361_v30  ;;  %v3366_v36 = vrot.slane %v3361_v30, 4  ;;  %v3347_v29 = vor.u32 %v3345_v28, %v3344_v61  ;;  %v3349_v10 = vrot.slane %v3344_v61, 4  ;;  %v12622_v28 = vld [vmem:[#allocation2 + $0x38] sm:$0x1] }
 0x254   : > { %v3390_v52 = vor.u32 %v3388_v11, %v12592_v13  ;;  %v3391_v42 = vrot.slane %v12592_v13, 4  ;;  %v3750_v31 = vsel %vm10803_vm4, %v3745_v26, %v3749_v37  ;;  %v3754_v48 = vor.u32 %v3753_v34, %v3749_v37  ;;  %10054 = vmatpush3.bf16.msra.mxu1 %v10482_v53  ;;  %v9949_v11 = vpop.f32.mrf.mxu0  ;;  %v3615_v30 = vld [vmem:[#allocation2 + $0x54] sm:$0xf] }
 0x255   : > { %v3365_v4 = vsel %vm12353_vm13, %v3357_v20, %v3364_v9  ;;  %v3571_v17 = vsel %vm12359_vm14, %v3366_v36, %v3570_v49  ;;  %v3348_v43 = vsel %vm12353_vm13, %v3340_v56, %v3347_v29  ;;  %v3564_v0 = vsel %vm12359_vm14, %v3349_v10, %v3563_v5  ;;  %10055 = vmatprep.subr.bf16.mxu1 %v10487_v25 }
 0x256   : > { %3569 = vst [vmem:[#allocation2 + $0x94] sm:$0xf] %v3365_v4  ;;  %3572 = vst [vmem:[#allocation2 + $0x98] sm:$0x1] %v3571_v17  ;;  %v3581_v24 = vsel %vm12342_vm12, %v3390_v52, %v3580_v27  ;;  %v3755_v20 = vrot.slane %v3754_v48, 4  ;;  %v3759_v53 = vrot.slane %v3757_v45, 5  ;;  %v8891_v12 = vcombine.low %v3613_v35, %v12601_v16 }
 0x257   : > { %3562 = vst [vmem:[#allocation2 + $0x88] sm:$0xf] %v3348_v43  ;;  %3565 = vst [vmem:[#allocation2 + $0x8c] sm:$0x1] %v3564_v0  ;;  %v3810_v2 = vshrl.u32 %v3613_v35, 16  ;;  %v3813_v55 = vshll.u32 %v3613_v35, 16  ;;  %v2931_v1 = vadd.f32 %v12572_v38, %v12318_v41  ;;  %v3768_v49 = vor.u32 %v12532_v60, %v12530_v15 }
 0x258   : > { %3582 = vst [vmem:[#allocation2 + $0xa8] sm:$0xf] %v3581_v24  ;;  %v3823_v39 = vshrl.u32 %v12601_v16, 16  ;;  %v3760_v57 = vsel %vm10803_vm4, %v3755_v20, %v3759_v53  ;;  %v3771_v54 = vshll.u32 %v12503_v58, 16  ;;  %10056 = vmatpush3.bf16.msra.mxu1 %v10487_v25  ;;  %10027 = vmatprep.mubr.bf16.mxu0 %v8891_v12  ;;  %v12636_v41 = vld [vmem:[%s14879_s2] ss:$0 sm:$0xff]  ;;  %v2934_v5 = vadd.f32 %v12585_v23, %v12322_v44 }
 0x259   : > { %v12626_v56 = vrot.slane %v3810_v2, 4  ;;  %v8864_v61 = vcombine.low %v3750_v31, %v3760_v57  ;;  %v12631_v26 = vrot.slane %v3813_v55, 5  ;;  %v2970_v38 = vadd.f32 %v12636_v41, %v2931_v1  ;;  %10057 = vmatprep.subr.bf16.mxu1 %v10492_v59  ;;  %v10497_v15 = vld [vmem:[%s14880_s3 + $0x88] sm:$0xff]   ;;  %v12649_v58 = vld [vmem:[#allocation2 + $0x58] sm:$0xf] }
 0x25a   : > { %v3777_v37 = vrot.slane %v3775_v46, 4  ;;  %v3769_v60 = vrot.slane %v3768_v49, 4  ;;  %v3773_v25 = vrot.slane %v3771_v54, 5  ;;  %v3781_v6 = vshll.u32 %v12622_v28, 16  ;;  %v12670_v57 = vld [vmem:[%s14880_s3 + $0x138] sm:$0xff]  }
 0x25b   : > { %9972 = vmatmul.mubr.bf16.gmra.mxu1 %v8864_v61  ;;  %v3002_v34 = vmax.f32 %v2970_v38, 0.0  ;;  %v2932_v45 = vadd.f32 %v2879_v47, %v12325_v63  ;;  %v2937_v9 = vadd.f32 %v9949_v11, %v12329_v22  ;;  %v3834_v46 = vshrl.u32 %v3615_v30, 16  ;;  %v10501_v63 = vld [vmem:[%s14880_s3 + $0x80] sm:$0xff]   ;;  %v3573_v49 = vld [vmem:[#allocation2 + $0x9c] sm:$0xf] }
 0x25c   : > { %v3774_v36 = vsel %vm10803_vm4, %v3769_v60, %v3773_v25  ;;  %v3778_v29 = vor.u32 %v3777_v37, %v3773_v25  ;;  %v3783_v10 = vrot.slane %v3781_v6, 5  ;;  %v2973_v27 = vadd.f32 %v12636_v41, %v2934_v5  ;;  %10058 = vmatpush3.bf16.msra.mxu1 %v10492_v59  ;;  %v12675_v25 = vld [vmem:[#allocation2 + $0x44] sm:$0x1]  ;;  %v2892_v6 = vpop.f32.mrf.mxu0 }
 0x25d   : > { %v9267_v35 = vpack.c.bf16 %v3002_v34, %v3002_v34  ;;  %v2971_v44 = vadd.f32 %v12636_v41, %v2932_v45  ;;  %v2976_v23 = vadd.f32 %v12636_v41, %v2937_v9  ;;  %v12656_v52 = vrot.slane %v3834_v46, 4  ;;  %10059 = vmatprep.subr.bf16.mxu1 %v10497_v15  ;;  %v3584_v34 = vld [vmem:[#allocation2 + $0xb0] sm:$0x1] }
 0x25e   : > { %v3779_v22 = vrot.slane %v3778_v29, 4  ;;  %v3005_v31 = vmax.f32 %v2973_v27, 0.0  ;;  %v3837_v48 = vshll.u32 %v3615_v30, 16  ;;  %v3847_v47 = vshrl.u32 %v12649_v58, 16 }
 0x25f   : > { %v3368_v4 = vshrl.u32 %v9267_v35, 16  ;;  %v3371_v17 = vshll.u32 %v9267_v35, 16  ;;  %v3003_v43 = vmax.f32 %v2971_v44, 0.0  ;;  %v3008_v0 = vmax.f32 %v2976_v23, 0.0  ;;  %v3594_v23 = vld [vmem:[#allocation2 + $0xc0] sm:$0xf] }
 0x260   : > { %v3784_v59 = vsel %vm10803_vm4, %v3779_v22, %v3783_v10  ;;  %v9270_v24 = vpack.c.bf16 %v3005_v31, %v3005_v31  ;;  %v12664_v20 = vrot.slane %v3837_v48, 5  ;;  %v8892_v53 = vcombine.low %v3615_v30, %v12649_v58  ;;  %10060 = vmatpush3.bf16.msra.mxu1 %v10497_v15 }
 0x261   : > { %v3370_v2 = vrot.slane %v3368_v4, 7  ;;  %v8865_v55 = vcombine.low %v3774_v36, %v3784_v59  ;;  %v9268_v12 = vpack.c.bf16 %v3003_v43, %v3003_v43  ;;  %v9273_v1 = vpack.c.bf16 %v3008_v0, %v3008_v0  ;;  %10061 = vmatprep.subr.bf16.mxu1 %v10501_v63  ;;  %v12687_v43 = vld [vmem:[#allocation2 + $0x64] sm:$0xf] }
 0x262   : > { %v3393_v54 = vshrl.u32 %v9270_v24, 16  ;;  %v3396_v11 = vshll.u32 %v9270_v24, 16  ;;  %10028 = vmatmul.mubr.bf16.gmra.mxu0 %v8892_v53  ;;  %v3792_v61 = vor.u32 %v12563_v3, %v12561_v19  ;;  %v3795_v30 = vshll.u32 %v12551_v32, 16  ;;  %v3577_v3 = vld [vmem:[#allocation2 + $0xa4] sm:$0x1]  ;;  %v9950_v32 = vpop.f32.mrf.mxu0 }
 0x263   : > { %v3373_v38 = vor.u32 %v3371_v17, %v3370_v2  ;;  %v3374_v37 = vrot.slane %v3370_v2, 4  ;;  %9975 = vmatprep.mubr.bf16.mxu1 %v8865_v55  ;;  %v3376_v15 = vshrl.u32 %v9268_v12, 16  ;;  %v3379_v60 = vshll.u32 %v9268_v12, 16  ;;  %v3617_v17 = vld [vmem:[#allocation2 + $0x60] sm:$0xf] }
 0x264   : > { %v3395_v5 = vrot.slane %v3393_v54, 7  ;;  %v3419_v45 = vshrl.u32 %v9273_v1, 16  ;;  %v3422_v9 = vshll.u32 %v9273_v1, 16  ;;  %v3793_v46 = vrot.slane %v3792_v61, 4  ;;  %10062 = vmatpush3.bf16.msra.mxu1 %v10501_v63  ;;  %v12701_v12 = vld [vmem:[#allocation2 + $0x50] sm:$0x1] }
 0x265   : > { %v3574_v36 = vsel %vm12342_vm12, %v3373_v38, %v3573_v49  ;;  %v3378_v19 = vrot.slane %v3376_v15, 7  ;;  %v3797_v29 = vrot.slane %v3795_v30, 5  ;;  %v3801_v10 = vrot.slane %v3799_v50, 4  ;;  %10143 = vmatprep.subr.bf16.mxu1 %v12670_v57  ;;  %v2895_v15 = vpop.f32.mrf.mxu0 }
 0x266   : > { %3575 = vst [vmem:[#allocation2 + $0x9c] sm:$0xf] %v3574_v36  ;;  %v3398_v27 = vor.u32 %v3396_v11, %v3395_v5  ;;  %v3400_v35 = vrot.slane %v3395_v5, 4  ;;  %v12682_v44 = vrot.slane %v3419_v45, 7  ;;  %v3805_v22 = vshll.u32 %v12675_v25, 16 }
 0x267   : > { %v3381_v63 = vor.u32 %v3379_v60, %v3378_v19  ;;  %v3383_v31 = vrot.slane %v3378_v19, 4  ;;  %v3798_v48 = vsel %vm10803_vm4, %v3793_v46, %v3797_v29  ;;  %v3802_v4 = vor.u32 %v3801_v10, %v3797_v29  ;;  %v3619_v11 = vld [vmem:[#allocation2 + $0x6c] sm:$0xf]  ;;  %v12712_v60 = vld [vmem:[#allocation2 + $0x70] sm:$0xf] }
 0x268   : > { %v3399_v50 = vsel %vm12353_vm13, %v3391_v42, %v3398_v27  ;;  %v3585_v0 = vsel %vm12359_vm14, %v3400_v35, %v3584_v34  ;;  %v3424_v59 = vor.u32 %v3422_v9, %v12682_v44  ;;  %v3425_v24 = vrot.slane %v12682_v44, 4 }
 0x269   : > { %3583 = vst [vmem:[#allocation2 + $0xac] sm:$0xf] %v3399_v50  ;;  %3586 = vst [vmem:[#allocation2 + $0xb0] sm:$0x1] %v3585_v0  ;;  %v3382_v53 = vsel %vm12353_vm13, %v3374_v37, %v3381_v63  ;;  %v3578_v2 = vsel %vm12359_vm14, %v3383_v31, %v3577_v3  ;;  %v3803_v55 = vrot.slane %v3802_v4, 4  ;;  %v3807_v13 = vrot.slane %v3805_v22, 5 }
 0x26a   : > { %3576 = vst [vmem:[#allocation2 + $0xa0] sm:$0xf] %v3382_v53  ;;  %3579 = vst [vmem:[#allocation2 + $0xa4] sm:$0x1] %v3578_v2  ;;  %v3595_v42 = vsel %vm12342_vm12, %v3424_v59, %v3594_v23  ;;  %v3858_v1 = vshrl.u32 %v3617_v17, 16  ;;  %v3861_v49 = vshll.u32 %v3617_v17, 16  ;;  %v8893_v30 = vcombine.low %v3617_v17, %v12687_v43 }
 0x26b   : > { %v3871_v54 = vshrl.u32 %v12687_v43, 16  ;;  %3596 = vst [vmem:[#allocation2 + $0xc0] sm:$0xf] %v3595_v42  ;;  %v3808_v61 = vsel %vm10803_vm4, %v3803_v55, %v3807_v13  ;;  %v2935_v38 = vadd.f32 %v2892_v6, %v12332_v62  ;;  %v3816_v37 = vor.u32 %v12631_v26, %v12626_v56  ;;  %v12735_v4 = vld [vmem:[#allocation2 + $0x5c] sm:$0x1] }
 0x26c   : > { %v8866_v5 = vcombine.low %v3798_v48, %v3808_v61  ;;  %v12714_v34 = vrot.slane %v3858_v1, 4  ;;  %v12716_v45 = vrot.slane %v3861_v49, 5  ;;  %v3819_v9 = vshll.u32 %v12601_v16, 16  ;;  %10031 = vmatprep.mubr.bf16.mxu0 %v8893_v30  ;;  %v3587_v55 = vld [vmem:[#allocation2 + $0xb4] sm:$0xf] }
 0x26d   : > { %v2974_v46 = vadd.f32 %v12636_v41, %v2935_v38  ;;  %v3817_v36 = vrot.slane %v3816_v37, 4  ;;  %v3825_v62 = vrot.slane %v3823_v39, 4  ;;  %v3829_v6 = vshll.u32 %v12701_v12, 16 }
 0x26e   : > { %9976 = vmatmul.mubr.bf16.gmra.mxu1 %v8866_v5  ;;  %v3821_v56 = vrot.slane %v3819_v9, 5  ;;  %v2938_v26 = vadd.f32 %v9950_v32, %v12335_v7  ;;  %v2936_v19 = vadd.f32 %v2895_v15, %v12337_v21  ;;  %v3882_v3 = vshrl.u32 %v3619_v11, 16  ;;  %v12745_v9 = vld [vmem:[#allocation2 + $0x7c] sm:$0xf] }
 0x26f   : > { %v3006_v29 = vmax.f32 %v2974_v46, 0.0  ;;  %v3831_v10 = vrot.slane %v3829_v6, 5  ;;  %v3885_v27 = vshll.u32 %v3619_v11, 16  ;;  %v3895_v35 = vshrl.u32 %v12712_v60, 16 }
 0x270   : > { %v3822_v23 = vsel %vm10803_vm4, %v3817_v36, %v3821_v56  ;;  %v3826_v22 = vor.u32 %v3825_v62, %v3821_v56  ;;  %v2977_v39 = vadd.f32 %v12636_v41, %v2938_v26  ;;  %v2975_v63 = vadd.f32 %v12636_v41, %v2936_v19  ;;  %v3598_v56 = vld [vmem:[#allocation2 + $0xc8] sm:$0x1] }
 0x271   : > { %v9271_v31 = vpack.c.bf16 %v3006_v29, %v3006_v29  ;;  %v12730_v48 = vrot.slane %v3882_v3, 4  ;;  %v12732_v7 = vrot.slane %v3885_v27, 5  ;;  %v8894_v21 = vcombine.low %v3619_v11, %v12712_v60 }
 0x272   : > { %v3827_v17 = vrot.slane %v3826_v22, 4  ;;  %v3009_v32 = vmax.f32 %v2977_v39, 0.0  ;;  %v3007_v50 = vmax.f32 %v2975_v63, 0.0  ;;  %v3840_v0 = vor.u32 %v12664_v20, %v12656_v52  ;;  %v3621_v20 = vld [vmem:[#allocation2 + $0x78] sm:$0xf] }
 0x273   : > { %v3402_v59 = vshrl.u32 %v9271_v31, 16  ;;  %v3405_v53 = vshll.u32 %v9271_v31, 16  ;;  %10032 = vmatmul.mubr.bf16.gmra.mxu0 %v8894_v21  ;;  %v3843_v41 = vshll.u32 %v12649_v58, 16  ;;  %v3849_v2 = vrot.slane %v3847_v47, 4 }
 0x274   : > { %v3832_v13 = vsel %vm10803_vm4, %v3827_v17, %v3831_v10  ;;  %v9274_v42 = vpack.c.bf16 %v3009_v32, %v3009_v32  ;;  %v9272_v1 = vpack.c.bf16 %v3007_v50, %v3007_v50  ;;  %v3841_v49 = vrot.slane %v3840_v0, 4  ;;  %v3591_v10 = vld [vmem:[#allocation2 + $0xbc] sm:$0x1]  ;;  %v12752_v17 = vld [vmem:[#allocation2 + $0x68] sm:$0x1] }
 0x275   : > { %v3404_v11 = vrot.slane %v3402_v59, 7  ;;  %v8867_v61 = vcombine.low %v3822_v23, %v3832_v13  ;;  %v3845_v30 = vrot.slane %v3843_v41, 5  ;;  %v3853_v52 = vshll.u32 %v12735_v4, 16  ;;  %v3623_v59 = vld [vmem:[#allocation2 + $0x84] sm:$0xf] }
 0x276   : > { %v3427_v38 = vshrl.u32 %v9274_v42, 16  ;;  %v3430_v37 = vshll.u32 %v9274_v42, 16  ;;  %v3410_v15 = vshrl.u32 %v9272_v1, 16  ;;  %v3413_v5 = vshll.u32 %v9272_v1, 16 }
 0x277   : > { %v3407_v47 = vor.u32 %v3405_v53, %v3404_v11  ;;  %v3408_v46 = vrot.slane %v3404_v11, 4  ;;  %9979 = vmatprep.mubr.bf16.mxu1 %v8867_v61  ;;  %v3846_v36 = vsel %vm10803_vm4, %v3841_v49, %v3845_v30  ;;  %v3850_v62 = vor.u32 %v3849_v2, %v3845_v30  ;;  %v12757_v53 = vld [vmem:[#allocation2 + $0x88] sm:$0xf]  ;;  %v12774_v49 = vld [vmem:[#allocation2 + $0x74] sm:$0x1] }
 0x278   : > { %v3429_v6 = vrot.slane %v3427_v38, 7  ;;  %v3412_v26 = vrot.slane %v3410_v15, 7  ;;  %v3855_v19 = vrot.slane %v3853_v52, 5  ;;  %v3906_v3 = vshrl.u32 %v3621_v20, 16  ;;  %v12778_v52 = vld [vmem:[#allocation2 + $0x94] sm:$0xf] }
 0x279   : > { %v3588_v29 = vsel %vm12342_vm12, %v3407_v47, %v3587_v55  ;;  %v3851_v27 = vrot.slane %v3850_v62, 4  ;;  %v3909_v23 = vshll.u32 %v3621_v20, 16  ;;  %v3919_v22 = vshrl.u32 %v12745_v9, 16 }
 0x27a   : > { %3589 = vst [vmem:[#allocation2 + $0xb4] sm:$0xf] %v3588_v29  ;;  %v3432_v39 = vor.u32 %v3430_v37, %v3429_v6  ;;  %v3434_v63 = vrot.slane %v3429_v6, 4  ;;  %v3415_v31 = vor.u32 %v3413_v5, %v3412_v26  ;;  %v3417_v21 = vrot.slane %v3412_v26, 4  ;;  %v12791_v29 = vld [vmem:[#allocation2 + $0x80] sm:$0x1] }
 0x27b   : > { %v3856_v32 = vsel %vm10803_vm4, %v3851_v27, %v3855_v19  ;;  %v3908_v50 = vrot.slane %v3906_v3, 4  ;;  %v3911_v0 = vrot.slane %v3909_v23, 5  ;;  %v8895_v8 = vcombine.low %v3621_v20, %v12745_v9 }
 0x27c   : > { %v3433_v41 = vsel %vm12353_vm13, %v3425_v24, %v3432_v39  ;;  %v3599_v2 = vsel %vm12359_vm14, %v3434_v63, %v3598_v56  ;;  %v3416_v55 = vsel %vm12353_vm13, %v3408_v46, %v3415_v31  ;;  %v3592_v13 = vsel %vm12359_vm14, %v3417_v21, %v3591_v10  ;;  %v12795_v31 = vld [vmem:[#allocation2 + $0xa0] sm:$0xf] }
 0x27d   : > { %3597 = vst [vmem:[#allocation2 + $0xc4] sm:$0xf] %v3433_v41  ;;  %3600 = vst [vmem:[#allocation2 + $0xc8] sm:$0x1] %v3599_v2  ;;  %v8868_v42 = vcombine.low %v3846_v36, %v3856_v32  ;;  %10035 = vmatprep.mubr.bf16.mxu0 %v8895_v8  ;;  %v3864_v44 = vor.u32 %v12716_v45, %v12714_v34  ;;  %v3867_v24 = vshll.u32 %v12687_v43, 16  ;;  %v3873_v1 = vrot.slane %v3871_v54, 4 }
 0x27e   : > { %3590 = vst [vmem:[#allocation2 + $0xb8] sm:$0xf] %v3416_v55  ;;  %3593 = vst [vmem:[#allocation2 + $0xbc] sm:$0x1] %v3592_v13  ;;  %v3877_v51 = vshll.u32 %v12752_v17, 16  ;;  %v3930_v11 = vshrl.u32 %v3623_v59, 16  ;;  %v8896_v34 = vcombine.low %v3623_v59, %v12757_v53  ;;  %v3888_v45 = vor.u32 %v12732_v7, %v12730_v48 }
 0x27f   : > { %v3933_v61 = vshll.u32 %v3623_v59, 16  ;;  %v3943_v30 = vshrl.u32 %v12757_v53, 16  ;;  %9980 = vmatmul.mubr.bf16.gmra.mxu1 %v8868_v42  ;;  %v3865_v20 = vrot.slane %v3864_v44, 4  ;;  %v3869_v38 = vrot.slane %v3867_v24, 5 }
 0x280   : > { %v3879_v54 = vrot.slane %v3877_v51, 5  ;;  %v3932_v37 = vrot.slane %v3930_v11, 4  ;;  %v3891_v5 = vshll.u32 %v12712_v60, 16  ;;  %10036 = vmatmul.mubr.bf16.gmra.mxu0 %v8896_v34  ;;  %v3889_v36 = vrot.slane %v3888_v45, 4  ;;  %v12807_v51 = vld [vmem:[#allocation2 + $0x8c] sm:$0x1] }
 0x281   : > { %v3935_v15 = vrot.slane %v3933_v61, 5  ;;  %v3870_v47 = vsel %vm10803_vm4, %v3865_v20, %v3869_v38  ;;  %v3874_v46 = vor.u32 %v3873_v1, %v3869_v38  ;;  %v3897_v62 = vrot.slane %v3895_v35, 4  ;;  %v3627_v35 = vld [vmem:[#allocation2 + $0x9c] sm:$0xf]  ;;  %v3629_v61 = vld [vmem:[#allocation2 + $0xa8] sm:$0xf] }
 0x282   : > { %v3893_v6 = vrot.slane %v3891_v5, 5  ;;  %v3901_v56 = vshll.u32 %v12774_v49, 16  ;;  %v3954_v26 = vshrl.u32 %v3625_v33, 16  ;;  %v3957_v19 = vshll.u32 %v3625_v33, 16  ;;  %v12811_v45 = vld [vmem:[#allocation2 + $0xac] sm:$0xf] }
 0x283   : > { %v3875_v48 = vrot.slane %v3874_v46, 4  ;;  %v3967_v7 = vshrl.u32 %v12778_v52, 16  ;;  %v8897_v3 = vcombine.low %v3625_v33, %v12778_v52  ;;  %v3912_v10 = vor.u32 %v3911_v0, %v3908_v50 }
 0x284   : > { %v3894_v27 = vsel %vm10803_vm4, %v3889_v36, %v3893_v6  ;;  %v3898_v23 = vor.u32 %v3897_v62, %v3893_v6  ;;  %v3903_v39 = vrot.slane %v3901_v56, 5  ;;  %v3956_v63 = vrot.slane %v3954_v26, 4  ;;  %v12814_v36 = vld [vmem:[#allocation2 + $0x98] sm:$0x1]  ;;  %v3631_v56 = vld [vmem:[#allocation2 + $0xb4] sm:$0xf] }
 0x285   : > { %v3880_v21 = vsel %vm10803_vm4, %v3875_v48, %v3879_v54  ;;  %v3959_v32 = vrot.slane %v3957_v19, 5  ;;  %10039 = vmatprep.mubr.bf16.mxu0 %v8897_v3  ;;  %v3913_v8 = vrot.slane %v3912_v10, 4  ;;  %v3915_v59 = vshll.u32 %v12745_v9, 16 }
 0x286   : > { %v8869_v41 = vcombine.low %v3870_v47, %v3880_v21  ;;  %v3899_v2 = vrot.slane %v3898_v23, 4  ;;  %v3921_v50 = vrot.slane %v3919_v22, 4  ;;  %v3925_v0 = vshll.u32 %v12791_v29, 16 }
 0x287   : > { %v3917_v55 = vrot.slane %v3915_v59, 5  ;;  %v3978_v13 = vshrl.u32 %v3627_v35, 16  ;;  %v3981_v42 = vshll.u32 %v3627_v35, 16  ;;  %v3991_v44 = vshrl.u32 %v12795_v31, 16 }
 0x288   : > { %9983 = vmatprep.mubr.bf16.mxu1 %v8869_v41  ;;  %v3904_v24 = vsel %vm10803_vm4, %v3899_v2, %v3903_v39  ;;  %v3927_v1 = vrot.slane %v3925_v0, 5  ;;  %v8898_v33 = vcombine.low %v3627_v35, %v12795_v31  ;;  %v3936_v11 = vor.u32 %v3935_v15, %v3932_v37  ;;  %v12821_v39 = vld [vmem:[#allocation2 + $0xb8] sm:$0xf] }
 0x289   : > { %v8870_v20 = vcombine.low %v3894_v27, %v3904_v24  ;;  %v3918_v22 = vsel %vm10803_vm4, %v3913_v8, %v3917_v55  ;;  %v3922_v38 = vor.u32 %v3921_v50, %v3917_v55  ;;  %v3980_v34 = vrot.slane %v3978_v13, 4 }
 0x28a   : > { %v3983_v54 = vrot.slane %v3981_v42, 5  ;;  %10040 = vmatmul.mubr.bf16.gmra.mxu0 %v8898_v33  ;;  %v3937_v5 = vrot.slane %v3936_v11, 4  ;;  %v3939_v47 = vshll.u32 %v12757_v53, 16  ;;  %v3945_v46 = vrot.slane %v3943_v30, 4  ;;  %v12829_v33 = vld [vmem:[#allocation2 + $0xa4] sm:$0x1] }
 0x28b   : > { %9984 = vmatmul.mubr.bf16.gmra.mxu1 %v8870_v20  ;;  %v3923_v62 = vrot.slane %v3922_v38, 4  ;;  %v3949_v37 = vshll.u32 %v12807_v51, 16  ;;  %v4002_v15 = vshrl.u32 %v3629_v61, 16  ;;  %v4005_v6 = vshll.u32 %v3629_v61, 16 }
 0x28c   : > { %v3941_v26 = vrot.slane %v3939_v47, 5  ;;  %v4015_v19 = vshrl.u32 %v12811_v45, 16  ;;  %v8899_v48 = vcombine.low %v3629_v61, %v12811_v45  ;;  %v3960_v3 = vor.u32 %v3959_v32, %v3956_v63  ;;  %v10499_v61 = vld [vmem:[#allocation2 + $0xc] sm:$0xff]  }
 0x28d   : > { %v3928_v10 = vsel %vm10803_vm4, %v3923_v62, %v3927_v1  ;;  %v3951_v27 = vrot.slane %v3949_v37, 5  ;;  %v4004_v30 = vrot.slane %v4002_v15, 4  ;;  %v4007_v23 = vrot.slane %v4005_v6, 5 }
 0x28e   : > { %v8871_v35 = vcombine.low %v3918_v22, %v3928_v10  ;;  %v3942_v21 = vsel %vm10803_vm4, %v3937_v5, %v3941_v26  ;;  %v3946_v8 = vor.u32 %v3945_v46, %v3941_v26  ;;  %10043 = vmatprep.mubr.bf16.mxu0 %v8899_v48  ;;  %v3961_v59 = vrot.slane %v3960_v3, 4  ;;  %v12834_v5 = vld [vmem:[#allocation2 + $0xb0] sm:$0x1] }
 0x28f   : > { %v3963_v41 = vshll.u32 %v12778_v52, 16  ;;  %v3969_v2 = vrot.slane %v3967_v7, 4  ;;  %v3973_v63 = vshll.u32 %v12814_v36, 16  ;;  %v4026_v32 = vshrl.u32 %v3631_v56, 16 }
 0x290   : > { %9987 = vmatprep.mubr.bf16.mxu1 %v8871_v35  ;;  %v3947_v50 = vrot.slane %v3946_v8, 4  ;;  %v4029_v0 = vshll.u32 %v3631_v56, 16  ;;  %v4039_v55 = vshrl.u32 %v12821_v39, 16  ;;  %v8900_v13 = vcombine.low %v3631_v56, %v12821_v39  ;;  %v4644_v8 = vld [vmem:[#allocation2] sm:$0xe] }
 0x291   : > { %v3965_v42 = vrot.slane %v3963_v41, 5  ;;  %v3975_v24 = vrot.slane %v3973_v63, 5  ;;  %v4028_v1 = vrot.slane %v4026_v32, 4  ;;  %v3984_v11 = vor.u32 %v3983_v54, %v3980_v34  ;;  %v10502_v32 = vld [vmem:[#allocation2 + $0x18] sm:$0xff]  }
 0x292   : > { %v3952_v7 = vsel %vm10803_vm4, %v3947_v50, %v3951_v27  ;;  %v4031_v20 = vrot.slane %v4029_v0, 5  ;;  %10044 = vmatmul.mubr.bf16.gmra.mxu0 %v8900_v13  ;;  %v3987_v22 = vshll.u32 %v12795_v31, 16  ;;  %v3993_v38 = vrot.slane %v3991_v44, 4  ;;  %v10517_v13 = vld [vmem:[%s14880_s3 + $0x170] sm:$0xff]  }
 0x293   : > { %v8872_v47 = vcombine.low %v3942_v21, %v3952_v7  ;;  %v3966_v46 = vsel %vm10803_vm4, %v3961_v59, %v3965_v42  ;;  %v3970_v62 = vor.u32 %v3969_v2, %v3965_v42  ;;  %v3985_v37 = vrot.slane %v3984_v11, 4  ;;  %10111 = vmatprep.mubr.bf16.mxu0 %v10499_v61  ;;  %v12843_v21 = vld [vmem:[#allocation2 + $0xbc] sm:$0x1]  ;;  %v10503_v11 = vld [vmem:[#allocation2 + $0x24] sm:$0xff]  }
 0x294   : > { %v3989_v15 = vrot.slane %v3987_v22, 5  ;;  %v3997_v34 = vshll.u32 %v12829_v33, 16  ;;  %v4008_v54 = vor.u32 %v4007_v23, %v4004_v30  ;;  %v4011_v6 = vshll.u32 %v12811_v45, 16  ;;  %v10575_v22 = vld [vmem:[#allocation2 + $0x4] sm:$0xf] }
 0x295   : > { %9988 = vmatmul.mubr.bf16.gmra.mxu1 %v8872_v47  ;;  %v3971_v56 = vrot.slane %v3970_v62, 4  ;;  %v4017_v26 = vrot.slane %v4015_v19, 4  ;;  %v4021_v44 = vshll.u32 %v12834_v5, 16  ;;  %v4032_v48 = vor.u32 %v4031_v20, %v4028_v1  ;;  %v4645_v19 = vld [vmem:[#allocation2 + $0xc] sm:$0xe] }
 0x296   : > { %v3990_v3 = vsel %vm10803_vm4, %v3985_v37, %v3989_v15  ;;  %v3994_v10 = vor.u32 %v3993_v38, %v3989_v15  ;;  %v3999_v27 = vrot.slane %v3997_v34, 5  ;;  %v4009_v35 = vrot.slane %v4008_v54, 4  ;;  %v10576_v38 = vld [vmem:[#allocation2 + $0x8] sm:$0x1] }
 0x297   : > { %v3976_v30 = vsel %vm10803_vm4, %v3971_v56, %v3975_v24  ;;  %v4013_v23 = vrot.slane %v4011_v6, 5  ;;  %v4023_v59 = vrot.slane %v4021_v44, 5  ;;  %v12847_v41 = vrot.slane %v4032_v48, 4  ;;  %v10520_v48 = vld [vmem:[%s14880_s3 + $0x168] sm:$0xff]  }
 0x298   : > { %v8873_v2 = vcombine.low %v3966_v46, %v3976_v30  ;;  %v3995_v63 = vrot.slane %v3994_v10, 4  ;;  %v4035_v50 = vshll.u32 %v12821_v39, 16  ;;  %v4041_v0 = vrot.slane %v4039_v55, 4  ;;  %v4646_v46 = vld [vmem:[#allocation2 + $0x18] sm:$0xe] }
 0x299   : > { %v4014_v42 = vsel %vm10803_vm4, %v4009_v35, %v4013_v23  ;;  %v4018_v1 = vor.u32 %v4017_v26, %v4013_v23  ;;  %v4045_v24 = vshll.u32 %v12843_v21, 16  ;;  %v8909_v61 = vrot.slane %v4644_v8, 9  ;;  %v4647_v30 = vld [vmem:[#allocation2 + $0x24] sm:$0xe] }
 0x29a   : > { %9991 = vmatprep.mubr.bf16.mxu1 %v8873_v2  ;;  %v4000_v7 = vsel %vm10803_vm4, %v3995_v63, %v3999_v27  ;;  %10112 = vmatmul.mubr.bf16.vlgmr.msra.gmra.mxu0 %v10502_v32  ;;  %v4037_v20 = vrot.slane %v4035_v50, 5  ;;  %v4694_v55 = vrot.slane %v10575_v22, 5  ;;  %v4697_v47 = vrot.slane %v10576_v38, 5  ;;  %v10578_v27 = vld [vmem:[#allocation2 + $0x14] sm:$0x1]  ;;  %v10522_v22 = vld [vmem:[%s14880_s3 + $0x160] sm:$0xff]  }
 0x29b   : > { %v8874_v62 = vcombine.low %v3990_v3, %v4000_v7  ;;  %v4019_v37 = vrot.slane %v4018_v1, 4  ;;  %v4047_v15 = vrot.slane %v4045_v24, 5  ;;  %10115 = vmatprep.mubr.bf16.mxu0 %v10503_v11  ;;  %v8910_v34 = vrot.slane %v4645_v19, 9  ;;  %10192 = vmatpush3.bf16.msra.mxu0 %v12568_v14  ;;  %v10577_v14 = vld [vmem:[#allocation2 + $0x10] sm:$0xf]  ;;  %v10506_v38 = vld [vmem:[#allocation2 + $0x3c] sm:$0xff]  }
 0x29c   : > { %v4038_v54 = vsel %vm10803_vm4, %v12847_v41, %v4037_v20  ;;  %v4042_v6 = vor.u32 %v4041_v0, %v4037_v20  ;;  %v12864_v26 = vsel %vm11214_vm7, %v8909_v61, %v4694_v55  ;;  %v4696_v44 = vrot.slane %v4694_v55, 4  ;;  %10193 = vmatprep.subr.bf16.mxu0 %v10517_v13  ;;  %v10579_v2 = vld [vmem:[#allocation2 + $0x1c] sm:$0xf]  ;;  %v10580_v0 = vld [vmem:[#allocation2 + $0x20] sm:$0x1]  ;;  %v10504_v11 = vld [vmem:[#allocation2 + $0x30] sm:$0xff]  }
 0x29d   : > { %9992 = vmatmul.mubr.bf16.gmra.mxu1 %v8874_v62  ;;  %v4024_v3 = vsel %vm10803_vm4, %v4019_v37, %v4023_v59  ;;  %v4701_v10 = vrot.slane %v10577_v14, 5  ;;  %v4704_v35 = vrot.slane %v10578_v27, 5  ;;  %v8911_v8 = vrot.slane %v4646_v46, 9  ;;  %v4648_v24 = vld [vmem:[#allocation2 + $0x30] sm:$0xe] }
 0x29e   : > { %v8875_v23 = vcombine.low %v4014_v42, %v4024_v3  ;;  %v4043_v41 = vrot.slane %v4042_v6, 4  ;;  %v4698_v19 = vsel %vm11214_vm7, %v4696_v44, %v4697_v47  ;;  %v4708_v63 = vrot.slane %v10579_v2, 5  ;;  %v10581_v47 = vld [vmem:[#allocation2 + $0x28] sm:$0xf]  ;;  %v4649_v37 = vld [vmem:[#allocation2 + $0x3c] sm:$0xe] }
 0x29f   : > { %v8941_v32 = vcombine.low %v12864_v26, %v4698_v19  ;;  %v12876_v50 = vsel %vm11214_vm7, %v8910_v34, %v4701_v10  ;;  %v4703_v59 = vrot.slane %v4701_v10, 4  ;;  %v4711_v1 = vrot.slane %v10580_v0, 5  ;;  %10194 = vmatpush3.bf16.msra.mxu0 %v10517_v13  ;;  %v4650_v44 = vld [vmem:[#allocation2 + $0x48] sm:$0xe] }
 0x2a0   : > { %9995 = vmatprep.mubr.bf16.mxu1 %v8875_v23  ;;  %v4048_v42 = vsel %vm10803_vm4, %v4043_v41, %v4047_v15  ;;  %v12882_v61 = vsel %vm11214_vm7, %v8911_v8, %v4708_v63  ;;  %v4710_v7 = vrot.slane %v4708_v63, 4  ;;  %v8912_v20 = vrot.slane %v4647_v30, 9  ;;  %10195 = vmatprep.subr.bf16.mxu0 %v10520_v48  ;;  %v10583_v30 = vld [vmem:[#allocation2 + $0x40] sm:$0xf]  ;;  %v10525_v41 = vld [vmem:[%s14880_s3 + $0x158] sm:$0xff]  }
 0x2a1   : > { %v8876_v55 = vcombine.low %v4038_v54, %v4048_v42  ;;  %v12889_v13 = vsel %vm11214_vm7, %v4703_v59, %v4704_v35  ;;  %v4715_v46 = vrot.slane %v10581_v47, 5  ;;  %v4718_v62 = vrot.slane %v12583_v40, 5  ;;  %v10582_v54 = vld [vmem:[#allocation2 + $0x34] sm:$0xf]  ;;  %v4652_v42 = vld [vmem:[#allocation2 + $0x60] sm:$0xe] }
 0x2a2   : > { %10116 = vmatmul.mubr.bf16.gmra.mxu0 %v10504_v11  ;;  %v8942_v15 = vcombine.low %v12876_v50, %v12889_v13  ;;  %v12896_v34 = vsel %vm11214_vm7, %v4710_v7, %v4711_v1  ;;  %v8913_v6 = vrot.slane %v4648_v24, 9  ;;  %v4722_v26 = vrot.slane %v10582_v54, 5  ;;  %v4651_v63 = vld [vmem:[#allocation2 + $0x54] sm:$0xe]  ;;  %v10507_v11 = vld [vmem:[#allocation2 + $0x48] sm:$0xff]  }
 0x2a3   : > { %10119 = vmatprep.mubr.bf16.mxu0 %v10506_v38  ;;  %v8943_v3 = vcombine.low %v12882_v61, %v12896_v34  ;;  %v12902_v40 = vsel %vm11214_vm7, %v8912_v20, %v4715_v46  ;;  %v4717_v14 = vrot.slane %v4715_v46, 4  ;;  %v4725_v10 = vrot.slane %v12622_v28, 5  ;;  %10196 = vmatpush3.bf16.msra.mxu0 %v10520_v48  ;;  %v4653_v46 = vld [vmem:[#allocation2 + $0x6c] sm:$0xe] }
 0x2a4   : > { %v12907_v27 = vsel %vm11214_vm7, %v8913_v6, %v4722_v26  ;;  %v4724_v35 = vrot.slane %v4722_v26, 4  ;;  %v8914_v8 = vrot.slane %v4649_v37, 9  ;;  %v4729_v23 = vrot.slane %v10583_v30, 5  ;;  %10197 = vmatprep.subr.bf16.mxu0 %v10522_v22  ;;  %v10509_v37 = vld [vmem:[#allocation2 + $0x54] sm:$0xff]  }
 0x2a5   : > { %9996 = vmatmul.mubr.bf16.gmra.mxu1 %v8876_v55  ;;  %v12914_v19 = vsel %vm11214_vm7, %v4717_v14, %v4718_v62  ;;  %v4732_v28 = vrot.slane %v12675_v25, 5  ;;  %v8915_v48 = vrot.slane %v4650_v44, 9  ;;  %v4736_v2 = vrot.slane %v12601_v16, 5  ;;  %v10527_v62 = vld [vmem:[%s14880_s3 + $0x150] sm:$0xff]  }
 0x2a6   : > { %10063 = vmatprep.mubr.bf16.mxu1 %v8941_v32  ;;  %v8944_v59 = vcombine.low %v12902_v40, %v12914_v19  ;;  %v12922_v0 = vsel %vm11214_vm7, %v4724_v35, %v4725_v10  ;;  %v12926_v1 = vsel %vm11214_vm7, %v8914_v8, %v4729_v23  ;;  %v4731_v24 = vrot.slane %v4729_v23, 4  ;;  %v10508_v10 = vld [vmem:[%s14880_s3 + $0x130] sm:$0xff]  }
 0x2a7   : > { %v8945_v25 = vcombine.low %v12907_v27, %v12922_v0  ;;  %v12932_v16 = vsel %vm11214_vm7, %v8915_v48, %v4736_v2  ;;  %v4738_v32 = vrot.slane %v4736_v2, 4  ;;  %v4739_v7 = vrot.slane %v12701_v12, 5  ;;  %10198 = vmatpush3.bf16.msra.mxu0 %v10522_v22  ;;  %v4655_v2 = vld [vmem:[#allocation2 + $0x84] sm:$0xe] }
 0x2a8   : > { %v12937_v20 = vsel %vm11214_vm7, %v4731_v24, %v4732_v28  ;;  %v8916_v55 = vrot.slane %v4651_v63, 9  ;;  %v4743_v38 = vrot.slane %v12649_v58, 5  ;;  %v4746_v47 = vrot.slane %v12735_v4, 5  ;;  %10199 = vmatprep.subr.bf16.mxu0 %v10525_v41  ;;  %v4654_v58 = vld [vmem:[#allocation2 + $0x78] sm:$0xe]  ;;  %v10530_v63 = vld [vmem:[%s14880_s3 + $0x148] sm:$0xff]  }
 0x2a9   : > { %v8946_v12 = vcombine.low %v12926_v1, %v12937_v20  ;;  %v12948_v22 = vsel %vm11214_vm7, %v4738_v32, %v4739_v7  ;;  %v8917_v6 = vrot.slane %v4652_v42, 9  ;;  %v4750_v54 = vrot.slane %v12687_v43, 5  ;;  %v4656_v24 = vld [vmem:[#allocation2 + $0x90] sm:$0xe]  ;;  %v4657_v7 = vld [vmem:[#allocation2 + $0x9c] sm:$0xe] }
 0x2aa   : > { %10120 = vmatmul.mubr.bf16.gmra.mxu0 %v10507_v11  ;;  %v8947_v4 = vcombine.low %v12932_v16, %v12948_v22  ;;  %v12955_v26 = vsel %vm11214_vm7, %v8916_v55, %v4743_v38  ;;  %v4745_v44 = vrot.slane %v4743_v38, 4  ;;  %v4753_v14 = vrot.slane %v12752_v17, 5  ;;  %v6266_v11 = vld [vmem:[#allocation2 + $0xc] sm:$0xe]  ;;  %v10510_v55 = vld [vmem:[#allocation2 + $0x60] sm:$0xff]  }
 0x2ab   : > { %10123 = vmatprep.mubr.bf16.mxu0 %v10509_v37  ;;  %v12963_v43 = vsel %vm11214_vm7, %v8917_v6, %v4750_v54  ;;  %v4752_v35 = vrot.slane %v4750_v54, 4  ;;  %v8918_v8 = vrot.slane %v4653_v46, 9  ;;  %v4757_v30 = vrot.slane %v12712_v60, 5  ;;  %10200 = vmatpush3.bf16.msra.mxu0 %v10525_v41  ;;  %v13015_v37 = vld [vmem:[#allocation2 + $0x10] sm:$0xf]  ;;  %v10529_v16 = vld [vmem:[%s14880_s3 + $0x108] sm:$0xff]  }
 0x2ac   : > { %v12968_v23 = vsel %vm11214_vm7, %v4745_v44, %v4746_v47  ;;  %v4760_v17 = vrot.slane %v12774_v49, 5  ;;  %v8919_v28 = vrot.slane %v4654_v58, 9  ;;  %v4764_v48 = vrot.slane %v12745_v9, 5  ;;  %10201 = vmatprep.subr.bf16.mxu0 %v10527_v62  ;;  %v10512_v6 = vld [vmem:[#allocation2 + $0x6c] sm:$0xff]   ;;  %v13024_v58 = vld [vmem:[#allocation2 + $0x14] sm:$0x1] }
 0x2ad   : > { %10064 = vmatmul.mubr.bf16.vlgmr.msra.gmra.mxu1 %v8942_v15  ;;  %v8948_v60 = vcombine.low %v12955_v26, %v12968_v23  ;;  %v12982_v41 = vsel %vm11214_vm7, %v4752_v35, %v4753_v14  ;;  %v12986_v9 = vsel %vm11214_vm7, %v8918_v8, %v4757_v30  ;;  %v4759_v49 = vrot.slane %v4757_v30, 4  ;;  %v6267_v30 = vld [vmem:[#allocation2 + $0x18] sm:$0xe]  ;;  %v13180_v22 = vld [vmem:[#allocation2 + $0x44] sm:$0x1] }
 0x2ae   : > { %10144 = vmatpush3.bf16.msra.mxu1 %v12670_v57  ;;  %10067 = vmatprep.mubr.bf16.mxu1 %v8943_v3  ;;  %v8949_v50 = vcombine.low %v12963_v43, %v12982_v41  ;;  %v12996_v13 = vsel %vm11214_vm7, %v8919_v28, %v4764_v48  ;;  %v4766_v15 = vrot.slane %v4764_v48, 4  ;;  %v4767_v42 = vrot.slane %v12791_v29, 5  ;;  %v10511_v57 = vld [vmem:[%s14880_s3 + $0x128] sm:$0xff]  }
 0x2af   : > { %10145 = vmatprep.subr.bf16.mxu1 %v10508_v10  ;;  %v13004_v61 = vsel %vm11214_vm7, %v4759_v49, %v4760_v17  ;;  %v8920_v34 = vrot.slane %v4655_v2, 9  ;;  %v4771_v3 = vrot.slane %v12757_v53, 5  ;;  %v4774_v32 = vrot.slane %v12807_v51, 5  ;;  %10202 = vmatpush3.bf16.msra.mxu0 %v10527_v62  ;;  %v4658_v2 = vld [vmem:[#allocation2 + $0xa8] sm:$0xe] }
 0x2b0   : > { %v8950_v29 = vcombine.low %v12986_v9, %v13004_v61  ;;  %v13012_v38 = vsel %vm11214_vm7, %v4766_v15, %v4767_v42  ;;  %v8921_v47 = vrot.slane %v4656_v24, 9  ;;  %v4778_v46 = vrot.slane %v12778_v52, 5  ;;  %10203 = vmatprep.subr.bf16.mxu0 %v10530_v63  ;;  %v10531_v52 = vld [vmem:[%s14880_s3 + $0x140] sm:$0xff]   ;;  %v13053_v42 = vld [vmem:[#allocation2 + $0x1c] sm:$0xf] }
 0x2b1   : > { %v8951_v53 = vcombine.low %v12996_v13, %v13012_v38  ;;  %v13021_v51 = vsel %vm11214_vm7, %v8920_v34, %v4771_v3  ;;  %v4773_v62 = vrot.slane %v4771_v3, 4  ;;  %v4781_v54 = vrot.slane %v12814_v36, 5  ;;  %v10514_v36 = vld [vmem:[%s14880_s3 + $0x120] sm:$0xff]   ;;  %v6271_v41 = vld [vmem:[#allocation2 + $0x48] sm:$0xe] }
 0x2b2   : > { %10146 = vmatpush3.bf16.msra.mxu1 %v10508_v10  ;;  %10124 = vmatmul.mubr.bf16.gmra.mxu0 %v10510_v55  ;;  %v13031_v44 = vsel %vm11214_vm7, %v8921_v47, %v4778_v46  ;;  %v4780_v14 = vrot.slane %v4778_v46, 4  ;;  %v8922_v35 = vrot.slane %v4657_v7, 9  ;;  %v4785_v8 = vrot.slane %v12795_v31, 5  ;;  %v13070_v7 = vld [vmem:[%s14880_s3 + $0x1f8] sm:$0xff]   ;;  %v4659_v47 = vld [vmem:[#allocation2 + $0xb4] sm:$0xe] }
 0x2b3   : > { %10147 = vmatprep.subr.bf16.mxu1 %v10511_v57  ;;  %10127 = vmatprep.mubr.bf16.mxu0 %v10512_v6  ;;  %v13039_v17 = vsel %vm11214_vm7, %v4773_v62, %v4774_v32  ;;  %v4788_v10 = vrot.slane %v12829_v33, 5  ;;  %v9045_v28 = vrot.slane %v6266_v11, 9  ;;  %v6332_v48 = vrot.slane %v13015_v37, 5  ;;  %v13055_v33 = vld [vmem:[#allocation2 + $0x20] sm:$0x1]  ;;  %v10519_v46 = vld [vmem:[%s14880_s3 + $0x118] sm:$0xff]  }
 0x2b4   : > { %v8952_v31 = vcombine.low %v13021_v51, %v13039_v17  ;;  %v13047_v49 = vsel %vm11214_vm7, %v4780_v14, %v4781_v54  ;;  %v13051_v24 = vsel %vm11214_vm7, %v8922_v35, %v4785_v8  ;;  %v4787_v15 = vrot.slane %v4785_v8, 4  ;;  %10204 = vmatpush3.bf16.msra.mxu0 %v10530_v63  ;;  %v6268_v63 = vld [vmem:[#allocation2 + $0x24] sm:$0xe]  ;;  %v13091_v6 = vld [vmem:[#allocation2 + $0x28] sm:$0xf] }
 0x2b5   : > { %10068 = vmatmul.mubr.bf16.gmra.mxu1 %v8944_v59  ;;  %v8953_v11 = vcombine.low %v13031_v44, %v13047_v49  ;;  %v13064_v34 = vsel %vm11214_vm7, %v9045_v28, %v6332_v48  ;;  %v6334_v3 = vrot.slane %v6332_v48, 4  ;;  %v6335_v32 = vrot.slane %v13024_v58, 5  ;;  %10205 = vmatprep.subr.bf16.mxu0 %v10531_v52  ;;  %v10516_v35 = vld [vmem:[#allocation2 + $0x84] sm:$0xff]   ;;  %v13105_v48 = vld [vmem:[#allocation2 + $0x2c] sm:$0x1] }
 0x2b6   : > { %10071 = vmatprep.mubr.bf16.mxu1 %v8945_v25  ;;  %10148 = vmatpush3.bf16.msra.mxu1 %v10511_v57  ;;  %v13077_v40 = vsel %vm11214_vm7, %v4787_v15, %v4788_v10  ;;  %v8923_v19 = vrot.slane %v4658_v2, 9  ;;  %v4792_v59 = vrot.slane %v12811_v45, 5  ;;  %v4795_v55 = vrot.slane %v12834_v5, 5  ;;  %v10513_v45 = vld [vmem:[#allocation2 + $0x78] sm:$0xff]  }
 0x2b7   : > { %10149 = vmatprep.subr.bf16.mxu1 %v10514_v36  ;;  %v13088_v0 = vsel %vm11214_vm7, %v6334_v3, %v6335_v32  ;;  %v9046_v25 = vrot.slane %v6267_v30, 9  ;;  %v6339_v57 = vrot.slane %v13053_v42, 5  ;;  %v6342_v14 = vrot.slane %v13055_v33, 5  ;;  %v5512_v32 = vld [vmem:[#allocation2 + $0xc] sm:$0xf] }
 0x2b8   : > { %v9077_v5 = vcombine.low %v13064_v34, %v13088_v0  ;;  %v13097_v62 = vsel %vm11214_vm7, %v8923_v19, %v4792_v59  ;;  %v4794_v54 = vrot.slane %v4792_v59, 4  ;;  %10206 = vmatpush3.bf16.msra.mxu0 %v10531_v52  ;;  %v8924_v10 = vrot.slane %v4659_v47, 9 }
 0x2b9   : > { %v13102_v8 = vsel %vm11214_vm7, %v9046_v25, %v6339_v57  ;;  %v6341_v30 = vrot.slane %v6339_v57, 4  ;;  %v4799_v28 = vrot.slane %v12821_v39, 5  ;;  %10287 = vmatprep.subr.bf16.mxu0 %v13070_v7  ;;  %v4802_v2 = vrot.slane %v12843_v21, 5  ;;  %v10524_v39 = vld [vmem:[%s14880_s3 + $0x110] sm:$0xff]  }
 0x2ba   : > { %10128 = vmatmul.mubr.bf16.gmra.mxu0 %v10513_v45  ;;  %10150 = vmatpush3.bf16.msra.mxu1 %v10514_v36  ;;  %v13110_v52 = vsel %vm11214_vm7, %v4794_v54, %v4795_v55  ;;  %v9047_v15 = vrot.slane %v6268_v63, 9  ;;  %v6346_v3 = vrot.slane %v13091_v6, 5  ;;  %v6349_v25 = vrot.slane %v13105_v48, 5  ;;  %v6269_v57 = vld [vmem:[#allocation2 + $0x30] sm:$0xe] }
 0x2bb   : > { %10131 = vmatprep.mubr.bf16.mxu0 %v10516_v35  ;;  %10151 = vmatprep.subr.bf16.mxu1 %v10519_v46  ;;  %v13121_v36 = vsel %vm11214_vm7, %v6341_v30, %v6342_v14  ;;  %v13125_v21 = vsel %vm11214_vm7, %v8924_v10, %v4799_v28  ;;  %v4801_v63 = vrot.slane %v4799_v28, 4  ;;  %v5561_v54 = vshrl.u32 %v5512_v32, 16  ;;  %v13142_v30 = vld [vmem:[#allocation2 + $0x34] sm:$0xf]  ;;  %v13155_v28 = vld [vmem:[#allocation2 + $0x38] sm:$0x1] }
 0x2bc   : > { %v13131_v55 = vsel %vm11214_vm7, %v9047_v15, %v6346_v3  ;;  %v6348_v47 = vrot.slane %v6346_v3, 4  ;;  %v5564_v14 = vshll.u32 %v5512_v32, 16  ;;  %v5570_v35 = vshll.u32 %v13015_v37, 16  ;;  %v10518_v3 = vld [vmem:[#allocation2 + $0x90] sm:$0xff]  }
 0x2bd   : > { %10072 = vmatmul.mubr.bf16.gmra.mxu1 %v8946_v12  ;;  %v13139_v45 = vsel %vm11214_vm7, %v4801_v63, %v4802_v2  ;;  %v5574_v20 = vshrl.u32 %v13015_v37, 16  ;;  %v5580_v12 = vshll.u32 %v13024_v58, 16  ;;  %v5515_v2 = vld [vmem:[#allocation2 + $0x18] sm:$0xf]  ;;  %v9048_v37 = vrot.slane %v6269_v57, 9 }
 0x2be   : > { %10075 = vmatprep.mubr.bf16.mxu1 %v8947_v4  ;;  %10152 = vmatpush3.bf16.msra.mxu1 %v10519_v46  ;;  %v13151_v1 = vsel %vm11214_vm7, %v6348_v47, %v6349_v25  ;;  %v5563_v4 = vrot.slane %v5561_v54, 4  ;;  %v5566_v46 = vrot.slane %v5564_v14, 5  ;;  %v5572_v15 = vrot.slane %v5570_v35, 5  ;;  %v10521_v47 = vld [vmem:[#allocation2 + $0x9c] sm:$0xff]  }
 0x2bf   : > { %10153 = vmatprep.subr.bf16.mxu1 %v10524_v39  ;;  %v5576_v32 = vrot.slane %v5574_v20, 4  ;;  %v5582_v63 = vrot.slane %v5580_v12, 5  ;;  %v6353_v58 = vrot.slane %v13142_v30, 5  ;;  %v6356_v10 = vrot.slane %v13155_v28, 5  ;;  %v13169_v20 = vld [vmem:[#allocation2 + $0x40] sm:$0xf] }
 0x2c0   : > { %v5567_v25 = vor.u32 %v5566_v46, %v5563_v4  ;;  %v5585_v19 = vshrl.u32 %v5515_v2, 16  ;;  %v5588_v27 = vshll.u32 %v5515_v2, 16  ;;  %v5594_v35 = vshll.u32 %v13053_v42, 16  ;;  %v6270_v57 = vld [vmem:[#allocation2 + $0x3c] sm:$0xe]  ;;  %v10532_v12 = vld [vmem:[%s14880_s3 + $0x100] sm:$0xff]  }
 0x2c1   : > { %v5577_v59 = vor.u32 %v5576_v32, %v5572_v15  ;;  %v13166_v54 = vsel %vm11214_vm7, %v9048_v37, %v6353_v58  ;;  %v6355_v14 = vrot.slane %v6353_v58, 4  ;;  %v5598_v46 = vshrl.u32 %v13053_v42, 16 }
 0x2c2   : > { %10132 = vmatmul.mubr.bf16.gmra.mxu0 %v10518_v3  ;;  %10154 = vmatpush3.bf16.msra.mxu1 %v10524_v39  ;;  %v5568_v2 = vrot.slane %v5567_v25, 4  ;;  %v5587_v4 = vrot.slane %v5585_v19, 4  ;;  %v5590_v39 = vrot.slane %v5588_v27, 5  ;;  %v5596_v37 = vrot.slane %v5594_v35, 5 }
 0x2c3   : > { %10135 = vmatprep.mubr.bf16.mxu0 %v10521_v47  ;;  %10155 = vmatprep.subr.bf16.mxu1 %v10529_v16  ;;  %v5578_v3 = vrot.slane %v5577_v59, 4  ;;  %v13177_v32 = vsel %vm11214_vm7, %v6355_v14, %v6356_v10  ;;  %v5604_v58 = vshll.u32 %v13055_v33, 16  ;;  %v5600_v59 = vrot.slane %v5598_v46, 4  ;;  %v5518_v47 = vld [vmem:[#allocation2 + $0x24] sm:$0xf] }
 0x2c4   : > { %v5573_v19 = vsel %vm10803_vm4, %v5568_v2, %v5572_v15  ;;  %v9080_v42 = vcombine.low %v13166_v54, %v13177_v32  ;;  %v5591_v27 = vor.u32 %v5590_v39, %v5587_v4  ;;  %v9049_v26 = vrot.slane %v6270_v57, 9  ;;  %v13200_v15 = vld [vmem:[%s14880_s3 + $0x1b8] sm:$0xff]   ;;  %v5521_v2 = vld [vmem:[#allocation2 + $0x30] sm:$0xf] }
 0x2c5   : > { %10076 = vmatmul.mubr.bf16.gmra.mxu1 %v8948_v60  ;;  %v5583_v33 = vsel %vm10803_vm4, %v5578_v3, %v5582_v63  ;;  %v5606_v10 = vrot.slane %v5604_v58, 5  ;;  %v6360_v23 = vrot.slane %v13169_v20, 5  ;;  %v5601_v14 = vor.u32 %v5600_v59, %v5596_v37  ;;  %v10526_v4 = vld [vmem:[#allocation2 + $0xb4] sm:$0xff]  }
 0x2c6   : > { %10079 = vmatprep.mubr.bf16.mxu1 %v8949_v50  ;;  %10156 = vmatpush3.bf16.msra.mxu1 %v10529_v16  ;;  %v13195_v60 = vcombine.low %v5573_v19, %v5583_v33  ;;  %v5592_v25 = vrot.slane %v5591_v27, 4  ;;  %v6363_v43 = vrot.slane %v13180_v22, 5  ;;  %v10523_v50 = vld [vmem:[#allocation2 + $0xa8] sm:$0xff]   ;;  %v5609_v35 = vshrl.u32 %v5518_v47, 16 }
 0x2c7   : > { %10157 = vmatprep.subr.bf16.mxu1 %v10532_v12  ;;  %v13205_v16 = vsel %vm11214_vm7, %v9049_v26, %v6360_v23  ;;  %v6362_v63 = vrot.slane %v6360_v23, 4  ;;  %v5612_v57 = vshll.u32 %v5518_v47, 16  ;;  %v5602_v46 = vrot.slane %v5601_v14, 4  ;;  %v13211_v19 = vld [vmem:[#allocation2 + $0x4c] sm:$0xf] }
 0x2c8   : > { %v5597_v39 = vsel %vm10803_vm4, %v5592_v25, %v5596_v37  ;;  %v5618_v3 = vshll.u32 %v13091_v6, 16  ;;  %v5622_v58 = vshrl.u32 %v13091_v6, 16  ;;  %v5611_v59 = vrot.slane %v5609_v35, 4  ;;  %v13218_v26 = vld [vmem:[#allocation2 + $0x50] sm:$0x1] }
 0x2c9   : > { %v13215_v27 = vsel %vm11214_vm7, %v6362_v63, %v6363_v43  ;;  %v5614_v47 = vrot.slane %v5612_v57, 5  ;;  %v5628_v33 = vshll.u32 %v13105_v48, 16  ;;  %v5607_v6 = vsel %vm10803_vm4, %v5602_v46, %v5606_v10  ;;  %v6272_v46 = vld [vmem:[#allocation2 + $0x54] sm:$0xe] }
 0x2ca   : > { %10136 = vmatmul.mubr.bf16.gmra.mxu0 %v10523_v50  ;;  %10158 = vmatpush3.bf16.msra.mxu1 %v10532_v12  ;;  %v9081_v37 = vcombine.low %v13205_v16, %v13215_v27  ;;  %v5620_v12 = vrot.slane %v5618_v3, 5  ;;  %v5624_v23 = vrot.slane %v5622_v58, 4  ;;  %v13225_v25 = vcombine.low %v5597_v39, %v5607_v6  ;;  %v5524_v3 = vld [vmem:[#allocation2 + $0x3c] sm:$0xf] }
 0x2cb   : > { %10139 = vmatprep.mubr.bf16.mxu0 %v10526_v4  ;;  %10239 = vmatprep.subr.bf16.mxu1 %v13200_v15  ;;  %v5615_v14 = vor.u32 %v5614_v47, %v5611_v59  ;;  %v5630_v43 = vrot.slane %v5628_v33, 5  ;;  %v9050_v50 = vrot.slane %v6271_v41, 9  ;;  %v6367_v63 = vrot.slane %v13211_v19, 5  ;;  %v13241_v59 = vld [vmem:[#allocation2 + $0x58] sm:$0xf]  ;;  %v10528_v47 = vld [vmem:[#allocation2 + $0xc0] sm:$0xff]  }
 0x2cc   : > { %v5625_v48 = vor.u32 %v5624_v23, %v5620_v12  ;;  %v6370_v35 = vrot.slane %v13218_v26, 5  ;;  %v5633_v10 = vshrl.u32 %v5521_v2, 16  ;;  %v5636_v4 = vshll.u32 %v5521_v2, 16  ;;  %v13245_v33 = vld [vmem:[#allocation2 + $0x5c] sm:$0x1] }
 0x2cd   : > { %10080 = vmatmul.mubr.bf16.gmra.mxu1 %v8950_v29  ;;  %v5616_v57 = vrot.slane %v5615_v14, 4  ;;  %v5642_v39 = vshll.u32 %v13142_v30, 16  ;;  %v5646_v41 = vshrl.u32 %v13142_v30, 16  ;;  %v13239_v61 = vsel %vm11214_vm7, %v9050_v50, %v6367_v63  ;;  %v10543_v16 = vld [vmem:[%s14880_s3 + $0x1d8] sm:$0xff]  }
 0x2ce   : > { %10083 = vmatprep.mubr.bf16.mxu1 %v8951_v53  ;;  %v5626_v9 = vrot.slane %v5625_v48, 4  ;;  %v6369_v29 = vrot.slane %v6367_v63, 4  ;;  %v5635_v58 = vrot.slane %v5633_v10, 4  ;;  %v5638_v38 = vrot.slane %v5636_v4, 5 }
 0x2cf   : > { %v5621_v13 = vsel %vm10803_vm4, %v5616_v57, %v5620_v12  ;;  %v5644_v53 = vrot.slane %v5642_v39, 5  ;;  %v5648_v2 = vrot.slane %v5646_v41, 4  ;;  %v5652_v23 = vshll.u32 %v13155_v28, 16 }
 0x2d0   : > { %v5631_v30 = vsel %vm10803_vm4, %v5626_v9, %v5630_v43  ;;  %v13251_v6 = vsel %vm11214_vm7, %v6369_v29, %v6370_v35  ;;  %v9051_v14 = vrot.slane %v6272_v46, 9  ;;  %v5639_v48 = vor.u32 %v5638_v38, %v5635_v58  ;;  %v13264_v46 = vld [vmem:[#allocation2 + $0x64] sm:$0xf]  ;;  %v6273_v29 = vld [vmem:[#allocation2 + $0x60] sm:$0xe] }
 0x2d1   : > { %v13254_v50 = vcombine.low %v5621_v13, %v5631_v30  ;;  %v9082_v12 = vcombine.low %v13239_v61, %v13251_v6  ;;  %v5649_v63 = vor.u32 %v5648_v2, %v5644_v53  ;;  %v5654_v43 = vrot.slane %v5652_v23, 5  ;;  %v13281_v58 = vld [vmem:[#allocation2 + $0x68] sm:$0x1]  ;;  %v10538_v30 = vld [vmem:[%s14880_s3 + $0x1f0] sm:$0xff]  }
 0x2d2   : > { %10140 = vmatmul.mubr.bf16.gmra.mxu0 %v10528_v47  ;;  %v6374_v10 = vrot.slane %v13241_v59, 5  ;;  %v6377_v35 = vrot.slane %v13245_v33, 5  ;;  %v5657_v57 = vshrl.u32 %v5524_v3, 16  ;;  %v5640_v28 = vrot.slane %v5639_v48, 4  ;;  %v5527_v47 = vld [vmem:[#allocation2 + $0x48] sm:$0xf] }
 0x2d3   : > { %10207 = vmatprep.mubr.bf16.mxu0 %v9077_v5  ;;  %v5650_v4 = vrot.slane %v5649_v63, 4  ;;  %v5660_v39 = vshll.u32 %v5524_v3, 16  ;;  %v5666_v41 = vshll.u32 %v13169_v20, 16  ;;  %v5670_v9 = vshrl.u32 %v13169_v20, 16 }
 0x2d4   : > { %v13271_v34 = vsel %vm11214_vm7, %v9051_v14, %v6374_v10  ;;  %v6376_v0 = vrot.slane %v6374_v10, 4  ;;  %v5659_v5 = vrot.slane %v5657_v57, 4  ;;  %v5645_v3 = vsel %vm10803_vm4, %v5640_v28, %v5644_v53  ;;  %v6274_v28 = vld [vmem:[#allocation2 + $0x6c] sm:$0xe] }
 0x2d5   : > { %10084 = vmatmul.mubr.bf16.gmra.mxu1 %v8952_v31  ;;  %v5655_v51 = vsel %vm10803_vm4, %v5650_v4, %v5654_v43  ;;  %v5662_v17 = vrot.slane %v5660_v39, 5  ;;  %v5668_v31 = vrot.slane %v5666_v41, 5  ;;  %v5672_v38 = vrot.slane %v5670_v9, 4  ;;  %v5530_v4 = vld [vmem:[#allocation2 + $0x54] sm:$0xf] }
 0x2d6   : > { %10087 = vmatprep.mubr.bf16.mxu1 %v8953_v11  ;;  %v13283_v13 = vcombine.low %v5645_v3, %v5655_v51  ;;  %v13287_v20 = vsel %vm11214_vm7, %v6376_v0, %v6377_v35  ;;  %v5676_v44 = vshll.u32 %v13180_v22, 16  ;;  %v9052_v53 = vrot.slane %v6273_v29, 9 }
 0x2d7   : > { %v9083_v49 = vcombine.low %v13271_v34, %v13287_v20  ;;  %v5663_v11 = vor.u32 %v5662_v17, %v5659_v5  ;;  %v6381_v2 = vrot.slane %v13264_v46, 5  ;;  %v5673_v23 = vor.u32 %v5672_v38, %v5668_v31  ;;  %v10546_v34 = vld [vmem:[%s14880_s3 + $0x1c8] sm:$0xff]  }
 0x2d8   : > { %v5678_v14 = vrot.slane %v5676_v44, 5  ;;  %v6384_v48 = vrot.slane %v13281_v58, 5  ;;  %v5681_v63 = vshrl.u32 %v5527_v47, 16  ;;  %v15151_v43 = vcombine.low %v13102_v8, %v13121_v36  ;;  %v13309_v36 = vld [vmem:[#allocation2 + $0x70] sm:$0xf] }
 0x2d9   : > { %v5664_v22 = vrot.slane %v5663_v11, 4  ;;  %v13302_v10 = vsel %vm11214_vm7, %v9052_v53, %v6381_v2  ;;  %v6383_v35 = vrot.slane %v6381_v2, 4  ;;  %v5684_v57 = vshll.u32 %v5527_v47, 16 }
 0x2da   : > { %10208 = vmatmul.mubr.bf16.vlgmr.msra.gmra.mxu0 %v15151_v43  ;;  %v15152_v39 = vcombine.low %v13131_v55, %v13151_v1  ;;  %v5674_v41 = vrot.slane %v5673_v23, 4  ;;  %v5683_v0 = vrot.slane %v5681_v63, 4  ;;  %v5690_v5 = vshll.u32 %v13211_v19, 16  ;;  %v13319_v1 = vld [vmem:[#allocation2 + $0x74] sm:$0x1] }
 0x2db   : > { %v5694_v8 = vshrl.u32 %v13211_v19, 16  ;;  %10288 = vmatpush3.bf16.msra.mxu0 %v13070_v7  ;;  %v5669_v9 = vsel %vm10803_vm4, %v5664_v22, %v5668_v31  ;;  %v13316_v29 = vsel %vm11214_vm7, %v6383_v35, %v6384_v48  ;;  %v5686_v3 = vrot.slane %v5684_v57, 5  ;;  %v10540_v19 = vld [vmem:[%s14880_s3 + $0x1e8] sm:$0xff]   ;;  %v10541_v22 = vld [vmem:[%s14880_s3 + $0x1e0] sm:$0xff]  }
 0x2dc   : > { %10211 = vmatprep.mubr.bf16.mxu0 %v15152_v39  ;;  %v5700_v55 = vshll.u32 %v13218_v26, 16  ;;  %10289 = vmatprep.subr.bf16.mxu0 %v10538_v30  ;;  %v15153_v7 = vcombine.low %v13051_v24, %v13077_v40  ;;  %v5679_v51 = vsel %vm10803_vm4, %v5674_v41, %v5678_v14  ;;  %v9084_v17 = vcombine.low %v13302_v10, %v13316_v29  ;;  %v6275_v14 = vld [vmem:[#allocation2 + $0x78] sm:$0xe] }
 0x2dd   : > { %v5692_v31 = vrot.slane %v5690_v5, 5  ;;  %v5696_v47 = vrot.slane %v5694_v8, 4  ;;  %v15154_v26 = vcombine.low %v13097_v62, %v13110_v52  ;;  %v13334_v38 = vcombine.low %v5669_v9, %v5679_v51  ;;  %v5533_v52 = vld [vmem:[#allocation2 + $0x60] sm:$0xf] }
 0x2de   : > { %10088 = vmatmul.mubr.bf16.gmra.mxu1 %v15153_v7  ;;  %v5687_v44 = vor.u32 %v5686_v3, %v5683_v0  ;;  %v5702_v11 = vrot.slane %v5700_v55, 5  ;;  %v9053_v53 = vrot.slane %v6274_v28, 9  ;;  %v6388_v24 = vrot.slane %v13309_v36, 5  ;;  %v13354_v5 = vld [vmem:[#allocation2 + $0x80] sm:$0x1] }
 0x2df   : > { %10091 = vmatprep.mubr.bf16.mxu1 %v15154_v26  ;;  %v5697_v2 = vor.u32 %v5696_v47, %v5692_v31  ;;  %v6391_v40 = vrot.slane %v13319_v1, 5  ;;  %v5705_v23 = vshrl.u32 %v5530_v4, 16  ;;  %10290 = vmatpush3.bf16.msra.mxu0 %v10538_v30  ;;  %v5708_v63 = vshll.u32 %v5530_v4, 16  ;;  %v13347_v30 = vld [vmem:[#allocation2 + $0x7c] sm:$0xf] }
 0x2e0   : > { %v5688_v48 = vrot.slane %v5687_v44, 4  ;;  %v5714_v43 = vshll.u32 %v13241_v59, 16  ;;  %v5718_v62 = vshrl.u32 %v13241_v59, 16  ;;  %10291 = vmatprep.subr.bf16.mxu0 %v10540_v19  ;;  %v13345_v57 = vsel %vm11214_vm7, %v9053_v53, %v6388_v24  ;;  %v5536_v53 = vld [vmem:[#allocation2 + $0x6c] sm:$0xf] }
 0x2e1   : > { %v5698_v35 = vrot.slane %v5697_v2, 4  ;;  %v6390_v28 = vrot.slane %v6388_v24, 4  ;;  %v5707_v39 = vrot.slane %v5705_v23, 4  ;;  %v5710_v4 = vrot.slane %v5708_v63, 5  ;;  %v13391_v63 = vld [vmem:[#allocation2 + $0x8c] sm:$0x1] }
 0x2e2   : > { %10212 = vmatmul.mubr.bf16.gmra.mxu0 %v9080_v42  ;;  %v5693_v59 = vsel %vm10803_vm4, %v5688_v48, %v5692_v31  ;;  %v5716_v41 = vrot.slane %v5714_v43, 5  ;;  %v5720_v0 = vrot.slane %v5718_v62, 4  ;;  %v5724_v54 = vshll.u32 %v13245_v33, 16  ;;  %v6276_v31 = vld [vmem:[#allocation2 + $0x84] sm:$0xe]  ;;  %v10544_v43 = vld [vmem:[%s14880_s3 + $0x1d0] sm:$0xff]  }
 0x2e3   : > { %10215 = vmatprep.mubr.bf16.mxu0 %v9081_v37  ;;  %v5703_v8 = vsel %vm10803_vm4, %v5698_v35, %v5702_v11  ;;  %v13363_v9 = vsel %vm11214_vm7, %v6390_v28, %v6391_v40  ;;  %v9054_v32 = vrot.slane %v6275_v14, 9  ;;  %10292 = vmatpush3.bf16.msra.mxu0 %v10540_v19  ;;  %v5711_v55 = vor.u32 %v5710_v4, %v5707_v39  ;;  %v13385_v40 = vld [vmem:[#allocation2 + $0x88] sm:$0xf]  ;;  %v10534_v4 = vld [vmem:[%s14880_s3 + $0x1b0] sm:$0xff]  }
 0x2e4   : > { %v13366_v42 = vcombine.low %v5693_v59, %v5703_v8  ;;  %v9085_v3 = vcombine.low %v13345_v57, %v13363_v9  ;;  %v5721_v7 = vor.u32 %v5720_v0, %v5716_v41  ;;  %10293 = vmatprep.subr.bf16.mxu0 %v10541_v22  ;;  %v15155_v27 = vcombine.low %v13125_v21, %v13139_v45 }
 0x2e5   : > { %v5726_v37 = vrot.slane %v5724_v54, 5  ;;  %v6395_v33 = vrot.slane %v13347_v30, 5  ;;  %v6398_v19 = vrot.slane %v13354_v5, 5  ;;  %v5729_v51 = vshrl.u32 %v5533_v52, 16 }
 0x2e6   : > { %10092 = vmatmul.mubr.bf16.gmra.mxu1 %v15155_v27  ;;  %v5712_v47 = vrot.slane %v5711_v55, 4  ;;  %v5722_v26 = vrot.slane %v5721_v7, 4  ;;  %v5732_v44 = vshll.u32 %v5533_v52, 16  ;;  %v5738_v11 = vshll.u32 %v13264_v46, 16 }
 0x2e7   : > { %10159 = vmatprep.mubr.bf16.mxu1 %v13195_v60  ;;  %v13382_v2 = vsel %vm11214_vm7, %v9054_v32, %v6395_v33  ;;  %v6397_v21 = vrot.slane %v6395_v33, 4  ;;  %v5731_v45 = vrot.slane %v5729_v51, 4  ;;  %v5742_v24 = vshrl.u32 %v13264_v46, 16  ;;  %10294 = vmatpush3.bf16.msra.mxu0 %v10541_v22  ;;  %v13420_v32 = vld [vmem:[#allocation2 + $0x94] sm:$0xf] }
 0x2e8   : > { %v5717_v60 = vsel %vm10803_vm4, %v5712_v47, %v5716_v41  ;;  %v5727_v23 = vsel %vm10803_vm4, %v5722_v26, %v5726_v37  ;;  %v5734_v14 = vrot.slane %v5732_v44, 5  ;;  %v5740_v48 = vrot.slane %v5738_v11, 5  ;;  %10295 = vmatprep.subr.bf16.mxu0 %v10543_v16  ;;  %v5539_v51 = vld [vmem:[#allocation2 + $0x78] sm:$0xf] }
 0x2e9   : > { %v13396_v62 = vcombine.low %v5717_v60, %v5727_v23  ;;  %v13400_v46 = vsel %vm11214_vm7, %v6397_v21, %v6398_v19  ;;  %v5744_v52 = vrot.slane %v5742_v24, 4  ;;  %v5748_v22 = vshll.u32 %v13281_v58, 16  ;;  %v13437_v19 = vld [vmem:[#allocation2 + $0x98] sm:$0x1]  ;;  %v10547_v60 = vld [vmem:[%s14880_s3 + $0x1c0] sm:$0xff]  }
 0x2ea   : > { %10216 = vmatmul.mubr.bf16.gmra.mxu0 %v9082_v12  ;;  %v9086_v35 = vcombine.low %v13382_v2, %v13400_v46  ;;  %v5735_v28 = vor.u32 %v5734_v14, %v5731_v45  ;;  %v9055_v39 = vrot.slane %v6276_v31, 9  ;;  %v6402_v59 = vrot.slane %v13385_v40, 5 }
 0x2eb   : > { %10219 = vmatprep.mubr.bf16.mxu0 %v9083_v49  ;;  %v5745_v58 = vor.u32 %v5744_v52, %v5740_v48  ;;  %v5750_v41 = vrot.slane %v5748_v22, 5  ;;  %v6405_v61 = vrot.slane %v13391_v63, 5  ;;  %v5753_v6 = vshrl.u32 %v5536_v53, 16  ;;  %10296 = vmatpush3.bf16.msra.mxu0 %v10543_v16  ;;  %v6277_v16 = vld [vmem:[#allocation2 + $0x90] sm:$0xe] }
 0x2ec   : > { %v5736_v12 = vrot.slane %v5735_v28, 4  ;;  %v13418_v0 = vsel %vm11214_vm7, %v9055_v39, %v6402_v59  ;;  %v6404_v8 = vrot.slane %v6402_v59, 4  ;;  %v5756_v54 = vshll.u32 %v5536_v53, 16  ;;  %10297 = vmatprep.subr.bf16.mxu0 %v10544_v43  ;;  %v6278_v52 = vld [vmem:[#allocation2 + $0x9c] sm:$0xe]  ;;  %v10536_v28 = vld [vmem:[%s14880_s3 + $0x1a0] sm:$0xff]  }
 0x2ed   : > { %v5746_v20 = vrot.slane %v5745_v58, 4  ;;  %v5755_v49 = vrot.slane %v5753_v6, 4  ;;  %v5762_v55 = vshll.u32 %v13309_v36, 16  ;;  %v5766_v7 = vshrl.u32 %v13309_v36, 16  ;;  %v5542_v22 = vld [vmem:[#allocation2 + $0x84] sm:$0xf] }
 0x2ee   : > { %10160 = vmatmul.mubr.bf16.vlgmr.msra.gmra.mxu1 %v13225_v25  ;;  %v5741_v27 = vsel %vm10803_vm4, %v5736_v12, %v5740_v48  ;;  %v13434_v37 = vsel %vm11214_vm7, %v6404_v8, %v6405_v61  ;;  %v5758_v33 = vrot.slane %v5756_v54, 5  ;;  %v5772_v25 = vshll.u32 %v13319_v1, 16  ;;  %v13468_v59 = vld [vmem:[#allocation2 + $0xa0] sm:$0xf]  ;;  %v13474_v58 = vld [vmem:[#allocation2 + $0xa4] sm:$0x1] }
 0x2ef   : > { %10240 = vmatpush3.bf16.msra.mxu1 %v13200_v15  ;;  %10163 = vmatprep.mubr.bf16.mxu1 %v13254_v50  ;;  %v10535_v15 = vld [vmem:[%s14880_s3 + $0x1a8] sm:$0xff]   ;;  %v5751_v50 = vsel %vm10803_vm4, %v5746_v20, %v5750_v41  ;;  %v9087_v36 = vcombine.low %v13418_v0, %v13434_v37  ;;  %v5764_v31 = vrot.slane %v5762_v55, 5  ;;  %v5768_v47 = vrot.slane %v5766_v7, 4  ;;  %v10539_v20 = vld [vmem:[%s14880_s3 + $0x198] sm:$0xff]  }
 0x2f0   : > { %10241 = vmatprep.subr.bf16.mxu1 %v10534_v4  ;;  %10298 = vmatpush3.bf16.msra.mxu0 %v10544_v43  ;;  %v13446_v26 = vcombine.low %v5741_v27, %v5751_v50  ;;  %v5759_v1 = vor.u32 %v5758_v33, %v5755_v49  ;;  %v5774_v44 = vrot.slane %v5772_v25, 5  ;;  %v9056_v11 = vrot.slane %v6277_v16, 9 }
 0x2f1   : > { %10299 = vmatprep.subr.bf16.mxu0 %v10546_v34  ;;  %v5769_v53 = vor.u32 %v5768_v47, %v5764_v31  ;;  %v6409_v21 = vrot.slane %v13420_v32, 5  ;;  %v6412_v45 = vrot.slane %v13437_v19, 5  ;;  %v5777_v24 = vshrl.u32 %v5539_v51, 16 }
 0x2f2   : > { %10220 = vmatmul.mubr.bf16.gmra.mxu0 %v9084_v17  ;;  %v5760_v23 = vrot.slane %v5759_v1, 4  ;;  %v5780_v14 = vshll.u32 %v5539_v51, 16  ;;  %v5786_v48 = vshll.u32 %v13347_v30, 16  ;;  %v5790_v43 = vshrl.u32 %v13347_v30, 16  ;;  %v13470_v30 = vpop.f32.mrf.mxu0  ;;  %v5545_v51 = vld [vmem:[#allocation2 + $0x90] sm:$0xf] }
 0x2f3   : > { %10242 = vmatpush3.bf16.msra.mxu1 %v10534_v4  ;;  %10223 = vmatprep.mubr.bf16.mxu0 %v9085_v3  ;;  %v5770_v39 = vrot.slane %v5769_v53, 4  ;;  %v13466_v10 = vsel %vm11214_vm7, %v9056_v11, %v6409_v21  ;;  %v6411_v29 = vrot.slane %v6409_v21, 4  ;;  %v5779_v17 = vrot.slane %v5777_v24, 4  ;;  %v6279_v1 = vld [vmem:[#allocation2 + $0xa8] sm:$0xe] }
 0x2f4   : > { %10243 = vmatprep.subr.bf16.mxu1 %v10535_v15  ;;  %v5765_v4 = vsel %vm10803_vm4, %v5760_v23, %v5764_v31  ;;  %v5782_v57 = vrot.slane %v5780_v14, 5  ;;  %v5788_v9 = vrot.slane %v5786_v48, 5  ;;  %v5792_v3 = vrot.slane %v5790_v43, 4  ;;  %10300 = vmatpush3.bf16.msra.mxu0 %v10546_v34  ;;  %v13512_v24 = vld [vmem:[#allocation2 + $0xb0] sm:$0x1] }
 0x2f5   : > { %v5775_v41 = vsel %vm10803_vm4, %v5770_v39, %v5774_v44  ;;  %v13481_v61 = vsel %vm11214_vm7, %v6411_v29, %v6412_v45  ;;  %v5796_v6 = vshll.u32 %v13354_v5, 16  ;;  %v9057_v12 = vrot.slane %v6278_v52, 9  ;;  %10301 = vmatprep.subr.bf16.mxu0 %v10547_v60  ;;  %v13510_v45 = vld [vmem:[#allocation2 + $0xac] sm:$0xf] }
 0x2f6   : > { %10164 = vmatmul.mubr.bf16.gmra.mxu1 %v13283_v13  ;;  %v13485_v8 = vcombine.low %v5765_v4, %v5775_v41  ;;  %v9088_v54 = vcombine.low %v13466_v10, %v13481_v61  ;;  %v5783_v13 = vor.u32 %v5782_v57, %v5779_v17  ;;  %v6416_v34 = vrot.slane %v13468_v59, 5  ;;  %v6280_v17 = vld [vmem:[#allocation2 + $0xb4] sm:$0xe]  ;;  %v5548_v4 = vld [vmem:[#allocation2 + $0x9c] sm:$0xf] }
 0x2f7   : > { %10167 = vmatprep.mubr.bf16.mxu1 %v13334_v38  ;;  %10244 = vmatpush3.bf16.msra.mxu1 %v10535_v15  ;;  %v5793_v49 = vor.u32 %v5792_v3, %v5788_v9  ;;  %v5798_v5 = vrot.slane %v5796_v6, 5  ;;  %v6419_v55 = vrot.slane %v13474_v58, 5  ;;  %v5801_v7 = vshrl.u32 %v5542_v22, 16  ;;  %v13494_v38 = vpop.f32.mrf.mxu0  ;;  %v13537_v41 = vld [vmem:[#allocation2 + $0xb8] sm:$0xf] }
 0x2f8   : > { %10245 = vmatprep.subr.bf16.mxu1 %v10536_v28  ;;  %v5784_v16 = vrot.slane %v5783_v13, 4  ;;  %v13498_v27 = vsel %vm11214_vm7, %v9057_v12, %v6416_v34  ;;  %v6418_v33 = vrot.slane %v6416_v34, 4  ;;  %v5804_v25 = vshll.u32 %v5542_v22, 16  ;;  %10302 = vmatpush3.bf16.msra.mxu0 %v10547_v60  ;;  %v13543_v34 = vld [vmem:[#allocation2 + $0xbc] sm:$0x1] }
 0x2f9   : > { %v5794_v15 = vrot.slane %v5793_v49, 4  ;;  %v5803_v50 = vrot.slane %v5801_v7, 4  ;;  %v5810_v31 = vshll.u32 %v13385_v40, 16  ;;  %v5814_v47 = vshrl.u32 %v13385_v40, 16  ;;  %v13523_v60 = vpop.f32.mrf.mxu0 }
 0x2fa   : > { %10224 = vmatmul.mubr.bf16.gmra.mxu0 %v9086_v35  ;;  %v5789_v44 = vsel %vm10803_vm4, %v5784_v16, %v5788_v9  ;;  %v6420_v11 = vsel %vm11214_vm7, %v6418_v33, %v6419_v55  ;;  %v5806_v53 = vrot.slane %v5804_v25, 5  ;;  %v5820_v21 = vshll.u32 %v13391_v63, 16  ;;  %v10542_v63 = vld [vmem:[%s14880_s3 + $0x190] sm:$0xff]  }
 0x2fb   : > { %10246 = vmatpush3.bf16.msra.mxu1 %v10536_v28  ;;  %10227 = vmatprep.mubr.bf16.mxu0 %v9087_v36  ;;  %v5799_v2 = vsel %vm10803_vm4, %v5794_v15, %v5798_v5  ;;  %v9089_v40 = vcombine.low %v13498_v27, %v6420_v11  ;;  %v5812_v46 = vrot.slane %v5810_v31, 5  ;;  %v5816_v35 = vrot.slane %v5814_v47, 4 }
 0x2fc   : > { %10247 = vmatprep.subr.bf16.mxu1 %v10539_v20  ;;  %v13525_v23 = vcombine.low %v5789_v44, %v5799_v2  ;;  %v5807_v14 = vor.u32 %v5806_v53, %v5803_v50  ;;  %v5822_v48 = vrot.slane %v5820_v21, 5  ;;  %v9058_v0 = vrot.slane %v6279_v1, 9  ;;  %v10548_v44 = vld [vmem:[%s14880_s3 + $0x180] sm:$0xff]  }
 0x2fd   : > { %v5817_v37 = vor.u32 %v5816_v35, %v5812_v46  ;;  %v6423_v36 = vrot.slane %v13510_v45, 5  ;;  %v6426_v43 = vrot.slane %v13512_v24, 5  ;;  %v5825_v52 = vshrl.u32 %v5545_v51, 16 }
 0x2fe   : > { %10168 = vmatmul.mubr.bf16.gmra.mxu1 %v13366_v42  ;;  %v5808_v22 = vrot.slane %v5807_v14, 4  ;;  %v5828_v28 = vshll.u32 %v5545_v51, 16  ;;  %v5834_v39 = vshll.u32 %v13420_v32, 16  ;;  %v5838_v29 = vshrl.u32 %v13420_v32, 16 }
 0x2ff   : > { %10171 = vmatprep.mubr.bf16.mxu1 %v13396_v62  ;;  %10248 = vmatpush3.bf16.msra.mxu1 %v10539_v20  ;;  %v5818_v57 = vrot.slane %v5817_v37, 4  ;;  %v13535_v42 = vsel %vm11214_vm7, %v9058_v0, %v6423_v36  ;;  %v6425_v9 = vrot.slane %v6423_v36, 4  ;;  %v5827_v3 = vrot.slane %v5825_v52, 4  ;;  %v13539_v62 = vpop.f32.mrf.mxu0  ;;  %v10545_v20 = vld [vmem:[%s14880_s3 + $0x188] sm:$0xff]  }
 0x300   : > { %10249 = vmatprep.subr.bf16.mxu1 %v10542_v63  ;;  %v5813_v6 = vsel %vm10803_vm4, %v5808_v22, %v5812_v46  ;;  %v5830_v12 = vrot.slane %v5828_v28, 5  ;;  %v5836_v13 = vrot.slane %v5834_v39, 5  ;;  %v5840_v32 = vrot.slane %v5838_v29, 4  ;;  %v13591_v39 = vld [vmem:[%s14880_s3 + $0x238] sm:$0xff]  }
 0x301   : > { %v5823_v49 = vsel %vm10803_vm4, %v5818_v57, %v5822_v48  ;;  %v6427_v5 = vsel %vm11214_vm7, %v6425_v9, %v6426_v43  ;;  %v5844_v55 = vshll.u32 %v13437_v19, 16  ;;  %v9059_v7 = vrot.slane %v6280_v17, 9  ;;  %v6281_v19 = vld [vmem:[#allocation2 + $0xc0] sm:$0xe]  ;;  %v13561_v47 = vpop.f32.mrf.mxu0  ;;  %v5551_v48 = vld [vmem:[#allocation2 + $0xa8] sm:$0xf] }
 0x302   : > { %10228 = vmatmul.mubr.bf16.gmra.mxu0 %v9088_v54  ;;  %v13556_v16 = vcombine.low %v5813_v6, %v5823_v49  ;;  %v9090_v27 = vcombine.low %v13535_v42, %v6427_v5  ;;  %v5831_v33 = vor.u32 %v5830_v12, %v5827_v3  ;;  %v5841_v25 = vor.u32 %v5840_v32, %v5836_v13 }
 0x303   : > { %10231 = vmatprep.mubr.bf16.mxu0 %v9089_v40  ;;  %v5846_v51 = vrot.slane %v5844_v55, 5  ;;  %v6430_v15 = vrot.slane %v13537_v41, 5  ;;  %v6433_v50 = vrot.slane %v13543_v34, 5  ;;  %10250 = vmatpush3.bf16.msra.mxu1 %v10542_v63  ;;  %v5849_v31 = vshrl.u32 %v5548_v4, 16  ;;  %v13571_v40 = vld [vmem:[#allocation2 + $0xc4] sm:$0xf] }
 0x304   : > { %v5832_v1 = vrot.slane %v5831_v33, 4  ;;  %v5842_v10 = vrot.slane %v5841_v25, 4  ;;  %v5852_v61 = vshll.u32 %v5548_v4, 16  ;;  %v5858_v54 = vshll.u32 %v13468_v59, 16  ;;  %10251 = vmatprep.subr.bf16.mxu1 %v10545_v20  ;;  %v13605_v33 = vld [vmem:[#allocation2 + $0x1c] sm:$0xf] }
 0x305   : > { %v6431_v11 = vsel %vm11214_vm7, %v9059_v7, %v6430_v15  ;;  %v6432_v53 = vrot.slane %v6430_v15, 4  ;;  %v5851_v21 = vrot.slane %v5849_v31, 4  ;;  %v5862_v2 = vshrl.u32 %v13468_v59, 16  ;;  %v5554_v31 = vld [vmem:[#allocation2 + $0xb4] sm:$0xf] }
 0x306   : > { %10172 = vmatmul.mubr.bf16.gmra.mxu1 %v13446_v26  ;;  %v5837_v46 = vsel %vm10803_vm4, %v5832_v1, %v5836_v13  ;;  %v5847_v35 = vsel %vm10803_vm4, %v5842_v10, %v5846_v51  ;;  %v5854_v63 = vrot.slane %v5852_v61, 5  ;;  %v5860_v14 = vrot.slane %v5858_v54, 5  ;;  %v13578_v26 = vld [vmem:[#allocation2 + $0xc8] sm:$0x1] }
 0x307   : > { %10175 = vmatprep.mubr.bf16.mxu1 %v13485_v8  ;;  %v13580_v0 = vcombine.low %v5837_v46, %v5847_v35  ;;  %v6434_v59 = vsel %vm11214_vm7, %v6432_v53, %v6433_v50  ;;  %v5864_v37 = vrot.slane %v5862_v2, 4  ;;  %v5868_v36 = vshll.u32 %v13474_v58, 16  ;;  %10252 = vmatpush3.bf16.msra.mxu1 %v10545_v20  ;;  %v13585_v8 = vpop.f32.mrf.mxu0  ;;  %v7151_v20 = vld [vmem:[#allocation2 + $0x18] sm:$0xf]  ;;  %v13611_v50 = vld [vmem:[#allocation2 + $0x20] sm:$0x1] }
 0x308   : > { %v9091_v43 = vcombine.low %v6431_v11, %v6434_v59  ;;  %v5855_v52 = vor.u32 %v5854_v63, %v5851_v21  ;;  %v9060_v22 = vrot.slane %v6281_v19, 9  ;;  %v6437_v28 = vrot.slane %v13571_v40, 5  ;;  %10253 = vmatprep.subr.bf16.mxu1 %v10548_v44  ;;  %v13616_v11 = vpop.f32.mrf.mxu1 }
 0x309   : > { %v5865_v29 = vor.u32 %v5864_v37, %v5860_v14  ;;  %v5870_v17 = vrot.slane %v5868_v36, 5  ;;  %v6440_v4 = vrot.slane %v13578_v26, 5  ;;  %v5873_v57 = vshrl.u32 %v5551_v48, 16  ;;  %v13598_v49 = vpop.f32.mrf.mxu0 }
 0x30a   : > { %10232 = vmatmul.mubr.bf16.gmra.mxu0 %v9090_v27  ;;  %v5856_v58 = vrot.slane %v5855_v52, 4  ;;  %v6438_v42 = vsel %vm11214_vm7, %v9060_v22, %v6437_v28  ;;  %v6439_v9 = vrot.slane %v6437_v28, 4  ;;  %v5876_v3 = vshll.u32 %v5551_v48, 16  ;;  %v7154_v52 = vld [vmem:[#allocation2 + $0x24] sm:$0xf] }
 0x30b   : > { %10235 = vmatprep.mubr.bf16.mxu0 %v9091_v43  ;;  %v5866_v6 = vrot.slane %v5865_v29, 4  ;;  %v5875_v12 = vrot.slane %v5873_v57, 4  ;;  %v5882_v13 = vshll.u32 %v13510_v45, 16  ;;  %v5886_v32 = vshrl.u32 %v13510_v45, 16  ;;  %10254 = vmatpush3.bf16.msra.mxu1 %v10548_v44  ;;  %v13618_v53 = vpop.f32.mrf.mxu0 }
 0x30c   : > { %v5861_v5 = vsel %vm10803_vm4, %v5856_v58, %v5860_v14  ;;  %v6441_v55 = vsel %vm11214_vm7, %v6439_v9, %v6440_v4  ;;  %v5878_v7 = vrot.slane %v5876_v3, 5  ;;  %v5892_v27 = vshll.u32 %v13512_v24, 16  ;;  %10335 = vmatprep.subr.bf16.mxu1 %v13591_v39  ;;  %15156 = vst [vmem:[#allocation6_spill] sm:$0xff] %v13618_v53  ;;  %v13626_v4 = vpop.f32.mrf.mxu1 }
 0x30d   : > { %v5871_v45 = vsel %vm10803_vm4, %v5866_v6, %v5870_v17  ;;  %v9092_v25 = vcombine.low %v6438_v42, %v6441_v55  ;;  %v5884_v51 = vrot.slane %v5882_v13, 5  ;;  %v5888_v15 = vrot.slane %v5886_v32, 4  ;;  %v13632_v6 = vld [vmem:[#allocation2 + $0x28] sm:$0xf] }
 0x30e   : > { %10176 = vmatmul.mubr.bf16.gmra.mxu1 %v13525_v23  ;;  %v9033_v19 = vcombine.low %v5861_v5, %v5871_v45  ;;  %v5879_v1 = vor.u32 %v5878_v7, %v5875_v12  ;;  %v5894_v24 = vrot.slane %v5892_v27, 5  ;;  %v7200_v10 = vshrl.u32 %v7151_v20, 16  ;;  %v13628_v57 = vpop.f32.mrf.mxu0 }
 0x30f   : > { %10179 = vmatprep.mubr.bf16.mxu1 %v13556_v16  ;;  %v5889_v61 = vor.u32 %v5888_v15, %v5884_v51  ;;  %v7203_v54 = vshll.u32 %v7151_v20, 16  ;;  %v7209_v44 = vshll.u32 %v13605_v33, 16  ;;  %v7213_v23 = vshrl.u32 %v13605_v33, 16  ;;  %v13635_v20 = vld [vmem:[#allocation2 + $0x2c] sm:$0x1]  ;;  %v13642_v15 = vpop.f32.mrf.mxu1 }
 0x310   : > { %v5880_v21 = vrot.slane %v5879_v1, 4  ;;  %v7202_v2 = vrot.slane %v7200_v10, 4  ;;  %v7219_v46 = vshll.u32 %v13611_v50, 16  ;;  %v5897_v35 = vshrl.u32 %v5554_v31, 16 }
 0x311   : > { %v5890_v16 = vrot.slane %v5889_v61, 4  ;;  %v7205_v63 = vrot.slane %v7203_v54, 5  ;;  %v7211_v14 = vrot.slane %v7209_v44, 5  ;;  %v7215_v48 = vrot.slane %v7213_v23, 4 }
 0x312   : > { %10236 = vmatmul.mubr.bf16.gmra.mxu0 %v9092_v25  ;;  %v5885_v59 = vsel %vm10803_vm4, %v5880_v21, %v5884_v51  ;;  %v7221_v37 = vrot.slane %v7219_v46, 5  ;;  %v5899_v36 = vrot.slane %v5897_v35, 4  ;;  %v5900_v43 = vshll.u32 %v5554_v31, 16  ;;  %v5557_v25 = vld [vmem:[#allocation2 + $0xc0] sm:$0xf]  ;;  %v13644_v31 = vpop.f32.mrf.mxu0 }
 0x313   : > { %v5895_v22 = vsel %vm10803_vm4, %v5890_v16, %v5894_v24  ;;  %v7206_v28 = vor.u32 %v7205_v63, %v7202_v2  ;;  %v7216_v29 = vor.u32 %v7215_v48, %v7211_v14  ;;  %v5906_v17 = vshll.u32 %v13537_v41, 16 }
 0x314   : > { %v9034_v58 = vcombine.low %v5885_v59, %v5895_v22  ;;  %v5902_v42 = vrot.slane %v5900_v43, 5  ;;  %v5910_v9 = vshrl.u32 %v13537_v41, 16  ;;  %v5916_v3 = vshll.u32 %v13543_v34, 16  ;;  %v7157_v59 = vld [vmem:[#allocation2 + $0x30] sm:$0xf] }
 0x315   : > { %v7207_v12 = vrot.slane %v7206_v28, 4  ;;  %v7217_v13 = vrot.slane %v7216_v29, 4  ;;  %v5908_v32 = vrot.slane %v5906_v17, 5  ;;  %v7224_v5 = vshrl.u32 %v7154_v52, 16  ;;  %v13658_v29 = vld [vmem:[#allocation2 + $0x34] sm:$0xf] }
 0x316   : > { %10180 = vmatmul.mubr.bf16.gmra.mxu1 %v13580_v0  ;;  %v5903_v55 = vor.u32 %v5902_v42, %v5899_v36  ;;  %v5912_v7 = vrot.slane %v5910_v9, 4  ;;  %v5918_v27 = vrot.slane %v5916_v3, 5  ;;  %v7227_v45 = vshll.u32 %v7154_v52, 16  ;;  %v13653_v36 = vpop.f32.mrf.mxu0 }
 0x317   : > { %10183 = vmatprep.mubr.bf16.mxu1 %v9033_v19  ;;  %v7212_v41 = vsel %vm10803_vm4, %v7207_v12, %v7211_v14  ;;  %v7222_v34 = vsel %vm10803_vm4, %v7217_v13, %v7221_v37  ;;  %v7226_v51 = vrot.slane %v7224_v5, 4  ;;  %v7233_v0 = vshll.u32 %v13632_v6, 16  ;;  %v13651_v37 = vpop.f32.mrf.mxu1  ;;  %v13663_v5 = vld [vmem:[#allocation2 + $0x38] sm:$0x1] }
 0x318   : > { %v9157_v1 = vcombine.low %v7212_v41, %v7222_v34  ;;  %v5904_v19 = vrot.slane %v5903_v55, 4  ;;  %v5913_v24 = vor.u32 %v5912_v7, %v5908_v32  ;;  %v7229_v10 = vrot.slane %v7227_v45, 5 }
 0x319   : > { %v7235_v61 = vrot.slane %v7233_v0, 5  ;;  %v7237_v54 = vshrl.u32 %v13632_v6, 16  ;;  %v7243_v44 = vshll.u32 %v13635_v20, 16  ;;  %v5921_v23 = vshrl.u32 %v5557_v25, 16  ;;  %v7160_v0 = vld [vmem:[#allocation2 + $0x3c] sm:$0xf] }
 0x31a   : > { %10303 = vmatprep.mubr.bf16.mxu0 %v9157_v1  ;;  %v5909_v21 = vsel %vm10803_vm4, %v5904_v19, %v5908_v32  ;;  %v5914_v2 = vrot.slane %v5913_v24, 4  ;;  %v7230_v46 = vor.u32 %v7229_v10, %v7226_v51  ;;  %v5924_v35 = vshll.u32 %v5557_v25, 16  ;;  %v13668_v25 = vpop.f32.mrf.mxu0 }
 0x31b   : > { %v7239_v16 = vrot.slane %v7237_v54, 4  ;;  %v7245_v63 = vrot.slane %v7243_v44, 5  ;;  %v5923_v14 = vrot.slane %v5921_v23, 4  ;;  %v5930_v48 = vshll.u32 %v13571_v40, 16 }
 0x31c   : > { %v5919_v43 = vsel %vm10803_vm4, %v5914_v2, %v5918_v27  ;;  %v7231_v52 = vrot.slane %v7230_v46, 4  ;;  %v5926_v22 = vrot.slane %v5924_v35, 5  ;;  %v5934_v28 = vshrl.u32 %v13571_v40, 16  ;;  %v13678_v35 = vld [vmem:[#allocation2 + $0x44] sm:$0x1] }
 0x31d   : > { %v9035_v17 = vcombine.low %v5909_v21, %v5919_v43  ;;  %v7240_v42 = vor.u32 %v7239_v16, %v7235_v61  ;;  %v5932_v9 = vrot.slane %v5930_v48, 5  ;;  %v5940_v3 = vshll.u32 %v13578_v26, 16 }
 0x31e   : > { %10184 = vmatmul.mubr.bf16.gmra.mxu1 %v9034_v58  ;;  %v7236_v12 = vsel %vm10803_vm4, %v7231_v52, %v7235_v61  ;;  %v5927_v13 = vor.u32 %v5926_v22, %v5923_v14  ;;  %v5936_v32 = vrot.slane %v5934_v28, 4  ;;  %v7248_v55 = vshrl.u32 %v7157_v59, 16  ;;  %v13666_v58 = vpop.f32.mrf.mxu1  ;;  %v13674_v61 = vld [vmem:[#allocation2 + $0x40] sm:$0xf]  ;;  %v7163_v28 = vld [vmem:[#allocation2 + $0x48] sm:$0xf] }
 0x31f   : > { %10187 = vmatprep.mubr.bf16.mxu1 %v9035_v17  ;;  %v7241_v7 = vrot.slane %v7240_v42, 4  ;;  %v5942_v27 = vrot.slane %v5940_v3, 5  ;;  %v7251_v40 = vshll.u32 %v7157_v59, 16  ;;  %v7257_v45 = vshll.u32 %v13658_v29, 16 }
 0x320   : > { %v5928_v41 = vrot.slane %v5927_v13, 4  ;;  %v5937_v26 = vor.u32 %v5936_v32, %v5932_v9  ;;  %v7250_v34 = vrot.slane %v7248_v55, 4  ;;  %v7261_v51 = vshrl.u32 %v13658_v29, 16  ;;  %v13680_v48 = vpop.f32.mrf.mxu1 }
 0x321   : > { %v7246_v1 = vsel %vm10803_vm4, %v7241_v7, %v7245_v63  ;;  %v7253_v19 = vrot.slane %v7251_v40, 5  ;;  %v7259_v24 = vrot.slane %v7257_v45, 5  ;;  %v7267_v10 = vshll.u32 %v13663_v5, 16  ;;  %v13689_v40 = vld [vmem:[#allocation2 + $0x4c] sm:$0xf] }
 0x322   : > { %v9158_v54 = vcombine.low %v7236_v12, %v7246_v1  ;;  %v5933_v44 = vsel %vm10803_vm4, %v5928_v41, %v5932_v9  ;;  %v5938_v23 = vrot.slane %v5937_v26, 4  ;;  %v7263_v21 = vrot.slane %v7261_v51, 4  ;;  %v13682_v63 = vpop.f32.mrf.mxu0  ;;  %v10549_v9 = vld [vmem:[#allocation2 + $0x18] sm:$0xff]   ;;  %v13697_v26 = vld [vmem:[#allocation2 + $0x50] sm:$0x1]  ;;  %v13699_v51 = vpop.f32.mrf.mxu1 }
 0x323   : > { %v7254_v2 = vor.u32 %v7253_v19, %v7250_v34  ;;  %v7269_v46 = vrot.slane %v7267_v10, 5  ;;  %v7272_v16 = vshrl.u32 %v7160_v0, 16  ;;  %v7275_v14 = vshll.u32 %v7160_v0, 16 }
 0x324   : > { %10304 = vmatmul.mubr.bf16.vlgmr.msra.gmra.mxu0 %v9158_v54  ;;  %v5943_v59 = vsel %vm10803_vm4, %v5938_v23, %v5942_v27  ;;  %v7264_v43 = vor.u32 %v7263_v21, %v7259_v24  ;;  %v7281_v52 = vshll.u32 %v13674_v61, 16  ;;  %v7285_v22 = vshrl.u32 %v13674_v61, 16  ;;  %v13701_v0 = vpop.f32.mrf.mxu0 }
 0x325   : > { %v9036_v17 = vcombine.low %v5933_v44, %v5943_v59  ;;  %v7255_v42 = vrot.slane %v7254_v2, 4  ;;  %v7274_v3 = vrot.slane %v7272_v16, 4  ;;  %v7277_v12 = vrot.slane %v7275_v14, 5  ;;  %v7166_v14 = vld [vmem:[#allocation2 + $0x54] sm:$0xf] }
 0x326   : > { %v7265_v13 = vrot.slane %v7264_v43, 4  ;;  %v7283_v32 = vrot.slane %v7281_v52, 5  ;;  %v7287_v55 = vrot.slane %v7285_v22, 4  ;;  %v7291_v7 = vshll.u32 %v13678_v35, 16  ;;  %v13716_v52 = vld [vmem:[#allocation2 + $0x58] sm:$0xf]  ;;  %v13718_v22 = vpop.f32.mrf.mxu1 }
 0x327   : > { %10188 = vmatmul.mubr.bf16.gmra.mxu1 %v9036_v17  ;;  %v7260_v27 = vsel %vm10803_vm4, %v7255_v42, %v7259_v24  ;;  %v7278_v45 = vor.u32 %v7277_v12, %v7274_v3  ;;  %v13695_v41 = vadd.f32 %v13470_v30, %v13616_v11  ;;  %v7296_v34 = vshrl.u32 %v7163_v28, 16  ;;  %15157 = vst [vmem:[#allocation11_spill] sm:$0xff] %v13718_v22  ;;  %v10551_v12 = vld [vmem:[#allocation2 + $0x24] sm:$0xff]  }
 0x328   : > { %v7270_v1 = vsel %vm10803_vm4, %v7265_v13, %v7269_v46  ;;  %10255 = vmatprep.mubr.bf16.mxu1 %v10549_v9  ;;  %v7288_v19 = vor.u32 %v7287_v55, %v7283_v32  ;;  %v7293_v10 = vrot.slane %v7291_v7, 5  ;;  %v7299_v54 = vshll.u32 %v7163_v28, 16  ;;  %v13720_v28 = vpop.f32.mrf.mxu0  ;;  %v10553_v55 = vld [vmem:[%s14880_s3 + $0x230] sm:$0xff]  }
 0x329   : > { %v9159_v24 = vcombine.low %v7260_v27, %v7270_v1  ;;  %v7279_v44 = vrot.slane %v7278_v45, 4  ;;  %v7298_v23 = vrot.slane %v7296_v34, 4  ;;  %v7305_v30 = vshll.u32 %v13689_v40, 16  ;;  %v10552_v45 = vld [vmem:[#allocation2 + $0x30] sm:$0xff]   ;;  %v7169_v1 = vld [vmem:[#allocation2 + $0x60] sm:$0xf] }
 0x32a   : > { %v7289_v11 = vrot.slane %v7288_v19, 4  ;;  %v7301_v21 = vrot.slane %v7299_v54, 5  ;;  %v7309_v2 = vshrl.u32 %v13689_v40, 16  ;;  %v7315_v16 = vshll.u32 %v13697_v26, 16 }
 0x32b   : > { %10307 = vmatprep.mubr.bf16.mxu0 %v9159_v24  ;;  %v7307_v59 = vrot.slane %v7305_v30, 5  ;;  %v13710_v46 = vadd.f32 %v13494_v38, %v13626_v4  ;;  %v13714_v43 = vadd.f32 %v13523_v60, %v13642_v15  ;;  %v7284_v17 = vsel %vm10803_vm4, %v7279_v44, %v7283_v32  ;;  %v13726_v38 = vld [vmem:[#allocation2 + $0x5c] sm:$0x1]  ;;  %v13738_v44 = vld [vmem:[#allocation2 + $0x64] sm:$0xf]  ;;  %v13742_v30 = vpop.f32.mrf.mxu0 }
 0x32c   : > { %v7294_v42 = vsel %vm10803_vm4, %v7289_v11, %v7293_v10  ;;  %v7302_v9 = vor.u32 %v7301_v21, %v7298_v23  ;;  %v7311_v3 = vrot.slane %v7309_v2, 4  ;;  %v7317_v60 = vrot.slane %v7315_v16, 5 }
 0x32d   : > { %v9160_v4 = vcombine.low %v7284_v17, %v7294_v42  ;;  %v7320_v15 = vshrl.u32 %v7166_v14, 16  ;;  %v7323_v13 = vshll.u32 %v7166_v14, 16  ;;  %v7329_v32 = vshll.u32 %v13716_v52, 16 }
 0x32e   : > { %v7303_v7 = vrot.slane %v7302_v9, 4  ;;  %v7312_v27 = vor.u32 %v7311_v3, %v7307_v59  ;;  %v7333_v34 = vshrl.u32 %v13716_v52, 16  ;;  %v7339_v54 = vshll.u32 %v13726_v38, 16  ;;  %v13740_v23 = vpop.f32.mrf.mxu1 }
 0x32f   : > { %10308 = vmatmul.mubr.bf16.gmra.mxu0 %v9160_v4  ;;  %10256 = vmatmul.mubr.bf16.vlgmr.msra.gmra.mxu1 %v10551_v12  ;;  %v7322_v19 = vrot.slane %v7320_v15, 4  ;;  %v7325_v10 = vrot.slane %v7323_v13, 5  ;;  %v13736_v24 = vadd.f32 %v13561_v47, %v13666_v58  ;;  %v7331_v2 = vrot.slane %v7329_v32, 5  ;;  %v13747_v47 = vld [vmem:[#allocation2 + $0x68] sm:$0x1]  ;;  %v10554_v13 = vld [vmem:[#allocation2 + $0x3c] sm:$0xff]  }
 0x330   : > { %v7308_v11 = vsel %vm10803_vm4, %v7303_v7, %v7307_v59  ;;  %v7313_v21 = vrot.slane %v7312_v27, 4  ;;  %10336 = vmatpush3.bf16.msra.mxu1 %v13591_v39  ;;  %10259 = vmatprep.mubr.bf16.mxu1 %v10552_v45  ;;  %v7335_v16 = vrot.slane %v7333_v34, 4  ;;  %v7341_v17 = vrot.slane %v7339_v54, 5  ;;  %v10556_v39 = vld [vmem:[%s14880_s3 + $0x228] sm:$0xff]   ;;  %v13756_v45 = vpop.f32.mrf.mxu1 }
 0x331   : > { %15158 = vst [vmem:[#allocation19_spill] sm:$0xff] %v13736_v24  ;;  %v7326_v14 = vor.u32 %v7325_v10, %v7322_v19  ;;  %10337 = vmatprep.subr.bf16.mxu1 %v10553_v55  ;;  %v7344_v58 = vshrl.u32 %v7169_v1, 16  ;;  %v7347_v42 = vshll.u32 %v7169_v1, 16  ;;  %v7353_v4 = vshll.u32 %v13738_v44, 16  ;;  %v7172_v10 = vld [vmem:[#allocation2 + $0x6c] sm:$0xf] }
 0x332   : > { %v7318_v9 = vsel %vm10803_vm4, %v7313_v21, %v7317_v60  ;;  %v7336_v3 = vor.u32 %v7335_v16, %v7331_v2  ;;  %v7357_v59 = vshrl.u32 %v13738_v44, 16  ;;  %v7363_v19 = vshll.u32 %v13747_v47, 16  ;;  %v13769_v16 = vld [vmem:[#allocation2 + $0x70] sm:$0xf] }
 0x333   : > { %v9161_v12 = vcombine.low %v7308_v11, %v7318_v9  ;;  %v7327_v15 = vrot.slane %v7326_v14, 4  ;;  %v7346_v7 = vrot.slane %v7344_v58, 4  ;;  %v7349_v27 = vrot.slane %v7347_v42, 5  ;;  %v13758_v32 = vpop.f32.mrf.mxu0  ;;  %v13771_v14 = vld [vmem:[#allocation2 + $0x74] sm:$0x1]  ;;  %v10559_v58 = vld [vmem:[%s14880_s3 + $0x220] sm:$0xff]  }
 0x334   : > { %v7337_v34 = vrot.slane %v7336_v3, 4  ;;  %v7355_v60 = vrot.slane %v7353_v4, 5  ;;  %v7359_v1 = vrot.slane %v7357_v59, 4  ;;  %10338 = vmatpush3.bf16.msra.mxu1 %v10553_v55  ;;  %v13763_v11 = vadd.f32 %v13585_v8, %v13680_v48 }
 0x335   : > { %10311 = vmatprep.mubr.bf16.mxu0 %v9161_v12  ;;  %v7350_v54 = vor.u32 %v7349_v27, %v7346_v7  ;;  %v13767_v21 = vadd.f32 %v13598_v49, %v13699_v51  ;;  %v13776_v55 = vpop.f32.mrf.mxu0  ;;  %v7332_v42 = vsel %vm10803_vm4, %v7327_v15, %v7331_v2  ;;  %v7365_v9 = vrot.slane %v7363_v19, 5  ;;  %v10555_v49 = vld [vmem:[#allocation2 + $0x48] sm:$0xff]   ;;  %10339 = vmatprep.subr.bf16.mxu1 %v10556_v39  ;;  %v7175_v12 = vld [vmem:[#allocation2 + $0x78] sm:$0xf]  ;;  %v9978_v7 = vpop.f32.mrf.mxu1 }
 0x336   : > { %15159 = vst [vmem:[#allocation22_spill] sm:$0xff] %v13763_v11  ;;  %v7342_v8 = vsel %vm10803_vm4, %v7337_v34, %v7341_v17  ;;  %v7360_v48 = vor.u32 %v7359_v1, %v7355_v60  ;;  %v7368_v4 = vshrl.u32 %v7172_v10, 16  ;;  %v7371_v59 = vshll.u32 %v7172_v10, 16  ;;  %v13785_v17 = vld [vmem:[#allocation2 + $0x7c] sm:$0xf]  ;;  %v10558_v11 = vld [vmem:[#allocation2 + $0x60] sm:$0xff]  }
 0x337   : > { %15160 = vst [vmem:[#allocation21_spill] sm:$0xff] %v13767_v21  ;;  %v9162_v51 = vcombine.low %v7332_v42, %v7342_v8  ;;  %10260 = vmatmul.mubr.bf16.gmra.mxu1 %v10554_v13  ;;  %v7351_v3 = vrot.slane %v7350_v54, 4  ;;  %v7377_v21 = vshll.u32 %v13769_v16, 16  ;;  %v7381_v2 = vshrl.u32 %v13769_v16, 16  ;;  %v13793_v10 = vld [vmem:[#allocation2 + $0x80] sm:$0x1]  ;;  %v13795_v54 = vpop.f32.mrf.mxu0 }
 0x338   : > { %v7361_v27 = vrot.slane %v7360_v48, 4  ;;  %10263 = vmatprep.mubr.bf16.mxu1 %v10555_v49  ;;  %v7387_v15 = vshll.u32 %v13771_v14, 16  ;;  %10340 = vmatpush3.bf16.msra.mxu1 %v10556_v39  ;;  %v7370_v34 = vrot.slane %v7368_v4, 4  ;;  %v7373_v1 = vrot.slane %v7371_v59, 5  ;;  %v10562_v42 = vld [vmem:[%s14880_s3 + $0x218] sm:$0xff]  }
 0x339   : > { %10312 = vmatmul.mubr.bf16.gmra.mxu0 %v9162_v51  ;;  %v7356_v13 = vsel %vm10803_vm4, %v7351_v3, %v7355_v60  ;;  %v13791_v19 = vadd.f32 %v13628_v57, %v13740_v23  ;;  %10341 = vmatprep.subr.bf16.mxu1 %v10559_v58  ;;  %v7379_v8 = vrot.slane %v7377_v21, 5  ;;  %v7383_v60 = vrot.slane %v7381_v2, 4  ;;  %v4247_v23 = vpop.f32.mrf.mxu1  ;;  %v10557_v59 = vld [vmem:[#allocation2 + $0x54] sm:$0xff]  }
 0x33a   : > { %v7366_v39 = vsel %vm10803_vm4, %v7361_v27, %v7365_v9  ;;  %v7389_v48 = vrot.slane %v7387_v15, 5  ;;  %v7374_v51 = vor.u32 %v7373_v1, %v7370_v34  ;;  %v7392_v3 = vshrl.u32 %v7175_v12, 16  ;;  %v13809_v15 = vpop.f32.mrf.mxu0 }
 0x33b   : > { %15161 = vst [vmem:[#allocation24_spill] sm:$0xff] %v13791_v19  ;;  %v9163_v49 = vcombine.low %v7356_v13, %v7366_v39  ;;  %v7395_v57 = vshll.u32 %v7175_v12, 16  ;;  %v7384_v4 = vor.u32 %v7383_v60, %v7379_v8  ;;  %v7401_v19 = vshll.u32 %v13785_v17, 16  ;;  %v7178_v12 = vld [vmem:[#allocation2 + $0x84] sm:$0xf]  ;;  %v10565_v13 = vld [vmem:[%s14880_s3 + $0x210] sm:$0xff]  }
 0x33c   : > { %v7405_v53 = vshrl.u32 %v13785_v17, 16  ;;  %v7411_v22 = vshll.u32 %v13793_v10, 16  ;;  %10342 = vmatpush3.bf16.msra.mxu1 %v10559_v58  ;;  %v7375_v9 = vrot.slane %v7374_v51, 4  ;;  %v7394_v21 = vrot.slane %v7392_v3, 4  ;;  %v13814_v60 = vld [vmem:[#allocation2 + $0x88] sm:$0xf] }
 0x33d   : > { %10315 = vmatprep.mubr.bf16.mxu0 %v9163_v49  ;;  %v7397_v27 = vrot.slane %v7395_v57, 5  ;;  %v13807_v2 = vadd.f32 %v13644_v31, %v13756_v45  ;;  %10343 = vmatprep.subr.bf16.mxu1 %v10562_v42  ;;  %v7385_v34 = vrot.slane %v7384_v4, 4  ;;  %v7403_v1 = vrot.slane %v7401_v19, 5  ;;  %v13824_v3 = vld [vmem:[#allocation2 + $0x8c] sm:$0x1] }
 0x33e   : > { %v7407_v39 = vrot.slane %v7405_v53, 4  ;;  %v7413_v58 = vrot.slane %v7411_v22, 5  ;;  %v7380_v49 = vsel %vm10803_vm4, %v7375_v9, %v7379_v8  ;;  %v13819_v45 = vadd.f32 %v13653_v36, %v9978_v7  ;;  %15165 = vst [vmem:[#allocation29_spill] sm:$0xff] %v13824_v3  ;;  %v7181_v7 = vld [vmem:[#allocation2 + $0x90] sm:$0xf] }
 0x33f   : > { %15162 = vst [vmem:[#allocation26_spill] sm:$0xff] %v13807_v2  ;;  %10264 = vmatmul.mubr.bf16.gmra.mxu1 %v10557_v59  ;;  %v7398_v31 = vor.u32 %v7397_v27, %v7394_v21  ;;  %v13822_v51 = vadd.f32 %v13668_v25, %v4247_v23  ;;  %v9981_v57 = vpop.f32.mrf.mxu1  ;;  %v7390_v53 = vsel %vm10803_vm4, %v7385_v34, %v7389_v48  ;;  %v7416_v19 = vshrl.u32 %v7178_v12, 16  ;;  %v10568_v48 = vld [vmem:[%s14880_s3 + $0x208] sm:$0xff]  }
 0x340   : > { %15163 = vst [vmem:[#allocation27_spill] sm:$0xff] %v13819_v45  ;;  %v7408_v22 = vor.u32 %v7407_v39, %v7403_v1  ;;  %10267 = vmatprep.mubr.bf16.mxu1 %v10558_v11  ;;  %v7419_v4 = vshll.u32 %v7178_v12, 16  ;;  %10344 = vmatpush3.bf16.msra.mxu1 %v10562_v42  ;;  %v9164_v8 = vcombine.low %v7380_v49, %v7390_v53  ;;  %v7425_v9 = vshll.u32 %v13814_v60, 16  ;;  %v13830_v23 = vpop.f32.mrf.mxu0  ;;  %v13836_v12 = vld [vmem:[#allocation2 + $0x94] sm:$0xf] }
 0x341   : > { %15164 = vst [vmem:[#allocation36_spill] sm:$0xff] %v13822_v51  ;;  %v7399_v59 = vrot.slane %v7398_v31, 4  ;;  %v7429_v36 = vshrl.u32 %v13814_v60, 16  ;;  %v4260_v25 = vpop.f32.mrf.mxu1  ;;  %10345 = vmatprep.subr.bf16.mxu1 %v10565_v13  ;;  %v7418_v11 = vrot.slane %v7416_v19, 4  ;;  %v7435_v42 = vshll.u32 %v13824_v3, 16  ;;  %15166 = vst [vmem:[#allocation15_spill] sm:$0xff] %v13836_v12 }
 0x342   : > { %v7409_v21 = vrot.slane %v7408_v22, 4  ;;  %v7421_v27 = vrot.slane %v7419_v4, 5  ;;  %10316 = vmatmul.mubr.bf16.gmra.mxu0 %v9164_v8  ;;  %v7427_v39 = vrot.slane %v7425_v9, 5  ;;  %v13841_v31 = vadd.f32 %v13682_v63, %v9981_v57  ;;  %v13843_v53 = vld [vmem:[#allocation2 + $0x98] sm:$0x1]  ;;  %v13845_v45 = vpop.f32.mrf.mxu0 }
 0x343   : > { %v7404_v34 = vsel %vm10803_vm4, %v7399_v59, %v7403_v1  ;;  %v7431_v49 = vrot.slane %v7429_v36, 4  ;;  %15168 = vst [vmem:[#allocation33_spill] sm:$0xff] %v13843_v53  ;;  %v9982_v51 = vpop.f32.mrf.mxu1  ;;  %v7437_v4 = vrot.slane %v7435_v42, 5  ;;  %v7440_v2 = vshrl.u32 %v7181_v7, 16  ;;  %v10560_v1 = vld [vmem:[#allocation2 + $0x6c] sm:$0xff]   ;;  %v10561_v63 = vld [vmem:[#allocation2 + $0x78] sm:$0xff]  }
 0x344   : > { %15167 = vst [vmem:[#allocation31_spill] sm:$0xff] %v13841_v31  ;;  %v7414_v22 = vsel %vm10803_vm4, %v7409_v21, %v7413_v58  ;;  %v7422_v19 = vor.u32 %v7421_v27, %v7418_v11  ;;  %10346 = vmatpush3.bf16.msra.mxu1 %v10565_v13  ;;  %v7443_v59 = vshll.u32 %v7181_v7, 16  ;;  %v7449_v9 = vshll.u32 %v13836_v12, 16  ;;  %v13850_v57 = vpop.f32.mrf.mxu0  ;;  %v10571_v36 = vld [vmem:[%s14880_s3 + $0x200] sm:$0xff]   ;;  %v7184_v27 = vld [vmem:[#allocation2 + $0x9c] sm:$0xf] }
 0x345   : > { %v9165_v8 = vcombine.low %v7404_v34, %v7414_v22  ;;  %v7432_v3 = vor.u32 %v7431_v49, %v7427_v39  ;;  %10347 = vmatprep.subr.bf16.mxu1 %v10568_v48  ;;  %v7442_v58 = vrot.slane %v7440_v2, 4  ;;  %v7453_v21 = vshrl.u32 %v13836_v12, 16  ;;  %v4263_v11 = vpop.f32.mrf.mxu1  ;;  %v13860_v22 = vld [vmem:[#allocation2 + $0xa0] sm:$0xf] }
 0x346   : > { %v7423_v31 = vrot.slane %v7422_v19, 4  ;;  %v7459_v13 = vshll.u32 %v13843_v53, 16  ;;  %v7445_v42 = vrot.slane %v7443_v59, 5  ;;  %v7451_v34 = vrot.slane %v7449_v9, 5  ;;  %15170 = vst [vmem:[#allocation35_spill] sm:$0xff] %v13860_v22  ;;  %v13862_v24 = vpop.f32.mrf.mxu0 }
 0x347   : > { %10319 = vmatprep.mubr.bf16.mxu0 %v9165_v8  ;;  %v7433_v7 = vrot.slane %v7432_v3, 4  ;;  %10268 = vmatmul.mubr.bf16.gmra.mxu1 %v10560_v1  ;;  %v13858_v49 = vadd.f32 %v13701_v0, %v4260_v25  ;;  %v7455_v19 = vrot.slane %v7453_v21, 4  ;;  %v13867_v53 = vadd.f32 %v13720_v28, %v9982_v51  ;;  %v13869_v3 = vld [vmem:[#allocation2 + $0xa4] sm:$0x1] }
 0x348   : > { %v7428_v2 = vsel %vm10803_vm4, %v7423_v31, %v7427_v39  ;;  %v7461_v12 = vrot.slane %v7459_v13, 5  ;;  %10271 = vmatprep.mubr.bf16.mxu1 %v10561_v63  ;;  %15172 = vst [vmem:[#allocation13_spill] sm:$0xff] %v13869_v3  ;;  %10348 = vmatpush3.bf16.msra.mxu1 %v10568_v48  ;;  %v7446_v25 = vor.u32 %v7445_v42, %v7442_v58  ;;  %v7464_v1 = vshrl.u32 %v7184_v27, 16  ;;  %v7187_v63 = vld [vmem:[#allocation2 + $0xa8] sm:$0xf] }
 0x349   : > { %15169 = vst [vmem:[#allocation16_spill] sm:$0xff] %v13858_v49  ;;  %15171 = vst [vmem:[#allocation18_spill] sm:$0xff] %v13867_v53  ;;  %v7438_v0 = vsel %vm10803_vm4, %v7433_v7, %v7437_v4  ;;  %v13874_v8 = vadd.f32 %v13742_v30, %v4263_v11  ;;  %10349 = vmatprep.subr.bf16.mxu1 %v10571_v36  ;;  %v7456_v39 = vor.u32 %v7455_v19, %v7451_v34  ;;  %v13881_v13 = vld [vmem:[#allocation2 + $0xac] sm:$0xf] }
 0x34a   : > { %v9166_v59 = vcombine.low %v7428_v2, %v7438_v0  ;;  %v7467_v31 = vshll.u32 %v7184_v27, 16  ;;  %v7473_v9 = vshll.u32 %v13860_v22, 16  ;;  %v13877_v28 = vpop.f32.mrf.mxu0  ;;  %v7447_v51 = vrot.slane %v7446_v25, 4  ;;  %v10563_v25 = vld [vmem:[#allocation2 + $0x84] sm:$0xff]  }
 0x34b   : > { %15173 = vst [vmem:[#allocation34_spill] sm:$0xff] %v13874_v8  ;;  %v7466_v21 = vrot.slane %v7464_v1, 4  ;;  %v7477_v48 = vshrl.u32 %v13860_v22, 16  ;;  %v7483_v4 = vshll.u32 %v13869_v3, 16  ;;  %v9985_v58 = vpop.f32.mrf.mxu1  ;;  %v7457_v30 = vrot.slane %v7456_v39, 4 }
 0x34c   : > { %10320 = vmatmul.mubr.bf16.gmra.mxu0 %v9166_v59  ;;  %v7469_v11 = vrot.slane %v7467_v31, 5  ;;  %v7475_v7 = vrot.slane %v7473_v9, 5  ;;  %v13884_v27 = vadd.f32 %v13758_v32, %v9985_v58  ;;  %v13886_v42 = vpop.f32.mrf.mxu0  ;;  %10350 = vmatpush3.bf16.msra.mxu1 %v10571_v36  ;;  %v7452_v2 = vsel %vm10803_vm4, %v7447_v51, %v7451_v34  ;;  %v13890_v1 = vld [vmem:[#allocation2 + $0xb0] sm:$0x1] }
 0x34d   : > { %v7479_v19 = vrot.slane %v7477_v48, 4  ;;  %v7485_v0 = vrot.slane %v7483_v4, 5  ;;  %15175 = vst [vmem:[#allocation10_spill] sm:$0xff] %v13890_v1  ;;  %v7488_v8 = vshrl.u32 %v7187_v63, 16  ;;  %v4276_v53 = vpop.f32.mrf.mxu1  ;;  %v7462_v59 = vsel %vm10803_vm4, %v7457_v30, %v7461_v12  ;;  %v10564_v9 = vld [vmem:[#allocation2 + $0x90] sm:$0xff]  }
 0x34e   : > { %15174 = vst [vmem:[#allocation8_spill] sm:$0xff] %v13884_v27  ;;  %v7470_v39 = vor.u32 %v7469_v11, %v7466_v21  ;;  %v7491_v31 = vshll.u32 %v7187_v63, 16  ;;  %v7497_v32 = vshll.u32 %v13881_v13, 16  ;;  %v13895_v58 = vpop.f32.mrf.mxu0  ;;  %v9167_v36 = vcombine.low %v7452_v2, %v7462_v59  ;;  %v7190_v12 = vld [vmem:[#allocation2 + $0xb4] sm:$0xf] }
 0x34f   : > { %v7480_v27 = vor.u32 %v7479_v19, %v7475_v7  ;;  %10272 = vmatmul.mubr.bf16.gmra.mxu1 %v10563_v25  ;;  %v7490_v34 = vrot.slane %v7488_v8, 4  ;;  %v7501_v51 = vshrl.u32 %v13881_v13, 16  ;;  %v9986_v48 = vpop.f32.mrf.mxu1  ;;  %v7507_v22 = vshll.u32 %v13890_v1, 16  ;;  %v13907_v19 = vld [vmem:[#allocation2 + $0xb8] sm:$0xf] }
 0x350   : > { %v7471_v4 = vrot.slane %v7470_v39, 4  ;;  %v7493_v49 = vrot.slane %v7491_v31, 5  ;;  %v7499_v3 = vrot.slane %v7497_v32, 5  ;;  %10275 = vmatprep.mubr.bf16.mxu1 %v10564_v9  ;;  %v13899_v63 = vpop.f32.mrf.mxu0  ;;  %10323 = vmatprep.mubr.bf16.mxu0 %v9167_v36  ;;  %v13902_v11 = vadd.f32 %v13776_v55, %v4276_v53  ;;  %15178 = vst [vmem:[#allocation23_spill] sm:$0xff] %v13907_v19  ;;  %v13914_v32 = vld [vmem:[#allocation2 + $0xbc] sm:$0x1] }
 0x351   : > { %v7481_v21 = vrot.slane %v7480_v27, 4  ;;  %v7503_v30 = vrot.slane %v7501_v51, 4  ;;  %v13905_v8 = vadd.f32 %v13795_v54, %v9986_v48  ;;  %v4279_v2 = vpop.f32.mrf.mxu1  ;;  %v7509_v39 = vrot.slane %v7507_v22, 5  ;;  %15180 = vst [vmem:[#allocation39_spill] sm:$0xff] %v13914_v32  ;;  %v10566_v22 = vld [vmem:[#allocation2 + $0x9c] sm:$0xff]  }
 0x352   : > { %15176 = vst [vmem:[#allocation38_spill] sm:$0xff] %v13902_v11  ;;  %v7476_v25 = vsel %vm10803_vm4, %v7471_v4, %v7475_v7  ;;  %v7494_v59 = vor.u32 %v7493_v49, %v7490_v34  ;;  %v13912_v31 = vadd.f32 %v13809_v15, %v4279_v2  ;;  %v13916_v27 = vpop.f32.mrf.mxu0  ;;  %v7512_v53 = vshrl.u32 %v7190_v12, 16  ;;  %v7193_v7 = vld [vmem:[#allocation2 + $0xc0] sm:$0xf] }
 0x353   : > { %15177 = vst [vmem:[#allocation14_spill] sm:$0xff] %v13905_v8  ;;  %v7486_v55 = vsel %vm10803_vm4, %v7481_v21, %v7485_v0  ;;  %v7504_v54 = vor.u32 %v7503_v30, %v7499_v3  ;;  %v7515_v9 = vshll.u32 %v7190_v12, 16  ;;  %v7521_v48 = vshll.u32 %v13907_v19, 16  ;;  %v13925_v0 = vld [vmem:[#allocation2 + $0xc4] sm:$0xf] }
 0x354   : > { %15179 = vst [vmem:[#allocation30_spill] sm:$0xff] %v13912_v31  ;;  %v9168_v36 = vcombine.low %v7476_v25, %v7486_v55  ;;  %v7495_v51 = vrot.slane %v7494_v59, 4  ;;  %v7525_v49 = vshrl.u32 %v13907_v19, 16  ;;  %v13922_v15 = vpop.f32.mrf.mxu0  ;;  %v7514_v4 = vrot.slane %v7512_v53, 4  ;;  %v13932_v59 = vld [vmem:[#allocation2 + $0xc8] sm:$0x1] }
 0x355   : > { %v7505_v34 = vrot.slane %v7504_v54, 4  ;;  %v7517_v2 = vrot.slane %v7515_v9, 5  ;;  %v7531_v31 = vshll.u32 %v13914_v32, 16  ;;  %v9989_v8 = vpop.f32.mrf.mxu1  ;;  %v7523_v21 = vrot.slane %v7521_v48, 5  ;;  %15182 = vst [vmem:[#allocation12_spill] sm:$0xff] %v13932_v59  ;;  %v10567_v55 = vld [vmem:[#allocation2 + $0xa8] sm:$0xff]  }
 0x356   : > { %10324 = vmatmul.mubr.bf16.gmra.mxu0 %v9168_v36  ;;  %v7500_v12 = vsel %vm10803_vm4, %v7495_v51, %v7499_v3  ;;  %v7527_v30 = vrot.slane %v7525_v49, 4  ;;  %v13930_v25 = vadd.f32 %v13830_v23, %v9989_v8  ;;  %v13934_v54 = vpop.f32.mrf.mxu0  ;;  %v7536_v36 = vshrl.u32 %v7193_v7, 16 }
 0x357   : > { %v7510_v53 = vsel %vm10803_vm4, %v7505_v34, %v7509_v39  ;;  %v7518_v9 = vor.u32 %v7517_v2, %v7514_v4  ;;  %v7533_v11 = vrot.slane %v7531_v31, 5  ;;  %10276 = vmatmul.mubr.bf16.gmra.mxu1 %v10566_v22  ;;  %v4292_v32 = vpop.f32.mrf.mxu1  ;;  %v7539_v51 = vshll.u32 %v7193_v7, 16  ;;  %v7905_v2 = vld [vmem:[#allocation2 + $0x18] sm:$0xe] }
 0x358   : > { %15181 = vst [vmem:[#allocation9_spill] sm:$0xff] %v13930_v25  ;;  %v9169_v1 = vcombine.low %v7500_v12, %v7510_v53  ;;  %v7528_v3 = vor.u32 %v7527_v30, %v7523_v21  ;;  %v7545_v48 = vshll.u32 %v13925_v0, 16  ;;  %10279 = vmatprep.mubr.bf16.mxu1 %v10567_v55  ;;  %v13939_v23 = vpop.f32.mrf.mxu0  ;;  %v7538_v49 = vrot.slane %v7536_v36, 4 }
 0x359   : > { %v7519_v8 = vrot.slane %v7518_v9, 4  ;;  %v7549_v25 = vshrl.u32 %v13925_v0, 16  ;;  %v7555_v19 = vshll.u32 %v13932_v59, 16  ;;  %v9990_v39 = vpop.f32.mrf.mxu1  ;;  %v7541_v22 = vrot.slane %v7539_v51, 5  ;;  %v7196_v9 = vld [vmem:[#allocation2 + $0xcc] sm:$0xf] }
 0x35a   : > { %10327 = vmatprep.mubr.bf16.mxu0 %v9169_v1  ;;  %v7529_v31 = vrot.slane %v7528_v3, 4  ;;  %v7547_v34 = vrot.slane %v7545_v48, 5  ;;  %v13944_v4 = vadd.f32 %v13845_v45, %v4292_v32  ;;  %v13946_v7 = vpop.f32.mrf.mxu0  ;;  %v13951_v55 = vadd.f32 %v13850_v57, %v9990_v39  ;;  %v13960_v51 = vld [vmem:[#allocation2 + $0xd0] sm:$0xf] }
 0x35b   : > { %v7524_v12 = vsel %vm10803_vm4, %v7519_v8, %v7523_v21  ;;  %v7551_v30 = vrot.slane %v7549_v25, 4  ;;  %v4295_v53 = vpop.f32.mrf.mxu1  ;;  %v7542_v36 = vor.u32 %v7541_v22, %v7538_v49  ;;  %v7557_v3 = vrot.slane %v7555_v19, 5  ;;  %v10569_v8 = vld [vmem:[#allocation2 + $0xb4] sm:$0xff]  }
 0x35c   : > { %15183 = vst [vmem:[#allocation17_spill] sm:$0xff] %v13951_v55  ;;  %v7534_v1 = vsel %vm10803_vm4, %v7529_v31, %v7533_v11  ;;  %v13956_v45 = vadd.f32 %v13862_v24, %v4295_v53  ;;  %v13958_v32 = vpop.f32.mrf.mxu0  ;;  %v9181_v57 = vrot.slane %v7905_v2, 9  ;;  %v7971_v39 = vrot.slane %v13605_v33, 5  ;;  %v10570_v11 = vld [vmem:[#allocation2 + $0xc0] sm:$0xff]   ;;  %v13975_v53 = vld [vmem:[#allocation2 + $0xd4] sm:$0x1] }
 0x35d   : > { %v9170_v48 = vcombine.low %v7524_v12, %v7534_v1  ;;  %v7552_v21 = vor.u32 %v7551_v30, %v7547_v34  ;;  %v9993_v25 = vpop.f32.mrf.mxu1  ;;  %v7543_v55 = vrot.slane %v7542_v36, 4  ;;  %v7560_v19 = vshrl.u32 %v7196_v9, 16  ;;  %15186 = vst [vmem:[#allocation25_spill] sm:$0xff] %v13975_v53 }
 0x35e   : > { %v13964_v59 = vadd.f32 %v13877_v28, %v9993_v25  ;;  %v7563_v49 = vshll.u32 %v7196_v9, 16  ;;  %v13966_v24 = vpop.f32.mrf.mxu0  ;;  %v7973_v12 = vrot.slane %v7971_v39, 4  ;;  %v7974_v30 = vrot.slane %v13611_v50, 5 }
 0x35f   : > { %10328 = vmatmul.mubr.bf16.gmra.mxu0 %v9170_v48  ;;  %v7553_v31 = vrot.slane %v7552_v21, 4  ;;  %10280 = vmatmul.mubr.bf16.gmra.mxu1 %v10569_v8  ;;  %v4308_v22 = vpop.f32.mrf.mxu1  ;;  %v7569_v2 = vshll.u32 %v13960_v51, 16  ;;  %v7548_v33 = vsel %vm10803_vm4, %v7543_v55, %v7547_v34  ;;  %v7562_v9 = vrot.slane %v7560_v19, 4  ;;  %v7906_v55 = vld [vmem:[#allocation2 + $0x24] sm:$0xe] }
 0x360   : > { %15184 = vst [vmem:[#allocation20_spill] sm:$0xff] %v13964_v59  ;;  %10283 = vmatprep.mubr.bf16.mxu1 %v10570_v11  ;;  %v13973_v28 = vadd.f32 %v13886_v42, %v4308_v22  ;;  %v7565_v1 = vrot.slane %v7563_v49, 5  ;;  %v13977_v36 = vpop.f32.mrf.mxu0  ;;  %v7975_v50 = vsel %vm11214_vm7, %v7973_v12, %v7974_v30  ;;  %v7573_v34 = vshrl.u32 %v13960_v51, 16 }
 0x361   : > { %v7558_v48 = vsel %vm10803_vm4, %v7553_v31, %v7557_v3  ;;  %v9994_v21 = vpop.f32.mrf.mxu1  ;;  %v7571_v25 = vrot.slane %v7569_v2, 5  ;;  %v13986_v42 = vadd.f32 %v13539_v62, %v13651_v37  ;;  %v10572_v31 = vld [vmem:[#allocation2 + $0xcc] sm:$0xff]   ;;  %v7972_v22 = vsel %vm11214_vm7, %v9181_v57, %v7971_v39  ;;  %v7908_v39 = vld [vmem:[#allocation2 + $0x3c] sm:$0xe] }
 0x362   : > { %15185 = vst [vmem:[#allocation42_spill] sm:$0xff] %v13973_v28  ;;  %v9171_v8 = vcombine.low %v7548_v33, %v7558_v48  ;;  %v13989_v11 = vadd.f32 %v13895_v58, %v9994_v21  ;;  %v7566_v19 = vor.u32 %v7565_v1, %v7562_v9  ;;  %v13991_v49 = vpop.f32.mrf.mxu0  ;;  %v7575_v12 = vrot.slane %v7573_v34, 4  ;;  %v7907_v28 = vld [vmem:[#allocation2 + $0x30] sm:$0xe] }
 0x363   : > { %v4311_v3 = vpop.f32.mrf.mxu1  ;;  %v7579_v30 = vshll.u32 %v13975_v53, 16  ;;  %v7978_v2 = vrot.slane %v13632_v6, 5  ;;  %v9213_v37 = vcombine.low %v7972_v22, %v7975_v50  ;;  %v9182_v33 = vrot.slane %v7906_v55, 9  ;;  %v15206_v53 = vld [vmem:[#allocation39_spill] sm:$0xff] }
 0x364   : > { %15187 = vst [vmem:[#allocation28_spill] sm:$0xff] %v13989_v11  ;;  %10331 = vmatprep.mubr.bf16.mxu0 %v9171_v8  ;;  %v13998_v62 = vadd.f32 %v13899_v63, %v4311_v3  ;;  %v7567_v58 = vrot.slane %v7566_v19, 4  ;;  %v14000_v9 = vpop.f32.mrf.mxu0  ;;  %v7576_v48 = vor.u32 %v7575_v12, %v7571_v25  ;;  %v7981_v57 = vrot.slane %v13635_v20, 5 }
 0x365   : > { %v9997_v1 = vpop.f32.mrf.mxu1  ;;  %v7581_v21 = vrot.slane %v7579_v30, 5  ;;  %v7980_v11 = vrot.slane %v7978_v2, 4  ;;  %v7979_v6 = vsel %vm11214_vm7, %v9182_v33, %v7978_v2  ;;  %v9183_v63 = vrot.slane %v7907_v28, 9  ;;  %v7909_v30 = vld [vmem:[#allocation2 + $0x48] sm:$0xe] }
 0x366   : > { %15188 = vst [vmem:[#allocation32_spill] sm:$0xff] %v13998_v62  ;;  %v14004_v34 = vadd.f32 %v13916_v27, %v9997_v1  ;;  %v7985_v50 = vrot.slane %v13658_v29, 5  ;;  %v14009_v8 = vpop.f32.mrf.mxu0  ;;  %v7572_v19 = vsel %vm10803_vm4, %v7567_v58, %v7571_v25  ;;  %v7577_v3 = vrot.slane %v7576_v48, 4  ;;  %v7910_v48 = vld [vmem:[#allocation2 + $0x54] sm:$0xe] }
 0x367   : > { %10284 = vmatmul.mubr.bf16.gmra.mxu1 %v10572_v31  ;;  %v4324_v55 = vpop.f32.mrf.mxu1  ;;  %v7982_v20 = vsel %vm11214_vm7, %v7980_v11, %v7981_v57  ;;  %v7992_v27 = vrot.slane %v13674_v61, 5  ;;  %v7988_v29 = vrot.slane %v13663_v5, 5  ;;  %v9184_v31 = vrot.slane %v7908_v39, 9 }
 0x368   : > { %15189 = vst [vmem:[#allocation37_spill] sm:$0xff] %v14004_v34  ;;  %10351 = vmatprep.mubr.bf16.mxu1 %v9213_v37  ;;  %v14017_v22 = vadd.f32 %v13922_v15, %v4324_v55  ;;  %v7987_v28 = vrot.slane %v7985_v50, 4  ;;  %v14020_v12 = vpop.f32.mrf.mxu0  ;;  %v7582_v25 = vsel %vm10803_vm4, %v7577_v3, %v7581_v21  ;;  %v9214_v58 = vcombine.low %v7979_v6, %v7982_v20 }
 0x369   : > { %v9998_v2 = vpop.f32.mrf.mxu1  ;;  %v7994_v33 = vrot.slane %v7992_v27, 4  ;;  %v7995_v11 = vrot.slane %v13678_v35, 5  ;;  %v9172_v61 = vcombine.low %v7572_v19, %v7582_v25  ;;  %v7986_v15 = vsel %vm11214_vm7, %v9183_v63, %v7985_v50  ;;  %v7911_v19 = vld [vmem:[#allocation2 + $0x60] sm:$0xe] }
 0x36a   : > { %15190 = vst [vmem:[#allocation47_spill] sm:$0xff] %v14017_v22  ;;  %v14026_v37 = vadd.f32 %v13934_v54, %v9998_v2  ;;  %v7989_v5 = vsel %vm11214_vm7, %v7987_v28, %v7988_v29  ;;  %v14032_v1 = vpop.f32.mrf.mxu0  ;;  %v14036_v21 = vsel %vm11214_vm7, %v9184_v31, %v7992_v27  ;;  %v9185_v54 = vrot.slane %v7909_v30, 9  ;;  %v7912_v29 = vld [vmem:[#allocation2 + $0x6c] sm:$0xe] }
 0x36b   : > { %v4327_v18 = vpop.f32.mrf.mxu1  ;;  %v14040_v35 = vsel %vm11214_vm7, %v7994_v33, %v7995_v11  ;;  %v7999_v57 = vrot.slane %v13689_v40, 5  ;;  %10332 = vmatmul.mubr.bf16.gmra.mxu0 %v9172_v61  ;;  %v9215_v6 = vcombine.low %v7986_v15, %v7989_v5  ;;  %v8002_v50 = vrot.slane %v13697_v26, 5  ;;  %v7913_v5 = vld [vmem:[#allocation2 + $0x78] sm:$0xe] }
 0x36c   : > { %15191 = vst [vmem:[#allocation40_spill] sm:$0xff] %v14026_v37  ;;  %v14044_v39 = vadd.f32 %v13939_v23, %v4327_v18  ;;  %v14046_v63 = vpop.f32.mrf.mxu0  ;;  %v8006_v55 = vrot.slane %v13716_v52, 5  ;;  %v9216_v20 = vcombine.low %v14036_v21, %v14040_v35  ;;  %v9186_v28 = vrot.slane %v7910_v48, 9  ;;  %v15201_v21 = vld [vmem:[#allocation21_spill] sm:$0xff] }
 0x36d   : > { %v10065_v3 = vpop.f32.mrf.mxu1  ;;  %v8000_v27 = vsel %vm11214_vm7, %v9185_v54, %v7999_v57  ;;  %v8001_v40 = vrot.slane %v7999_v57, 4  ;;  %v8009_v26 = vrot.slane %v13726_v38, 5  ;;  %v8013_v52 = vrot.slane %v13738_v44, 5  ;;  %v15202_v37 = vld [vmem:[#allocation13_spill] sm:$0xff] }
 0x36e   : > { %15192 = vst [vmem:[#allocation43_spill] sm:$0xff] %v14044_v39  ;;  %v14055_v23 = vadd.f32 %v10065_v3, %v13695_v41  ;;  %v14057_v31 = vpop.f32.mrf.mxu0  ;;  %v8008_v30 = vrot.slane %v8006_v55, 4  ;;  %v14065_v33 = vsel %vm11214_vm7, %v9186_v28, %v8006_v55  ;;  %v9187_v11 = vrot.slane %v7911_v19, 9 }
 0x36f   : > { %10352 = vmatmul.mubr.bf16.vlgmr.msra.gmra.mxu1 %v9214_v58  ;;  %v4967_v25 = vpop.f32.mrf.mxu1  ;;  %v8003_v2 = vsel %vm11214_vm7, %v8001_v40, %v8002_v50  ;;  %v8020_v41 = vrot.slane %v13769_v16, 5  ;;  %v8016_v44 = vrot.slane %v13747_v47, 5  ;;  %v9188_v58 = vrot.slane %v7912_v29, 9  ;;  %v7914_v50 = vld [vmem:[#allocation2 + $0x84] sm:$0xe] }
 0x370   : > { %10355 = vmatprep.mubr.bf16.mxu1 %v9215_v6  ;;  %v14069_v61 = vadd.f32 %v4967_v25, %v13710_v46  ;;  %v14071_v15 = vpop.f32.mrf.mxu0  ;;  %v14075_v38 = vsel %vm11214_vm7, %v8008_v30, %v8009_v26  ;;  %v9217_v18 = vcombine.low %v8000_v27, %v8003_v2  ;;  %v8015_v16 = vrot.slane %v8013_v52, 4  ;;  %v7915_v30 = vld [vmem:[#allocation2 + $0x90] sm:$0xe]  ;;  %v15193_v2 = vld [vmem:[#allocation19_spill] sm:$0xff] }
 0x371   : > { %v10066_v48 = vpop.f32.mrf.mxu1  ;;  %v8022_v35 = vrot.slane %v8020_v41, 4  ;;  %v14087_v57 = vsel %vm11214_vm7, %v9187_v11, %v8013_v52  ;;  %v8023_v47 = vrot.slane %v13771_v14, 5  ;;  %v8027_v6 = vrot.slane %v13785_v17, 5 }
 0x372   : > { %v14081_v46 = vadd.f32 %v10066_v48, %v13714_v43  ;;  %v14083_v54 = vpop.f32.mrf.mxu0  ;;  %v14093_v19 = vsel %vm11214_vm7, %v8015_v16, %v8016_v44  ;;  %v14097_v43 = vsel %vm11214_vm7, %v9188_v58, %v8020_v41  ;;  %v9189_v3 = vrot.slane %v7913_v5, 9  ;;  %v15194_v58 = vld [vmem:[#allocation29_spill] sm:$0xff]  ;;  %v7916_v16 = vld [vmem:[#allocation2 + $0x9c] sm:$0xe] }
 0x373   : > { %v4970_v55 = vpop.f32.mrf.mxu1  ;;  %v8034_v27 = vrot.slane %v13814_v60, 5  ;;  %v14109_v17 = vsel %vm11214_vm7, %v8022_v35, %v8023_v47  ;;  %v8030_v29 = vrot.slane %v13793_v10, 5  ;;  %v8029_v60 = vrot.slane %v8027_v6, 4  ;;  %v15195_v10 = vld [vmem:[#allocation15_spill] sm:$0xff] }
 0x374   : > { %v14101_v40 = vadd.f32 %v4970_v55, %v13986_v42  ;;  %v14103_v28 = vpop.f32.mrf.mxu0  ;;  %v9190_v25 = vrot.slane %v7914_v50, 9  ;;  %v14121_v44 = vsel %vm11214_vm7, %v9189_v3, %v8027_v6  ;;  %v8037_v5 = vrot.slane %v15194_v58, 5  ;;  %v15197_v6 = vld [vmem:[#allocation22_spill] sm:$0xff] }
 0x375   : > { %v10069_v26 = vpop.f32.mrf.mxu1  ;;  %v8036_v42 = vrot.slane %v8034_v27, 4  ;;  %v8041_v48 = vrot.slane %v15195_v10, 5  ;;  %v14127_v47 = vsel %vm11214_vm7, %v8029_v60, %v8030_v29  ;;  %v9191_v55 = vrot.slane %v7915_v30, 9  ;;  %v15198_v29 = vld [vmem:[#allocation33_spill] sm:$0xff] }
 0x376   : > { %v14115_v11 = vadd.f32 %v10069_v26, %v15193_v2  ;;  %v14117_v41 = vpop.f32.mrf.mxu0  ;;  %v14131_v50 = vsel %vm11214_vm7, %v9190_v25, %v8034_v27  ;;  %v15196_v26 = vld [vmem:[#allocation35_spill] sm:$0xff]  ;;  %v8044_v60 = vrot.slane %v15198_v29, 5  ;;  %v9192_v25 = vrot.slane %v7916_v16, 9 }
 0x377   : > { %10356 = vmatmul.mubr.bf16.gmra.mxu1 %v9216_v20  ;;  %v4983_v35 = vpop.f32.mrf.mxu1  ;;  %v8048_v2 = vrot.slane %v15196_v26, 5  ;;  %v14141_v10 = vsel %vm11214_vm7, %v8036_v42, %v8037_v5  ;;  %v8043_v30 = vrot.slane %v8041_v48, 4  ;;  %v7917_v26 = vld [vmem:[#allocation2 + $0xa8] sm:$0xe]  ;;  %v8051_v42 = vrot.slane %v15202_v37, 5 }
 0x378   : > { %10359 = vmatprep.mubr.bf16.mxu1 %v9217_v18  ;;  %v5098_v3 = vadd.f32 %v4983_v35, %v15197_v6  ;;  %v14135_v58 = vpop.f32.mrf.mxu0  ;;  %v15199_v35 = vld [vmem:[#allocation11_spill] sm:$0xff]  ;;  %v15200_v6 = vld [vmem:[#allocation6_spill] sm:$0xff]  ;;  %v8055_v5 = vrot.slane %v13881_v13, 5  ;;  %v14155_v22 = vsel %vm11214_vm7, %v9191_v55, %v8041_v48  ;;  %v9193_v55 = vrot.slane %v7917_v26, 9 }
 0x379   : > { %v10070_v52 = vpop.f32.mrf.mxu1  ;;  %v8050_v18 = vrot.slane %v8048_v2, 4  ;;  %v4537_v14 = vadd.f32 %v15200_v6, %v15199_v35  ;;  %v14159_v16 = vsel %vm11214_vm7, %v8043_v30, %v8044_v60  ;;  %v14163_v35 = vsel %vm11214_vm7, %v9192_v25, %v8048_v2  ;;  %v15204_v25 = vld [vmem:[#allocation10_spill] sm:$0xff] }
 0x37a   : > { %v5101_v39 = vadd.f32 %v10070_v52, %v15201_v21  ;;  %v14149_v20 = vpop.f32.mrf.mxu0  ;;  %v7918_v21 = vld [vmem:[#allocation2 + $0xb4] sm:$0xe]  ;;  %v15203_v52 = vld [vmem:[#allocation23_spill] sm:$0xff]  ;;  %v8057_v2 = vrot.slane %v8055_v5, 4  ;;  %v8058_v34 = vrot.slane %v15204_v25, 5  ;;  %v8065_v13 = vrot.slane %v15206_v53, 5 }
 0x37b   : > { %v4986_v29 = vpop.f32.mrf.mxu1  ;;  %v8062_v6 = vrot.slane %v15203_v52, 5  ;;  %v14172_v48 = vsel %vm11214_vm7, %v8050_v18, %v8051_v42  ;;  %v15205_v52 = vld [vmem:[#allocation24_spill] sm:$0xff]  ;;  %v9194_v59 = vrot.slane %v7918_v21, 9  ;;  %v15207_v18 = vcombine.low %v14065_v33, %v14075_v38  ;;  %v15209_v21 = vld [vmem:[#allocation26_spill] sm:$0xff] }
 0x37c   : > { %v5099_v27 = vadd.f32 %v4986_v29, %v4537_v14  ;;  %v14166_v37 = vpop.f32.mrf.mxu0  ;;  %v9224_v30 = vcombine.low %v14163_v35, %v14172_v48  ;;  %v14186_v42 = vsel %vm11214_vm7, %v9193_v55, %v8055_v5  ;;  %v14190_v25 = vsel %vm11214_vm7, %v8057_v2, %v8058_v34  ;;  %v15226_v48 = vld [vmem:[#allocation17_spill] sm:$0xff] }
 0x37d   : > { %v10073_v60 = vpop.f32.mrf.mxu1  ;;  %v8064_v62 = vrot.slane %v8062_v6, 4  ;;  %v9225_v33 = vcombine.low %v14186_v42, %v14190_v25  ;;  %v14200_v38 = vsel %vm11214_vm7, %v9194_v59, %v8062_v6  ;;  %v14217_v59 = vadd.f32 %v13958_v32, %v14069_v61 }
 0x37e   : > { %v5104_v14 = vadd.f32 %v10073_v60, %v15205_v52  ;;  %v14178_v29 = vpop.f32.mrf.mxu0  ;;  %v15208_v60 = vcombine.low %v14087_v57, %v14093_v19  ;;  %v15210_v57 = vld [vmem:[#allocation27_spill] sm:$0xff]  ;;  %v14236_v61 = vadd.f32 %v14009_v8, %v5101_v39  ;;  %v15213_v8 = vcombine.low %v14097_v43, %v14109_v17  ;;  %v15215_v39 = vld [vmem:[#allocation16_spill] sm:$0xff]  ;;  %v15217_v17 = vld [vmem:[#allocation34_spill] sm:$0xff] }
 0x37f   : > { %10360 = vmatmul.mubr.bf16.gmra.mxu1 %v15207_v18  ;;  %v4999_v26 = vpop.f32.mrf.mxu1  ;;  %v14204_v5 = vsel %vm11214_vm7, %v8064_v62, %v8065_v13  ;;  %v14213_v18 = vadd.f32 %v13946_v7, %v14055_v23  ;;  %v14221_v62 = vadd.f32 %v13966_v24, %v14081_v46  ;;  %v14225_v13 = vadd.f32 %v13977_v36, %v14101_v40  ;;  %v15212_v46 = vld [vmem:[#allocation31_spill] sm:$0xff] }
 0x380   : > { %10363 = vmatprep.mubr.bf16.mxu1 %v15208_v60  ;;  %v5102_v52 = vadd.f32 %v4999_v26, %v15209_v21  ;;  %v5420_v53 = vpop.f32.mrf.mxu0  ;;  %v9226_v55 = vcombine.low %v14200_v38, %v14204_v5  ;;  %v14229_v26 = vadd.f32 %v13991_v49, %v14115_v11  ;;  %v15211_v60 = vld [vmem:[#allocation36_spill] sm:$0xff]  ;;  %v14233_v21 = vadd.f32 %v14000_v9, %v5098_v3 }
 0x381   : > { %v10074_v34 = vpop.f32.mrf.mxu1  ;;  %v14239_v24 = vadd.f32 %v14020_v12, %v5099_v27  ;;  %v14242_v36 = vadd.f32 %v14032_v1, %v5104_v14  ;;  %v15214_v1 = vcombine.low %v14121_v44, %v14127_v47 }
 0x382   : > { %v5105_v19 = vadd.f32 %v10074_v34, %v15210_v57  ;;  %v14209_v2 = vpop.f32.mrf.mxu0  ;;  %v14248_v11 = vadd.f32 %v14046_v63, %v5102_v52  ;;  %v15216_v52 = vld [vmem:[#allocation18_spill] sm:$0xff] }
 0x383   : > { %v5002_v6 = vpop.f32.mrf.mxu1 }
 0x384   : > { %v5103_v7 = vadd.f32 %v5002_v6, %v15211_v60  ;;  %v5433_v23 = vpop.f32.mrf.mxu0  ;;  %v14251_v9 = vadd.f32 %v14057_v31, %v5105_v19  ;;  %v15218_v60 = vld [vmem:[#allocation8_spill] sm:$0xff] }
 0x385   : > { %v10077_v32 = vpop.f32.mrf.mxu1 }
 0x386   : > { %v5108_v40 = vadd.f32 %v10077_v32, %v15212_v46  ;;  %v14245_v49 = vpop.f32.mrf.mxu0  ;;  %v14254_v3 = vadd.f32 %v14071_v15, %v5103_v7 }
 0x387   : > { %10364 = vmatmul.mubr.bf16.gmra.mxu1 %v15213_v8  ;;  %v5015_v12 = vpop.f32.mrf.mxu1  ;;  %v15221_v8 = vld [vmem:[#allocation38_spill] sm:$0xff] }
 0x388   : > { %10367 = vmatprep.mubr.bf16.mxu1 %v15214_v1  ;;  %v5106_v27 = vadd.f32 %v5015_v12, %v15215_v39  ;;  %v5436_v14 = vpop.f32.mrf.mxu0  ;;  %v14264_v63 = vadd.f32 %v14083_v54, %v5108_v40  ;;  %v15220_v40 = vcombine.low %v14155_v22, %v14159_v16  ;;  %v15223_v22 = vld [vmem:[#allocation30_spill] sm:$0xff] }
 0x389   : > { %v10078_v31 = vpop.f32.mrf.mxu1 }
 0x38a   : > { %v5109_v34 = vadd.f32 %v10078_v31, %v15216_v52  ;;  %v14267_v15 = vpop.f32.mrf.mxu0  ;;  %v14270_v57 = vadd.f32 %v14103_v28, %v5106_v27  ;;  %v15219_v28 = vcombine.low %v14131_v50, %v14141_v10  ;;  %v15222_v27 = vld [vmem:[#allocation14_spill] sm:$0xff]  ;;  %v8069_v52 = vrot.slane %v13925_v0, 5 }
 0x38b   : > { %v5018_v43 = vpop.f32.mrf.mxu1 }
 0x38c   : > { %v5107_v19 = vadd.f32 %v5018_v43, %v15217_v17  ;;  %v14273_v6 = vpop.f32.mrf.mxu0  ;;  %v14276_v44 = vadd.f32 %v14117_v41, %v5109_v34  ;;  %v15224_v17 = vld [vmem:[#allocation9_spill] sm:$0xff]  ;;  %v8071_v0 = vrot.slane %v8069_v52, 4 }
 0x38d   : > { %v10081_v47 = vpop.f32.mrf.mxu1 }
 0x38e   : > { %v5112_v54 = vadd.f32 %v10081_v47, %v15218_v60  ;;  %v14279_v7 = vpop.f32.mrf.mxu0  ;;  %v14282_v32 = vadd.f32 %v14135_v58, %v5107_v19 }
 0x38f   : > { %10368 = vmatmul.mubr.bf16.gmra.mxu1 %v15219_v28  ;;  %v5031_v46 = vpop.f32.mrf.mxu1 }
 0x390   : > { %10371 = vmatprep.mubr.bf16.mxu1 %v15220_v40  ;;  %v5110_v41 = vadd.f32 %v5031_v46, %v15221_v8  ;;  %v14291_v12 = vpop.f32.mrf.mxu0  ;;  %v14294_v1 = vadd.f32 %v14149_v20, %v5112_v54  ;;  %v7919_v54 = vld [vmem:[#allocation2 + $0xc0] sm:$0xe]  ;;  %v7920_v46 = vld [vmem:[#allocation2 + $0xcc] sm:$0xe]  ;;  %v8076_v40 = vrot.slane %v13960_v51, 5 }
 0x391   : > { %v10082_v39 = vpop.f32.mrf.mxu1  ;;  %v9195_v25 = vrot.slane %v7919_v54, 9  ;;  %v15229_v54 = vld [vmem:[#allocation42_spill] sm:$0xff] }
 0x392   : > { %v5113_v58 = vadd.f32 %v10082_v39, %v15222_v27  ;;  %v14297_v31 = vpop.f32.mrf.mxu0  ;;  %v14300_v50 = vadd.f32 %v14166_v37, %v5110_v41  ;;  %v15225_v41 = vld [vmem:[#allocation12_spill] sm:$0xff] }
 0x393   : > { %v5034_v10 = vpop.f32.mrf.mxu1  ;;  %v8072_v35 = vrot.slane %v15225_v41, 5 }
 0x394   : > { %v5111_v16 = vadd.f32 %v5034_v10, %v15223_v22  ;;  %v14304_v34 = vpop.f32.mrf.mxu0  ;;  %v14307_v43 = vadd.f32 %v14178_v29, %v5113_v58  ;;  %v8078_v58 = vrot.slane %v8076_v40, 4 }
 0x395   : > { %v10085_v20 = vpop.f32.mrf.mxu1 }
 0x396   : > { %v5116_v19 = vadd.f32 %v10085_v20, %v15224_v17  ;;  %v14310_v47 = vpop.f32.mrf.mxu0  ;;  %v14312_v60 = vadd.f32 %v5420_v53, %v5111_v16  ;;  %v15228_v17 = vld [vmem:[#allocation20_spill] sm:$0xff] }
 0x397   : > { %10372 = vmatmul.mubr.bf16.gmra.mxu1 %v9224_v30  ;;  %v5047_v37 = vpop.f32.mrf.mxu1 }
 0x398   : > { %10375 = vmatprep.mubr.bf16.mxu1 %v9225_v33  ;;  %v5114_v29 = vadd.f32 %v5047_v37, %v13944_v4  ;;  %v5468_v28 = vpop.f32.mrf.mxu0  ;;  %v14323_v53 = vadd.f32 %v14209_v2, %v5116_v19  ;;  %v8073_v4 = vsel %vm11214_vm7, %v8071_v0, %v8072_v35  ;;  %v9196_v33 = vrot.slane %v7920_v46, 9  ;;  %v15227_v2 = vld [vmem:[#allocation25_spill] sm:$0xff]  ;;  %v15230_v35 = vld [vmem:[#allocation28_spill] sm:$0xff] }
 0x399   : > { %v10086_v8 = vpop.f32.mrf.mxu1  ;;  %v8079_v10 = vrot.slane %v15227_v2, 5  ;;  %v15233_v2 = vld [vmem:[#allocation47_spill] sm:$0xff] }
 0x39a   : > { %v5117_v30 = vadd.f32 %v10086_v8, %v15226_v48  ;;  %v14327_v39 = vpop.f32.mrf.mxu0  ;;  %v14329_v27 = vadd.f32 %v5433_v23, %v5114_v29  ;;  %v8070_v23 = vsel %vm11214_vm7, %v9195_v25, %v8069_v52  ;;  %v8077_v46 = vsel %vm11214_vm7, %v9196_v33, %v8076_v40 }
 0x39b   : > { %v5050_v42 = vpop.f32.mrf.mxu1  ;;  %v9227_v37 = vcombine.low %v8070_v23, %v8073_v4  ;;  %v8080_v52 = vsel %vm11214_vm7, %v8078_v58, %v8079_v10 }
 0x39c   : > { %v5115_v51 = vadd.f32 %v5050_v42, %v13956_v45  ;;  %v14335_v22 = vpop.f32.mrf.mxu0  ;;  %v14338_v16 = vadd.f32 %v14245_v49, %v5117_v30  ;;  %v9228_v30 = vcombine.low %v8077_v46, %v8080_v52  ;;  %v15231_v42 = vld [vmem:[#allocation32_spill] sm:$0xff] }
 0x39e   : > { %v10089_v20 = vpop.f32.mrf.mxu1  ;;  %v14343_v29 = vpop.f32.mrf.mxu0  ;;  %v14345_v0 = vadd.f32 %v5436_v14, %v5115_v51 }
 0x39f   : > { %v5120_v19 = vadd.f32 %v10089_v20, %v15228_v17  ;;  %10376 = vmatmul.mubr.bf16.gmra.mxu1 %v9226_v55 }
 0x3a0   : > { %v5063_v45 = vpop.f32.mrf.mxu1  ;;  %10379 = vmatprep.mubr.bf16.mxu1 %v9227_v37  ;;  %v14355_v8 = vpop.f32.mrf.mxu0 }
 0x3a1   : > { %v5118_v49 = vadd.f32 %v5063_v45, %v15229_v54  ;;  %v14358_v41 = vadd.f32 %v14267_v15, %v5120_v19  ;;  %v15232_v15 = vld [vmem:[#allocation37_spill] sm:$0xff] }
 0x3a2   : > { %v10090_v14 = vpop.f32.mrf.mxu1  ;;  %v14361_v38 = vpop.f32.mrf.mxu0 }
 0x3a3   : > { %v5121_v48 = vadd.f32 %v10090_v14, %v15230_v35  ;;  %v14364_v5 = vadd.f32 %v14273_v6, %v5118_v49 }
 0x3a4   : > { %v5066_v55 = vpop.f32.mrf.mxu1  ;;  %v14367_v25 = vpop.f32.mrf.mxu0 }
 0x3a5   : > { %v5119_v40 = vadd.f32 %v5066_v55, %v15231_v42  ;;  %v14370_v56 = vadd.f32 %v14279_v7, %v5121_v48  ;;  %v15234_v7 = vld [vmem:[#allocation40_spill] sm:$0xff] }
 0x3a6   : > { %v10093_v4 = vpop.f32.mrf.mxu1  ;;  %v14373_v51 = vpop.f32.mrf.mxu0 }
 0x3a7   : > { %v5124_v33 = vadd.f32 %v10093_v4, %v15232_v15  ;;  %v14376_v58 = vadd.f32 %v14291_v12, %v5119_v40  ;;  %10380 = vmatmul.mubr.bf16.gmra.mxu1 %v9228_v30  ;;  %v15235_v12 = vld [vmem:[#allocation43_spill] sm:$0xff] }
 0x3a8   : > { %v5079_v6 = vpop.f32.mrf.mxu1  ;;  %v14379_v20 = vpop.f32.mrf.mxu0 }
 0x3a9   : > { %v5122_v10 = vadd.f32 %v5079_v6, %v15233_v2  ;;  %v14382_v23 = vadd.f32 %v14297_v31, %v5124_v33 }
 0x3aa   : > { %v10094_v17 = vpop.f32.mrf.mxu1  ;;  %v14385_v37 = vpop.f32.mrf.mxu0 }
 0x3ab   : > { %v5125_v19 = vadd.f32 %v10094_v17, %v15234_v7  ;;  %v14388_v45 = vadd.f32 %v14304_v34, %v5122_v10 }
 0x3ac   : > { %v5082_v54 = vpop.f32.mrf.mxu1  ;;  %v14391_v46 = vpop.f32.mrf.mxu0 }
 0x3ad   : > { %v5123_v49 = vadd.f32 %v5082_v54, %v15235_v12  ;;  %v14394_v52 = vadd.f32 %v14310_v47, %v5125_v19 }
 0x3ae   : > { %v10161_v14 = vpop.f32.mrf.mxu1  ;;  %v14399_v35 = vpop.f32.mrf.mxu0 }
 0x3af   : > { %v14397_v31 = vadd.f32 %v10161_v14, %v14213_v18  ;;  %v14401_v48 = vadd.f32 %v5468_v28, %v5123_v49 }
 0x3b0   : > { %v6107_v55 = vpop.f32.mrf.mxu1  ;;  %v14406_v30 = vpop.f32.mrf.mxu0 }
 0x3b1   : > { %v14404_v34 = vadd.f32 %v6107_v55, %v14217_v59 }
 0x3b2   : > { %v10162_v42 = vpop.f32.mrf.mxu1  ;;  %v14411_v47 = vpop.f32.mrf.mxu0 }
 0x3b3   : > { %v14409_v40 = vadd.f32 %v10162_v42, %v14221_v62 }
 0x3b4   : > { %v6110_v4 = vpop.f32.mrf.mxu1  ;;  %v14416_v15 = vpop.f32.mrf.mxu0 }
 0x3b5   : > { %v14414_v18 = vadd.f32 %v6110_v4, %v14225_v13 }
 0x3b6   : > { %v10165_v28 = vpop.f32.mrf.mxu1  ;;  %v14421_v59 = vpop.f32.mrf.mxu0 }
 0x3b7   : > { %v14419_v33 = vadd.f32 %v10165_v28, %v14229_v26 }
 0x3b8   : > { %v6123_v6 = vpop.f32.mrf.mxu1  ;;  %v14426_v62 = vpop.f32.mrf.mxu0 }
 0x3b9   : > { %v14424_v2 = vadd.f32 %v6123_v6, %v14233_v21  ;;  %15236 = vst [vmem:[#allocation44_spill] sm:$0xff] %v14426_v62 }
 0x3ba   : > { %v10166_v10 = vpop.f32.mrf.mxu1  ;;  %v14431_v13 = vpop.f32.mrf.mxu0 }
 0x3bb   : > { %v14429_v17 = vadd.f32 %v10166_v10, %v14236_v61  ;;  %15237 = vst [vmem:[#allocation45_spill] sm:$0xff] %v14431_v13 }
 0x3bc   : > { %v6126_v7 = vpop.f32.mrf.mxu1  ;;  %v14436_v26 = vpop.f32.mrf.mxu0 }
 0x3bd   : > { %v14434_v19 = vadd.f32 %v6126_v7, %v14239_v24  ;;  %15238 = vst [vmem:[#allocation46_spill] sm:$0xff] %v14436_v26 }
 0x3be   : > { %v10169_v54 = vpop.f32.mrf.mxu1  ;;  %v14441_v21 = vpop.f32.mrf.mxu0 }
 0x3bf   : > { %v14439_v12 = vadd.f32 %v10169_v54, %v14242_v36  ;;  %15239 = vst [vmem:[#allocation48_spill] sm:$0xff] %v14441_v21 }
 0x3c0   : > { %v6139_v49 = vpop.f32.mrf.mxu1  ;;  %v14446_v61 = vpop.f32.mrf.mxu0 }
 0x3c1   : > { %v14444_v14 = vadd.f32 %v6139_v49, %v14248_v11  ;;  %15240 = vst [vmem:[#allocation54_spill] sm:$0xff] %v14446_v61 }
 0x3c2   : > { %v10170_v55 = vpop.f32.mrf.mxu1  ;;  %v14451_v24 = vpop.f32.mrf.mxu0 }
 0x3c3   : > { %v14449_v42 = vadd.f32 %v10170_v55, %v14251_v9  ;;  %15241 = vst [vmem:[#allocation49_spill] sm:$0xff] %v14451_v24 }
 0x3c4   : > { %v6142_v4 = vpop.f32.mrf.mxu1  ;;  %v14456_v36 = vpop.f32.mrf.mxu0 }
 0x3c5   : > { %v14454_v28 = vadd.f32 %v6142_v4, %v14254_v3  ;;  %15242 = vst [vmem:[#allocation56_spill] sm:$0xff] %v14456_v36 }
 0x3c6   : > { %v10173_v6 = vpop.f32.mrf.mxu1  ;;  %v14461_v7 = vpop.f32.mrf.mxu0 }
 0x3c7   : > { %v14459_v10 = vadd.f32 %v10173_v6, %v14264_v63  ;;  %15243 = vst [vmem:[#allocation50_spill] sm:$0xff] %v14461_v7 }
 0x3c8   : > { %v6155_v11 = vpop.f32.mrf.mxu1  ;;  %v14469_v24 = vpop.f32.mrf.mxu0 }
 0x3c9   : > { %v14464_v54 = vadd.f32 %v6155_v11, %v14270_v57  ;;  %15244 = vst [vmem:[#allocation58_spill] sm:$0xff] %v14469_v24 }
 0x3ca   : > { %v10174_v9 = vpop.f32.mrf.mxu1  ;;  %v14477_v36 = vpop.f32.mrf.mxu0 }
 0x3cb   : > { %v14467_v49 = vadd.f32 %v10174_v9, %v14276_v44  ;;  %15247 = vst [vmem:[#allocation60_spill] sm:$0xff] %v14477_v36 }
 0x3cc   : > { %v6158_v55 = vpop.f32.mrf.mxu1  ;;  %v14485_v7 = vpop.f32.mrf.mxu0 }
 0x3cd   : > { %v14472_v3 = vadd.f32 %v6158_v55, %v14282_v32  ;;  %15250 = vst [vmem:[#allocation55_spill] sm:$0xff] %v14485_v7 }
 0x3ce   : > { %v10177_v4 = vpop.f32.mrf.mxu1  ;;  %v14493_v24 = vpop.f32.mrf.mxu0 }
 0x3cf   : > { %15245 = vst [vmem:[#allocation51_spill] sm:$0xff] %v14472_v3  ;;  %v14475_v63 = vadd.f32 %v10177_v4, %v14294_v1  ;;  %15253 = vst [vmem:[#allocation59_spill] sm:$0xff] %v14493_v24 }
 0x3d0   : > { %v6171_v6 = vpop.f32.mrf.mxu1 }
 0x3d1   : > { %15246 = vst [vmem:[#allocation52_spill] sm:$0xff] %v14475_v63  ;;  %v14480_v57 = vadd.f32 %v6171_v6, %v14300_v50 }
 0x3d2   : > { %v10178_v11 = vpop.f32.mrf.mxu1 }
 0x3d3   : > { %15248 = vst [vmem:[#allocation53_spill] sm:$0xff] %v14480_v57  ;;  %v14483_v44 = vadd.f32 %v10178_v11, %v14307_v43  ;;  %v14501_v11 = vpop.f32.mrf.mxu0 }
 0x3d4   : > { %v6174_v9 = vpop.f32.mrf.mxu1  ;;  %15256 = vst [vmem:[#allocation41_spill] sm:$0xff] %v14501_v11 }
 0x3d5   : > { %15249 = vst [vmem:[#allocation61_spill] sm:$0xff] %v14483_v44  ;;  %v14488_v32 = vadd.f32 %v6174_v9, %v14312_v60 }
 0x3d6   : > { %v10181_v55 = vpop.f32.mrf.mxu1 }
 0x3d7   : > { %15251 = vst [vmem:[#allocation63_spill] sm:$0xff] %v14488_v32  ;;  %v14491_v1 = vadd.f32 %v10181_v55, %v14323_v53  ;;  %v14509_v55 = vpop.f32.mrf.mxu0 }
 0x3d8   : > { %v6187_v4 = vpop.f32.mrf.mxu1  ;;  %15259 = vst [vmem:[#allocation15_spill] sm:$0xff] %v14509_v55 }
 0x3d9   : > { %15252 = vst [vmem:[#allocation57_spill] sm:$0xff] %v14491_v1  ;;  %v14496_v50 = vadd.f32 %v6187_v4, %v14329_v27 }
 0x3da   : > { %v10182_v6 = vpop.f32.mrf.mxu1 }
 0x3db   : > { %15254 = vst [vmem:[#allocation62_spill] sm:$0xff] %v14496_v50  ;;  %v14499_v43 = vadd.f32 %v10182_v6, %v14338_v16  ;;  %v14517_v6 = vpop.f32.mrf.mxu0 }
 0x3dc   : > { %v6190_v7 = vpop.f32.mrf.mxu1  ;;  %15262 = vst [vmem:[#allocation33_spill] sm:$0xff] %v14517_v6 }
 0x3dd   : > { %15255 = vst [vmem:[#allocation7_spill] sm:$0xff] %v14499_v43  ;;  %v14504_v60 = vadd.f32 %v6190_v7, %v14345_v0  ;;  %v14522_v7 = vpop.f32.mrf.mxu0 }
 0x3de   : > { %v10185_v9 = vpop.f32.mrf.mxu1  ;;  %15264 = vst [vmem:[#allocation6_spill] sm:$0xff] %v14522_v7 }
 0x3df   : > { %15257 = vst [vmem:[#allocation19_spill] sm:$0xff] %v14504_v60  ;;  %v14507_v53 = vadd.f32 %v10185_v9, %v14358_v41 }
 0x3e0   : > { %v6203_v24 = vpop.f32.mrf.mxu1 }
 0x3e1   : > { %15258 = vst [vmem:[#allocation29_spill] sm:$0xff] %v14507_v53  ;;  %v14512_v27 = vadd.f32 %v6203_v24, %v14364_v5  ;;  %v14530_v24 = vpop.f32.mrf.mxu0 }
 0x3e2   : > { %v10186_v4 = vpop.f32.mrf.mxu1  ;;  %15267 = vst [vmem:[#allocation23_spill] sm:$0xff] %v14530_v24 }
 0x3e3   : > { %15260 = vst [vmem:[#allocation35_spill] sm:$0xff] %v14512_v27  ;;  %v14515_v16 = vadd.f32 %v10186_v4, %v14370_v56 }
 0x3e4   : > { %v6206_v11 = vpop.f32.mrf.mxu1 }
 0x3e5   : > { %15261 = vst [vmem:[#allocation22_spill] sm:$0xff] %v14515_v16  ;;  %v14520_v0 = vadd.f32 %v6206_v11, %v14376_v58  ;;  %v10305_v11 = vpop.f32.mrf.mxu0 }
 0x3e7   : > { %15263 = vst [vmem:[#allocation11_spill] sm:$0xff] %v14520_v0  ;;  %v10189_v41 = vpop.f32.mrf.mxu1  ;;  %v7746_v16 = vpop.f32.mrf.mxu0 }
 0x3e8   : > { %v14525_v9 = vadd.f32 %v10189_v41, %v14382_v23 }
 0x3e9   : > { %v6219_v55 = vpop.f32.mrf.mxu1 }
 0x3ea   : > { %15265 = vst [vmem:[#allocation21_spill] sm:$0xff] %v14525_v9  ;;  %v14528_v5 = vadd.f32 %v6219_v55, %v14388_v45  ;;  %v14538_v9 = vpop.f32.mrf.mxu0 }
 0x3eb   : > { %v10190_v56 = vpop.f32.mrf.mxu1 }
 0x3ec   : > { %15266 = vst [vmem:[#allocation13_spill] sm:$0xff] %v14528_v5  ;;  %v14533_v4 = vadd.f32 %v10190_v56, %v14394_v52  ;;  %v14542_v24 = vpop.f32.mrf.mxu0 }
 0x3ed   : > { %v6222_v6 = vpop.f32.mrf.mxu1 }
 0x3ee   : > { %15268 = vst [vmem:[#allocation10_spill] sm:$0xff] %v14533_v4  ;;  %v14536_v58 = vadd.f32 %v6222_v6, %v14401_v48 }
 0x3ef   : > { %v10257_v7 = vpop.f32.mrf.mxu1  ;;  %v14548_v56 = vpop.f32.mrf.mxu0 }
 0x3f0   : > { %15269 = vst [vmem:[#allocation24_spill] sm:$0xff] %v14536_v58 }
 0x3f1   : > { %v6992_v0 = vpop.f32.mrf.mxu1  ;;  %v14554_v58 = vpop.f32.mrf.mxu0 }
 0x3f3   : > { %v10258_v23 = vpop.f32.mrf.mxu1  ;;  %v14560_v36 = vpop.f32.mrf.mxu0 }
 0x3f5   : > { %v6995_v41 = vpop.f32.mrf.mxu1  ;;  %v14566_v43 = vpop.f32.mrf.mxu0 }
 0x3f7   : > { %v10261_v45 = vpop.f32.mrf.mxu1 }
 0x3f9   : > { %v14540_v55 = vpop.f32.mrf.mxu1  ;;  %v14572_v61 = vpop.f32.mrf.mxu0 }
 0x3fb   : > { %v14544_v5 = vpop.f32.mrf.mxu1  ;;  %v14578_v44 = vpop.f32.mrf.mxu0 }
 0x3fd   : > { %v14546_v52 = vpop.f32.mrf.mxu1  ;;  %v14584_v13 = vpop.f32.mrf.mxu0 }
 0x3ff   : > { %v14550_v48 = vpop.f32.mrf.mxu1  ;;  %v14590_v3 = vpop.f32.mrf.mxu0 }
 0x400   : > { %15279 = vst [vmem:[#allocation38_spill] sm:$0xff] %v14590_v3 }
 0x401   : > { %v14552_v6 = vpop.f32.mrf.mxu1 }
 0x403   : > { %v14556_v4 = vpop.f32.mrf.mxu1 }
 0x405   : > { %v14558_v27 = vpop.f32.mrf.mxu1 }
 0x407   : > { %v14562_v53 = vpop.f32.mrf.mxu1 }
 0x409   : > { %v14564_v60 = vpop.f32.mrf.mxu1 }
 0x40a   : > { %15270 = vst [vmem:[#allocation39_spill] sm:$0xff] %v14564_v60 }
 0x40b   : > { %v14568_v50 = vpop.f32.mrf.mxu1 }
 0x40c   : > { %15271 = vst [vmem:[#allocation26_spill] sm:$0xff] %v14568_v50 }
 0x40d   : > { %v14570_v1 = vpop.f32.mrf.mxu1 }
 0x40e   : > { %15272 = vst [vmem:[#allocation27_spill] sm:$0xff] %v14570_v1 }
 0x40f   : > { %v14574_v32 = vpop.f32.mrf.mxu1 }
 0x410   : > { %15273 = vst [vmem:[#allocation36_spill] sm:$0xff] %v14574_v32  ;;  %v14596_v32 = vpop.f32.mrf.mxu0 }
 0x411   : > { %v14576_v21 = vpop.f32.mrf.mxu1  ;;  %15282 = vst [vmem:[#allocation9_spill] sm:$0xff] %v14596_v32 }
 0x412   : > { %15274 = vst [vmem:[#allocation31_spill] sm:$0xff] %v14576_v21 }
 0x413   : > { %v14580_v26 = vpop.f32.mrf.mxu1 }
 0x414   : > { %15275 = vst [vmem:[#allocation16_spill] sm:$0xff] %v14580_v26 }
 0x415   : > { %v14582_v57 = vpop.f32.mrf.mxu1 }
 0x416   : > { %15276 = vst [vmem:[#allocation18_spill] sm:$0xff] %v14582_v57  ;;  %v14602_v57 = vpop.f32.mrf.mxu0 }
 0x417   : > { %v14586_v63 = vpop.f32.mrf.mxu1  ;;  %15285 = vst [vmem:[#allocation25_spill] sm:$0xff] %v14602_v57 }
 0x418   : > { %15277 = vst [vmem:[#allocation34_spill] sm:$0xff] %v14586_v63 }
 0x419   : > { %v14588_v62 = vpop.f32.mrf.mxu1 }
 0x41a   : > { %15278 = vst [vmem:[#allocation8_spill] sm:$0xff] %v14588_v62  ;;  %v14608_v62 = vpop.f32.mrf.mxu0 }
 0x41b   : > { %v14592_v1 = vpop.f32.mrf.mxu1  ;;  %15288 = vst [vmem:[#allocation28_spill] sm:$0xff] %v14608_v62 }
 0x41c   : > { %15280 = vst [vmem:[#allocation14_spill] sm:$0xff] %v14592_v1 }
 0x41d   : > { %v14594_v50 = vpop.f32.mrf.mxu1 }
 0x41e   : > { %15281 = vst [vmem:[#allocation30_spill] sm:$0xff] %v14594_v50  ;;  %v6734_v50 = vadd.f32 %v14327_v39, %v14397_v31 }
 0x41f   : > { %v14598_v21 = vpop.f32.mrf.mxu1 }
 0x420   : > { %15283 = vst [vmem:[#allocation12_spill] sm:$0xff] %v14598_v21  ;;  %v7121_v32 = vadd.f32 %v10257_v7, %v6734_v50  ;;  %v14618_v21 = vpop.f32.mrf.mxu0 }
 0x421   : > { %v14600_v60 = vpop.f32.mrf.mxu1 }
 0x422   : > { %15284 = vst [vmem:[#allocation17_spill] sm:$0xff] %v14600_v60  ;;  %v6732_v60 = vadd.f32 %v14335_v22, %v14404_v34  ;;  %v7875_v31 = vadd.f32 %v10305_v11, %v7121_v32  ;;  %v14629_v7 = vpop.f32.mrf.mxu0  ;;  %v14634_v34 = vld [vmem:[%s14881_s4] ss:$0 sm:$0xff]  ;;  %v6739_v11 = vadd.f32 %v14373_v51, %v14429_v17 }
 0x423   : > { %v14604_v26 = vpop.f32.mrf.mxu1 }
 0x424   : > { %15286 = vst [vmem:[#allocation20_spill] sm:$0xff] %v14604_v26  ;;  %v7119_v26 = vadd.f32 %v6992_v0, %v6732_v60 }
 0x425   : > { %v14606_v63 = vpop.f32.mrf.mxu1 }
 0x426   : > { %15287 = vst [vmem:[#allocation42_spill] sm:$0xff] %v14606_v63  ;;  %v6735_v63 = vadd.f32 %v14343_v29, %v14409_v40  ;;  %v6738_v29 = vadd.f32 %v14361_v38, %v14419_v33  ;;  %v7873_v40 = vadd.f32 %v7746_v16, %v7119_v26 }
 0x427   : > { %v14610_v3 = vpop.f32.mrf.mxu1 }
 0x428   : > { %15289 = vst [vmem:[#allocation32_spill] sm:$0xff] %v14610_v3  ;;  %v6733_v3 = vadd.f32 %v14355_v8, %v14414_v18  ;;  %v7122_v39 = vadd.f32 %v10258_v23, %v6735_v63  ;;  %v6736_v18 = vadd.f32 %v14367_v25, %v14424_v2  ;;  %v14646_v23 = vpop.f32.mrf.mxu0 }
 0x429   : > { %v14614_v1 = vpop.f32.mrf.mxu1 }
 0x42a   : > { %v7120_v50 = vadd.f32 %v6995_v41, %v6733_v3  ;;  %v7125_v3 = vadd.f32 %v10261_v45, %v6738_v29  ;;  %v7876_v0 = vadd.f32 %v14538_v9, %v7122_v39  ;;  %v7123_v26 = vadd.f32 %v14540_v55, %v6736_v18 }
 0x42b   : > { %v14620_v57 = vpop.f32.mrf.mxu1  ;;  %v7126_v41 = vadd.f32 %v14544_v5, %v6739_v11  ;;  %v6737_v45 = vadd.f32 %v14379_v20, %v14434_v19  ;;  %v6742_v5 = vadd.f32 %v14385_v37, %v14439_v12 }
 0x42c   : > { %v7874_v33 = vadd.f32 %v14542_v24, %v7120_v50  ;;  %v7879_v55 = vadd.f32 %v14548_v56, %v7125_v3  ;;  %v7877_v29 = vadd.f32 %v14554_v58, %v7123_v26 }
 0x42d   : > { %v14626_v62 = vpop.f32.mrf.mxu1  ;;  %v7124_v39 = vadd.f32 %v14546_v52, %v6737_v45  ;;  %v7880_v52 = vadd.f32 %v14560_v36, %v7126_v41 }
 0x42f   : > { %v10353_v22 = vpop.f32.mrf.mxu1 }
 0x430   : > { %v8373_v8 = vadd.f32 %v10353_v22, %v7875_v31  ;;  %v14662_v31 = vpop.f32.mrf.mxu0 }
 0x431   : > { %v8244_v63 = vpop.f32.mrf.mxu1 }
 0x432   : > { %v8412_v32 = vadd.f32 %v14634_v34, %v8373_v8  ;;  %v8371_v60 = vadd.f32 %v8244_v63, %v7873_v40  ;;  %v6740_v8 = vadd.f32 %v14391_v46, %v14444_v14  ;;  %v7129_v40 = vadd.f32 %v14550_v48, %v6742_v5  ;;  %v14675_v3 = vpop.f32.mrf.mxu0 }
 0x433   : > { %v10354_v38 = vpop.f32.mrf.mxu1  ;;  %v6743_v63 = vadd.f32 %v14399_v35, %v14449_v42 }
 0x434   : > { %v8444_v16 = vmax.f32 %v8412_v32, 0.0  ;;  %v8410_v25 = vadd.f32 %v14634_v34, %v8371_v60  ;;  %v8374_v2 = vadd.f32 %v10354_v38, %v7876_v0  ;;  %v7878_v32 = vadd.f32 %v14566_v43, %v7124_v39  ;;  %v14690_v26 = vpop.f32.mrf.mxu0  ;;  %v15292_v39 = vld [vmem:[#allocation26_spill] sm:$0xff] }
 0x435   : > { %v8247_v9 = vpop.f32.mrf.mxu1  ;;  %v7127_v46 = vadd.f32 %v14552_v6, %v6740_v8  ;;  %v7130_v60 = vadd.f32 %v14556_v4, %v6743_v63  ;;  %v6741_v0 = vadd.f32 %v14406_v30, %v14454_v28  ;;  %v7883_v6 = vadd.f32 %v14572_v61, %v7129_v40  ;;  %v15295_v8 = vld [vmem:[#allocation9_spill] sm:$0xff] }
 0x436   : > { %8476 = vst [vmem:[%s14654_s6 + $0x10] sm:$0xff] %v8444_v16  ;;  %v8442_v51 = vmax.f32 %v8410_v25, 0.0  ;;  %v8413_v17 = vadd.f32 %v14634_v34, %v8374_v2  ;;  %v8372_v24 = vadd.f32 %v8247_v9, %v7874_v33  ;;  %v6746_v33 = vadd.f32 %v14411_v47, %v14459_v10 }
 0x437   : > { %v10357_v20 = vpop.f32.mrf.mxu1  ;;  %v7128_v38 = vadd.f32 %v14558_v27, %v6741_v0  ;;  %v7881_v25 = vadd.f32 %v14578_v44, %v7127_v46  ;;  %v6744_v2 = vadd.f32 %v14416_v15, %v14464_v54  ;;  %v7884_v27 = vadd.f32 %v14584_v13, %v7130_v60  ;;  %v15291_v15 = vld [vmem:[#allocation39_spill] sm:$0xff]  ;;  %v15300_v60 = vld [vmem:[#allocation53_spill] sm:$0xff]  ;;  %v15301_v0 = vld [vmem:[#allocation46_spill] sm:$0xff] }
 0x438   : > { %8474 = vst [vmem:[%s14654_s6] sm:$0xff] %v8442_v51  ;;  %v8445_v19 = vmax.f32 %v8413_v17, 0.0  ;;  %v8411_v50 = vadd.f32 %v14634_v34, %v8372_v24  ;;  %v8377_v22 = vadd.f32 %v10357_v20, %v7879_v55  ;;  %v7133_v41 = vadd.f32 %v14562_v53, %v6746_v33  ;;  %v14703_v51 = vpop.f32.mrf.mxu0  ;;  %v15290_v17 = vld [vmem:[#allocation38_spill] sm:$0xff]  ;;  %v15293_v20 = vld [vmem:[#allocation51_spill] sm:$0xff] }
 0x439   : > { %v8260_v56 = vpop.f32.mrf.mxu1  ;;  %v6747_v9 = vadd.f32 %v14421_v59, %v14467_v49  ;;  %v7882_v24 = vadd.f32 %v15290_v17, %v7128_v38  ;;  %v7131_v54 = vadd.f32 %v15291_v15, %v6744_v2  ;;  %v15309_v15 = vld [vmem:[#allocation54_spill] sm:$0xff] }
 0x43a   : > { %8477 = vst [vmem:[%s14654_s6 + $0x18] sm:$0xff] %v8445_v19  ;;  %v8443_v37 = vmax.f32 %v8411_v50, 0.0  ;;  %v8416_v12 = vadd.f32 %v14634_v34, %v8377_v22  ;;  %v8375_v18 = vadd.f32 %v8260_v56, %v7877_v29  ;;  %v15294_v19 = vld [vmem:[#allocation44_spill] sm:$0xff]  ;;  %v7887_v56 = vadd.f32 %v15295_v8, %v7133_v41  ;;  %v14718_v63 = vpop.f32.mrf.mxu0  ;;  %v15306_v41 = vld [vmem:[#allocation31_spill] sm:$0xff] }
 0x43b   : > { %v10358_v58 = vpop.f32.mrf.mxu1  ;;  %v7134_v5 = vadd.f32 %v15292_v39, %v6747_v9  ;;  %v6745_v50 = vadd.f32 %v15294_v19, %v15293_v20 }
 0x43c   : > { %8475 = vst [vmem:[%s14654_s6 + $0x8] sm:$0xff] %v8443_v37  ;;  %v8448_v14 = vmax.f32 %v8416_v12, 0.0  ;;  %v8414_v36 = vadd.f32 %v14634_v34, %v8375_v18  ;;  %v8378_v48 = vadd.f32 %v10358_v58, %v7880_v52  ;;  %v15296_v52 = vld [vmem:[#allocation27_spill] sm:$0xff]  ;;  %v15297_v37 = vld [vmem:[#allocation52_spill] sm:$0xff]  ;;  %v15298_v12 = vld [vmem:[#allocation45_spill] sm:$0xff]  ;;  %v14731_v2 = vpop.f32.mrf.mxu0 }
 0x43d   : > { %v8263_v11 = vpop.f32.mrf.mxu1  ;;  %v7132_v40 = vadd.f32 %v15296_v52, %v6745_v50  ;;  %v6750_v18 = vadd.f32 %v15298_v12, %v15297_v37  ;;  %v15311_v50 = vld [vmem:[#allocation57_spill] sm:$0xff]  ;;  %v15314_v37 = vld [vmem:[#allocation56_spill] sm:$0xff] }
 0x43e   : > { %8480 = vst [vmem:[%s14654_s6 + $0x30] sm:$0xff] %v8448_v14  ;;  %v8446_v35 = vmax.f32 %v8414_v36, 0.0  ;;  %v8417_v42 = vadd.f32 %v14634_v34, %v8378_v48  ;;  %v8376_v43 = vadd.f32 %v8263_v11, %v7878_v32  ;;  %v15299_v36 = vld [vmem:[#allocation25_spill] sm:$0xff]  ;;  %v6748_v11 = vadd.f32 %v15301_v0, %v15300_v60  ;;  %v14744_v19 = vpop.f32.mrf.mxu0  ;;  %v15316_v60 = vld [vmem:[#allocation7_spill] sm:$0xff]  ;;  %v15317_v0 = vld [vmem:[#allocation50_spill] sm:$0xff] }
 0x43f   : > { %v10361_v4 = vpop.f32.mrf.mxu1  ;;  %v7885_v48 = vadd.f32 %v15299_v36, %v7131_v54 }
 0x440   : > { %8478 = vst [vmem:[%s14654_s6 + $0x20] sm:$0xff] %v8446_v35  ;;  %v8449_v16 = vmax.f32 %v8417_v42, 0.0  ;;  %v8415_v30 = vadd.f32 %v14634_v34, %v8376_v43  ;;  %v8381_v28 = vadd.f32 %v10361_v4, %v7883_v6  ;;  %v15302_v42 = vld [vmem:[#allocation28_spill] sm:$0xff] }
 0x441   : > { %v8276_v61 = vpop.f32.mrf.mxu1  ;;  %v7888_v43 = vadd.f32 %v15302_v42, %v7134_v5  ;;  %v15303_v6 = vld [vmem:[#allocation36_spill] sm:$0xff]  ;;  %v15310_v5 = vld [vmem:[#allocation18_spill] sm:$0xff] }
 0x442   : > { %8481 = vst [vmem:[%s14654_s6 + $0x38] sm:$0xff] %v8449_v16  ;;  %v8447_v47 = vmax.f32 %v8415_v30, 0.0  ;;  %v8420_v10 = vadd.f32 %v14634_v34, %v8381_v28  ;;  %v8379_v45 = vadd.f32 %v8276_v61, %v7881_v25  ;;  %v7137_v38 = vadd.f32 %v15303_v6, %v6750_v18  ;;  %v15304_v30 = vld [vmem:[#allocation61_spill] sm:$0xff]  ;;  %v15305_v28 = vld [vmem:[#allocation48_spill] sm:$0xff] }
 0x443   : > { %v10362_v44 = vpop.f32.mrf.mxu1  ;;  %v6751_v25 = vadd.f32 %v15305_v28, %v15304_v30  ;;  %v15318_v42 = vld [vmem:[#allocation8_spill] sm:$0xff]  ;;  %v15321_v30 = vld [vmem:[#allocation58_spill] sm:$0xff] }
 0x444   : > { %8479 = vst [vmem:[%s14654_s6 + $0x28] sm:$0xff] %v8447_v47  ;;  %v8452_v13 = vmax.f32 %v8420_v10, 0.0  ;;  %v8418_v53 = vadd.f32 %v14634_v34, %v8379_v45  ;;  %v8382_v55 = vadd.f32 %v10362_v44, %v7884_v27  ;;  %v7886_v27 = vadd.f32 %v14618_v21, %v7132_v40  ;;  %v15307_v44 = vld [vmem:[#allocation16_spill] sm:$0xff]  ;;  %v15313_v40 = vld [vmem:[#allocation62_spill] sm:$0xff] }
 0x445   : > { %v8279_v22 = vpop.f32.mrf.mxu1  ;;  %v7135_v47 = vadd.f32 %v15306_v41, %v6748_v11  ;;  %v7138_v17 = vadd.f32 %v15307_v44, %v6751_v25  ;;  %v7891_v39 = vadd.f32 %v14629_v7, %v7137_v38  ;;  %v6752_v12 = vadd.f32 %v15314_v37, %v15313_v40  ;;  %v15324_v44 = vld [vmem:[#allocation60_spill] sm:$0xff]  ;;  %v15330_v37 = vld [vmem:[#allocation17_spill] sm:$0xff] }
 0x446   : > { %8484 = vst [vmem:[%s14654_s6 + $0x50] sm:$0xff] %v8452_v13  ;;  %v8450_v59 = vmax.f32 %v8418_v53, 0.0  ;;  %v8421_v49 = vadd.f32 %v14634_v34, %v8382_v55  ;;  %v8380_v29 = vadd.f32 %v8279_v22, %v7882_v24  ;;  %v15308_v24 = vld [vmem:[#allocation63_spill] sm:$0xff]  ;;  %v15312_v22 = vld [vmem:[#allocation49_spill] sm:$0xff]  ;;  %v6755_v11 = vadd.f32 %v15317_v0, %v15316_v60 }
 0x447   : > { %v10365_v58 = vpop.f32.mrf.mxu1  ;;  %v6749_v54 = vadd.f32 %v15309_v15, %v15308_v24  ;;  %v7889_v52 = vadd.f32 %v14646_v23, %v7135_v47  ;;  %v7892_v18 = vadd.f32 %v14662_v31, %v7138_v17 }
 0x448   : > { %8482 = vst [vmem:[%s14654_s6 + $0x40] sm:$0xff] %v8450_v59  ;;  %v8453_v32 = vmax.f32 %v8421_v49, 0.0  ;;  %v8419_v46 = vadd.f32 %v14634_v34, %v8380_v29  ;;  %v8385_v14 = vadd.f32 %v10365_v58, %v7887_v56  ;;  %v6754_v59 = vadd.f32 %v15312_v22, %v15311_v50  ;;  %v15315_v58 = vld [vmem:[#allocation34_spill] sm:$0xff] }
 0x449   : > { %v8292_v35 = vpop.f32.mrf.mxu1  ;;  %v7136_v20 = vadd.f32 %v15310_v5, %v6749_v54 }
 0x44a   : > { %8485 = vst [vmem:[%s14654_s6 + $0x58] sm:$0xff] %v8453_v32  ;;  %v8451_v33 = vmax.f32 %v8419_v46, 0.0  ;;  %v8424_v4 = vadd.f32 %v14634_v34, %v8385_v14  ;;  %v8383_v16 = vadd.f32 %v8292_v35, %v7885_v48  ;;  %v7141_v32 = vadd.f32 %v15315_v58, %v6754_v59  ;;  %v7842_v48 = vpop.f32.mrf.mxu0  ;;  %v15331_v58 = vld [vmem:[#allocation20_spill] sm:$0xff] }
 0x44b   : > { %v10366_v61 = vpop.f32.mrf.mxu1  ;;  %v7890_v23 = vadd.f32 %v14675_v3, %v7136_v20  ;;  %v15327_v20 = vld [vmem:[#allocation12_spill] sm:$0xff] }
 0x44c   : > { %8483 = vst [vmem:[%s14654_s6 + $0x48] sm:$0xff] %v8451_v33  ;;  %v8456_v10 = vmax.f32 %v8424_v4, 0.0  ;;  %v8422_v45 = vadd.f32 %v14634_v34, %v8383_v16  ;;  %v8386_v9 = vadd.f32 %v10366_v61, %v7888_v43  ;;  %v7139_v43 = vadd.f32 %v15318_v42, %v6752_v12  ;;  %v15319_v33 = vld [vmem:[#allocation14_spill] sm:$0xff]  ;;  %v15320_v16 = vld [vmem:[#allocation19_spill] sm:$0xff]  ;;  %v10330_v47 = vpop.f32.mrf.mxu0 }
 0x44d   : > { %v8295_v13 = vpop.f32.mrf.mxu1  ;;  %v7142_v4 = vadd.f32 %v15319_v33, %v6755_v11  ;;  %v6753_v28 = vadd.f32 %v15321_v30, %v15320_v16  ;;  %v7895_v41 = vadd.f32 %v14690_v26, %v7141_v32  ;;  %v15334_v42 = vld [vmem:[#allocation42_spill] sm:$0xff] }
 0x44e   : > { %8488 = vst [vmem:[%s14654_s6 + $0x70] sm:$0xff] %v8456_v10  ;;  %v8454_v53 = vmax.f32 %v8422_v45, 0.0  ;;  %v8425_v55 = vadd.f32 %v14634_v34, %v8386_v9  ;;  %v8384_v21 = vadd.f32 %v8295_v13, %v7886_v27  ;;  %v15322_v10 = vld [vmem:[#allocation30_spill] sm:$0xff]  ;;  %v15323_v9 = vld [vmem:[#allocation29_spill] sm:$0xff] }
 0x44f   : > { %v10369_v49 = vpop.f32.mrf.mxu1  ;;  %v7140_v45 = vadd.f32 %v15322_v10, %v6753_v28  ;;  %v6758_v17 = vadd.f32 %v15324_v44, %v15323_v9  ;;  %v7896_v26 = vadd.f32 %v14718_v63, %v7142_v4 }
 0x450   : > { %8486 = vst [vmem:[%s14654_s6 + $0x60] sm:$0xff] %v8454_v53  ;;  %v8457_v29 = vmax.f32 %v8425_v55, 0.0  ;;  %v8423_v8 = vadd.f32 %v14634_v34, %v8384_v21  ;;  %v8389_v56 = vadd.f32 %v10369_v49, %v7891_v39  ;;  %v7893_v53 = vadd.f32 %v14703_v51, %v7139_v43  ;;  %v15325_v55 = vld [vmem:[#allocation35_spill] sm:$0xff] }
 0x451   : > { %v8308_v7 = vpop.f32.mrf.mxu1  ;;  %v15326_v21 = vld [vmem:[#allocation55_spill] sm:$0xff]  ;;  %v7145_v50 = vadd.f32 %v15327_v20, %v6758_v17  ;;  %v7894_v51 = vadd.f32 %v14731_v2, %v7140_v45 }
 0x452   : > { %8489 = vst [vmem:[%s14654_s6 + $0x78] sm:$0xff] %v8457_v29  ;;  %v8455_v46 = vmax.f32 %v8423_v8, 0.0  ;;  %v8428_v14 = vadd.f32 %v14634_v34, %v8389_v56  ;;  %v8387_v36 = vadd.f32 %v8308_v7, %v7889_v52  ;;  %v6756_v39 = vadd.f32 %v15326_v21, %v15325_v55  ;;  %v7845_v29 = vpop.f32.mrf.mxu0  ;;  %v15328_v8 = vld [vmem:[#allocation22_spill] sm:$0xff]  ;;  %v15329_v56 = vld [vmem:[#allocation59_spill] sm:$0xff] }
 0x453   : > { %v10370_v35 = vpop.f32.mrf.mxu1  ;;  %v6759_v52 = vadd.f32 %v15329_v56, %v15328_v8 }
 0x454   : > { %8487 = vst [vmem:[%s14654_s6 + $0x68] sm:$0xff] %v8455_v46  ;;  %v8460_v31 = vmax.f32 %v8428_v14, 0.0  ;;  %v8426_v6 = vadd.f32 %v14634_v34, %v8387_v36  ;;  %v8390_v38 = vadd.f32 %v10370_v35, %v7892_v18  ;;  %v7143_v12 = vadd.f32 %v15330_v37, %v6756_v39  ;;  %v15332_v46 = vld [vmem:[#allocation11_spill] sm:$0xff]  ;;  %v15333_v14 = vld [vmem:[#allocation41_spill] sm:$0xff]  ;;  %v10333_v60 = vpop.f32.mrf.mxu0 }
 0x455   : > { %v8311_v25 = vpop.f32.mrf.mxu1  ;;  %v7146_v32 = vadd.f32 %v15331_v58, %v6759_v52  ;;  %v6757_v36 = vadd.f32 %v15333_v14, %v15332_v46 }
 0x456   : > { %8492 = vst [vmem:[%s14654_s6 + $0x90] sm:$0xff] %v8460_v31  ;;  %v8458_v61 = vmax.f32 %v8426_v6, 0.0  ;;  %v8429_v27 = vadd.f32 %v14634_v34, %v8390_v38  ;;  %v8388_v3 = vadd.f32 %v8311_v25, %v7890_v23  ;;  %v7899_v23 = vadd.f32 %v14744_v19, %v7145_v50  ;;  %v15335_v31 = vld [vmem:[#allocation21_spill] sm:$0xff]  ;;  %v15336_v6 = vld [vmem:[#allocation15_spill] sm:$0xff]  ;;  %v15339_v19 = vld [vmem:[#allocation32_spill] sm:$0xff] }
 0x457   : > { %v10373_v24 = vpop.f32.mrf.mxu1  ;;  %v7144_v43 = vadd.f32 %v15334_v42, %v6757_v36  ;;  %v6762_v38 = vadd.f32 %v15336_v6, %v15335_v31  ;;  %v7897_v28 = vadd.f32 %v7842_v48, %v7143_v12  ;;  %v15337_v25 = vld [vmem:[#allocation13_spill] sm:$0xff]  ;;  %v7900_v10 = vadd.f32 %v10330_v47, %v7146_v32 }
 0x458   : > { %8490 = vst [vmem:[%s14654_s6 + $0x80] sm:$0xff] %v8458_v61  ;;  %v8461_v15 = vmax.f32 %v8429_v27, 0.0  ;;  %v8427_v54 = vadd.f32 %v14634_v34, %v8388_v3  ;;  %v8393_v13 = vadd.f32 %v10373_v24, %v7895_v41  ;;  %v15338_v61 = vld [vmem:[#allocation33_spill] sm:$0xff]  ;;  %v7858_v3 = vpop.f32.mrf.mxu0  ;;  %v15340_v24 = vld [vmem:[#allocation10_spill] sm:$0xff] }
 0x459   : > { %v8324_v5 = vpop.f32.mrf.mxu1  ;;  %v6760_v27 = vadd.f32 %v15338_v61, %v15337_v25  ;;  %v7149_v45 = vadd.f32 %v15339_v19, %v6762_v38 }
 0x45a   : > { %8493 = vst [vmem:[%s14654_s6 + $0x98] sm:$0xff] %v8461_v15  ;;  %v8459_v22 = vmax.f32 %v8427_v54, 0.0  ;;  %v8432_v59 = vadd.f32 %v14634_v34, %v8393_v13  ;;  %v8391_v49 = vadd.f32 %v8324_v5, %v7893_v53  ;;  %v15341_v15 = vld [vmem:[#allocation6_spill] sm:$0xff]  ;;  %v7898_v53 = vadd.f32 %v7845_v29, %v7144_v43  ;;  %v15342_v5 = vld [vmem:[#allocation24_spill] sm:$0xff]  ;;  %v10334_v50 = vpop.f32.mrf.mxu0 }
 0x45b   : > { %v10374_v40 = vpop.f32.mrf.mxu1  ;;  %v6763_v54 = vadd.f32 %v15341_v15, %v15340_v24  ;;  %v7147_v48 = vadd.f32 %v14614_v1, %v6760_v27 }
 0x45c   : > { %8491 = vst [vmem:[%s14654_s6 + $0x88] sm:$0xff] %v8459_v22  ;;  %v8464_v63 = vmax.f32 %v8432_v59, 0.0  ;;  %v8430_v7 = vadd.f32 %v14634_v34, %v8391_v49  ;;  %v8394_v18 = vadd.f32 %v10374_v40, %v7896_v26  ;;  %v15343_v26 = vld [vmem:[#allocation23_spill] sm:$0xff]  ;;  %v7903_v59 = vadd.f32 %v10333_v60, %v7149_v45  ;;  %v7861_v37 = vpop.f32.mrf.mxu0 }
 0x45d   : > { %v8327_v0 = vpop.f32.mrf.mxu1  ;;  %v7150_v39 = vadd.f32 %v14620_v57, %v6763_v54  ;;  %v6761_v20 = vadd.f32 %v15343_v26, %v15342_v5  ;;  %v7901_v52 = vadd.f32 %v7858_v3, %v7147_v48 }
 0x45e   : > { %8496 = vst [vmem:[%s14654_s6 + $0xb0] sm:$0xff] %v8464_v63  ;;  %v8462_v11 = vmax.f32 %v8430_v7, 0.0  ;;  %v8433_v35 = vadd.f32 %v14634_v34, %v8394_v18  ;;  %v8392_v2 = vadd.f32 %v8327_v0, %v7894_v51 }
 0x45f   : > { %v10377_v33 = vpop.f32.mrf.mxu1  ;;  %v7148_v8 = vadd.f32 %v14626_v62, %v6761_v20  ;;  %v7904_v63 = vadd.f32 %v10334_v50, %v7150_v39 }
 0x460   : > { %8494 = vst [vmem:[%s14654_s6 + $0xa0] sm:$0xff] %v8462_v11  ;;  %v8465_v4 = vmax.f32 %v8433_v35, 0.0  ;;  %v8431_v16 = vadd.f32 %v14634_v34, %v8392_v2  ;;  %v8397_v30 = vadd.f32 %v10377_v33, %v7899_v23 }
 0x461   : > { %v8340_v41 = vpop.f32.mrf.mxu1  ;;  %v7902_v32 = vadd.f32 %v7861_v37, %v7148_v8 }
 0x462   : > { %8497 = vst [vmem:[%s14654_s6 + $0xb8] sm:$0xff] %v8465_v4  ;;  %v8463_v9 = vmax.f32 %v8431_v16, 0.0  ;;  %v8436_v44 = vadd.f32 %v14634_v34, %v8397_v30  ;;  %v8395_v17 = vadd.f32 %v8340_v41, %v7897_v28 }
 0x463   : > { %v10378_v13 = vpop.f32.mrf.mxu1 }
 0x464   : > { %8495 = vst [vmem:[%s14654_s6 + $0xa8] sm:$0xff] %v8463_v9  ;;  %v8468_v55 = vmax.f32 %v8436_v44, 0.0  ;;  %v8434_v47 = vadd.f32 %v14634_v34, %v8395_v17  ;;  %v8398_v21 = vadd.f32 %v10378_v13, %v7900_v10 }
 0x465   : > { %v8343_v22 = vpop.f32.mrf.mxu1 }
 0x466   : > { %8500 = vst [vmem:[%s14654_s6 + $0xd0] sm:$0xff] %v8468_v55  ;;  %v8466_v49 = vmax.f32 %v8434_v47, 0.0  ;;  %v8437_v29 = vadd.f32 %v14634_v34, %v8398_v21  ;;  %v8396_v1 = vadd.f32 %v8343_v22, %v7898_v53 }
 0x467   : > { %v10381_v56 = vpop.f32.mrf.mxu1 }
 0x468   : > { %8498 = vst [vmem:[%s14654_s6 + $0xc0] sm:$0xff] %v8466_v49  ;;  %v8469_v40 = vmax.f32 %v8437_v29, 0.0  ;;  %v8435_v57 = vadd.f32 %v14634_v34, %v8396_v1  ;;  %v8401_v51 = vadd.f32 %v10381_v56, %v7903_v59 }
 0x469   : > { %v8356_v12 = vpop.f32.mrf.mxu1 }
 0x46a   : > { %8501 = vst [vmem:[%s14654_s6 + $0xd8] sm:$0xff] %v8469_v40  ;;  %v8467_v7 = vmax.f32 %v8435_v57, 0.0  ;;  %v8440_v18 = vadd.f32 %v14634_v34, %v8401_v51  ;;  %v8399_v62 = vadd.f32 %v8356_v12, %v7901_v52 }
 0x46b   : > { %v10382_v58 = vpop.f32.mrf.mxu1 }
 0x46c   : > { %8499 = vst [vmem:[%s14654_s6 + $0xc8] sm:$0xff] %v8467_v7  ;;  %v8472_v46 = vmax.f32 %v8440_v18, 0.0  ;;  %v8438_v14 = vadd.f32 %v14634_v34, %v8399_v62  ;;  %v8402_v36 = vadd.f32 %v10382_v58, %v7904_v63 }
 0x46d   : > { %v8359_v60 = vpop.f32.mrf.mxu1 }
 0x46e   : > { %8504 = vst [vmem:[%s14654_s6 + $0xf0] sm:$0xff] %v8472_v46  ;;  %v8470_v0 = vmax.f32 %v8438_v14, 0.0  ;;  %v8441_v11 = vadd.f32 %v14634_v34, %v8402_v36  ;;  %v8400_v35 = vadd.f32 %v8359_v60, %v7902_v32 }
 0x470   : > { %8502 = vst [vmem:[%s14654_s6 + $0xe0] sm:$0xff] %v8470_v0  ;;  %v8473_v2 = vmax.f32 %v8441_v11, 0.0  ;;  %v8439_v23 = vadd.f32 %v14634_v34, %v8400_v35 }
 0x472   : > { %8505 = vst [vmem:[%s14654_s6 + $0xf8] sm:$0xff] %v8473_v2  ;;  %v8471_v42 = vmax.f32 %v8439_v23, 0.0 }
 0x474   : > { %8503 = vst [vmem:[%s14654_s6 + $0xe8] sm:$0xff] %v8471_v42 }
 0x475   : > { %10597 = shalt.err (!%p10594_p3)
}
 0x476   : > { %s10598_s16 = scalar_lea.hbm %s14829_s11, 4096  ;;  %s10602_s25 = scalar_lea.hbm %s14882_s5, 8192 }
 0x477   : > { %p10599_p4 = scmp.ne.s32.totalorder %s14829_s11, %s10598_s16  ;;  %p10603_p9 = scmp.lt.s32.totalorder %s14829_s11, %s14882_s5 }
 0x478   : > { %p10604_p10 = scmp.lt.s32.totalorder %s10602_s25, %s10598_s16 }
 0x479   : > { %p10600_p7 = pnand %p10599_p4, %p10718_p5 }
 0x47a   : > { %p10605_p11 = por %p10604_p10, %p10603_p9 }
 0x47b   : > { %p10601_p8 = pneg %p10600_p7 }
 0x47d   : > { %p10606_p12 = pnand %p10605_p11, %p10601_p8 }
 0x47f   : > { %10609 = shalt.err (!%p10606_p12)
}
 0x480   : > { %s10648_s6 = smov 128   ;;  %s10649_s7 = smov 8  }
 0x481   : > { %10393 = dma.vmem_to_hbm [thread:$0]  (%p10718_p5), %s14831_s8, 4096, %s14829_s11, %s14837_s22, %s10648_s6, %s10648_s6, %s10649_s7  }
 0x482 PF: > { %p10399_p13 = scmp.ge.s32.totalorder %s10644_s21, 2  ;;  %s8535_s9 = sand.u32 1, %s10632_s18  }
 0x483   : > { %s8536_s10 = scalar_lea.sflag [#allocation4], %s8535_s9 }
 0x484   : > { %p10396_p0 = pnand %p10399_p13, %p10722_p6 }
 0x486   : > { %p10397_p1 = pneg %p10396_p0 }
 0x488   : > { %10627 = dma.done.wait (%p10397_p1), %s8536_s10, 4096  }
 0x489   : > { %10629 = vsyncadd (%p10397_p1), %s8536_s10, 4294963200  ;;  %p15_p2 = scmp.ge.s32.totalorder %s10705_s24, 4   ;;  %s15344_s18 = smov %s10636_s19 }
 0x48a   : > { %s15345_s19 = smov %s10640_s20  ;;  %s15346_s20 = smov %s10716_s27 }
 0x48b   : > { %s15347_s21 = smov %s10705_s24  ;;  %17 = sbr.rel (!%p15_p2) target bundleno = 3 (0x3), region = 93 }
 0x490   :  { %8541 = vsyncpa [#allocation4], 1 }
 0x491   :  { %8543 = vsyncpa [#allocation4 + $0x1], 1 }

</bundles_post_ra>
